<compile_context>
chip_gen: v7x
topology: tpu7x:2x2x1
jax: 0.10.0
libtpu: 0.0.40
codegen_flags: <defaults>
</compile_context>

<pallas_src>
import jax
import jax.numpy as jnp
from jax.experimental import pallas as pl
from jax.experimental.pallas import tpu as pltpu

# Small, TPU-friendly shapes consistent with the module structure.
BATCH = 2
SEQ = 8
HIDDEN = 128
NUM_HEADS = 4
HEAD_DIM = HIDDEN // NUM_HEADS
NUM_LAYERS = 2
FF_DIM = 256
NUM_CLASSES = 3
LANE = 128          # the 3-class head is padded to a full lane width
EPS = 1e-5


# ------------------------------ fused kernel --------------------------------

def _attention(q, k, v):
    """Multi-head attention for one batch element; heads live along lanes."""
    scale = 1.0 / (HEAD_DIM ** 0.5)
    heads = []
    for h in range(NUM_HEADS):            # static unroll over 4 heads
        lo = h * HEAD_DIM
        qh = q[:, lo:lo + HEAD_DIM]       # (S, 32)
        kh = k[:, lo:lo + HEAD_DIM]
        vh = v[:, lo:lo + HEAD_DIM]
        s = jax.lax.dot_general(qh, kh, (((1,), (1,)), ((), ())),
                                preferred_element_type=jnp.float32) * scale
        s = s - jnp.max(s, axis=-1, keepdims=True)
        p = jnp.exp(s)
        p = p / jnp.sum(p, axis=-1, keepdims=True)
        heads.append(jnp.dot(p, vh, preferred_element_type=jnp.float32))
    return jnp.concatenate(heads, axis=-1)      # (S, D)


def _add_ln(x, res, g, b):
    """residual add + LayerNorm fused behind the producer matmul."""
    y = x + res
    mu = jnp.mean(y, axis=-1, keepdims=True)
    yc = y - mu
    var = jnp.mean(yc * yc, axis=-1, keepdims=True)
    return yc * jax.lax.rsqrt(var + EPS) * g + b


def _fused_kernel(logits_ref, past_ref, emb_w_ref, emb_b_ref,
                  sa_wqkv_ref, sa_bqkv_ref, sa_wo_ref, sa_bo_ref,
                  ca_wq_ref, ca_bq_ref, ca_wkv_ref, ca_bkv_ref,
                  ca_wo_ref, ca_bo_ref,
                  ln1_g_ref, ln1_b_ref, ln2_g_ref, ln2_b_ref,
                  ln3_g_ref, ln3_b_ref,
                  ff_w1_ref, ff_b1_ref, ff_w2_ref, ff_b2_ref,
                  fc_w_ref, fc_b_ref,
                  out_ref):
    B, S, D = BATCH, SEQ, HIDDEN

    x = logits_ref[...].reshape(B * S, D)        # (16, 128) lane-dense
    mem = past_ref[...].reshape(B * S, D)

    # Embedding linear.
    x = jnp.dot(x, emb_w_ref[...], preferred_element_type=jnp.float32) + emb_b_ref[...]

    # Static Python loop over layers: distinct weight refs per iteration, so no
    # repeated broadcasts inside a runtime loop.
    for l in range(NUM_LAYERS):
        # ----------------------- self attention -----------------------
        qkv = (jnp.dot(x, sa_wqkv_ref[l], preferred_element_type=jnp.float32)
               + sa_bqkv_ref[l])                                 # (16, 3D)
        q, k, v = qkv[:, :D], qkv[:, D:2 * D], qkv[:, 2 * D:]
        attn = jnp.concatenate(
            [_attention(q[b * S:(b + 1) * S],
                        k[b * S:(b + 1) * S],
                        v[b * S:(b + 1) * S]) for b in range(B)],
            axis=0)                                              # (16, D)
        sa_out = (jnp.dot(attn, sa_wo_ref[l], preferred_element_type=jnp.float32)
                  + sa_bo_ref[l])
        x = _add_ln(x, sa_out, ln1_g_ref[l], ln1_b_ref[l])

        # ----------------------- cross attention ----------------------
        q = (jnp.dot(x, ca_wq_ref[l], preferred_element_type=jnp.float32)
             + ca_bq_ref[l])                                     # (16, D)
        kv = (jnp.dot(mem, ca_wkv_ref[l], preferred_element_type=jnp.float32)
              + ca_bkv_ref[l])                                   # (16, 2D)
        k, v = kv[:, :D], kv[:, D:]
        attn = jnp.concatenate(
            [_attention(q[b * S:(b + 1) * S],
                        k[b * S:(b + 1) * S],
                        v[b * S:(b + 1) * S]) for b in range(B)],
            axis=0)
        ca_out = (jnp.dot(attn, ca_wo_ref[l], preferred_element_type=jnp.float32)
                  + ca_bo_ref[l])
        x = _add_ln(x, ca_out, ln2_g_ref[l], ln2_b_ref[l])

        # -------------------------- FFN (relu) -------------------------
        h = (jnp.dot(x, ff_w1_ref[l], preferred_element_type=jnp.float32)
             + ff_b1_ref[l])
        h = jnp.maximum(h, 0.0)
        h = (jnp.dot(h, ff_w2_ref[l], preferred_element_type=jnp.float32)
             + ff_b2_ref[l])
        x = _add_ln(x, h, ln3_g_ref[l], ln3_b_ref[l])

    # ----------------- head: mean over seq, fc, softmax -----------------
    m = jnp.concatenate(
        [jnp.mean(x[b * S:(b + 1) * S], axis=0, keepdims=True) for b in range(B)],
        axis=0)                                                  # (B, D)
    logits_out = (jnp.dot(m, fc_w_ref[...], preferred_element_type=jnp.float32)
                  + fc_b_ref[...])                               # (B, LANE) lane-dense
    col = jax.lax.broadcasted_iota(jnp.int32, logits_out.shape, 1)
    logits_out = jnp.where(col < NUM_CLASSES, logits_out, -jnp.inf)  # mask padding
    logits_out = logits_out - jnp.max(logits_out, axis=-1, keepdims=True)
    e = jnp.exp(logits_out)
    out_ref[...] = (e / jnp.sum(e, axis=-1, keepdims=True)).astype(out_ref.dtype)


# ------------------------------ host wrapper --------------------------------

def _full_spec(shape):
    zeros = (0,) * len(shape)
    return pl.BlockSpec(shape, lambda i, _z=zeros: _z)


@jax.jit
def confidence_evaluator(packed, logits, past_sentences):
    args = (logits, past_sentences) + tuple(packed)
    out = pl.pallas_call(
        _fused_kernel,
        grid=(1,),
        in_specs=[_full_spec(a.shape) for a in args],
        out_specs=_full_spec((BATCH, LANE)),
        out_shape=jax.ShapeDtypeStruct((BATCH, LANE), jnp.float32),
        compiler_params=pltpu.CompilerParams(
            dimension_semantics=("arbitrary",),
            vmem_limit_bytes=32 * 1024 * 1024),
    )(*args)
    return out[:, :NUM_CLASSES]


# -------------------------- deterministic params ----------------------------

def init_params(key):
    kiter = iter(jax.random.split(key, 256))

    def w(shape, scale=0.05):
        return (scale * jax.random.normal(next(kiter), shape)).astype(jnp.float32)

    params = {
        "emb_w": w((HIDDEN, HIDDEN)),
        "emb_b": w((1, HIDDEN)),
        "layers": [],
    }
    for _ in range(NUM_LAYERS):
        lp = {}
        for pref in ("sa", "ca"):
            for nm in ("q", "k", "v", "o"):
                lp[f"{pref}_w{nm}"] = w((HIDDEN, HIDDEN))
                lp[f"{pref}_b{nm}"] = w((1, HIDDEN))
        for i in (1, 2, 3):
            lp[f"g{i}"] = jnp.ones((1, HIDDEN), jnp.float32)
            lp[f"b{i}"] = jnp.zeros((1, HIDDEN), jnp.float32)
        lp["ff_w1"] = w((HIDDEN, FF_DIM))
        lp["ff_b1"] = w((1, FF_DIM))
        lp["ff_w2"] = w((FF_DIM, HIDDEN))
        lp["ff_b2"] = w((1, HIDDEN))
        params["layers"].append(lp)
    fc_w = w((HIDDEN, NUM_CLASSES), scale=0.2)
    fc_b = w((1, NUM_CLASSES), scale=0.2)
    params["fc_w_pad"] = jnp.zeros((HIDDEN, LANE), jnp.float32).at[:, :NUM_CLASSES].set(fc_w)
    params["fc_b_pad"] = jnp.zeros((1, LANE), jnp.float32).at[:, :NUM_CLASSES].set(fc_b)
    return params


def pack_params(params):
    """Stack per-layer weights (leading layer dim) and fuse QKV projections."""
    layers = params["layers"]

    def stack(fn):
        return jnp.stack([fn(lp) for lp in layers], axis=0)

    return (
        params["emb_w"], params["emb_b"],
        # self-attention: fused QKV
        stack(lambda lp: jnp.concatenate([lp["sa_wq"], lp["sa_wk"], lp["sa_wv"]], axis=1)),
        stack(lambda lp: jnp.concatenate([lp["sa_bq"], lp["sa_bk"], lp["sa_bv"]], axis=1)),
        stack(lambda lp: lp["sa_wo"]),
        stack(lambda lp: lp["sa_bo"]),
        # cross-attention: Q from x, fused KV from memory
        stack(lambda lp: lp["ca_wq"]),
        stack(lambda lp: lp["ca_bq"]),
        stack(lambda lp: jnp.concatenate([lp["ca_wk"], lp["ca_wv"]], axis=1)),
        stack(lambda lp: jnp.concatenate([lp["ca_bk"], lp["ca_bv"]], axis=1)),
        stack(lambda lp: lp["ca_wo"]),
        stack(lambda lp: lp["ca_bo"]),
        # layer norms
        stack(lambda lp: lp["g1"]), stack(lambda lp: lp["b1"]),
        stack(lambda lp: lp["g2"]), stack(lambda lp: lp["b2"]),
        stack(lambda lp: lp["g3"]), stack(lambda lp: lp["b3"]),
        # FFN
        stack(lambda lp: lp["ff_w1"]), stack(lambda lp: lp["ff_b1"]),
        stack(lambda lp: lp["ff_w2"]), stack(lambda lp: lp["ff_b2"]),
        # head (lane-padded to 128)
        params["fc_w_pad"], params["fc_b_pad"],
    )


# --------------------------- pure-JAX reference -----------------------------

def reference_forward(params, logits, past):
    def lin(x, wm, bm, act=None):
        y = x @ wm + bm
        return jnp.maximum(y, 0.0) if act == "relu" else y

    def ln(x, g, b):
        mu = x.mean(-1, keepdims=True)
        xc = x - mu
        var = (xc * xc).mean(-1, keepdims=True)
        return xc * jax.lax.rsqrt(var + EPS) * g + b

    def mha(xq, xkv, p, pref):
        b, sq, d = xq.shape
        skv = xkv.shape[1]
        q = lin(xq, p[pref + "_wq"], p[pref + "_bq"]).reshape(
            b, sq, NUM_HEADS, HEAD_DIM).transpose(0, 2, 1, 3)
        k = lin(xkv, p[pref + "_wk"], p[pref + "_bk"]).reshape(
            b, skv, NUM_HEADS, HEAD_DIM).transpose(0, 2, 1, 3)
        v = lin(xkv, p[pref + "_wv"], p[pref + "_bv"]).reshape(
            b, skv, NUM_HEADS, HEAD_DIM).transpose(0, 2, 1, 3)
        s = jnp.einsum("bhqd,bhkd->bhqk", q, k) / (HEAD_DIM ** 0.5)
        a = jax.nn.softmax(s, axis=-1)
        o = jnp.einsum("bhqk,bhkd->bhqd", a, v).transpose(0, 2, 1, 3).reshape(b, sq, d)
        return lin(o, p[pref + "_wo"], p[pref + "_bo"])

    x = lin(logits, params["emb_w"], params["emb_b"])
    for p in params["layers"]:
        x = ln(x + mha(x, x, p, "sa"), p["g1"], p["b1"])
        x = ln(x + mha(x, past, p, "ca"), p["g2"], p["b2"])
        h = lin(lin(x, p["ff_w1"], p["ff_b1"], "relu"), p["ff_w2"], p["ff_b2"])
        x = ln(x + h, p["g3"], p["b3"])
    m = x.mean(axis=1)
    out = m @ params["fc_w_pad"][:, :NUM_CLASSES] + params["fc_b_pad"][:, :NUM_CLASSES]
    return jax.nn.softmax(out, axis=-1)


# ----------------------------------- main -----------------------------------

if __name__ == "__main__":
    key = jax.random.PRNGKey(0)
    k_params, k_logits, k_past = jax.random.split(key, 3)
    params = init_params(k_params)
    packed = pack_params(params)
    logits = jax.random.normal(k_logits, (BATCH, SEQ, HIDDEN), jnp.float32)
    past_sentences = jax.random.normal(k_past, (BATCH, SEQ, HIDDEN), jnp.float32)

    out = confidence_evaluator(packed, logits, past_sentences)
    out = jax.block_until_ready(out)

    ref = reference_forward(params, logits, past_sentences)
    assert out.shape == (BATCH, NUM_CLASSES)
    assert bool(jnp.all(jnp.isfinite(out)))
    assert bool(jnp.allclose(jnp.sum(out, axis=-1), 1.0, atol=1e-4))
    assert bool(jnp.allclose(out, ref, atol=3e-3, rtol=3e-3))
    print("KERNEL_OK")
</pallas_src>

<mosaic_0001>
module attributes {stable_mosaic.version = 11 : i64} {
  func.func @_fused_kernel(%arg0: i32, %arg1: memref<2x8x128xf32, #tpu.memory_space<vmem>>, %arg2: memref<2x8x128xf32, #tpu.memory_space<vmem>>, %arg3: memref<128x128xf32, #tpu.memory_space<vmem>>, %arg4: memref<1x128xf32, #tpu.memory_space<vmem>>, %arg5: memref<2x128x384xf32, #tpu.memory_space<vmem>>, %arg6: memref<2x1x384xf32, #tpu.memory_space<vmem>>, %arg7: memref<2x128x128xf32, #tpu.memory_space<vmem>>, %arg8: memref<2x1x128xf32, #tpu.memory_space<vmem>>, %arg9: memref<2x128x128xf32, #tpu.memory_space<vmem>>, %arg10: memref<2x1x128xf32, #tpu.memory_space<vmem>>, %arg11: memref<2x128x256xf32, #tpu.memory_space<vmem>>, %arg12: memref<2x1x256xf32, #tpu.memory_space<vmem>>, %arg13: memref<2x128x128xf32, #tpu.memory_space<vmem>>, %arg14: memref<2x1x128xf32, #tpu.memory_space<vmem>>, %arg15: memref<2x1x128xf32, #tpu.memory_space<vmem>>, %arg16: memref<2x1x128xf32, #tpu.memory_space<vmem>>, %arg17: memref<2x1x128xf32, #tpu.memory_space<vmem>>, %arg18: memref<2x1x128xf32, #tpu.memory_space<vmem>>, %arg19: memref<2x1x128xf32, #tpu.memory_space<vmem>>, %arg20: memref<2x1x128xf32, #tpu.memory_space<vmem>>, %arg21: memref<2x128x256xf32, #tpu.memory_space<vmem>>, %arg22: memref<2x1x256xf32, #tpu.memory_space<vmem>>, %arg23: memref<2x256x128xf32, #tpu.memory_space<vmem>>, %arg24: memref<2x1x128xf32, #tpu.memory_space<vmem>>, %arg25: memref<128x128xf32, #tpu.memory_space<vmem>>, %arg26: memref<1x128xf32, #tpu.memory_space<vmem>>, %arg27: memref<2x128xf32, #tpu.memory_space<vmem>>) attributes {dimension_semantics = [#tpu.dimension_semantics<arbitrary>], iteration_bounds = array<i64: 1>, scalar_prefetch = 0 : i64, scratch_operands = 0 : i64, tpu.core_type = #tpu.core_type<tc>, window_params = [{pipeline_mode = #tpu.pipeline_mode<synchronous>, transform_indices = @transform_0, window_bounds = array<i64: 2, 8, 128>}, {pipeline_mode = #tpu.pipeline_mode<synchronous>, transform_indices = @transform_1, window_bounds = array<i64: 2, 8, 128>}, {pipeline_mode = #tpu.pipeline_mode<synchronous>, transform_indices = @transform_2, window_bounds = array<i64: 128, 128>}, {pipeline_mode = #tpu.pipeline_mode<synchronous>, transform_indices = @transform_3, window_bounds = array<i64: 1, 128>}, {pipeline_mode = #tpu.pipeline_mode<synchronous>, transform_indices = @transform_4, window_bounds = array<i64: 2, 128, 384>}, {pipeline_mode = #tpu.pipeline_mode<synchronous>, transform_indices = @transform_5, window_bounds = array<i64: 2, 1, 384>}, {pipeline_mode = #tpu.pipeline_mode<synchronous>, transform_indices = @transform_6, window_bounds = array<i64: 2, 128, 128>}, {pipeline_mode = #tpu.pipeline_mode<synchronous>, transform_indices = @transform_7, window_bounds = array<i64: 2, 1, 128>}, {pipeline_mode = #tpu.pipeline_mode<synchronous>, transform_indices = @transform_8, window_bounds = array<i64: 2, 128, 128>}, {pipeline_mode = #tpu.pipeline_mode<synchronous>, transform_indices = @transform_9, window_bounds = array<i64: 2, 1, 128>}, {pipeline_mode = #tpu.pipeline_mode<synchronous>, transform_indices = @transform_10, window_bounds = array<i64: 2, 128, 256>}, {pipeline_mode = #tpu.pipeline_mode<synchronous>, transform_indices = @transform_11, window_bounds = array<i64: 2, 1, 256>}, {pipeline_mode = #tpu.pipeline_mode<synchronous>, transform_indices = @transform_12, window_bounds = array<i64: 2, 128, 128>}, {pipeline_mode = #tpu.pipeline_mode<synchronous>, transform_indices = @transform_13, window_bounds = array<i64: 2, 1, 128>}, {pipeline_mode = #tpu.pipeline_mode<synchronous>, transform_indices = @transform_14, window_bounds = array<i64: 2, 1, 128>}, {pipeline_mode = #tpu.pipeline_mode<synchronous>, transform_indices = @transform_15, window_bounds = array<i64: 2, 1, 128>}, {pipeline_mode = #tpu.pipeline_mode<synchronous>, transform_indices = @transform_16, window_bounds = array<i64: 2, 1, 128>}, {pipeline_mode = #tpu.pipeline_mode<synchronous>, transform_indices = @transform_17, window_bounds = array<i64: 2, 1, 128>}, {pipeline_mode = #tpu.pipeline_mode<synchronous>, transform_indices = @transform_18, window_bounds = array<i64: 2, 1, 128>}, {pipeline_mode = #tpu.pipeline_mode<synchronous>, transform_indices = @transform_19, window_bounds = array<i64: 2, 1, 128>}, {pipeline_mode = #tpu.pipeline_mode<synchronous>, transform_indices = @transform_20, window_bounds = array<i64: 2, 128, 256>}, {pipeline_mode = #tpu.pipeline_mode<synchronous>, transform_indices = @transform_21, window_bounds = array<i64: 2, 1, 256>}, {pipeline_mode = #tpu.pipeline_mode<synchronous>, transform_indices = @transform_22, window_bounds = array<i64: 2, 256, 128>}, {pipeline_mode = #tpu.pipeline_mode<synchronous>, transform_indices = @transform_23, window_bounds = array<i64: 2, 1, 128>}, {pipeline_mode = #tpu.pipeline_mode<synchronous>, transform_indices = @transform_24, window_bounds = array<i64: 128, 128>}, {pipeline_mode = #tpu.pipeline_mode<synchronous>, transform_indices = @transform_25, window_bounds = array<i64: 1, 128>}, {pipeline_mode = #tpu.pipeline_mode<synchronous>, transform_indices = @transform_26, window_bounds = array<i64: 2, 128>}]} {
    %c0 = arith.constant 0 : index
    %c0_0 = arith.constant 0 : index
    %c0_1 = arith.constant 0 : index
    %0 = vector.load %arg1[%c0, %c0_0, %c0_1] : memref<2x8x128xf32, #tpu.memory_space<vmem>>, vector<2x8x128xf32>
    %1 = vector.shape_cast %0 : vector<2x8x128xf32> to vector<16x128xf32>
    %c0_2 = arith.constant 0 : index
    %c0_3 = arith.constant 0 : index
    %c0_4 = arith.constant 0 : index
    %2 = vector.load %arg2[%c0_2, %c0_3, %c0_4] : memref<2x8x128xf32, #tpu.memory_space<vmem>>, vector<2x8x128xf32>
    %3 = vector.shape_cast %2 : vector<2x8x128xf32> to vector<16x128xf32>
    %c0_5 = arith.constant 0 : index
    %c0_6 = arith.constant 0 : index
    %4 = vector.load %arg3[%c0_5, %c0_6] : memref<128x128xf32, #tpu.memory_space<vmem>>, vector<128x128xf32>
    %cst = arith.constant dense<0.000000e+00> : vector<16x128xf32>
    %5 = tpu.matmul %1, %4, %cst {dimension_numbers = #tpu.dot_dimension_numbers<[1], [0], [0], [1], [0, 0, 1, 1], [], []>} : vector<16x128xf32>, vector<128x128xf32>, vector<16x128xf32> -> vector<16x128xf32>
    %c0_7 = arith.constant 0 : index
    %c0_8 = arith.constant 0 : index
    %6 = vector.load %arg4[%c0_7, %c0_8] : memref<1x128xf32, #tpu.memory_space<vmem>>, vector<1x128xf32>
    %7 = vector.broadcast %6 : vector<1x128xf32> to vector<16x128xf32>
    %8 = arith.addf %5, %7 : vector<16x128xf32>
    %c0_9 = arith.constant 0 : index
    %c0_10 = arith.constant 0 : index
    %c0_11 = arith.constant 0 : index
    %9 = vector.load %arg5[%c0_9, %c0_10, %c0_11] : memref<2x128x384xf32, #tpu.memory_space<vmem>>, vector<1x128x384xf32>
    %10 = vector.shape_cast %9 : vector<1x128x384xf32> to vector<128x384xf32>
    %cst_12 = arith.constant dense<0.000000e+00> : vector<16x384xf32>
    %11 = tpu.matmul %8, %10, %cst_12 {dimension_numbers = #tpu.dot_dimension_numbers<[1], [0], [0], [1], [0, 0, 1, 1], [], []>} : vector<16x128xf32>, vector<128x384xf32>, vector<16x384xf32> -> vector<16x384xf32>
    %c0_13 = arith.constant 0 : index
    %c0_14 = arith.constant 0 : index
    %c0_15 = arith.constant 0 : index
    %12 = vector.load %arg6[%c0_13, %c0_14, %c0_15] : memref<2x1x384xf32, #tpu.memory_space<vmem>>, vector<1x1x384xf32>
    %13 = vector.shape_cast %12 : vector<1x1x384xf32> to vector<1x384xf32>
    %14 = vector.broadcast %13 : vector<1x384xf32> to vector<16x384xf32>
    %15 = arith.addf %11, %14 : vector<16x384xf32>
    %16 = vector.extract_strided_slice %15 {offsets = [0, 0], sizes = [16, 128], strides = [1, 1]} : vector<16x384xf32> to vector<16x128xf32>
    %17 = vector.extract_strided_slice %15 {offsets = [0, 128], sizes = [16, 128], strides = [1, 1]} : vector<16x384xf32> to vector<16x128xf32>
    %18 = vector.extract_strided_slice %15 {offsets = [0, 256], sizes = [16, 128], strides = [1, 1]} : vector<16x384xf32> to vector<16x128xf32>
    %19 = vector.extract_strided_slice %16 {offsets = [0, 0], sizes = [8, 128], strides = [1, 1]} : vector<16x128xf32> to vector<8x128xf32>
    %20 = vector.extract_strided_slice %17 {offsets = [0, 0], sizes = [8, 128], strides = [1, 1]} : vector<16x128xf32> to vector<8x128xf32>
    %21 = vector.extract_strided_slice %18 {offsets = [0, 0], sizes = [8, 128], strides = [1, 1]} : vector<16x128xf32> to vector<8x128xf32>
    %22 = vector.extract_strided_slice %19 {offsets = [0, 0], sizes = [8, 32], strides = [1, 1]} : vector<8x128xf32> to vector<8x32xf32>
    %23 = vector.extract_strided_slice %20 {offsets = [0, 0], sizes = [8, 32], strides = [1, 1]} : vector<8x128xf32> to vector<8x32xf32>
    %24 = vector.extract_strided_slice %21 {offsets = [0, 0], sizes = [8, 32], strides = [1, 1]} : vector<8x128xf32> to vector<8x32xf32>
    %cst_16 = arith.constant dense<0.000000e+00> : vector<8x8xf32>
    %25 = tpu.matmul %22, %23, %cst_16 {dimension_numbers = #tpu.dot_dimension_numbers<[1], [1], [0], [0], [0, 0, 1, 0], [], []>} : vector<8x32xf32>, vector<8x32xf32>, vector<8x8xf32> -> vector<8x8xf32>
    %cst_17 = arith.constant 0.176776692 : f32
    %26 = vector.broadcast %cst_17 : f32 to vector<8x8xf32>
    %27 = arith.mulf %25, %26 : vector<8x8xf32>
    %cst_18 = arith.constant dense<0xFF800000> : vector<8xf32>
    %28 = vector.multi_reduction <maximumf>, %27, %cst_18 [1] : vector<8x8xf32> to vector<8xf32>
    %29 = vector.shape_cast %28 : vector<8xf32> to vector<8x1xf32>
    %30 = vector.broadcast %29 : vector<8x1xf32> to vector<8x8xf32>
    %31 = arith.subf %27, %30 : vector<8x8xf32>
    %32 = math.exp %31 : vector<8x8xf32>
    %cst_19 = arith.constant dense<0.000000e+00> : vector<8xf32>
    %33 = vector.multi_reduction <add>, %32, %cst_19 [1] : vector<8x8xf32> to vector<8xf32>
    %34 = vector.shape_cast %33 : vector<8xf32> to vector<8x1xf32>
    %35 = vector.broadcast %34 : vector<8x1xf32> to vector<8x8xf32>
    %36 = arith.divf %32, %35 : vector<8x8xf32>
    %cst_20 = arith.constant dense<0.000000e+00> : vector<8x32xf32>
    %37 = tpu.matmul %36, %24, %cst_20 {dimension_numbers = #tpu.dot_dimension_numbers<[1], [0], [0], [1], [0, 0, 1, 1], [], []>} : vector<8x8xf32>, vector<8x32xf32>, vector<8x32xf32> -> vector<8x32xf32>
    %38 = vector.extract_strided_slice %19 {offsets = [0, 32], sizes = [8, 32], strides = [1, 1]} : vector<8x128xf32> to vector<8x32xf32>
    %39 = vector.extract_strided_slice %20 {offsets = [0, 32], sizes = [8, 32], strides = [1, 1]} : vector<8x128xf32> to vector<8x32xf32>
    %40 = vector.extract_strided_slice %21 {offsets = [0, 32], sizes = [8, 32], strides = [1, 1]} : vector<8x128xf32> to vector<8x32xf32>
    %cst_21 = arith.constant dense<0.000000e+00> : vector<8x8xf32>
    %41 = tpu.matmul %38, %39, %cst_21 {dimension_numbers = #tpu.dot_dimension_numbers<[1], [1], [0], [0], [0, 0, 1, 0], [], []>} : vector<8x32xf32>, vector<8x32xf32>, vector<8x8xf32> -> vector<8x8xf32>
    %cst_22 = arith.constant 0.176776692 : f32
    %42 = vector.broadcast %cst_22 : f32 to vector<8x8xf32>
    %43 = arith.mulf %41, %42 : vector<8x8xf32>
    %cst_23 = arith.constant dense<0xFF800000> : vector<8xf32>
    %44 = vector.multi_reduction <maximumf>, %43, %cst_23 [1] : vector<8x8xf32> to vector<8xf32>
    %45 = vector.shape_cast %44 : vector<8xf32> to vector<8x1xf32>
    %46 = vector.broadcast %45 : vector<8x1xf32> to vector<8x8xf32>
    %47 = arith.subf %43, %46 : vector<8x8xf32>
    %48 = math.exp %47 : vector<8x8xf32>
    %cst_24 = arith.constant dense<0.000000e+00> : vector<8xf32>
    %49 = vector.multi_reduction <add>, %48, %cst_24 [1] : vector<8x8xf32> to vector<8xf32>
    %50 = vector.shape_cast %49 : vector<8xf32> to vector<8x1xf32>
    %51 = vector.broadcast %50 : vector<8x1xf32> to vector<8x8xf32>
    %52 = arith.divf %48, %51 : vector<8x8xf32>
    %cst_25 = arith.constant dense<0.000000e+00> : vector<8x32xf32>
    %53 = tpu.matmul %52, %40, %cst_25 {dimension_numbers = #tpu.dot_dimension_numbers<[1], [0], [0], [1], [0, 0, 1, 1], [], []>} : vector<8x8xf32>, vector<8x32xf32>, vector<8x32xf32> -> vector<8x32xf32>
    %54 = vector.extract_strided_slice %19 {offsets = [0, 64], sizes = [8, 32], strides = [1, 1]} : vector<8x128xf32> to vector<8x32xf32>
    %55 = vector.extract_strided_slice %20 {offsets = [0, 64], sizes = [8, 32], strides = [1, 1]} : vector<8x128xf32> to vector<8x32xf32>
    %56 = vector.extract_strided_slice %21 {offsets = [0, 64], sizes = [8, 32], strides = [1, 1]} : vector<8x128xf32> to vector<8x32xf32>
    %cst_26 = arith.constant dense<0.000000e+00> : vector<8x8xf32>
    %57 = tpu.matmul %54, %55, %cst_26 {dimension_numbers = #tpu.dot_dimension_numbers<[1], [1], [0], [0], [0, 0, 1, 0], [], []>} : vector<8x32xf32>, vector<8x32xf32>, vector<8x8xf32> -> vector<8x8xf32>
    %cst_27 = arith.constant 0.176776692 : f32
    %58 = vector.broadcast %cst_27 : f32 to vector<8x8xf32>
    %59 = arith.mulf %57, %58 : vector<8x8xf32>
    %cst_28 = arith.constant dense<0xFF800000> : vector<8xf32>
    %60 = vector.multi_reduction <maximumf>, %59, %cst_28 [1] : vector<8x8xf32> to vector<8xf32>
    %61 = vector.shape_cast %60 : vector<8xf32> to vector<8x1xf32>
    %62 = vector.broadcast %61 : vector<8x1xf32> to vector<8x8xf32>
    %63 = arith.subf %59, %62 : vector<8x8xf32>
    %64 = math.exp %63 : vector<8x8xf32>
    %cst_29 = arith.constant dense<0.000000e+00> : vector<8xf32>
    %65 = vector.multi_reduction <add>, %64, %cst_29 [1] : vector<8x8xf32> to vector<8xf32>
    %66 = vector.shape_cast %65 : vector<8xf32> to vector<8x1xf32>
    %67 = vector.broadcast %66 : vector<8x1xf32> to vector<8x8xf32>
    %68 = arith.divf %64, %67 : vector<8x8xf32>
    %cst_30 = arith.constant dense<0.000000e+00> : vector<8x32xf32>
    %69 = tpu.matmul %68, %56, %cst_30 {dimension_numbers = #tpu.dot_dimension_numbers<[1], [0], [0], [1], [0, 0, 1, 1], [], []>} : vector<8x8xf32>, vector<8x32xf32>, vector<8x32xf32> -> vector<8x32xf32>
    %70 = vector.extract_strided_slice %19 {offsets = [0, 96], sizes = [8, 32], strides = [1, 1]} : vector<8x128xf32> to vector<8x32xf32>
    %71 = vector.extract_strided_slice %20 {offsets = [0, 96], sizes = [8, 32], strides = [1, 1]} : vector<8x128xf32> to vector<8x32xf32>
    %72 = vector.extract_strided_slice %21 {offsets = [0, 96], sizes = [8, 32], strides = [1, 1]} : vector<8x128xf32> to vector<8x32xf32>
    %cst_31 = arith.constant dense<0.000000e+00> : vector<8x8xf32>
    %73 = tpu.matmul %70, %71, %cst_31 {dimension_numbers = #tpu.dot_dimension_numbers<[1], [1], [0], [0], [0, 0, 1, 0], [], []>} : vector<8x32xf32>, vector<8x32xf32>, vector<8x8xf32> -> vector<8x8xf32>
    %cst_32 = arith.constant 0.176776692 : f32
    %74 = vector.broadcast %cst_32 : f32 to vector<8x8xf32>
    %75 = arith.mulf %73, %74 : vector<8x8xf32>
    %cst_33 = arith.constant dense<0xFF800000> : vector<8xf32>
    %76 = vector.multi_reduction <maximumf>, %75, %cst_33 [1] : vector<8x8xf32> to vector<8xf32>
    %77 = vector.shape_cast %76 : vector<8xf32> to vector<8x1xf32>
    %78 = vector.broadcast %77 : vector<8x1xf32> to vector<8x8xf32>
    %79 = arith.subf %75, %78 : vector<8x8xf32>
    %80 = math.exp %79 : vector<8x8xf32>
    %cst_34 = arith.constant dense<0.000000e+00> : vector<8xf32>
    %81 = vector.multi_reduction <add>, %80, %cst_34 [1] : vector<8x8xf32> to vector<8xf32>
    %82 = vector.shape_cast %81 : vector<8xf32> to vector<8x1xf32>
    %83 = vector.broadcast %82 : vector<8x1xf32> to vector<8x8xf32>
    %84 = arith.divf %80, %83 : vector<8x8xf32>
    %cst_35 = arith.constant dense<0.000000e+00> : vector<8x32xf32>
    %85 = tpu.matmul %84, %72, %cst_35 {dimension_numbers = #tpu.dot_dimension_numbers<[1], [0], [0], [1], [0, 0, 1, 1], [], []>} : vector<8x8xf32>, vector<8x32xf32>, vector<8x32xf32> -> vector<8x32xf32>
    %86 = tpu.concatenate %37, %53, %69, %85 in 1 : vector<8x32xf32>, vector<8x32xf32>, vector<8x32xf32>, vector<8x32xf32> -> vector<8x128xf32>
    %87 = vector.extract_strided_slice %16 {offsets = [8, 0], sizes = [8, 128], strides = [1, 1]} : vector<16x128xf32> to vector<8x128xf32>
    %88 = vector.extract_strided_slice %17 {offsets = [8, 0], sizes = [8, 128], strides = [1, 1]} : vector<16x128xf32> to vector<8x128xf32>
    %89 = vector.extract_strided_slice %18 {offsets = [8, 0], sizes = [8, 128], strides = [1, 1]} : vector<16x128xf32> to vector<8x128xf32>
    %90 = vector.extract_strided_slice %87 {offsets = [0, 0], sizes = [8, 32], strides = [1, 1]} : vector<8x128xf32> to vector<8x32xf32>
    %91 = vector.extract_strided_slice %88 {offsets = [0, 0], sizes = [8, 32], strides = [1, 1]} : vector<8x128xf32> to vector<8x32xf32>
    %92 = vector.extract_strided_slice %89 {offsets = [0, 0], sizes = [8, 32], strides = [1, 1]} : vector<8x128xf32> to vector<8x32xf32>
    %cst_36 = arith.constant dense<0.000000e+00> : vector<8x8xf32>
    %93 = tpu.matmul %90, %91, %cst_36 {dimension_numbers = #tpu.dot_dimension_numbers<[1], [1], [0], [0], [0, 0, 1, 0], [], []>} : vector<8x32xf32>, vector<8x32xf32>, vector<8x8xf32> -> vector<8x8xf32>
    %cst_37 = arith.constant 0.176776692 : f32
    %94 = vector.broadcast %cst_37 : f32 to vector<8x8xf32>
    %95 = arith.mulf %93, %94 : vector<8x8xf32>
    %cst_38 = arith.constant dense<0xFF800000> : vector<8xf32>
    %96 = vector.multi_reduction <maximumf>, %95, %cst_38 [1] : vector<8x8xf32> to vector<8xf32>
    %97 = vector.shape_cast %96 : vector<8xf32> to vector<8x1xf32>
    %98 = vector.broadcast %97 : vector<8x1xf32> to vector<8x8xf32>
    %99 = arith.subf %95, %98 : vector<8x8xf32>
    %100 = math.exp %99 : vector<8x8xf32>
    %cst_39 = arith.constant dense<0.000000e+00> : vector<8xf32>
    %101 = vector.multi_reduction <add>, %100, %cst_39 [1] : vector<8x8xf32> to vector<8xf32>
    %102 = vector.shape_cast %101 : vector<8xf32> to vector<8x1xf32>
    %103 = vector.broadcast %102 : vector<8x1xf32> to vector<8x8xf32>
    %104 = arith.divf %100, %103 : vector<8x8xf32>
    %cst_40 = arith.constant dense<0.000000e+00> : vector<8x32xf32>
    %105 = tpu.matmul %104, %92, %cst_40 {dimension_numbers = #tpu.dot_dimension_numbers<[1], [0], [0], [1], [0, 0, 1, 1], [], []>} : vector<8x8xf32>, vector<8x32xf32>, vector<8x32xf32> -> vector<8x32xf32>
    %106 = vector.extract_strided_slice %87 {offsets = [0, 32], sizes = [8, 32], strides = [1, 1]} : vector<8x128xf32> to vector<8x32xf32>
    %107 = vector.extract_strided_slice %88 {offsets = [0, 32], sizes = [8, 32], strides = [1, 1]} : vector<8x128xf32> to vector<8x32xf32>
    %108 = vector.extract_strided_slice %89 {offsets = [0, 32], sizes = [8, 32], strides = [1, 1]} : vector<8x128xf32> to vector<8x32xf32>
    %cst_41 = arith.constant dense<0.000000e+00> : vector<8x8xf32>
    %109 = tpu.matmul %106, %107, %cst_41 {dimension_numbers = #tpu.dot_dimension_numbers<[1], [1], [0], [0], [0, 0, 1, 0], [], []>} : vector<8x32xf32>, vector<8x32xf32>, vector<8x8xf32> -> vector<8x8xf32>
    %cst_42 = arith.constant 0.176776692 : f32
    %110 = vector.broadcast %cst_42 : f32 to vector<8x8xf32>
    %111 = arith.mulf %109, %110 : vector<8x8xf32>
    %cst_43 = arith.constant dense<0xFF800000> : vector<8xf32>
    %112 = vector.multi_reduction <maximumf>, %111, %cst_43 [1] : vector<8x8xf32> to vector<8xf32>
    %113 = vector.shape_cast %112 : vector<8xf32> to vector<8x1xf32>
    %114 = vector.broadcast %113 : vector<8x1xf32> to vector<8x8xf32>
    %115 = arith.subf %111, %114 : vector<8x8xf32>
    %116 = math.exp %115 : vector<8x8xf32>
    %cst_44 = arith.constant dense<0.000000e+00> : vector<8xf32>
    %117 = vector.multi_reduction <add>, %116, %cst_44 [1] : vector<8x8xf32> to vector<8xf32>
    %118 = vector.shape_cast %117 : vector<8xf32> to vector<8x1xf32>
    %119 = vector.broadcast %118 : vector<8x1xf32> to vector<8x8xf32>
    %120 = arith.divf %116, %119 : vector<8x8xf32>
    %cst_45 = arith.constant dense<0.000000e+00> : vector<8x32xf32>
    %121 = tpu.matmul %120, %108, %cst_45 {dimension_numbers = #tpu.dot_dimension_numbers<[1], [0], [0], [1], [0, 0, 1, 1], [], []>} : vector<8x8xf32>, vector<8x32xf32>, vector<8x32xf32> -> vector<8x32xf32>
    %122 = vector.extract_strided_slice %87 {offsets = [0, 64], sizes = [8, 32], strides = [1, 1]} : vector<8x128xf32> to vector<8x32xf32>
    %123 = vector.extract_strided_slice %88 {offsets = [0, 64], sizes = [8, 32], strides = [1, 1]} : vector<8x128xf32> to vector<8x32xf32>
    %124 = vector.extract_strided_slice %89 {offsets = [0, 64], sizes = [8, 32], strides = [1, 1]} : vector<8x128xf32> to vector<8x32xf32>
    %cst_46 = arith.constant dense<0.000000e+00> : vector<8x8xf32>
    %125 = tpu.matmul %122, %123, %cst_46 {dimension_numbers = #tpu.dot_dimension_numbers<[1], [1], [0], [0], [0, 0, 1, 0], [], []>} : vector<8x32xf32>, vector<8x32xf32>, vector<8x8xf32> -> vector<8x8xf32>
    %cst_47 = arith.constant 0.176776692 : f32
    %126 = vector.broadcast %cst_47 : f32 to vector<8x8xf32>
    %127 = arith.mulf %125, %126 : vector<8x8xf32>
    %cst_48 = arith.constant dense<0xFF800000> : vector<8xf32>
    %128 = vector.multi_reduction <maximumf>, %127, %cst_48 [1] : vector<8x8xf32> to vector<8xf32>
    %129 = vector.shape_cast %128 : vector<8xf32> to vector<8x1xf32>
    %130 = vector.broadcast %129 : vector<8x1xf32> to vector<8x8xf32>
    %131 = arith.subf %127, %130 : vector<8x8xf32>
    %132 = math.exp %131 : vector<8x8xf32>
    %cst_49 = arith.constant dense<0.000000e+00> : vector<8xf32>
    %133 = vector.multi_reduction <add>, %132, %cst_49 [1] : vector<8x8xf32> to vector<8xf32>
    %134 = vector.shape_cast %133 : vector<8xf32> to vector<8x1xf32>
    %135 = vector.broadcast %134 : vector<8x1xf32> to vector<8x8xf32>
    %136 = arith.divf %132, %135 : vector<8x8xf32>
    %cst_50 = arith.constant dense<0.000000e+00> : vector<8x32xf32>
    %137 = tpu.matmul %136, %124, %cst_50 {dimension_numbers = #tpu.dot_dimension_numbers<[1], [0], [0], [1], [0, 0, 1, 1], [], []>} : vector<8x8xf32>, vector<8x32xf32>, vector<8x32xf32> -> vector<8x32xf32>
    %138 = vector.extract_strided_slice %87 {offsets = [0, 96], sizes = [8, 32], strides = [1, 1]} : vector<8x128xf32> to vector<8x32xf32>
    %139 = vector.extract_strided_slice %88 {offsets = [0, 96], sizes = [8, 32], strides = [1, 1]} : vector<8x128xf32> to vector<8x32xf32>
    %140 = vector.extract_strided_slice %89 {offsets = [0, 96], sizes = [8, 32], strides = [1, 1]} : vector<8x128xf32> to vector<8x32xf32>
    %cst_51 = arith.constant dense<0.000000e+00> : vector<8x8xf32>
    %141 = tpu.matmul %138, %139, %cst_51 {dimension_numbers = #tpu.dot_dimension_numbers<[1], [1], [0], [0], [0, 0, 1, 0], [], []>} : vector<8x32xf32>, vector<8x32xf32>, vector<8x8xf32> -> vector<8x8xf32>
    %cst_52 = arith.constant 0.176776692 : f32
    %142 = vector.broadcast %cst_52 : f32 to vector<8x8xf32>
    %143 = arith.mulf %141, %142 : vector<8x8xf32>
    %cst_53 = arith.constant dense<0xFF800000> : vector<8xf32>
    %144 = vector.multi_reduction <maximumf>, %143, %cst_53 [1] : vector<8x8xf32> to vector<8xf32>
    %145 = vector.shape_cast %144 : vector<8xf32> to vector<8x1xf32>
    %146 = vector.broadcast %145 : vector<8x1xf32> to vector<8x8xf32>
    %147 = arith.subf %143, %146 : vector<8x8xf32>
    %148 = math.exp %147 : vector<8x8xf32>
    %cst_54 = arith.constant dense<0.000000e+00> : vector<8xf32>
    %149 = vector.multi_reduction <add>, %148, %cst_54 [1] : vector<8x8xf32> to vector<8xf32>
    %150 = vector.shape_cast %149 : vector<8xf32> to vector<8x1xf32>
    %151 = vector.broadcast %150 : vector<8x1xf32> to vector<8x8xf32>
    %152 = arith.divf %148, %151 : vector<8x8xf32>
    %cst_55 = arith.constant dense<0.000000e+00> : vector<8x32xf32>
    %153 = tpu.matmul %152, %140, %cst_55 {dimension_numbers = #tpu.dot_dimension_numbers<[1], [0], [0], [1], [0, 0, 1, 1], [], []>} : vector<8x8xf32>, vector<8x32xf32>, vector<8x32xf32> -> vector<8x32xf32>
    %154 = tpu.concatenate %105, %121, %137, %153 in 1 : vector<8x32xf32>, vector<8x32xf32>, vector<8x32xf32>, vector<8x32xf32> -> vector<8x128xf32>
    %155 = tpu.concatenate %86, %154 in 0 : vector<8x128xf32>, vector<8x128xf32> -> vector<16x128xf32>
    %c0_56 = arith.constant 0 : index
    %c0_57 = arith.constant 0 : index
    %c0_58 = arith.constant 0 : index
    %156 = vector.load %arg7[%c0_56, %c0_57, %c0_58] : memref<2x128x128xf32, #tpu.memory_space<vmem>>, vector<1x128x128xf32>
    %157 = vector.shape_cast %156 : vector<1x128x128xf32> to vector<128x128xf32>
    %cst_59 = arith.constant dense<0.000000e+00> : vector<16x128xf32>
    %158 = tpu.matmul %155, %157, %cst_59 {dimension_numbers = #tpu.dot_dimension_numbers<[1], [0], [0], [1], [0, 0, 1, 1], [], []>} : vector<16x128xf32>, vector<128x128xf32>, vector<16x128xf32> -> vector<16x128xf32>
    %c0_60 = arith.constant 0 : index
    %c0_61 = arith.constant 0 : index
    %c0_62 = arith.constant 0 : index
    %159 = vector.load %arg8[%c0_60, %c0_61, %c0_62] : memref<2x1x128xf32, #tpu.memory_space<vmem>>, vector<1x1x128xf32>
    %160 = vector.shape_cast %159 : vector<1x1x128xf32> to vector<1x128xf32>
    %161 = vector.broadcast %160 : vector<1x128xf32> to vector<16x128xf32>
    %162 = arith.addf %158, %161 : vector<16x128xf32>
    %c0_63 = arith.constant 0 : index
    %c0_64 = arith.constant 0 : index
    %c0_65 = arith.constant 0 : index
    %163 = vector.load %arg15[%c0_63, %c0_64, %c0_65] : memref<2x1x128xf32, #tpu.memory_space<vmem>>, vector<1x1x128xf32>
    %164 = vector.shape_cast %163 : vector<1x1x128xf32> to vector<1x128xf32>
    %c0_66 = arith.constant 0 : index
    %c0_67 = arith.constant 0 : index
    %c0_68 = arith.constant 0 : index
    %165 = vector.load %arg16[%c0_66, %c0_67, %c0_68] : memref<2x1x128xf32, #tpu.memory_space<vmem>>, vector<1x1x128xf32>
    %166 = vector.shape_cast %165 : vector<1x1x128xf32> to vector<1x128xf32>
    %167 = arith.addf %8, %162 : vector<16x128xf32>
    %cst_69 = arith.constant dense<0.000000e+00> : vector<16xf32>
    %168 = vector.multi_reduction <add>, %167, %cst_69 [1] : vector<16x128xf32> to vector<16xf32>
    %169 = vector.shape_cast %168 : vector<16xf32> to vector<16x1xf32>
    %cst_70 = arith.constant 1.280000e+02 : f32
    %170 = vector.broadcast %cst_70 : f32 to vector<16x1xf32>
    %171 = arith.divf %169, %170 : vector<16x1xf32>
    %172 = vector.broadcast %171 : vector<16x1xf32> to vector<16x128xf32>
    %173 = arith.subf %167, %172 : vector<16x128xf32>
    %174 = arith.mulf %173, %173 : vector<16x128xf32>
    %cst_71 = arith.constant dense<0.000000e+00> : vector<16xf32>
    %175 = vector.multi_reduction <add>, %174, %cst_71 [1] : vector<16x128xf32> to vector<16xf32>
    %176 = vector.shape_cast %175 : vector<16xf32> to vector<16x1xf32>
    %cst_72 = arith.constant 1.280000e+02 : f32
    %177 = vector.broadcast %cst_72 : f32 to vector<16x1xf32>
    %178 = arith.divf %176, %177 : vector<16x1xf32>
    %cst_73 = arith.constant 9.99999974E-6 : f32
    %179 = vector.broadcast %cst_73 : f32 to vector<16x1xf32>
    %180 = arith.addf %178, %179 : vector<16x1xf32>
    %181 = math.rsqrt %180 : vector<16x1xf32>
    %182 = vector.broadcast %181 : vector<16x1xf32> to vector<16x128xf32>
    %183 = arith.mulf %173, %182 : vector<16x128xf32>
    %184 = vector.broadcast %164 : vector<1x128xf32> to vector<16x128xf32>
    %185 = arith.mulf %183, %184 : vector<16x128xf32>
    %186 = vector.broadcast %166 : vector<1x128xf32> to vector<16x128xf32>
    %187 = arith.addf %185, %186 : vector<16x128xf32>
    %c0_74 = arith.constant 0 : index
    %c0_75 = arith.constant 0 : index
    %c0_76 = arith.constant 0 : index
    %188 = vector.load %arg9[%c0_74, %c0_75, %c0_76] : memref<2x128x128xf32, #tpu.memory_space<vmem>>, vector<1x128x128xf32>
    %189 = vector.shape_cast %188 : vector<1x128x128xf32> to vector<128x128xf32>
    %cst_77 = arith.constant dense<0.000000e+00> : vector<16x128xf32>
    %190 = tpu.matmul %187, %189, %cst_77 {dimension_numbers = #tpu.dot_dimension_numbers<[1], [0], [0], [1], [0, 0, 1, 1], [], []>} : vector<16x128xf32>, vector<128x128xf32>, vector<16x128xf32> -> vector<16x128xf32>
    %c0_78 = arith.constant 0 : index
    %c0_79 = arith.constant 0 : index
    %c0_80 = arith.constant 0 : index
    %191 = vector.load %arg10[%c0_78, %c0_79, %c0_80] : memref<2x1x128xf32, #tpu.memory_space<vmem>>, vector<1x1x128xf32>
    %192 = vector.shape_cast %191 : vector<1x1x128xf32> to vector<1x128xf32>
    %193 = vector.broadcast %192 : vector<1x128xf32> to vector<16x128xf32>
    %194 = arith.addf %190, %193 : vector<16x128xf32>
    %c0_81 = arith.constant 0 : index
    %c0_82 = arith.constant 0 : index
    %c0_83 = arith.constant 0 : index
    %195 = vector.load %arg11[%c0_81, %c0_82, %c0_83] : memref<2x128x256xf32, #tpu.memory_space<vmem>>, vector<1x128x256xf32>
    %196 = vector.shape_cast %195 : vector<1x128x256xf32> to vector<128x256xf32>
    %cst_84 = arith.constant dense<0.000000e+00> : vector<16x256xf32>
    %197 = tpu.matmul %3, %196, %cst_84 {dimension_numbers = #tpu.dot_dimension_numbers<[1], [0], [0], [1], [0, 0, 1, 1], [], []>} : vector<16x128xf32>, vector<128x256xf32>, vector<16x256xf32> -> vector<16x256xf32>
    %c0_85 = arith.constant 0 : index
    %c0_86 = arith.constant 0 : index
    %c0_87 = arith.constant 0 : index
    %198 = vector.load %arg12[%c0_85, %c0_86, %c0_87] : memref<2x1x256xf32, #tpu.memory_space<vmem>>, vector<1x1x256xf32>
    %199 = vector.shape_cast %198 : vector<1x1x256xf32> to vector<1x256xf32>
    %200 = vector.broadcast %199 : vector<1x256xf32> to vector<16x256xf32>
    %201 = arith.addf %197, %200 : vector<16x256xf32>
    %202 = vector.extract_strided_slice %201 {offsets = [0, 0], sizes = [16, 128], strides = [1, 1]} : vector<16x256xf32> to vector<16x128xf32>
    %203 = vector.extract_strided_slice %201 {offsets = [0, 128], sizes = [16, 128], strides = [1, 1]} : vector<16x256xf32> to vector<16x128xf32>
    %204 = vector.extract_strided_slice %194 {offsets = [0, 0], sizes = [8, 128], strides = [1, 1]} : vector<16x128xf32> to vector<8x128xf32>
    %205 = vector.extract_strided_slice %202 {offsets = [0, 0], sizes = [8, 128], strides = [1, 1]} : vector<16x128xf32> to vector<8x128xf32>
    %206 = vector.extract_strided_slice %203 {offsets = [0, 0], sizes = [8, 128], strides = [1, 1]} : vector<16x128xf32> to vector<8x128xf32>
    %207 = vector.extract_strided_slice %204 {offsets = [0, 0], sizes = [8, 32], strides = [1, 1]} : vector<8x128xf32> to vector<8x32xf32>
    %208 = vector.extract_strided_slice %205 {offsets = [0, 0], sizes = [8, 32], strides = [1, 1]} : vector<8x128xf32> to vector<8x32xf32>
    %209 = vector.extract_strided_slice %206 {offsets = [0, 0], sizes = [8, 32], strides = [1, 1]} : vector<8x128xf32> to vector<8x32xf32>
    %cst_88 = arith.constant dense<0.000000e+00> : vector<8x8xf32>
    %210 = tpu.matmul %207, %208, %cst_88 {dimension_numbers = #tpu.dot_dimension_numbers<[1], [1], [0], [0], [0, 0, 1, 0], [], []>} : vector<8x32xf32>, vector<8x32xf32>, vector<8x8xf32> -> vector<8x8xf32>
    %cst_89 = arith.constant 0.176776692 : f32
    %211 = vector.broadcast %cst_89 : f32 to vector<8x8xf32>
    %212 = arith.mulf %210, %211 : vector<8x8xf32>
    %cst_90 = arith.constant dense<0xFF800000> : vector<8xf32>
    %213 = vector.multi_reduction <maximumf>, %212, %cst_90 [1] : vector<8x8xf32> to vector<8xf32>
    %214 = vector.shape_cast %213 : vector<8xf32> to vector<8x1xf32>
    %215 = vector.broadcast %214 : vector<8x1xf32> to vector<8x8xf32>
    %216 = arith.subf %212, %215 : vector<8x8xf32>
    %217 = math.exp %216 : vector<8x8xf32>
    %cst_91 = arith.constant dense<0.000000e+00> : vector<8xf32>
    %218 = vector.multi_reduction <add>, %217, %cst_91 [1] : vector<8x8xf32> to vector<8xf32>
    %219 = vector.shape_cast %218 : vector<8xf32> to vector<8x1xf32>
    %220 = vector.broadcast %219 : vector<8x1xf32> to vector<8x8xf32>
    %221 = arith.divf %217, %220 : vector<8x8xf32>
    %cst_92 = arith.constant dense<0.000000e+00> : vector<8x32xf32>
    %222 = tpu.matmul %221, %209, %cst_92 {dimension_numbers = #tpu.dot_dimension_numbers<[1], [0], [0], [1], [0, 0, 1, 1], [], []>} : vector<8x8xf32>, vector<8x32xf32>, vector<8x32xf32> -> vector<8x32xf32>
    %223 = vector.extract_strided_slice %204 {offsets = [0, 32], sizes = [8, 32], strides = [1, 1]} : vector<8x128xf32> to vector<8x32xf32>
    %224 = vector.extract_strided_slice %205 {offsets = [0, 32], sizes = [8, 32], strides = [1, 1]} : vector<8x128xf32> to vector<8x32xf32>
    %225 = vector.extract_strided_slice %206 {offsets = [0, 32], sizes = [8, 32], strides = [1, 1]} : vector<8x128xf32> to vector<8x32xf32>
    %cst_93 = arith.constant dense<0.000000e+00> : vector<8x8xf32>
    %226 = tpu.matmul %223, %224, %cst_93 {dimension_numbers = #tpu.dot_dimension_numbers<[1], [1], [0], [0], [0, 0, 1, 0], [], []>} : vector<8x32xf32>, vector<8x32xf32>, vector<8x8xf32> -> vector<8x8xf32>
    %cst_94 = arith.constant 0.176776692 : f32
    %227 = vector.broadcast %cst_94 : f32 to vector<8x8xf32>
    %228 = arith.mulf %226, %227 : vector<8x8xf32>
    %cst_95 = arith.constant dense<0xFF800000> : vector<8xf32>
    %229 = vector.multi_reduction <maximumf>, %228, %cst_95 [1] : vector<8x8xf32> to vector<8xf32>
    %230 = vector.shape_cast %229 : vector<8xf32> to vector<8x1xf32>
    %231 = vector.broadcast %230 : vector<8x1xf32> to vector<8x8xf32>
    %232 = arith.subf %228, %231 : vector<8x8xf32>
    %233 = math.exp %232 : vector<8x8xf32>
    %cst_96 = arith.constant dense<0.000000e+00> : vector<8xf32>
    %234 = vector.multi_reduction <add>, %233, %cst_96 [1] : vector<8x8xf32> to vector<8xf32>
    %235 = vector.shape_cast %234 : vector<8xf32> to vector<8x1xf32>
    %236 = vector.broadcast %235 : vector<8x1xf32> to vector<8x8xf32>
    %237 = arith.divf %233, %236 : vector<8x8xf32>
    %cst_97 = arith.constant dense<0.000000e+00> : vector<8x32xf32>
    %238 = tpu.matmul %237, %225, %cst_97 {dimension_numbers = #tpu.dot_dimension_numbers<[1], [0], [0], [1], [0, 0, 1, 1], [], []>} : vector<8x8xf32>, vector<8x32xf32>, vector<8x32xf32> -> vector<8x32xf32>
    %239 = vector.extract_strided_slice %204 {offsets = [0, 64], sizes = [8, 32], strides = [1, 1]} : vector<8x128xf32> to vector<8x32xf32>
    %240 = vector.extract_strided_slice %205 {offsets = [0, 64], sizes = [8, 32], strides = [1, 1]} : vector<8x128xf32> to vector<8x32xf32>
    %241 = vector.extract_strided_slice %206 {offsets = [0, 64], sizes = [8, 32], strides = [1, 1]} : vector<8x128xf32> to vector<8x32xf32>
    %cst_98 = arith.constant dense<0.000000e+00> : vector<8x8xf32>
    %242 = tpu.matmul %239, %240, %cst_98 {dimension_numbers = #tpu.dot_dimension_numbers<[1], [1], [0], [0], [0, 0, 1, 0], [], []>} : vector<8x32xf32>, vector<8x32xf32>, vector<8x8xf32> -> vector<8x8xf32>
    %cst_99 = arith.constant 0.176776692 : f32
    %243 = vector.broadcast %cst_99 : f32 to vector<8x8xf32>
    %244 = arith.mulf %242, %243 : vector<8x8xf32>
    %cst_100 = arith.constant dense<0xFF800000> : vector<8xf32>
    %245 = vector.multi_reduction <maximumf>, %244, %cst_100 [1] : vector<8x8xf32> to vector<8xf32>
    %246 = vector.shape_cast %245 : vector<8xf32> to vector<8x1xf32>
    %247 = vector.broadcast %246 : vector<8x1xf32> to vector<8x8xf32>
    %248 = arith.subf %244, %247 : vector<8x8xf32>
    %249 = math.exp %248 : vector<8x8xf32>
    %cst_101 = arith.constant dense<0.000000e+00> : vector<8xf32>
    %250 = vector.multi_reduction <add>, %249, %cst_101 [1] : vector<8x8xf32> to vector<8xf32>
    %251 = vector.shape_cast %250 : vector<8xf32> to vector<8x1xf32>
    %252 = vector.broadcast %251 : vector<8x1xf32> to vector<8x8xf32>
    %253 = arith.divf %249, %252 : vector<8x8xf32>
    %cst_102 = arith.constant dense<0.000000e+00> : vector<8x32xf32>
    %254 = tpu.matmul %253, %241, %cst_102 {dimension_numbers = #tpu.dot_dimension_numbers<[1], [0], [0], [1], [0, 0, 1, 1], [], []>} : vector<8x8xf32>, vector<8x32xf32>, vector<8x32xf32> -> vector<8x32xf32>
    %255 = vector.extract_strided_slice %204 {offsets = [0, 96], sizes = [8, 32], strides = [1, 1]} : vector<8x128xf32> to vector<8x32xf32>
    %256 = vector.extract_strided_slice %205 {offsets = [0, 96], sizes = [8, 32], strides = [1, 1]} : vector<8x128xf32> to vector<8x32xf32>
    %257 = vector.extract_strided_slice %206 {offsets = [0, 96], sizes = [8, 32], strides = [1, 1]} : vector<8x128xf32> to vector<8x32xf32>
    %cst_103 = arith.constant dense<0.000000e+00> : vector<8x8xf32>
    %258 = tpu.matmul %255, %256, %cst_103 {dimension_numbers = #tpu.dot_dimension_numbers<[1], [1], [0], [0], [0, 0, 1, 0], [], []>} : vector<8x32xf32>, vector<8x32xf32>, vector<8x8xf32> -> vector<8x8xf32>
    %cst_104 = arith.constant 0.176776692 : f32
    %259 = vector.broadcast %cst_104 : f32 to vector<8x8xf32>
    %260 = arith.mulf %258, %259 : vector<8x8xf32>
    %cst_105 = arith.constant dense<0xFF800000> : vector<8xf32>
    %261 = vector.multi_reduction <maximumf>, %260, %cst_105 [1] : vector<8x8xf32> to vector<8xf32>
    %262 = vector.shape_cast %261 : vector<8xf32> to vector<8x1xf32>
    %263 = vector.broadcast %262 : vector<8x1xf32> to vector<8x8xf32>
    %264 = arith.subf %260, %263 : vector<8x8xf32>
    %265 = math.exp %264 : vector<8x8xf32>
    %cst_106 = arith.constant dense<0.000000e+00> : vector<8xf32>
    %266 = vector.multi_reduction <add>, %265, %cst_106 [1] : vector<8x8xf32> to vector<8xf32>
    %267 = vector.shape_cast %266 : vector<8xf32> to vector<8x1xf32>
    %268 = vector.broadcast %267 : vector<8x1xf32> to vector<8x8xf32>
    %269 = arith.divf %265, %268 : vector<8x8xf32>
    %cst_107 = arith.constant dense<0.000000e+00> : vector<8x32xf32>
    %270 = tpu.matmul %269, %257, %cst_107 {dimension_numbers = #tpu.dot_dimension_numbers<[1], [0], [0], [1], [0, 0, 1, 1], [], []>} : vector<8x8xf32>, vector<8x32xf32>, vector<8x32xf32> -> vector<8x32xf32>
    %271 = tpu.concatenate %222, %238, %254, %270 in 1 : vector<8x32xf32>, vector<8x32xf32>, vector<8x32xf32>, vector<8x32xf32> -> vector<8x128xf32>
    %272 = vector.extract_strided_slice %194 {offsets = [8, 0], sizes = [8, 128], strides = [1, 1]} : vector<16x128xf32> to vector<8x128xf32>
    %273 = vector.extract_strided_slice %202 {offsets = [8, 0], sizes = [8, 128], strides = [1, 1]} : vector<16x128xf32> to vector<8x128xf32>
    %274 = vector.extract_strided_slice %203 {offsets = [8, 0], sizes = [8, 128], strides = [1, 1]} : vector<16x128xf32> to vector<8x128xf32>
    %275 = vector.extract_strided_slice %272 {offsets = [0, 0], sizes = [8, 32], strides = [1, 1]} : vector<8x128xf32> to vector<8x32xf32>
    %276 = vector.extract_strided_slice %273 {offsets = [0, 0], sizes = [8, 32], strides = [1, 1]} : vector<8x128xf32> to vector<8x32xf32>
    %277 = vector.extract_strided_slice %274 {offsets = [0, 0], sizes = [8, 32], strides = [1, 1]} : vector<8x128xf32> to vector<8x32xf32>
    %cst_108 = arith.constant dense<0.000000e+00> : vector<8x8xf32>
    %278 = tpu.matmul %275, %276, %cst_108 {dimension_numbers = #tpu.dot_dimension_numbers<[1], [1], [0], [0], [0, 0, 1, 0], [], []>} : vector<8x32xf32>, vector<8x32xf32>, vector<8x8xf32> -> vector<8x8xf32>
    %cst_109 = arith.constant 0.176776692 : f32
    %279 = vector.broadcast %cst_109 : f32 to vector<8x8xf32>
    %280 = arith.mulf %278, %279 : vector<8x8xf32>
    %cst_110 = arith.constant dense<0xFF800000> : vector<8xf32>
    %281 = vector.multi_reduction <maximumf>, %280, %cst_110 [1] : vector<8x8xf32> to vector<8xf32>
    %282 = vector.shape_cast %281 : vector<8xf32> to vector<8x1xf32>
    %283 = vector.broadcast %282 : vector<8x1xf32> to vector<8x8xf32>
    %284 = arith.subf %280, %283 : vector<8x8xf32>
    %285 = math.exp %284 : vector<8x8xf32>
    %cst_111 = arith.constant dense<0.000000e+00> : vector<8xf32>
    %286 = vector.multi_reduction <add>, %285, %cst_111 [1] : vector<8x8xf32> to vector<8xf32>
    %287 = vector.shape_cast %286 : vector<8xf32> to vector<8x1xf32>
    %288 = vector.broadcast %287 : vector<8x1xf32> to vector<8x8xf32>
    %289 = arith.divf %285, %288 : vector<8x8xf32>
    %cst_112 = arith.constant dense<0.000000e+00> : vector<8x32xf32>
    %290 = tpu.matmul %289, %277, %cst_112 {dimension_numbers = #tpu.dot_dimension_numbers<[1], [0], [0], [1], [0, 0, 1, 1], [], []>} : vector<8x8xf32>, vector<8x32xf32>, vector<8x32xf32> -> vector<8x32xf32>
    %291 = vector.extract_strided_slice %272 {offsets = [0, 32], sizes = [8, 32], strides = [1, 1]} : vector<8x128xf32> to vector<8x32xf32>
    %292 = vector.extract_strided_slice %273 {offsets = [0, 32], sizes = [8, 32], strides = [1, 1]} : vector<8x128xf32> to vector<8x32xf32>
    %293 = vector.extract_strided_slice %274 {offsets = [0, 32], sizes = [8, 32], strides = [1, 1]} : vector<8x128xf32> to vector<8x32xf32>
    %cst_113 = arith.constant dense<0.000000e+00> : vector<8x8xf32>
    %294 = tpu.matmul %291, %292, %cst_113 {dimension_numbers = #tpu.dot_dimension_numbers<[1], [1], [0], [0], [0, 0, 1, 0], [], []>} : vector<8x32xf32>, vector<8x32xf32>, vector<8x8xf32> -> vector<8x8xf32>
    %cst_114 = arith.constant 0.176776692 : f32
    %295 = vector.broadcast %cst_114 : f32 to vector<8x8xf32>
    %296 = arith.mulf %294, %295 : vector<8x8xf32>
    %cst_115 = arith.constant dense<0xFF800000> : vector<8xf32>
    %297 = vector.multi_reduction <maximumf>, %296, %cst_115 [1] : vector<8x8xf32> to vector<8xf32>
    %298 = vector.shape_cast %297 : vector<8xf32> to vector<8x1xf32>
    %299 = vector.broadcast %298 : vector<8x1xf32> to vector<8x8xf32>
    %300 = arith.subf %296, %299 : vector<8x8xf32>
    %301 = math.exp %300 : vector<8x8xf32>
    %cst_116 = arith.constant dense<0.000000e+00> : vector<8xf32>
    %302 = vector.multi_reduction <add>, %301, %cst_116 [1] : vector<8x8xf32> to vector<8xf32>
    %303 = vector.shape_cast %302 : vector<8xf32> to vector<8x1xf32>
    %304 = vector.broadcast %303 : vector<8x1xf32> to vector<8x8xf32>
    %305 = arith.divf %301, %304 : vector<8x8xf32>
    %cst_117 = arith.constant dense<0.000000e+00> : vector<8x32xf32>
    %306 = tpu.matmul %305, %293, %cst_117 {dimension_numbers = #tpu.dot_dimension_numbers<[1], [0], [0], [1], [0, 0, 1, 1], [], []>} : vector<8x8xf32>, vector<8x32xf32>, vector<8x32xf32> -> vector<8x32xf32>
    %307 = vector.extract_strided_slice %272 {offsets = [0, 64], sizes = [8, 32], strides = [1, 1]} : vector<8x128xf32> to vector<8x32xf32>
    %308 = vector.extract_strided_slice %273 {offsets = [0, 64], sizes = [8, 32], strides = [1, 1]} : vector<8x128xf32> to vector<8x32xf32>
    %309 = vector.extract_strided_slice %274 {offsets = [0, 64], sizes = [8, 32], strides = [1, 1]} : vector<8x128xf32> to vector<8x32xf32>
    %cst_118 = arith.constant dense<0.000000e+00> : vector<8x8xf32>
    %310 = tpu.matmul %307, %308, %cst_118 {dimension_numbers = #tpu.dot_dimension_numbers<[1], [1], [0], [0], [0, 0, 1, 0], [], []>} : vector<8x32xf32>, vector<8x32xf32>, vector<8x8xf32> -> vector<8x8xf32>
    %cst_119 = arith.constant 0.176776692 : f32
    %311 = vector.broadcast %cst_119 : f32 to vector<8x8xf32>
    %312 = arith.mulf %310, %311 : vector<8x8xf32>
    %cst_120 = arith.constant dense<0xFF800000> : vector<8xf32>
    %313 = vector.multi_reduction <maximumf>, %312, %cst_120 [1] : vector<8x8xf32> to vector<8xf32>
    %314 = vector.shape_cast %313 : vector<8xf32> to vector<8x1xf32>
    %315 = vector.broadcast %314 : vector<8x1xf32> to vector<8x8xf32>
    %316 = arith.subf %312, %315 : vector<8x8xf32>
    %317 = math.exp %316 : vector<8x8xf32>
    %cst_121 = arith.constant dense<0.000000e+00> : vector<8xf32>
    %318 = vector.multi_reduction <add>, %317, %cst_121 [1] : vector<8x8xf32> to vector<8xf32>
    %319 = vector.shape_cast %318 : vector<8xf32> to vector<8x1xf32>
    %320 = vector.broadcast %319 : vector<8x1xf32> to vector<8x8xf32>
    %321 = arith.divf %317, %320 : vector<8x8xf32>
    %cst_122 = arith.constant dense<0.000000e+00> : vector<8x32xf32>
    %322 = tpu.matmul %321, %309, %cst_122 {dimension_numbers = #tpu.dot_dimension_numbers<[1], [0], [0], [1], [0, 0, 1, 1], [], []>} : vector<8x8xf32>, vector<8x32xf32>, vector<8x32xf32> -> vector<8x32xf32>
    %323 = vector.extract_strided_slice %272 {offsets = [0, 96], sizes = [8, 32], strides = [1, 1]} : vector<8x128xf32> to vector<8x32xf32>
    %324 = vector.extract_strided_slice %273 {offsets = [0, 96], sizes = [8, 32], strides = [1, 1]} : vector<8x128xf32> to vector<8x32xf32>
    %325 = vector.extract_strided_slice %274 {offsets = [0, 96], sizes = [8, 32], strides = [1, 1]} : vector<8x128xf32> to vector<8x32xf32>
    %cst_123 = arith.constant dense<0.000000e+00> : vector<8x8xf32>
    %326 = tpu.matmul %323, %324, %cst_123 {dimension_numbers = #tpu.dot_dimension_numbers<[1], [1], [0], [0], [0, 0, 1, 0], [], []>} : vector<8x32xf32>, vector<8x32xf32>, vector<8x8xf32> -> vector<8x8xf32>
    %cst_124 = arith.constant 0.176776692 : f32
    %327 = vector.broadcast %cst_124 : f32 to vector<8x8xf32>
    %328 = arith.mulf %326, %327 : vector<8x8xf32>
    %cst_125 = arith.constant dense<0xFF800000> : vector<8xf32>
    %329 = vector.multi_reduction <maximumf>, %328, %cst_125 [1] : vector<8x8xf32> to vector<8xf32>
    %330 = vector.shape_cast %329 : vector<8xf32> to vector<8x1xf32>
    %331 = vector.broadcast %330 : vector<8x1xf32> to vector<8x8xf32>
    %332 = arith.subf %328, %331 : vector<8x8xf32>
    %333 = math.exp %332 : vector<8x8xf32>
    %cst_126 = arith.constant dense<0.000000e+00> : vector<8xf32>
    %334 = vector.multi_reduction <add>, %333, %cst_126 [1] : vector<8x8xf32> to vector<8xf32>
    %335 = vector.shape_cast %334 : vector<8xf32> to vector<8x1xf32>
    %336 = vector.broadcast %335 : vector<8x1xf32> to vector<8x8xf32>
    %337 = arith.divf %333, %336 : vector<8x8xf32>
    %cst_127 = arith.constant dense<0.000000e+00> : vector<8x32xf32>
    %338 = tpu.matmul %337, %325, %cst_127 {dimension_numbers = #tpu.dot_dimension_numbers<[1], [0], [0], [1], [0, 0, 1, 1], [], []>} : vector<8x8xf32>, vector<8x32xf32>, vector<8x32xf32> -> vector<8x32xf32>
    %339 = tpu.concatenate %290, %306, %322, %338 in 1 : vector<8x32xf32>, vector<8x32xf32>, vector<8x32xf32>, vector<8x32xf32> -> vector<8x128xf32>
    %340 = tpu.concatenate %271, %339 in 0 : vector<8x128xf32>, vector<8x128xf32> -> vector<16x128xf32>
    %c0_128 = arith.constant 0 : index
    %c0_129 = arith.constant 0 : index
    %c0_130 = arith.constant 0 : index
    %341 = vector.load %arg13[%c0_128, %c0_129, %c0_130] : memref<2x128x128xf32, #tpu.memory_space<vmem>>, vector<1x128x128xf32>
    %342 = vector.shape_cast %341 : vector<1x128x128xf32> to vector<128x128xf32>
    %cst_131 = arith.constant dense<0.000000e+00> : vector<16x128xf32>
    %343 = tpu.matmul %340, %342, %cst_131 {dimension_numbers = #tpu.dot_dimension_numbers<[1], [0], [0], [1], [0, 0, 1, 1], [], []>} : vector<16x128xf32>, vector<128x128xf32>, vector<16x128xf32> -> vector<16x128xf32>
    %c0_132 = arith.constant 0 : index
    %c0_133 = arith.constant 0 : index
    %c0_134 = arith.constant 0 : index
    %344 = vector.load %arg14[%c0_132, %c0_133, %c0_134] : memref<2x1x128xf32, #tpu.memory_space<vmem>>, vector<1x1x128xf32>
    %345 = vector.shape_cast %344 : vector<1x1x128xf32> to vector<1x128xf32>
    %346 = vector.broadcast %345 : vector<1x128xf32> to vector<16x128xf32>
    %347 = arith.addf %343, %346 : vector<16x128xf32>
    %c0_135 = arith.constant 0 : index
    %c0_136 = arith.constant 0 : index
    %c0_137 = arith.constant 0 : index
    %348 = vector.load %arg17[%c0_135, %c0_136, %c0_137] : memref<2x1x128xf32, #tpu.memory_space<vmem>>, vector<1x1x128xf32>
    %349 = vector.shape_cast %348 : vector<1x1x128xf32> to vector<1x128xf32>
    %c0_138 = arith.constant 0 : index
    %c0_139 = arith.constant 0 : index
    %c0_140 = arith.constant 0 : index
    %350 = vector.load %arg18[%c0_138, %c0_139, %c0_140] : memref<2x1x128xf32, #tpu.memory_space<vmem>>, vector<1x1x128xf32>
    %351 = vector.shape_cast %350 : vector<1x1x128xf32> to vector<1x128xf32>
    %352 = arith.addf %187, %347 : vector<16x128xf32>
    %cst_141 = arith.constant dense<0.000000e+00> : vector<16xf32>
    %353 = vector.multi_reduction <add>, %352, %cst_141 [1] : vector<16x128xf32> to vector<16xf32>
    %354 = vector.shape_cast %353 : vector<16xf32> to vector<16x1xf32>
    %cst_142 = arith.constant 1.280000e+02 : f32
    %355 = vector.broadcast %cst_142 : f32 to vector<16x1xf32>
    %356 = arith.divf %354, %355 : vector<16x1xf32>
    %357 = vector.broadcast %356 : vector<16x1xf32> to vector<16x128xf32>
    %358 = arith.subf %352, %357 : vector<16x128xf32>
    %359 = arith.mulf %358, %358 : vector<16x128xf32>
    %cst_143 = arith.constant dense<0.000000e+00> : vector<16xf32>
    %360 = vector.multi_reduction <add>, %359, %cst_143 [1] : vector<16x128xf32> to vector<16xf32>
    %361 = vector.shape_cast %360 : vector<16xf32> to vector<16x1xf32>
    %cst_144 = arith.constant 1.280000e+02 : f32
    %362 = vector.broadcast %cst_144 : f32 to vector<16x1xf32>
    %363 = arith.divf %361, %362 : vector<16x1xf32>
    %cst_145 = arith.constant 9.99999974E-6 : f32
    %364 = vector.broadcast %cst_145 : f32 to vector<16x1xf32>
    %365 = arith.addf %363, %364 : vector<16x1xf32>
    %366 = math.rsqrt %365 : vector<16x1xf32>
    %367 = vector.broadcast %366 : vector<16x1xf32> to vector<16x128xf32>
    %368 = arith.mulf %358, %367 : vector<16x128xf32>
    %369 = vector.broadcast %349 : vector<1x128xf32> to vector<16x128xf32>
    %370 = arith.mulf %368, %369 : vector<16x128xf32>
    %371 = vector.broadcast %351 : vector<1x128xf32> to vector<16x128xf32>
    %372 = arith.addf %370, %371 : vector<16x128xf32>
    %c0_146 = arith.constant 0 : index
    %c0_147 = arith.constant 0 : index
    %c0_148 = arith.constant 0 : index
    %373 = vector.load %arg21[%c0_146, %c0_147, %c0_148] : memref<2x128x256xf32, #tpu.memory_space<vmem>>, vector<1x128x256xf32>
    %374 = vector.shape_cast %373 : vector<1x128x256xf32> to vector<128x256xf32>
    %cst_149 = arith.constant dense<0.000000e+00> : vector<16x256xf32>
    %375 = tpu.matmul %372, %374, %cst_149 {dimension_numbers = #tpu.dot_dimension_numbers<[1], [0], [0], [1], [0, 0, 1, 1], [], []>} : vector<16x128xf32>, vector<128x256xf32>, vector<16x256xf32> -> vector<16x256xf32>
    %c0_150 = arith.constant 0 : index
    %c0_151 = arith.constant 0 : index
    %c0_152 = arith.constant 0 : index
    %376 = vector.load %arg22[%c0_150, %c0_151, %c0_152] : memref<2x1x256xf32, #tpu.memory_space<vmem>>, vector<1x1x256xf32>
    %377 = vector.shape_cast %376 : vector<1x1x256xf32> to vector<1x256xf32>
    %378 = vector.broadcast %377 : vector<1x256xf32> to vector<16x256xf32>
    %379 = arith.addf %375, %378 : vector<16x256xf32>
    %cst_153 = arith.constant 0.000000e+00 : f32
    %380 = vector.broadcast %cst_153 : f32 to vector<16x256xf32>
    %381 = arith.maximumf %379, %380 : vector<16x256xf32>
    %c0_154 = arith.constant 0 : index
    %c0_155 = arith.constant 0 : index
    %c0_156 = arith.constant 0 : index
    %382 = vector.load %arg23[%c0_154, %c0_155, %c0_156] : memref<2x256x128xf32, #tpu.memory_space<vmem>>, vector<1x256x128xf32>
    %383 = vector.shape_cast %382 : vector<1x256x128xf32> to vector<256x128xf32>
    %cst_157 = arith.constant dense<0.000000e+00> : vector<16x128xf32>
    %384 = tpu.matmul %381, %383, %cst_157 {dimension_numbers = #tpu.dot_dimension_numbers<[1], [0], [0], [1], [0, 0, 1, 1], [], []>} : vector<16x256xf32>, vector<256x128xf32>, vector<16x128xf32> -> vector<16x128xf32>
    %c0_158 = arith.constant 0 : index
    %c0_159 = arith.constant 0 : index
    %c0_160 = arith.constant 0 : index
    %385 = vector.load %arg24[%c0_158, %c0_159, %c0_160] : memref<2x1x128xf32, #tpu.memory_space<vmem>>, vector<1x1x128xf32>
    %386 = vector.shape_cast %385 : vector<1x1x128xf32> to vector<1x128xf32>
    %387 = vector.broadcast %386 : vector<1x128xf32> to vector<16x128xf32>
    %388 = arith.addf %384, %387 : vector<16x128xf32>
    %c0_161 = arith.constant 0 : index
    %c0_162 = arith.constant 0 : index
    %c0_163 = arith.constant 0 : index
    %389 = vector.load %arg19[%c0_161, %c0_162, %c0_163] : memref<2x1x128xf32, #tpu.memory_space<vmem>>, vector<1x1x128xf32>
    %390 = vector.shape_cast %389 : vector<1x1x128xf32> to vector<1x128xf32>
    %c0_164 = arith.constant 0 : index
    %c0_165 = arith.constant 0 : index
    %c0_166 = arith.constant 0 : index
    %391 = vector.load %arg20[%c0_164, %c0_165, %c0_166] : memref<2x1x128xf32, #tpu.memory_space<vmem>>, vector<1x1x128xf32>
    %392 = vector.shape_cast %391 : vector<1x1x128xf32> to vector<1x128xf32>
    %393 = arith.addf %372, %388 : vector<16x128xf32>
    %cst_167 = arith.constant dense<0.000000e+00> : vector<16xf32>
    %394 = vector.multi_reduction <add>, %393, %cst_167 [1] : vector<16x128xf32> to vector<16xf32>
    %395 = vector.shape_cast %394 : vector<16xf32> to vector<16x1xf32>
    %cst_168 = arith.constant 1.280000e+02 : f32
    %396 = vector.broadcast %cst_168 : f32 to vector<16x1xf32>
    %397 = arith.divf %395, %396 : vector<16x1xf32>
    %398 = vector.broadcast %397 : vector<16x1xf32> to vector<16x128xf32>
    %399 = arith.subf %393, %398 : vector<16x128xf32>
    %400 = arith.mulf %399, %399 : vector<16x128xf32>
    %cst_169 = arith.constant dense<0.000000e+00> : vector<16xf32>
    %401 = vector.multi_reduction <add>, %400, %cst_169 [1] : vector<16x128xf32> to vector<16xf32>
    %402 = vector.shape_cast %401 : vector<16xf32> to vector<16x1xf32>
    %cst_170 = arith.constant 1.280000e+02 : f32
    %403 = vector.broadcast %cst_170 : f32 to vector<16x1xf32>
    %404 = arith.divf %402, %403 : vector<16x1xf32>
    %cst_171 = arith.constant 9.99999974E-6 : f32
    %405 = vector.broadcast %cst_171 : f32 to vector<16x1xf32>
    %406 = arith.addf %404, %405 : vector<16x1xf32>
    %407 = math.rsqrt %406 : vector<16x1xf32>
    %408 = vector.broadcast %407 : vector<16x1xf32> to vector<16x128xf32>
    %409 = arith.mulf %399, %408 : vector<16x128xf32>
    %410 = vector.broadcast %390 : vector<1x128xf32> to vector<16x128xf32>
    %411 = arith.mulf %409, %410 : vector<16x128xf32>
    %412 = vector.broadcast %392 : vector<1x128xf32> to vector<16x128xf32>
    %413 = arith.addf %411, %412 : vector<16x128xf32>
    %c1 = arith.constant 1 : index
    %c0_172 = arith.constant 0 : index
    %c0_173 = arith.constant 0 : index
    %414 = vector.load %arg5[%c1, %c0_172, %c0_173] : memref<2x128x384xf32, #tpu.memory_space<vmem>>, vector<1x128x384xf32>
    %415 = vector.shape_cast %414 : vector<1x128x384xf32> to vector<128x384xf32>
    %cst_174 = arith.constant dense<0.000000e+00> : vector<16x384xf32>
    %416 = tpu.matmul %413, %415, %cst_174 {dimension_numbers = #tpu.dot_dimension_numbers<[1], [0], [0], [1], [0, 0, 1, 1], [], []>} : vector<16x128xf32>, vector<128x384xf32>, vector<16x384xf32> -> vector<16x384xf32>
    %c1_175 = arith.constant 1 : index
    %c0_176 = arith.constant 0 : index
    %c0_177 = arith.constant 0 : index
    %417 = vector.load %arg6[%c1_175, %c0_176, %c0_177] : memref<2x1x384xf32, #tpu.memory_space<vmem>>, vector<1x1x384xf32>
    %418 = vector.shape_cast %417 : vector<1x1x384xf32> to vector<1x384xf32>
    %419 = vector.broadcast %418 : vector<1x384xf32> to vector<16x384xf32>
    %420 = arith.addf %416, %419 : vector<16x384xf32>
    %421 = vector.extract_strided_slice %420 {offsets = [0, 0], sizes = [16, 128], strides = [1, 1]} : vector<16x384xf32> to vector<16x128xf32>
    %422 = vector.extract_strided_slice %420 {offsets = [0, 128], sizes = [16, 128], strides = [1, 1]} : vector<16x384xf32> to vector<16x128xf32>
    %423 = vector.extract_strided_slice %420 {offsets = [0, 256], sizes = [16, 128], strides = [1, 1]} : vector<16x384xf32> to vector<16x128xf32>
    %424 = vector.extract_strided_slice %421 {offsets = [0, 0], sizes = [8, 128], strides = [1, 1]} : vector<16x128xf32> to vector<8x128xf32>
    %425 = vector.extract_strided_slice %422 {offsets = [0, 0], sizes = [8, 128], strides = [1, 1]} : vector<16x128xf32> to vector<8x128xf32>
    %426 = vector.extract_strided_slice %423 {offsets = [0, 0], sizes = [8, 128], strides = [1, 1]} : vector<16x128xf32> to vector<8x128xf32>
    %427 = vector.extract_strided_slice %424 {offsets = [0, 0], sizes = [8, 32], strides = [1, 1]} : vector<8x128xf32> to vector<8x32xf32>
    %428 = vector.extract_strided_slice %425 {offsets = [0, 0], sizes = [8, 32], strides = [1, 1]} : vector<8x128xf32> to vector<8x32xf32>
    %429 = vector.extract_strided_slice %426 {offsets = [0, 0], sizes = [8, 32], strides = [1, 1]} : vector<8x128xf32> to vector<8x32xf32>
    %cst_178 = arith.constant dense<0.000000e+00> : vector<8x8xf32>
    %430 = tpu.matmul %427, %428, %cst_178 {dimension_numbers = #tpu.dot_dimension_numbers<[1], [1], [0], [0], [0, 0, 1, 0], [], []>} : vector<8x32xf32>, vector<8x32xf32>, vector<8x8xf32> -> vector<8x8xf32>
    %cst_179 = arith.constant 0.176776692 : f32
    %431 = vector.broadcast %cst_179 : f32 to vector<8x8xf32>
    %432 = arith.mulf %430, %431 : vector<8x8xf32>
    %cst_180 = arith.constant dense<0xFF800000> : vector<8xf32>
    %433 = vector.multi_reduction <maximumf>, %432, %cst_180 [1] : vector<8x8xf32> to vector<8xf32>
    %434 = vector.shape_cast %433 : vector<8xf32> to vector<8x1xf32>
    %435 = vector.broadcast %434 : vector<8x1xf32> to vector<8x8xf32>
    %436 = arith.subf %432, %435 : vector<8x8xf32>
    %437 = math.exp %436 : vector<8x8xf32>
    %cst_181 = arith.constant dense<0.000000e+00> : vector<8xf32>
    %438 = vector.multi_reduction <add>, %437, %cst_181 [1] : vector<8x8xf32> to vector<8xf32>
    %439 = vector.shape_cast %438 : vector<8xf32> to vector<8x1xf32>
    %440 = vector.broadcast %439 : vector<8x1xf32> to vector<8x8xf32>
    %441 = arith.divf %437, %440 : vector<8x8xf32>
    %cst_182 = arith.constant dense<0.000000e+00> : vector<8x32xf32>
    %442 = tpu.matmul %441, %429, %cst_182 {dimension_numbers = #tpu.dot_dimension_numbers<[1], [0], [0], [1], [0, 0, 1, 1], [], []>} : vector<8x8xf32>, vector<8x32xf32>, vector<8x32xf32> -> vector<8x32xf32>
    %443 = vector.extract_strided_slice %424 {offsets = [0, 32], sizes = [8, 32], strides = [1, 1]} : vector<8x128xf32> to vector<8x32xf32>
    %444 = vector.extract_strided_slice %425 {offsets = [0, 32], sizes = [8, 32], strides = [1, 1]} : vector<8x128xf32> to vector<8x32xf32>
    %445 = vector.extract_strided_slice %426 {offsets = [0, 32], sizes = [8, 32], strides = [1, 1]} : vector<8x128xf32> to vector<8x32xf32>
    %cst_183 = arith.constant dense<0.000000e+00> : vector<8x8xf32>
    %446 = tpu.matmul %443, %444, %cst_183 {dimension_numbers = #tpu.dot_dimension_numbers<[1], [1], [0], [0], [0, 0, 1, 0], [], []>} : vector<8x32xf32>, vector<8x32xf32>, vector<8x8xf32> -> vector<8x8xf32>
    %cst_184 = arith.constant 0.176776692 : f32
    %447 = vector.broadcast %cst_184 : f32 to vector<8x8xf32>
    %448 = arith.mulf %446, %447 : vector<8x8xf32>
    %cst_185 = arith.constant dense<0xFF800000> : vector<8xf32>
    %449 = vector.multi_reduction <maximumf>, %448, %cst_185 [1] : vector<8x8xf32> to vector<8xf32>
    %450 = vector.shape_cast %449 : vector<8xf32> to vector<8x1xf32>
    %451 = vector.broadcast %450 : vector<8x1xf32> to vector<8x8xf32>
    %452 = arith.subf %448, %451 : vector<8x8xf32>
    %453 = math.exp %452 : vector<8x8xf32>
    %cst_186 = arith.constant dense<0.000000e+00> : vector<8xf32>
    %454 = vector.multi_reduction <add>, %453, %cst_186 [1] : vector<8x8xf32> to vector<8xf32>
    %455 = vector.shape_cast %454 : vector<8xf32> to vector<8x1xf32>
    %456 = vector.broadcast %455 : vector<8x1xf32> to vector<8x8xf32>
    %457 = arith.divf %453, %456 : vector<8x8xf32>
    %cst_187 = arith.constant dense<0.000000e+00> : vector<8x32xf32>
    %458 = tpu.matmul %457, %445, %cst_187 {dimension_numbers = #tpu.dot_dimension_numbers<[1], [0], [0], [1], [0, 0, 1, 1], [], []>} : vector<8x8xf32>, vector<8x32xf32>, vector<8x32xf32> -> vector<8x32xf32>
    %459 = vector.extract_strided_slice %424 {offsets = [0, 64], sizes = [8, 32], strides = [1, 1]} : vector<8x128xf32> to vector<8x32xf32>
    %460 = vector.extract_strided_slice %425 {offsets = [0, 64], sizes = [8, 32], strides = [1, 1]} : vector<8x128xf32> to vector<8x32xf32>
    %461 = vector.extract_strided_slice %426 {offsets = [0, 64], sizes = [8, 32], strides = [1, 1]} : vector<8x128xf32> to vector<8x32xf32>
    %cst_188 = arith.constant dense<0.000000e+00> : vector<8x8xf32>
    %462 = tpu.matmul %459, %460, %cst_188 {dimension_numbers = #tpu.dot_dimension_numbers<[1], [1], [0], [0], [0, 0, 1, 0], [], []>} : vector<8x32xf32>, vector<8x32xf32>, vector<8x8xf32> -> vector<8x8xf32>
    %cst_189 = arith.constant 0.176776692 : f32
    %463 = vector.broadcast %cst_189 : f32 to vector<8x8xf32>
    %464 = arith.mulf %462, %463 : vector<8x8xf32>
    %cst_190 = arith.constant dense<0xFF800000> : vector<8xf32>
    %465 = vector.multi_reduction <maximumf>, %464, %cst_190 [1] : vector<8x8xf32> to vector<8xf32>
    %466 = vector.shape_cast %465 : vector<8xf32> to vector<8x1xf32>
    %467 = vector.broadcast %466 : vector<8x1xf32> to vector<8x8xf32>
    %468 = arith.subf %464, %467 : vector<8x8xf32>
    %469 = math.exp %468 : vector<8x8xf32>
    %cst_191 = arith.constant dense<0.000000e+00> : vector<8xf32>
    %470 = vector.multi_reduction <add>, %469, %cst_191 [1] : vector<8x8xf32> to vector<8xf32>
    %471 = vector.shape_cast %470 : vector<8xf32> to vector<8x1xf32>
    %472 = vector.broadcast %471 : vector<8x1xf32> to vector<8x8xf32>
    %473 = arith.divf %469, %472 : vector<8x8xf32>
    %cst_192 = arith.constant dense<0.000000e+00> : vector<8x32xf32>
    %474 = tpu.matmul %473, %461, %cst_192 {dimension_numbers = #tpu.dot_dimension_numbers<[1], [0], [0], [1], [0, 0, 1, 1], [], []>} : vector<8x8xf32>, vector<8x32xf32>, vector<8x32xf32> -> vector<8x32xf32>
    %475 = vector.extract_strided_slice %424 {offsets = [0, 96], sizes = [8, 32], strides = [1, 1]} : vector<8x128xf32> to vector<8x32xf32>
    %476 = vector.extract_strided_slice %425 {offsets = [0, 96], sizes = [8, 32], strides = [1, 1]} : vector<8x128xf32> to vector<8x32xf32>
    %477 = vector.extract_strided_slice %426 {offsets = [0, 96], sizes = [8, 32], strides = [1, 1]} : vector<8x128xf32> to vector<8x32xf32>
    %cst_193 = arith.constant dense<0.000000e+00> : vector<8x8xf32>
    %478 = tpu.matmul %475, %476, %cst_193 {dimension_numbers = #tpu.dot_dimension_numbers<[1], [1], [0], [0], [0, 0, 1, 0], [], []>} : vector<8x32xf32>, vector<8x32xf32>, vector<8x8xf32> -> vector<8x8xf32>
    %cst_194 = arith.constant 0.176776692 : f32
    %479 = vector.broadcast %cst_194 : f32 to vector<8x8xf32>
    %480 = arith.mulf %478, %479 : vector<8x8xf32>
    %cst_195 = arith.constant dense<0xFF800000> : vector<8xf32>
    %481 = vector.multi_reduction <maximumf>, %480, %cst_195 [1] : vector<8x8xf32> to vector<8xf32>
    %482 = vector.shape_cast %481 : vector<8xf32> to vector<8x1xf32>
    %483 = vector.broadcast %482 : vector<8x1xf32> to vector<8x8xf32>
    %484 = arith.subf %480, %483 : vector<8x8xf32>
    %485 = math.exp %484 : vector<8x8xf32>
    %cst_196 = arith.constant dense<0.000000e+00> : vector<8xf32>
    %486 = vector.multi_reduction <add>, %485, %cst_196 [1] : vector<8x8xf32> to vector<8xf32>
    %487 = vector.shape_cast %486 : vector<8xf32> to vector<8x1xf32>
    %488 = vector.broadcast %487 : vector<8x1xf32> to vector<8x8xf32>
    %489 = arith.divf %485, %488 : vector<8x8xf32>
    %cst_197 = arith.constant dense<0.000000e+00> : vector<8x32xf32>
    %490 = tpu.matmul %489, %477, %cst_197 {dimension_numbers = #tpu.dot_dimension_numbers<[1], [0], [0], [1], [0, 0, 1, 1], [], []>} : vector<8x8xf32>, vector<8x32xf32>, vector<8x32xf32> -> vector<8x32xf32>
    %491 = tpu.concatenate %442, %458, %474, %490 in 1 : vector<8x32xf32>, vector<8x32xf32>, vector<8x32xf32>, vector<8x32xf32> -> vector<8x128xf32>
    %492 = vector.extract_strided_slice %421 {offsets = [8, 0], sizes = [8, 128], strides = [1, 1]} : vector<16x128xf32> to vector<8x128xf32>
    %493 = vector.extract_strided_slice %422 {offsets = [8, 0], sizes = [8, 128], strides = [1, 1]} : vector<16x128xf32> to vector<8x128xf32>
    %494 = vector.extract_strided_slice %423 {offsets = [8, 0], sizes = [8, 128], strides = [1, 1]} : vector<16x128xf32> to vector<8x128xf32>
    %495 = vector.extract_strided_slice %492 {offsets = [0, 0], sizes = [8, 32], strides = [1, 1]} : vector<8x128xf32> to vector<8x32xf32>
    %496 = vector.extract_strided_slice %493 {offsets = [0, 0], sizes = [8, 32], strides = [1, 1]} : vector<8x128xf32> to vector<8x32xf32>
    %497 = vector.extract_strided_slice %494 {offsets = [0, 0], sizes = [8, 32], strides = [1, 1]} : vector<8x128xf32> to vector<8x32xf32>
    %cst_198 = arith.constant dense<0.000000e+00> : vector<8x8xf32>
    %498 = tpu.matmul %495, %496, %cst_198 {dimension_numbers = #tpu.dot_dimension_numbers<[1], [1], [0], [0], [0, 0, 1, 0], [], []>} : vector<8x32xf32>, vector<8x32xf32>, vector<8x8xf32> -> vector<8x8xf32>
    %cst_199 = arith.constant 0.176776692 : f32
    %499 = vector.broadcast %cst_199 : f32 to vector<8x8xf32>
    %500 = arith.mulf %498, %499 : vector<8x8xf32>
    %cst_200 = arith.constant dense<0xFF800000> : vector<8xf32>
    %501 = vector.multi_reduction <maximumf>, %500, %cst_200 [1] : vector<8x8xf32> to vector<8xf32>
    %502 = vector.shape_cast %501 : vector<8xf32> to vector<8x1xf32>
    %503 = vector.broadcast %502 : vector<8x1xf32> to vector<8x8xf32>
    %504 = arith.subf %500, %503 : vector<8x8xf32>
    %505 = math.exp %504 : vector<8x8xf32>
    %cst_201 = arith.constant dense<0.000000e+00> : vector<8xf32>
    %506 = vector.multi_reduction <add>, %505, %cst_201 [1] : vector<8x8xf32> to vector<8xf32>
    %507 = vector.shape_cast %506 : vector<8xf32> to vector<8x1xf32>
    %508 = vector.broadcast %507 : vector<8x1xf32> to vector<8x8xf32>
    %509 = arith.divf %505, %508 : vector<8x8xf32>
    %cst_202 = arith.constant dense<0.000000e+00> : vector<8x32xf32>
    %510 = tpu.matmul %509, %497, %cst_202 {dimension_numbers = #tpu.dot_dimension_numbers<[1], [0], [0], [1], [0, 0, 1, 1], [], []>} : vector<8x8xf32>, vector<8x32xf32>, vector<8x32xf32> -> vector<8x32xf32>
    %511 = vector.extract_strided_slice %492 {offsets = [0, 32], sizes = [8, 32], strides = [1, 1]} : vector<8x128xf32> to vector<8x32xf32>
    %512 = vector.extract_strided_slice %493 {offsets = [0, 32], sizes = [8, 32], strides = [1, 1]} : vector<8x128xf32> to vector<8x32xf32>
    %513 = vector.extract_strided_slice %494 {offsets = [0, 32], sizes = [8, 32], strides = [1, 1]} : vector<8x128xf32> to vector<8x32xf32>
    %cst_203 = arith.constant dense<0.000000e+00> : vector<8x8xf32>
    %514 = tpu.matmul %511, %512, %cst_203 {dimension_numbers = #tpu.dot_dimension_numbers<[1], [1], [0], [0], [0, 0, 1, 0], [], []>} : vector<8x32xf32>, vector<8x32xf32>, vector<8x8xf32> -> vector<8x8xf32>
    %cst_204 = arith.constant 0.176776692 : f32
    %515 = vector.broadcast %cst_204 : f32 to vector<8x8xf32>
    %516 = arith.mulf %514, %515 : vector<8x8xf32>
    %cst_205 = arith.constant dense<0xFF800000> : vector<8xf32>
    %517 = vector.multi_reduction <maximumf>, %516, %cst_205 [1] : vector<8x8xf32> to vector<8xf32>
    %518 = vector.shape_cast %517 : vector<8xf32> to vector<8x1xf32>
    %519 = vector.broadcast %518 : vector<8x1xf32> to vector<8x8xf32>
    %520 = arith.subf %516, %519 : vector<8x8xf32>
    %521 = math.exp %520 : vector<8x8xf32>
    %cst_206 = arith.constant dense<0.000000e+00> : vector<8xf32>
    %522 = vector.multi_reduction <add>, %521, %cst_206 [1] : vector<8x8xf32> to vector<8xf32>
    %523 = vector.shape_cast %522 : vector<8xf32> to vector<8x1xf32>
    %524 = vector.broadcast %523 : vector<8x1xf32> to vector<8x8xf32>
    %525 = arith.divf %521, %524 : vector<8x8xf32>
    %cst_207 = arith.constant dense<0.000000e+00> : vector<8x32xf32>
    %526 = tpu.matmul %525, %513, %cst_207 {dimension_numbers = #tpu.dot_dimension_numbers<[1], [0], [0], [1], [0, 0, 1, 1], [], []>} : vector<8x8xf32>, vector<8x32xf32>, vector<8x32xf32> -> vector<8x32xf32>
    %527 = vector.extract_strided_slice %492 {offsets = [0, 64], sizes = [8, 32], strides = [1, 1]} : vector<8x128xf32> to vector<8x32xf32>
    %528 = vector.extract_strided_slice %493 {offsets = [0, 64], sizes = [8, 32], strides = [1, 1]} : vector<8x128xf32> to vector<8x32xf32>
    %529 = vector.extract_strided_slice %494 {offsets = [0, 64], sizes = [8, 32], strides = [1, 1]} : vector<8x128xf32> to vector<8x32xf32>
    %cst_208 = arith.constant dense<0.000000e+00> : vector<8x8xf32>
    %530 = tpu.matmul %527, %528, %cst_208 {dimension_numbers = #tpu.dot_dimension_numbers<[1], [1], [0], [0], [0, 0, 1, 0], [], []>} : vector<8x32xf32>, vector<8x32xf32>, vector<8x8xf32> -> vector<8x8xf32>
    %cst_209 = arith.constant 0.176776692 : f32
    %531 = vector.broadcast %cst_209 : f32 to vector<8x8xf32>
    %532 = arith.mulf %530, %531 : vector<8x8xf32>
    %cst_210 = arith.constant dense<0xFF800000> : vector<8xf32>
    %533 = vector.multi_reduction <maximumf>, %532, %cst_210 [1] : vector<8x8xf32> to vector<8xf32>
    %534 = vector.shape_cast %533 : vector<8xf32> to vector<8x1xf32>
    %535 = vector.broadcast %534 : vector<8x1xf32> to vector<8x8xf32>
    %536 = arith.subf %532, %535 : vector<8x8xf32>
    %537 = math.exp %536 : vector<8x8xf32>
    %cst_211 = arith.constant dense<0.000000e+00> : vector<8xf32>
    %538 = vector.multi_reduction <add>, %537, %cst_211 [1] : vector<8x8xf32> to vector<8xf32>
    %539 = vector.shape_cast %538 : vector<8xf32> to vector<8x1xf32>
    %540 = vector.broadcast %539 : vector<8x1xf32> to vector<8x8xf32>
    %541 = arith.divf %537, %540 : vector<8x8xf32>
    %cst_212 = arith.constant dense<0.000000e+00> : vector<8x32xf32>
    %542 = tpu.matmul %541, %529, %cst_212 {dimension_numbers = #tpu.dot_dimension_numbers<[1], [0], [0], [1], [0, 0, 1, 1], [], []>} : vector<8x8xf32>, vector<8x32xf32>, vector<8x32xf32> -> vector<8x32xf32>
    %543 = vector.extract_strided_slice %492 {offsets = [0, 96], sizes = [8, 32], strides = [1, 1]} : vector<8x128xf32> to vector<8x32xf32>
    %544 = vector.extract_strided_slice %493 {offsets = [0, 96], sizes = [8, 32], strides = [1, 1]} : vector<8x128xf32> to vector<8x32xf32>
    %545 = vector.extract_strided_slice %494 {offsets = [0, 96], sizes = [8, 32], strides = [1, 1]} : vector<8x128xf32> to vector<8x32xf32>
    %cst_213 = arith.constant dense<0.000000e+00> : vector<8x8xf32>
    %546 = tpu.matmul %543, %544, %cst_213 {dimension_numbers = #tpu.dot_dimension_numbers<[1], [1], [0], [0], [0, 0, 1, 0], [], []>} : vector<8x32xf32>, vector<8x32xf32>, vector<8x8xf32> -> vector<8x8xf32>
    %cst_214 = arith.constant 0.176776692 : f32
    %547 = vector.broadcast %cst_214 : f32 to vector<8x8xf32>
    %548 = arith.mulf %546, %547 : vector<8x8xf32>
    %cst_215 = arith.constant dense<0xFF800000> : vector<8xf32>
    %549 = vector.multi_reduction <maximumf>, %548, %cst_215 [1] : vector<8x8xf32> to vector<8xf32>
    %550 = vector.shape_cast %549 : vector<8xf32> to vector<8x1xf32>
    %551 = vector.broadcast %550 : vector<8x1xf32> to vector<8x8xf32>
    %552 = arith.subf %548, %551 : vector<8x8xf32>
    %553 = math.exp %552 : vector<8x8xf32>
    %cst_216 = arith.constant dense<0.000000e+00> : vector<8xf32>
    %554 = vector.multi_reduction <add>, %553, %cst_216 [1] : vector<8x8xf32> to vector<8xf32>
    %555 = vector.shape_cast %554 : vector<8xf32> to vector<8x1xf32>
    %556 = vector.broadcast %555 : vector<8x1xf32> to vector<8x8xf32>
    %557 = arith.divf %553, %556 : vector<8x8xf32>
    %cst_217 = arith.constant dense<0.000000e+00> : vector<8x32xf32>
    %558 = tpu.matmul %557, %545, %cst_217 {dimension_numbers = #tpu.dot_dimension_numbers<[1], [0], [0], [1], [0, 0, 1, 1], [], []>} : vector<8x8xf32>, vector<8x32xf32>, vector<8x32xf32> -> vector<8x32xf32>
    %559 = tpu.concatenate %510, %526, %542, %558 in 1 : vector<8x32xf32>, vector<8x32xf32>, vector<8x32xf32>, vector<8x32xf32> -> vector<8x128xf32>
    %560 = tpu.concatenate %491, %559 in 0 : vector<8x128xf32>, vector<8x128xf32> -> vector<16x128xf32>
    %c1_218 = arith.constant 1 : index
    %c0_219 = arith.constant 0 : index
    %c0_220 = arith.constant 0 : index
    %561 = vector.load %arg7[%c1_218, %c0_219, %c0_220] : memref<2x128x128xf32, #tpu.memory_space<vmem>>, vector<1x128x128xf32>
    %562 = vector.shape_cast %561 : vector<1x128x128xf32> to vector<128x128xf32>
    %cst_221 = arith.constant dense<0.000000e+00> : vector<16x128xf32>
    %563 = tpu.matmul %560, %562, %cst_221 {dimension_numbers = #tpu.dot_dimension_numbers<[1], [0], [0], [1], [0, 0, 1, 1], [], []>} : vector<16x128xf32>, vector<128x128xf32>, vector<16x128xf32> -> vector<16x128xf32>
    %c1_222 = arith.constant 1 : index
    %c0_223 = arith.constant 0 : index
    %c0_224 = arith.constant 0 : index
    %564 = vector.load %arg8[%c1_222, %c0_223, %c0_224] : memref<2x1x128xf32, #tpu.memory_space<vmem>>, vector<1x1x128xf32>
    %565 = vector.shape_cast %564 : vector<1x1x128xf32> to vector<1x128xf32>
    %566 = vector.broadcast %565 : vector<1x128xf32> to vector<16x128xf32>
    %567 = arith.addf %563, %566 : vector<16x128xf32>
    %c1_225 = arith.constant 1 : index
    %c0_226 = arith.constant 0 : index
    %c0_227 = arith.constant 0 : index
    %568 = vector.load %arg15[%c1_225, %c0_226, %c0_227] : memref<2x1x128xf32, #tpu.memory_space<vmem>>, vector<1x1x128xf32>
    %569 = vector.shape_cast %568 : vector<1x1x128xf32> to vector<1x128xf32>
    %c1_228 = arith.constant 1 : index
    %c0_229 = arith.constant 0 : index
    %c0_230 = arith.constant 0 : index
    %570 = vector.load %arg16[%c1_228, %c0_229, %c0_230] : memref<2x1x128xf32, #tpu.memory_space<vmem>>, vector<1x1x128xf32>
    %571 = vector.shape_cast %570 : vector<1x1x128xf32> to vector<1x128xf32>
    %572 = arith.addf %413, %567 : vector<16x128xf32>
    %cst_231 = arith.constant dense<0.000000e+00> : vector<16xf32>
    %573 = vector.multi_reduction <add>, %572, %cst_231 [1] : vector<16x128xf32> to vector<16xf32>
    %574 = vector.shape_cast %573 : vector<16xf32> to vector<16x1xf32>
    %cst_232 = arith.constant 1.280000e+02 : f32
    %575 = vector.broadcast %cst_232 : f32 to vector<16x1xf32>
    %576 = arith.divf %574, %575 : vector<16x1xf32>
    %577 = vector.broadcast %576 : vector<16x1xf32> to vector<16x128xf32>
    %578 = arith.subf %572, %577 : vector<16x128xf32>
    %579 = arith.mulf %578, %578 : vector<16x128xf32>
    %cst_233 = arith.constant dense<0.000000e+00> : vector<16xf32>
    %580 = vector.multi_reduction <add>, %579, %cst_233 [1] : vector<16x128xf32> to vector<16xf32>
    %581 = vector.shape_cast %580 : vector<16xf32> to vector<16x1xf32>
    %cst_234 = arith.constant 1.280000e+02 : f32
    %582 = vector.broadcast %cst_234 : f32 to vector<16x1xf32>
    %583 = arith.divf %581, %582 : vector<16x1xf32>
    %cst_235 = arith.constant 9.99999974E-6 : f32
    %584 = vector.broadcast %cst_235 : f32 to vector<16x1xf32>
    %585 = arith.addf %583, %584 : vector<16x1xf32>
    %586 = math.rsqrt %585 : vector<16x1xf32>
    %587 = vector.broadcast %586 : vector<16x1xf32> to vector<16x128xf32>
    %588 = arith.mulf %578, %587 : vector<16x128xf32>
    %589 = vector.broadcast %569 : vector<1x128xf32> to vector<16x128xf32>
    %590 = arith.mulf %588, %589 : vector<16x128xf32>
    %591 = vector.broadcast %571 : vector<1x128xf32> to vector<16x128xf32>
    %592 = arith.addf %590, %591 : vector<16x128xf32>
    %c1_236 = arith.constant 1 : index
    %c0_237 = arith.constant 0 : index
    %c0_238 = arith.constant 0 : index
    %593 = vector.load %arg9[%c1_236, %c0_237, %c0_238] : memref<2x128x128xf32, #tpu.memory_space<vmem>>, vector<1x128x128xf32>
    %594 = vector.shape_cast %593 : vector<1x128x128xf32> to vector<128x128xf32>
    %cst_239 = arith.constant dense<0.000000e+00> : vector<16x128xf32>
    %595 = tpu.matmul %592, %594, %cst_239 {dimension_numbers = #tpu.dot_dimension_numbers<[1], [0], [0], [1], [0, 0, 1, 1], [], []>} : vector<16x128xf32>, vector<128x128xf32>, vector<16x128xf32> -> vector<16x128xf32>
    %c1_240 = arith.constant 1 : index
    %c0_241 = arith.constant 0 : index
    %c0_242 = arith.constant 0 : index
    %596 = vector.load %arg10[%c1_240, %c0_241, %c0_242] : memref<2x1x128xf32, #tpu.memory_space<vmem>>, vector<1x1x128xf32>
    %597 = vector.shape_cast %596 : vector<1x1x128xf32> to vector<1x128xf32>
    %598 = vector.broadcast %597 : vector<1x128xf32> to vector<16x128xf32>
    %599 = arith.addf %595, %598 : vector<16x128xf32>
    %c1_243 = arith.constant 1 : index
    %c0_244 = arith.constant 0 : index
    %c0_245 = arith.constant 0 : index
    %600 = vector.load %arg11[%c1_243, %c0_244, %c0_245] : memref<2x128x256xf32, #tpu.memory_space<vmem>>, vector<1x128x256xf32>
    %601 = vector.shape_cast %600 : vector<1x128x256xf32> to vector<128x256xf32>
    %cst_246 = arith.constant dense<0.000000e+00> : vector<16x256xf32>
    %602 = tpu.matmul %3, %601, %cst_246 {dimension_numbers = #tpu.dot_dimension_numbers<[1], [0], [0], [1], [0, 0, 1, 1], [], []>} : vector<16x128xf32>, vector<128x256xf32>, vector<16x256xf32> -> vector<16x256xf32>
    %c1_247 = arith.constant 1 : index
    %c0_248 = arith.constant 0 : index
    %c0_249 = arith.constant 0 : index
    %603 = vector.load %arg12[%c1_247, %c0_248, %c0_249] : memref<2x1x256xf32, #tpu.memory_space<vmem>>, vector<1x1x256xf32>
    %604 = vector.shape_cast %603 : vector<1x1x256xf32> to vector<1x256xf32>
    %605 = vector.broadcast %604 : vector<1x256xf32> to vector<16x256xf32>
    %606 = arith.addf %602, %605 : vector<16x256xf32>
    %607 = vector.extract_strided_slice %606 {offsets = [0, 0], sizes = [16, 128], strides = [1, 1]} : vector<16x256xf32> to vector<16x128xf32>
    %608 = vector.extract_strided_slice %606 {offsets = [0, 128], sizes = [16, 128], strides = [1, 1]} : vector<16x256xf32> to vector<16x128xf32>
    %609 = vector.extract_strided_slice %599 {offsets = [0, 0], sizes = [8, 128], strides = [1, 1]} : vector<16x128xf32> to vector<8x128xf32>
    %610 = vector.extract_strided_slice %607 {offsets = [0, 0], sizes = [8, 128], strides = [1, 1]} : vector<16x128xf32> to vector<8x128xf32>
    %611 = vector.extract_strided_slice %608 {offsets = [0, 0], sizes = [8, 128], strides = [1, 1]} : vector<16x128xf32> to vector<8x128xf32>
    %612 = vector.extract_strided_slice %609 {offsets = [0, 0], sizes = [8, 32], strides = [1, 1]} : vector<8x128xf32> to vector<8x32xf32>
    %613 = vector.extract_strided_slice %610 {offsets = [0, 0], sizes = [8, 32], strides = [1, 1]} : vector<8x128xf32> to vector<8x32xf32>
    %614 = vector.extract_strided_slice %611 {offsets = [0, 0], sizes = [8, 32], strides = [1, 1]} : vector<8x128xf32> to vector<8x32xf32>
    %cst_250 = arith.constant dense<0.000000e+00> : vector<8x8xf32>
    %615 = tpu.matmul %612, %613, %cst_250 {dimension_numbers = #tpu.dot_dimension_numbers<[1], [1], [0], [0], [0, 0, 1, 0], [], []>} : vector<8x32xf32>, vector<8x32xf32>, vector<8x8xf32> -> vector<8x8xf32>
    %cst_251 = arith.constant 0.176776692 : f32
    %616 = vector.broadcast %cst_251 : f32 to vector<8x8xf32>
    %617 = arith.mulf %615, %616 : vector<8x8xf32>
    %cst_252 = arith.constant dense<0xFF800000> : vector<8xf32>
    %618 = vector.multi_reduction <maximumf>, %617, %cst_252 [1] : vector<8x8xf32> to vector<8xf32>
    %619 = vector.shape_cast %618 : vector<8xf32> to vector<8x1xf32>
    %620 = vector.broadcast %619 : vector<8x1xf32> to vector<8x8xf32>
    %621 = arith.subf %617, %620 : vector<8x8xf32>
    %622 = math.exp %621 : vector<8x8xf32>
    %cst_253 = arith.constant dense<0.000000e+00> : vector<8xf32>
    %623 = vector.multi_reduction <add>, %622, %cst_253 [1] : vector<8x8xf32> to vector<8xf32>
    %624 = vector.shape_cast %623 : vector<8xf32> to vector<8x1xf32>
    %625 = vector.broadcast %624 : vector<8x1xf32> to vector<8x8xf32>
    %626 = arith.divf %622, %625 : vector<8x8xf32>
    %cst_254 = arith.constant dense<0.000000e+00> : vector<8x32xf32>
    %627 = tpu.matmul %626, %614, %cst_254 {dimension_numbers = #tpu.dot_dimension_numbers<[1], [0], [0], [1], [0, 0, 1, 1], [], []>} : vector<8x8xf32>, vector<8x32xf32>, vector<8x32xf32> -> vector<8x32xf32>
    %628 = vector.extract_strided_slice %609 {offsets = [0, 32], sizes = [8, 32], strides = [1, 1]} : vector<8x128xf32> to vector<8x32xf32>
    %629 = vector.extract_strided_slice %610 {offsets = [0, 32], sizes = [8, 32], strides = [1, 1]} : vector<8x128xf32> to vector<8x32xf32>
    %630 = vector.extract_strided_slice %611 {offsets = [0, 32], sizes = [8, 32], strides = [1, 1]} : vector<8x128xf32> to vector<8x32xf32>
    %cst_255 = arith.constant dense<0.000000e+00> : vector<8x8xf32>
    %631 = tpu.matmul %628, %629, %cst_255 {dimension_numbers = #tpu.dot_dimension_numbers<[1], [1], [0], [0], [0, 0, 1, 0], [], []>} : vector<8x32xf32>, vector<8x32xf32>, vector<8x8xf32> -> vector<8x8xf32>
    %cst_256 = arith.constant 0.176776692 : f32
    %632 = vector.broadcast %cst_256 : f32 to vector<8x8xf32>
    %633 = arith.mulf %631, %632 : vector<8x8xf32>
    %cst_257 = arith.constant dense<0xFF800000> : vector<8xf32>
    %634 = vector.multi_reduction <maximumf>, %633, %cst_257 [1] : vector<8x8xf32> to vector<8xf32>
    %635 = vector.shape_cast %634 : vector<8xf32> to vector<8x1xf32>
    %636 = vector.broadcast %635 : vector<8x1xf32> to vector<8x8xf32>
    %637 = arith.subf %633, %636 : vector<8x8xf32>
    %638 = math.exp %637 : vector<8x8xf32>
    %cst_258 = arith.constant dense<0.000000e+00> : vector<8xf32>
    %639 = vector.multi_reduction <add>, %638, %cst_258 [1] : vector<8x8xf32> to vector<8xf32>
    %640 = vector.shape_cast %639 : vector<8xf32> to vector<8x1xf32>
    %641 = vector.broadcast %640 : vector<8x1xf32> to vector<8x8xf32>
    %642 = arith.divf %638, %641 : vector<8x8xf32>
    %cst_259 = arith.constant dense<0.000000e+00> : vector<8x32xf32>
    %643 = tpu.matmul %642, %630, %cst_259 {dimension_numbers = #tpu.dot_dimension_numbers<[1], [0], [0], [1], [0, 0, 1, 1], [], []>} : vector<8x8xf32>, vector<8x32xf32>, vector<8x32xf32> -> vector<8x32xf32>
    %644 = vector.extract_strided_slice %609 {offsets = [0, 64], sizes = [8, 32], strides = [1, 1]} : vector<8x128xf32> to vector<8x32xf32>
    %645 = vector.extract_strided_slice %610 {offsets = [0, 64], sizes = [8, 32], strides = [1, 1]} : vector<8x128xf32> to vector<8x32xf32>
    %646 = vector.extract_strided_slice %611 {offsets = [0, 64], sizes = [8, 32], strides = [1, 1]} : vector<8x128xf32> to vector<8x32xf32>
    %cst_260 = arith.constant dense<0.000000e+00> : vector<8x8xf32>
    %647 = tpu.matmul %644, %645, %cst_260 {dimension_numbers = #tpu.dot_dimension_numbers<[1], [1], [0], [0], [0, 0, 1, 0], [], []>} : vector<8x32xf32>, vector<8x32xf32>, vector<8x8xf32> -> vector<8x8xf32>
    %cst_261 = arith.constant 0.176776692 : f32
    %648 = vector.broadcast %cst_261 : f32 to vector<8x8xf32>
    %649 = arith.mulf %647, %648 : vector<8x8xf32>
    %cst_262 = arith.constant dense<0xFF800000> : vector<8xf32>
    %650 = vector.multi_reduction <maximumf>, %649, %cst_262 [1] : vector<8x8xf32> to vector<8xf32>
    %651 = vector.shape_cast %650 : vector<8xf32> to vector<8x1xf32>
    %652 = vector.broadcast %651 : vector<8x1xf32> to vector<8x8xf32>
    %653 = arith.subf %649, %652 : vector<8x8xf32>
    %654 = math.exp %653 : vector<8x8xf32>
    %cst_263 = arith.constant dense<0.000000e+00> : vector<8xf32>
    %655 = vector.multi_reduction <add>, %654, %cst_263 [1] : vector<8x8xf32> to vector<8xf32>
    %656 = vector.shape_cast %655 : vector<8xf32> to vector<8x1xf32>
    %657 = vector.broadcast %656 : vector<8x1xf32> to vector<8x8xf32>
    %658 = arith.divf %654, %657 : vector<8x8xf32>
    %cst_264 = arith.constant dense<0.000000e+00> : vector<8x32xf32>
    %659 = tpu.matmul %658, %646, %cst_264 {dimension_numbers = #tpu.dot_dimension_numbers<[1], [0], [0], [1], [0, 0, 1, 1], [], []>} : vector<8x8xf32>, vector<8x32xf32>, vector<8x32xf32> -> vector<8x32xf32>
    %660 = vector.extract_strided_slice %609 {offsets = [0, 96], sizes = [8, 32], strides = [1, 1]} : vector<8x128xf32> to vector<8x32xf32>
    %661 = vector.extract_strided_slice %610 {offsets = [0, 96], sizes = [8, 32], strides = [1, 1]} : vector<8x128xf32> to vector<8x32xf32>
    %662 = vector.extract_strided_slice %611 {offsets = [0, 96], sizes = [8, 32], strides = [1, 1]} : vector<8x128xf32> to vector<8x32xf32>
    %cst_265 = arith.constant dense<0.000000e+00> : vector<8x8xf32>
    %663 = tpu.matmul %660, %661, %cst_265 {dimension_numbers = #tpu.dot_dimension_numbers<[1], [1], [0], [0], [0, 0, 1, 0], [], []>} : vector<8x32xf32>, vector<8x32xf32>, vector<8x8xf32> -> vector<8x8xf32>
    %cst_266 = arith.constant 0.176776692 : f32
    %664 = vector.broadcast %cst_266 : f32 to vector<8x8xf32>
    %665 = arith.mulf %663, %664 : vector<8x8xf32>
    %cst_267 = arith.constant dense<0xFF800000> : vector<8xf32>
    %666 = vector.multi_reduction <maximumf>, %665, %cst_267 [1] : vector<8x8xf32> to vector<8xf32>
    %667 = vector.shape_cast %666 : vector<8xf32> to vector<8x1xf32>
    %668 = vector.broadcast %667 : vector<8x1xf32> to vector<8x8xf32>
    %669 = arith.subf %665, %668 : vector<8x8xf32>
    %670 = math.exp %669 : vector<8x8xf32>
    %cst_268 = arith.constant dense<0.000000e+00> : vector<8xf32>
    %671 = vector.multi_reduction <add>, %670, %cst_268 [1] : vector<8x8xf32> to vector<8xf32>
    %672 = vector.shape_cast %671 : vector<8xf32> to vector<8x1xf32>
    %673 = vector.broadcast %672 : vector<8x1xf32> to vector<8x8xf32>
    %674 = arith.divf %670, %673 : vector<8x8xf32>
    %cst_269 = arith.constant dense<0.000000e+00> : vector<8x32xf32>
    %675 = tpu.matmul %674, %662, %cst_269 {dimension_numbers = #tpu.dot_dimension_numbers<[1], [0], [0], [1], [0, 0, 1, 1], [], []>} : vector<8x8xf32>, vector<8x32xf32>, vector<8x32xf32> -> vector<8x32xf32>
    %676 = tpu.concatenate %627, %643, %659, %675 in 1 : vector<8x32xf32>, vector<8x32xf32>, vector<8x32xf32>, vector<8x32xf32> -> vector<8x128xf32>
    %677 = vector.extract_strided_slice %599 {offsets = [8, 0], sizes = [8, 128], strides = [1, 1]} : vector<16x128xf32> to vector<8x128xf32>
    %678 = vector.extract_strided_slice %607 {offsets = [8, 0], sizes = [8, 128], strides = [1, 1]} : vector<16x128xf32> to vector<8x128xf32>
    %679 = vector.extract_strided_slice %608 {offsets = [8, 0], sizes = [8, 128], strides = [1, 1]} : vector<16x128xf32> to vector<8x128xf32>
    %680 = vector.extract_strided_slice %677 {offsets = [0, 0], sizes = [8, 32], strides = [1, 1]} : vector<8x128xf32> to vector<8x32xf32>
    %681 = vector.extract_strided_slice %678 {offsets = [0, 0], sizes = [8, 32], strides = [1, 1]} : vector<8x128xf32> to vector<8x32xf32>
    %682 = vector.extract_strided_slice %679 {offsets = [0, 0], sizes = [8, 32], strides = [1, 1]} : vector<8x128xf32> to vector<8x32xf32>
    %cst_270 = arith.constant dense<0.000000e+00> : vector<8x8xf32>
    %683 = tpu.matmul %680, %681, %cst_270 {dimension_numbers = #tpu.dot_dimension_numbers<[1], [1], [0], [0], [0, 0, 1, 0], [], []>} : vector<8x32xf32>, vector<8x32xf32>, vector<8x8xf32> -> vector<8x8xf32>
    %cst_271 = arith.constant 0.176776692 : f32
    %684 = vector.broadcast %cst_271 : f32 to vector<8x8xf32>
    %685 = arith.mulf %683, %684 : vector<8x8xf32>
    %cst_272 = arith.constant dense<0xFF800000> : vector<8xf32>
    %686 = vector.multi_reduction <maximumf>, %685, %cst_272 [1] : vector<8x8xf32> to vector<8xf32>
    %687 = vector.shape_cast %686 : vector<8xf32> to vector<8x1xf32>
    %688 = vector.broadcast %687 : vector<8x1xf32> to vector<8x8xf32>
    %689 = arith.subf %685, %688 : vector<8x8xf32>
    %690 = math.exp %689 : vector<8x8xf32>
    %cst_273 = arith.constant dense<0.000000e+00> : vector<8xf32>
    %691 = vector.multi_reduction <add>, %690, %cst_273 [1] : vector<8x8xf32> to vector<8xf32>
    %692 = vector.shape_cast %691 : vector<8xf32> to vector<8x1xf32>
    %693 = vector.broadcast %692 : vector<8x1xf32> to vector<8x8xf32>
    %694 = arith.divf %690, %693 : vector<8x8xf32>
    %cst_274 = arith.constant dense<0.000000e+00> : vector<8x32xf32>
    %695 = tpu.matmul %694, %682, %cst_274 {dimension_numbers = #tpu.dot_dimension_numbers<[1], [0], [0], [1], [0, 0, 1, 1], [], []>} : vector<8x8xf32>, vector<8x32xf32>, vector<8x32xf32> -> vector<8x32xf32>
    %696 = vector.extract_strided_slice %677 {offsets = [0, 32], sizes = [8, 32], strides = [1, 1]} : vector<8x128xf32> to vector<8x32xf32>
    %697 = vector.extract_strided_slice %678 {offsets = [0, 32], sizes = [8, 32], strides = [1, 1]} : vector<8x128xf32> to vector<8x32xf32>
    %698 = vector.extract_strided_slice %679 {offsets = [0, 32], sizes = [8, 32], strides = [1, 1]} : vector<8x128xf32> to vector<8x32xf32>
    %cst_275 = arith.constant dense<0.000000e+00> : vector<8x8xf32>
    %699 = tpu.matmul %696, %697, %cst_275 {dimension_numbers = #tpu.dot_dimension_numbers<[1], [1], [0], [0], [0, 0, 1, 0], [], []>} : vector<8x32xf32>, vector<8x32xf32>, vector<8x8xf32> -> vector<8x8xf32>
    %cst_276 = arith.constant 0.176776692 : f32
    %700 = vector.broadcast %cst_276 : f32 to vector<8x8xf32>
    %701 = arith.mulf %699, %700 : vector<8x8xf32>
    %cst_277 = arith.constant dense<0xFF800000> : vector<8xf32>
    %702 = vector.multi_reduction <maximumf>, %701, %cst_277 [1] : vector<8x8xf32> to vector<8xf32>
    %703 = vector.shape_cast %702 : vector<8xf32> to vector<8x1xf32>
    %704 = vector.broadcast %703 : vector<8x1xf32> to vector<8x8xf32>
    %705 = arith.subf %701, %704 : vector<8x8xf32>
    %706 = math.exp %705 : vector<8x8xf32>
    %cst_278 = arith.constant dense<0.000000e+00> : vector<8xf32>
    %707 = vector.multi_reduction <add>, %706, %cst_278 [1] : vector<8x8xf32> to vector<8xf32>
    %708 = vector.shape_cast %707 : vector<8xf32> to vector<8x1xf32>
    %709 = vector.broadcast %708 : vector<8x1xf32> to vector<8x8xf32>
    %710 = arith.divf %706, %709 : vector<8x8xf32>
    %cst_279 = arith.constant dense<0.000000e+00> : vector<8x32xf32>
    %711 = tpu.matmul %710, %698, %cst_279 {dimension_numbers = #tpu.dot_dimension_numbers<[1], [0], [0], [1], [0, 0, 1, 1], [], []>} : vector<8x8xf32>, vector<8x32xf32>, vector<8x32xf32> -> vector<8x32xf32>
    %712 = vector.extract_strided_slice %677 {offsets = [0, 64], sizes = [8, 32], strides = [1, 1]} : vector<8x128xf32> to vector<8x32xf32>
    %713 = vector.extract_strided_slice %678 {offsets = [0, 64], sizes = [8, 32], strides = [1, 1]} : vector<8x128xf32> to vector<8x32xf32>
    %714 = vector.extract_strided_slice %679 {offsets = [0, 64], sizes = [8, 32], strides = [1, 1]} : vector<8x128xf32> to vector<8x32xf32>
    %cst_280 = arith.constant dense<0.000000e+00> : vector<8x8xf32>
    %715 = tpu.matmul %712, %713, %cst_280 {dimension_numbers = #tpu.dot_dimension_numbers<[1], [1], [0], [0], [0, 0, 1, 0], [], []>} : vector<8x32xf32>, vector<8x32xf32>, vector<8x8xf32> -> vector<8x8xf32>
    %cst_281 = arith.constant 0.176776692 : f32
    %716 = vector.broadcast %cst_281 : f32 to vector<8x8xf32>
    %717 = arith.mulf %715, %716 : vector<8x8xf32>
    %cst_282 = arith.constant dense<0xFF800000> : vector<8xf32>
    %718 = vector.multi_reduction <maximumf>, %717, %cst_282 [1] : vector<8x8xf32> to vector<8xf32>
    %719 = vector.shape_cast %718 : vector<8xf32> to vector<8x1xf32>
    %720 = vector.broadcast %719 : vector<8x1xf32> to vector<8x8xf32>
    %721 = arith.subf %717, %720 : vector<8x8xf32>
    %722 = math.exp %721 : vector<8x8xf32>
    %cst_283 = arith.constant dense<0.000000e+00> : vector<8xf32>
    %723 = vector.multi_reduction <add>, %722, %cst_283 [1] : vector<8x8xf32> to vector<8xf32>
    %724 = vector.shape_cast %723 : vector<8xf32> to vector<8x1xf32>
    %725 = vector.broadcast %724 : vector<8x1xf32> to vector<8x8xf32>
    %726 = arith.divf %722, %725 : vector<8x8xf32>
    %cst_284 = arith.constant dense<0.000000e+00> : vector<8x32xf32>
    %727 = tpu.matmul %726, %714, %cst_284 {dimension_numbers = #tpu.dot_dimension_numbers<[1], [0], [0], [1], [0, 0, 1, 1], [], []>} : vector<8x8xf32>, vector<8x32xf32>, vector<8x32xf32> -> vector<8x32xf32>
    %728 = vector.extract_strided_slice %677 {offsets = [0, 96], sizes = [8, 32], strides = [1, 1]} : vector<8x128xf32> to vector<8x32xf32>
    %729 = vector.extract_strided_slice %678 {offsets = [0, 96], sizes = [8, 32], strides = [1, 1]} : vector<8x128xf32> to vector<8x32xf32>
    %730 = vector.extract_strided_slice %679 {offsets = [0, 96], sizes = [8, 32], strides = [1, 1]} : vector<8x128xf32> to vector<8x32xf32>
    %cst_285 = arith.constant dense<0.000000e+00> : vector<8x8xf32>
    %731 = tpu.matmul %728, %729, %cst_285 {dimension_numbers = #tpu.dot_dimension_numbers<[1], [1], [0], [0], [0, 0, 1, 0], [], []>} : vector<8x32xf32>, vector<8x32xf32>, vector<8x8xf32> -> vector<8x8xf32>
    %cst_286 = arith.constant 0.176776692 : f32
    %732 = vector.broadcast %cst_286 : f32 to vector<8x8xf32>
    %733 = arith.mulf %731, %732 : vector<8x8xf32>
    %cst_287 = arith.constant dense<0xFF800000> : vector<8xf32>
    %734 = vector.multi_reduction <maximumf>, %733, %cst_287 [1] : vector<8x8xf32> to vector<8xf32>
    %735 = vector.shape_cast %734 : vector<8xf32> to vector<8x1xf32>
    %736 = vector.broadcast %735 : vector<8x1xf32> to vector<8x8xf32>
    %737 = arith.subf %733, %736 : vector<8x8xf32>
    %738 = math.exp %737 : vector<8x8xf32>
    %cst_288 = arith.constant dense<0.000000e+00> : vector<8xf32>
    %739 = vector.multi_reduction <add>, %738, %cst_288 [1] : vector<8x8xf32> to vector<8xf32>
    %740 = vector.shape_cast %739 : vector<8xf32> to vector<8x1xf32>
    %741 = vector.broadcast %740 : vector<8x1xf32> to vector<8x8xf32>
    %742 = arith.divf %738, %741 : vector<8x8xf32>
    %cst_289 = arith.constant dense<0.000000e+00> : vector<8x32xf32>
    %743 = tpu.matmul %742, %730, %cst_289 {dimension_numbers = #tpu.dot_dimension_numbers<[1], [0], [0], [1], [0, 0, 1, 1], [], []>} : vector<8x8xf32>, vector<8x32xf32>, vector<8x32xf32> -> vector<8x32xf32>
    %744 = tpu.concatenate %695, %711, %727, %743 in 1 : vector<8x32xf32>, vector<8x32xf32>, vector<8x32xf32>, vector<8x32xf32> -> vector<8x128xf32>
    %745 = tpu.concatenate %676, %744 in 0 : vector<8x128xf32>, vector<8x128xf32> -> vector<16x128xf32>
    %c1_290 = arith.constant 1 : index
    %c0_291 = arith.constant 0 : index
    %c0_292 = arith.constant 0 : index
    %746 = vector.load %arg13[%c1_290, %c0_291, %c0_292] : memref<2x128x128xf32, #tpu.memory_space<vmem>>, vector<1x128x128xf32>
    %747 = vector.shape_cast %746 : vector<1x128x128xf32> to vector<128x128xf32>
    %cst_293 = arith.constant dense<0.000000e+00> : vector<16x128xf32>
    %748 = tpu.matmul %745, %747, %cst_293 {dimension_numbers = #tpu.dot_dimension_numbers<[1], [0], [0], [1], [0, 0, 1, 1], [], []>} : vector<16x128xf32>, vector<128x128xf32>, vector<16x128xf32> -> vector<16x128xf32>
    %c1_294 = arith.constant 1 : index
    %c0_295 = arith.constant 0 : index
    %c0_296 = arith.constant 0 : index
    %749 = vector.load %arg14[%c1_294, %c0_295, %c0_296] : memref<2x1x128xf32, #tpu.memory_space<vmem>>, vector<1x1x128xf32>
    %750 = vector.shape_cast %749 : vector<1x1x128xf32> to vector<1x128xf32>
    %751 = vector.broadcast %750 : vector<1x128xf32> to vector<16x128xf32>
    %752 = arith.addf %748, %751 : vector<16x128xf32>
    %c1_297 = arith.constant 1 : index
    %c0_298 = arith.constant 0 : index
    %c0_299 = arith.constant 0 : index
    %753 = vector.load %arg17[%c1_297, %c0_298, %c0_299] : memref<2x1x128xf32, #tpu.memory_space<vmem>>, vector<1x1x128xf32>
    %754 = vector.shape_cast %753 : vector<1x1x128xf32> to vector<1x128xf32>
    %c1_300 = arith.constant 1 : index
    %c0_301 = arith.constant 0 : index
    %c0_302 = arith.constant 0 : index
    %755 = vector.load %arg18[%c1_300, %c0_301, %c0_302] : memref<2x1x128xf32, #tpu.memory_space<vmem>>, vector<1x1x128xf32>
    %756 = vector.shape_cast %755 : vector<1x1x128xf32> to vector<1x128xf32>
    %757 = arith.addf %592, %752 : vector<16x128xf32>
    %cst_303 = arith.constant dense<0.000000e+00> : vector<16xf32>
    %758 = vector.multi_reduction <add>, %757, %cst_303 [1] : vector<16x128xf32> to vector<16xf32>
    %759 = vector.shape_cast %758 : vector<16xf32> to vector<16x1xf32>
    %cst_304 = arith.constant 1.280000e+02 : f32
    %760 = vector.broadcast %cst_304 : f32 to vector<16x1xf32>
    %761 = arith.divf %759, %760 : vector<16x1xf32>
    %762 = vector.broadcast %761 : vector<16x1xf32> to vector<16x128xf32>
    %763 = arith.subf %757, %762 : vector<16x128xf32>
    %764 = arith.mulf %763, %763 : vector<16x128xf32>
    %cst_305 = arith.constant dense<0.000000e+00> : vector<16xf32>
    %765 = vector.multi_reduction <add>, %764, %cst_305 [1] : vector<16x128xf32> to vector<16xf32>
    %766 = vector.shape_cast %765 : vector<16xf32> to vector<16x1xf32>
    %cst_306 = arith.constant 1.280000e+02 : f32
    %767 = vector.broadcast %cst_306 : f32 to vector<16x1xf32>
    %768 = arith.divf %766, %767 : vector<16x1xf32>
    %cst_307 = arith.constant 9.99999974E-6 : f32
    %769 = vector.broadcast %cst_307 : f32 to vector<16x1xf32>
    %770 = arith.addf %768, %769 : vector<16x1xf32>
    %771 = math.rsqrt %770 : vector<16x1xf32>
    %772 = vector.broadcast %771 : vector<16x1xf32> to vector<16x128xf32>
    %773 = arith.mulf %763, %772 : vector<16x128xf32>
    %774 = vector.broadcast %754 : vector<1x128xf32> to vector<16x128xf32>
    %775 = arith.mulf %773, %774 : vector<16x128xf32>
    %776 = vector.broadcast %756 : vector<1x128xf32> to vector<16x128xf32>
    %777 = arith.addf %775, %776 : vector<16x128xf32>
    %c1_308 = arith.constant 1 : index
    %c0_309 = arith.constant 0 : index
    %c0_310 = arith.constant 0 : index
    %778 = vector.load %arg21[%c1_308, %c0_309, %c0_310] : memref<2x128x256xf32, #tpu.memory_space<vmem>>, vector<1x128x256xf32>
    %779 = vector.shape_cast %778 : vector<1x128x256xf32> to vector<128x256xf32>
    %cst_311 = arith.constant dense<0.000000e+00> : vector<16x256xf32>
    %780 = tpu.matmul %777, %779, %cst_311 {dimension_numbers = #tpu.dot_dimension_numbers<[1], [0], [0], [1], [0, 0, 1, 1], [], []>} : vector<16x128xf32>, vector<128x256xf32>, vector<16x256xf32> -> vector<16x256xf32>
    %c1_312 = arith.constant 1 : index
    %c0_313 = arith.constant 0 : index
    %c0_314 = arith.constant 0 : index
    %781 = vector.load %arg22[%c1_312, %c0_313, %c0_314] : memref<2x1x256xf32, #tpu.memory_space<vmem>>, vector<1x1x256xf32>
    %782 = vector.shape_cast %781 : vector<1x1x256xf32> to vector<1x256xf32>
    %783 = vector.broadcast %782 : vector<1x256xf32> to vector<16x256xf32>
    %784 = arith.addf %780, %783 : vector<16x256xf32>
    %cst_315 = arith.constant 0.000000e+00 : f32
    %785 = vector.broadcast %cst_315 : f32 to vector<16x256xf32>
    %786 = arith.maximumf %784, %785 : vector<16x256xf32>
    %c1_316 = arith.constant 1 : index
    %c0_317 = arith.constant 0 : index
    %c0_318 = arith.constant 0 : index
    %787 = vector.load %arg23[%c1_316, %c0_317, %c0_318] : memref<2x256x128xf32, #tpu.memory_space<vmem>>, vector<1x256x128xf32>
    %788 = vector.shape_cast %787 : vector<1x256x128xf32> to vector<256x128xf32>
    %cst_319 = arith.constant dense<0.000000e+00> : vector<16x128xf32>
    %789 = tpu.matmul %786, %788, %cst_319 {dimension_numbers = #tpu.dot_dimension_numbers<[1], [0], [0], [1], [0, 0, 1, 1], [], []>} : vector<16x256xf32>, vector<256x128xf32>, vector<16x128xf32> -> vector<16x128xf32>
    %c1_320 = arith.constant 1 : index
    %c0_321 = arith.constant 0 : index
    %c0_322 = arith.constant 0 : index
    %790 = vector.load %arg24[%c1_320, %c0_321, %c0_322] : memref<2x1x128xf32, #tpu.memory_space<vmem>>, vector<1x1x128xf32>
    %791 = vector.shape_cast %790 : vector<1x1x128xf32> to vector<1x128xf32>
    %792 = vector.broadcast %791 : vector<1x128xf32> to vector<16x128xf32>
    %793 = arith.addf %789, %792 : vector<16x128xf32>
    %c1_323 = arith.constant 1 : index
    %c0_324 = arith.constant 0 : index
    %c0_325 = arith.constant 0 : index
    %794 = vector.load %arg19[%c1_323, %c0_324, %c0_325] : memref<2x1x128xf32, #tpu.memory_space<vmem>>, vector<1x1x128xf32>
    %795 = vector.shape_cast %794 : vector<1x1x128xf32> to vector<1x128xf32>
    %c1_326 = arith.constant 1 : index
    %c0_327 = arith.constant 0 : index
    %c0_328 = arith.constant 0 : index
    %796 = vector.load %arg20[%c1_326, %c0_327, %c0_328] : memref<2x1x128xf32, #tpu.memory_space<vmem>>, vector<1x1x128xf32>
    %797 = vector.shape_cast %796 : vector<1x1x128xf32> to vector<1x128xf32>
    %798 = arith.addf %777, %793 : vector<16x128xf32>
    %cst_329 = arith.constant dense<0.000000e+00> : vector<16xf32>
    %799 = vector.multi_reduction <add>, %798, %cst_329 [1] : vector<16x128xf32> to vector<16xf32>
    %800 = vector.shape_cast %799 : vector<16xf32> to vector<16x1xf32>
    %cst_330 = arith.constant 1.280000e+02 : f32
    %801 = vector.broadcast %cst_330 : f32 to vector<16x1xf32>
    %802 = arith.divf %800, %801 : vector<16x1xf32>
    %803 = vector.broadcast %802 : vector<16x1xf32> to vector<16x128xf32>
    %804 = arith.subf %798, %803 : vector<16x128xf32>
    %805 = arith.mulf %804, %804 : vector<16x128xf32>
    %cst_331 = arith.constant dense<0.000000e+00> : vector<16xf32>
    %806 = vector.multi_reduction <add>, %805, %cst_331 [1] : vector<16x128xf32> to vector<16xf32>
    %807 = vector.shape_cast %806 : vector<16xf32> to vector<16x1xf32>
    %cst_332 = arith.constant 1.280000e+02 : f32
    %808 = vector.broadcast %cst_332 : f32 to vector<16x1xf32>
    %809 = arith.divf %807, %808 : vector<16x1xf32>
    %cst_333 = arith.constant 9.99999974E-6 : f32
    %810 = vector.broadcast %cst_333 : f32 to vector<16x1xf32>
    %811 = arith.addf %809, %810 : vector<16x1xf32>
    %812 = math.rsqrt %811 : vector<16x1xf32>
    %813 = vector.broadcast %812 : vector<16x1xf32> to vector<16x128xf32>
    %814 = arith.mulf %804, %813 : vector<16x128xf32>
    %815 = vector.broadcast %795 : vector<1x128xf32> to vector<16x128xf32>
    %816 = arith.mulf %814, %815 : vector<16x128xf32>
    %817 = vector.broadcast %797 : vector<1x128xf32> to vector<16x128xf32>
    %818 = arith.addf %816, %817 : vector<16x128xf32>
    %819 = vector.extract_strided_slice %818 {offsets = [0, 0], sizes = [8, 128], strides = [1, 1]} : vector<16x128xf32> to vector<8x128xf32>
    %cst_334 = arith.constant dense<0.000000e+00> : vector<128xf32>
    %820 = vector.multi_reduction <add>, %819, %cst_334 [0] : vector<8x128xf32> to vector<128xf32>
    %821 = vector.shape_cast %820 : vector<128xf32> to vector<1x128xf32>
    %cst_335 = arith.constant 8.000000e+00 : f32
    %822 = vector.broadcast %cst_335 : f32 to vector<1x128xf32>
    %823 = arith.divf %821, %822 : vector<1x128xf32>
    %824 = vector.extract_strided_slice %818 {offsets = [8, 0], sizes = [8, 128], strides = [1, 1]} : vector<16x128xf32> to vector<8x128xf32>
    %cst_336 = arith.constant dense<0.000000e+00> : vector<128xf32>
    %825 = vector.multi_reduction <add>, %824, %cst_336 [0] : vector<8x128xf32> to vector<128xf32>
    %826 = vector.shape_cast %825 : vector<128xf32> to vector<1x128xf32>
    %cst_337 = arith.constant 8.000000e+00 : f32
    %827 = vector.broadcast %cst_337 : f32 to vector<1x128xf32>
    %828 = arith.divf %826, %827 : vector<1x128xf32>
    %829 = tpu.concatenate %823, %828 in 0 : vector<1x128xf32>, vector<1x128xf32> -> vector<2x128xf32>
    %c0_338 = arith.constant 0 : index
    %c0_339 = arith.constant 0 : index
    %830 = vector.load %arg25[%c0_338, %c0_339] : memref<128x128xf32, #tpu.memory_space<vmem>>, vector<128x128xf32>
    %cst_340 = arith.constant dense<0.000000e+00> : vector<2x128xf32>
    %831 = tpu.matmul %829, %830, %cst_340 {dimension_numbers = #tpu.dot_dimension_numbers<[1], [0], [0], [1], [0, 0, 1, 1], [], []>} : vector<2x128xf32>, vector<128x128xf32>, vector<2x128xf32> -> vector<2x128xf32>
    %c0_341 = arith.constant 0 : index
    %c0_342 = arith.constant 0 : index
    %832 = vector.load %arg26[%c0_341, %c0_342] : memref<1x128xf32, #tpu.memory_space<vmem>>, vector<1x128xf32>
    %833 = vector.broadcast %832 : vector<1x128xf32> to vector<2x128xf32>
    %834 = arith.addf %831, %833 : vector<2x128xf32>
    %835 = tpu.iota {dimensions = array<i32: 1>} : vector<2x128xi32>
    %c3_i32 = arith.constant 3 : i32
    %836 = vector.broadcast %c3_i32 : i32 to vector<2x128xi32>
    %837 = arith.cmpi slt, %835, %836 : vector<2x128xi32>
    %cst_343 = arith.constant 0xFF800000 : f32
    %838 = vector.broadcast %cst_343 : f32 to vector<2x128xf32>
    %839 = arith.select %837, %834, %838 : vector<2x128xi1>, vector<2x128xf32>
    %cst_344 = arith.constant dense<0xFF800000> : vector<2xf32>
    %840 = vector.multi_reduction <maximumf>, %839, %cst_344 [1] : vector<2x128xf32> to vector<2xf32>
    %841 = vector.shape_cast %840 : vector<2xf32> to vector<2x1xf32>
    %842 = vector.broadcast %841 : vector<2x1xf32> to vector<2x128xf32>
    %843 = arith.subf %839, %842 : vector<2x128xf32>
    %844 = math.exp %843 : vector<2x128xf32>
    %cst_345 = arith.constant dense<0.000000e+00> : vector<2xf32>
    %845 = vector.multi_reduction <add>, %844, %cst_345 [1] : vector<2x128xf32> to vector<2xf32>
    %846 = vector.shape_cast %845 : vector<2xf32> to vector<2x1xf32>
    %847 = vector.broadcast %846 : vector<2x1xf32> to vector<2x128xf32>
    %848 = arith.divf %844, %847 : vector<2x128xf32>
    %c0_346 = arith.constant 0 : index
    %c0_347 = arith.constant 0 : index
    %849 = vector.load %arg27[%c0_346, %c0_347] : memref<2x128xf32, #tpu.memory_space<vmem>>, vector<2x128xf32>
    tpu.vector_store %arg27[%c0_346, %c0_347], %848 {strides = array<i32>} : memref<2x128xf32, #tpu.memory_space<vmem>>, vector<2x128xf32>,
    return
  }
  func.func @transform_0(%arg0: i32) -> (i32, i32, i32) {
    %c0_i32 = arith.constant 0 : i32
    %c0_i32_0 = arith.constant 0 : i32
    %c0_i32_1 = arith.constant 0 : i32
    %c0_i32_2 = arith.constant 0 : i32
    return %c0_i32, %c0_i32_0, %c0_i32_1 : i32, i32, i32
  }
  func.func @transform_1(%arg0: i32) -> (i32, i32, i32) {
    %c0_i32 = arith.constant 0 : i32
    %c0_i32_0 = arith.constant 0 : i32
    %c0_i32_1 = arith.constant 0 : i32
    %c0_i32_2 = arith.constant 0 : i32
    return %c0_i32, %c0_i32_0, %c0_i32_1 : i32, i32, i32
  }
  func.func @transform_2(%arg0: i32) -> (i32, i32) {
    %c0_i32 = arith.constant 0 : i32
    %c0_i32_0 = arith.constant 0 : i32
    %c0_i32_1 = arith.constant 0 : i32
    return %c0_i32, %c0_i32_0 : i32, i32
  }
  func.func @transform_3(%arg0: i32) -> (i32, i32) {
    %c0_i32 = arith.constant 0 : i32
    %c0_i32_0 = arith.constant 0 : i32
    %c0_i32_1 = arith.constant 0 : i32
    return %c0_i32, %c0_i32_0 : i32, i32
  }
  func.func @transform_4(%arg0: i32) -> (i32, i32, i32) {
    %c0_i32 = arith.constant 0 : i32
    %c0_i32_0 = arith.constant 0 : i32
    %c0_i32_1 = arith.constant 0 : i32
    %c0_i32_2 = arith.constant 0 : i32
    return %c0_i32, %c0_i32_0, %c0_i32_1 : i32, i32, i32
  }
  func.func @transform_5(%arg0: i32) -> (i32, i32, i32) {
    %c0_i32 = arith.constant 0 : i32
    %c0_i32_0 = arith.constant 0 : i32
    %c0_i32_1 = arith.constant 0 : i32
    %c0_i32_2 = arith.constant 0 : i32
    return %c0_i32, %c0_i32_0, %c0_i32_1 : i32, i32, i32
  }
  func.func @transform_6(%arg0: i32) -> (i32, i32, i32) {
    %c0_i32 = arith.constant 0 : i32
    %c0_i32_0 = arith.constant 0 : i32
    %c0_i32_1 = arith.constant 0 : i32
    %c0_i32_2 = arith.constant 0 : i32
    return %c0_i32, %c0_i32_0, %c0_i32_1 : i32, i32, i32
  }
  func.func @transform_7(%arg0: i32) -> (i32, i32, i32) {
    %c0_i32 = arith.constant 0 : i32
    %c0_i32_0 = arith.constant 0 : i32
    %c0_i32_1 = arith.constant 0 : i32
    %c0_i32_2 = arith.constant 0 : i32
    return %c0_i32, %c0_i32_0, %c0_i32_1 : i32, i32, i32
  }
  func.func @transform_8(%arg0: i32) -> (i32, i32, i32) {
    %c0_i32 = arith.constant 0 : i32
    %c0_i32_0 = arith.constant 0 : i32
    %c0_i32_1 = arith.constant 0 : i32
    %c0_i32_2 = arith.constant 0 : i32
    return %c0_i32, %c0_i32_0, %c0_i32_1 : i32, i32, i32
  }
  func.func @transform_9(%arg0: i32) -> (i32, i32, i32) {
    %c0_i32 = arith.constant 0 : i32
    %c0_i32_0 = arith.constant 0 : i32
    %c0_i32_1 = arith.constant 0 : i32
    %c0_i32_2 = arith.constant 0 : i32
    return %c0_i32, %c0_i32_0, %c0_i32_1 : i32, i32, i32
  }
  func.func @transform_10(%arg0: i32) -> (i32, i32, i32) {
    %c0_i32 = arith.constant 0 : i32
    %c0_i32_0 = arith.constant 0 : i32
    %c0_i32_1 = arith.constant 0 : i32
    %c0_i32_2 = arith.constant 0 : i32
    return %c0_i32, %c0_i32_0, %c0_i32_1 : i32, i32, i32
  }
  func.func @transform_11(%arg0: i32) -> (i32, i32, i32) {
    %c0_i32 = arith.constant 0 : i32
    %c0_i32_0 = arith.constant 0 : i32
    %c0_i32_1 = arith.constant 0 : i32
    %c0_i32_2 = arith.constant 0 : i32
    return %c0_i32, %c0_i32_0, %c0_i32_1 : i32, i32, i32
  }
  func.func @transform_12(%arg0: i32) -> (i32, i32, i32) {
    %c0_i32 = arith.constant 0 : i32
    %c0_i32_0 = arith.constant 0 : i32
    %c0_i32_1 = arith.constant 0 : i32
    %c0_i32_2 = arith.constant 0 : i32
    return %c0_i32, %c0_i32_0, %c0_i32_1 : i32, i32, i32
  }
  func.func @transform_13(%arg0: i32) -> (i32, i32, i32) {
    %c0_i32 = arith.constant 0 : i32
    %c0_i32_0 = arith.constant 0 : i32
    %c0_i32_1 = arith.constant 0 : i32
    %c0_i32_2 = arith.constant 0 : i32
    return %c0_i32, %c0_i32_0, %c0_i32_1 : i32, i32, i32
  }
  func.func @transform_14(%arg0: i32) -> (i32, i32, i32) {
    %c0_i32 = arith.constant 0 : i32
    %c0_i32_0 = arith.constant 0 : i32
    %c0_i32_1 = arith.constant 0 : i32
    %c0_i32_2 = arith.constant 0 : i32
    return %c0_i32, %c0_i32_0, %c0_i32_1 : i32, i32, i32
  }
  func.func @transform_15(%arg0: i32) -> (i32, i32, i32) {
    %c0_i32 = arith.constant 0 : i32
    %c0_i32_0 = arith.constant 0 : i32
    %c0_i32_1 = arith.constant 0 : i32
    %c0_i32_2 = arith.constant 0 : i32
    return %c0_i32, %c0_i32_0, %c0_i32_1 : i32, i32, i32
  }
  func.func @transform_16(%arg0: i32) -> (i32, i32, i32) {
    %c0_i32 = arith.constant 0 : i32
    %c0_i32_0 = arith.constant 0 : i32
    %c0_i32_1 = arith.constant 0 : i32
    %c0_i32_2 = arith.constant 0 : i32
    return %c0_i32, %c0_i32_0, %c0_i32_1 : i32, i32, i32
  }
  func.func @transform_17(%arg0: i32) -> (i32, i32, i32) {
    %c0_i32 = arith.constant 0 : i32
    %c0_i32_0 = arith.constant 0 : i32
    %c0_i32_1 = arith.constant 0 : i32
    %c0_i32_2 = arith.constant 0 : i32
    return %c0_i32, %c0_i32_0, %c0_i32_1 : i32, i32, i32
  }
  func.func @transform_18(%arg0: i32) -> (i32, i32, i32) {
    %c0_i32 = arith.constant 0 : i32
    %c0_i32_0 = arith.constant 0 : i32
    %c0_i32_1 = arith.constant 0 : i32
    %c0_i32_2 = arith.constant 0 : i32
    return %c0_i32, %c0_i32_0, %c0_i32_1 : i32, i32, i32
  }
  func.func @transform_19(%arg0: i32) -> (i32, i32, i32) {
    %c0_i32 = arith.constant 0 : i32
    %c0_i32_0 = arith.constant 0 : i32
    %c0_i32_1 = arith.constant 0 : i32
    %c0_i32_2 = arith.constant 0 : i32
    return %c0_i32, %c0_i32_0, %c0_i32_1 : i32, i32, i32
  }
  func.func @transform_20(%arg0: i32) -> (i32, i32, i32) {
    %c0_i32 = arith.constant 0 : i32
    %c0_i32_0 = arith.constant 0 : i32
    %c0_i32_1 = arith.constant 0 : i32
    %c0_i32_2 = arith.constant 0 : i32
    return %c0_i32, %c0_i32_0, %c0_i32_1 : i32, i32, i32
  }
  func.func @transform_21(%arg0: i32) -> (i32, i32, i32) {
    %c0_i32 = arith.constant 0 : i32
    %c0_i32_0 = arith.constant 0 : i32
    %c0_i32_1 = arith.constant 0 : i32
    %c0_i32_2 = arith.constant 0 : i32
    return %c0_i32, %c0_i32_0, %c0_i32_1 : i32, i32, i32
  }
  func.func @transform_22(%arg0: i32) -> (i32, i32, i32) {
    %c0_i32 = arith.constant 0 : i32
    %c0_i32_0 = arith.constant 0 : i32
    %c0_i32_1 = arith.constant 0 : i32
    %c0_i32_2 = arith.constant 0 : i32
    return %c0_i32, %c0_i32_0, %c0_i32_1 : i32, i32, i32
  }
  func.func @transform_23(%arg0: i32) -> (i32, i32, i32) {
    %c0_i32 = arith.constant 0 : i32
    %c0_i32_0 = arith.constant 0 : i32
    %c0_i32_1 = arith.constant 0 : i32
    %c0_i32_2 = arith.constant 0 : i32
    return %c0_i32, %c0_i32_0, %c0_i32_1 : i32, i32, i32
  }
  func.func @transform_24(%arg0: i32) -> (i32, i32) {
    %c0_i32 = arith.constant 0 : i32
    %c0_i32_0 = arith.constant 0 : i32
    %c0_i32_1 = arith.constant 0 : i32
    return %c0_i32, %c0_i32_0 : i32, i32
  }
  func.func @transform_25(%arg0: i32) -> (i32, i32) {
    %c0_i32 = arith.constant 0 : i32
    %c0_i32_0 = arith.constant 0 : i32
    %c0_i32_1 = arith.constant 0 : i32
    return %c0_i32, %c0_i32_0 : i32, i32
  }
  func.func @transform_26(%arg0: i32) -> (i32, i32) {
    %c0_i32 = arith.constant 0 : i32
    %c0_i32_0 = arith.constant 0 : i32
    %c0_i32_1 = arith.constant 0 : i32
    return %c0_i32, %c0_i32_0 : i32, i32
  }
}

</mosaic_0001>

<bundles_post_ra>
// kernel: confidence_evaluator.1
= control target key start
LH: loop header
LB: loop body
LE: loop exit
PB: predicated region body
PF: predicated region fallthrough
CT: control target
= control target key end

     0   :  { %s11470_s0 = inlined_call_operand.vmem [shape: f32[2,8,128], index: 0, kind: input, shape index: {}]   ;;  %s11471_s1 = inlined_call_operand.vmem [shape: f32[2,8,128], index: 1, kind: input, shape index: {}]   ;;  %s11472_s2 = inlined_call_operand.hbm [shape: f32[128,128], index: 2, kind: input, shape index: {}]   ;;  %s11473_s3 = inlined_call_operand.vmem [shape: f32[1,128], index: 3, kind: input, shape index: {}]   ;;  %s11474_s4 = inlined_call_operand.hbm [shape: f32[2,128,384], index: 4, kind: input, shape index: {}]   ;;  %s11475_s5 = inlined_call_operand.hbm [shape: f32[2,1,384], index: 5, kind: input, shape index: {}]   ;;  %s11476_s6 = inlined_call_operand.hbm [shape: f32[2,128,128], index: 6, kind: input, shape index: {}]   ;;  %s11477_s7 = inlined_call_operand.hbm [shape: f32[2,1,128], index: 7, kind: input, shape index: {}]   ;;  %s11478_s8 = inlined_call_operand.hbm [shape: f32[2,128,128], index: 8, kind: input, shape index: {}]   ;;  %s11479_s9 = inlined_call_operand.hbm [shape: f32[2,1,128], index: 9, kind: input, shape index: {}]   ;;  %s11480_s10 = inlined_call_operand.hbm [shape: f32[2,128,256], index: 10, kind: input, shape index: {}]   ;;  %s11481_s11 = inlined_call_operand.hbm [shape: f32[2,1,256], index: 11, kind: input, shape index: {}]   ;;  %s11482_s12 = inlined_call_operand.hbm [shape: f32[2,128,128], index: 12, kind: input, shape index: {}]   ;;  %s11483_s13 = inlined_call_operand.vmem [shape: f32[2,1,128], index: 13, kind: input, shape index: {}]   ;;  %s11484_s14 = inlined_call_operand.vmem [shape: f32[2,1,128], index: 14, kind: input, shape index: {}]   ;;  %s11485_s15 = inlined_call_operand.vmem [shape: f32[2,1,128], index: 15, kind: input, shape index: {}]   ;;  %s11486_s16 = inlined_call_operand.vmem [shape: f32[2,1,128], index: 16, kind: input, shape index: {}]   ;;  %s11487_s17 = inlined_call_operand.vmem [shape: f32[2,1,128], index: 17, kind: input, shape index: {}]   ;;  %s11488_s18 = inlined_call_operand.vmem [shape: f32[2,1,128], index: 18, kind: input, shape index: {}]   ;;  %s11489_s19 = inlined_call_operand.vmem [shape: f32[2,1,128], index: 19, kind: input, shape index: {}]   ;;  %s11490_s20 = inlined_call_operand.hbm [shape: f32[2,128,256], index: 20, kind: input, shape index: {}]   ;;  %s11491_s21 = inlined_call_operand.vmem [shape: f32[2,1,256], index: 21, kind: input, shape index: {}]   ;;  %s11492_s22 = inlined_call_operand.hbm [shape: f32[2,256,128], index: 22, kind: input, shape index: {}]   ;;  %s11493_s23 = inlined_call_operand.vmem [shape: f32[2,1,128], index: 23, kind: input, shape index: {}]   ;;  %s11494_s24 = inlined_call_operand.hbm [shape: f32[128,128], index: 24, kind: input, shape index: {}]   ;;  %s11495_s25 = inlined_call_operand.vmem [shape: f32[1,128], index: 25, kind: input, shape index: {}]   ;;  %s11496_s26 = inlined_call_operand.hbm [shape: f32[2,128], index: 26, kind: output, shape index: {}]  }
   0x1   :  { %11511 = sst [smem:[#allocation32_spill]] %s11470_s0 }
   0x2   :  { %11512 = sst [smem:[#allocation33_spill]] %s11471_s1 }
   0x3   :  { %11513 = sst [smem:[#allocation34_spill]] %s11472_s2 }
   0x4   :  { %11514 = sst [smem:[#allocation35_spill]] %s11473_s3 }
   0x5   :  { %11515 = sst [smem:[#allocation36_spill]] %s11474_s4 }
   0x6   :  { %11516 = sst [smem:[#allocation37_spill]] %s11475_s5 }
   0x7   :  { %11517 = sst [smem:[#allocation38_spill]] %s11476_s6 }
   0x8   :  { %11518 = sst [smem:[#allocation39_spill]] %s11477_s7 }
   0x9   :  { %11519 = sst [smem:[#allocation40_spill]] %s11478_s8 }
   0xa   :  { %11520 = sst [smem:[#allocation41_spill]] %s11479_s9 }
   0xb   :  { %11521 = sst [smem:[#allocation42_spill]] %s11480_s10 }
   0xc   :  { %11522 = sst [smem:[#allocation43_spill]] %s11489_s19 }
   0xd   :  { %11523 = sst [smem:[#allocation44_spill]] %s11495_s25 }
   0xe   :  { %11524 = sst [smem:[#allocation45_spill]] %s11496_s26 }
   0xf   :  { %31 = vsyncpa [#allocation3], 0 }
  0x10   :  { %32 = vsyncpa [#allocation6], 0 }
  0x11   :  { %33 = vsyncpa [#allocation9], 0 }
  0x12   :  { %34 = vsyncpa [#allocation12], 0 }
  0x13   :  { %35 = vsyncpa [#allocation15], 0 }
  0x14   :  { %36 = vsyncpa [#allocation18], 0 }
  0x15   :  { %37 = vsyncpa [#allocation21], 0 }
  0x16   :  { %38 = vsyncpa [#allocation4], 0  ;;  %s10249_s27 = smov [#allocation5]   ;;  %s11525_s8 = sld [smem:[#allocation36_spill]] }
  0x17   :  { %s62_s3 = sshll.u32 %s10249_s27, 4  ;;  %s63_s3 = int_to_ptr.vmem [resolvable:$true] %s62_s3 }
  0x1c   :  { %s9925_s4 = scalar_lea.hbm %s11525_s8, 12288 }
  0x1d   :  { %p9926_p0 = scmp.ne.s32.totalorder %s11525_s8, %s9925_s4  ;;  %p9929_p1 = scmp.lt.u32.totalorder %s9925_s4, %s11525_s8 }
  0x1f   :  { %p9931_p2 = pnand %p9929_p1, %p9926_p0 }
  0x21   :  { %9934 = shalt.err (!%p9931_p2)
}
  0x22   :  { %s9935_s2 = scalar_lea.vmem %s63_s3, 12288  ;;  %p9940_p4 = scmp.lt.s32.totalorder %s63_s3, %s63_s3 }
  0x23   :  { %p9936_p3 = scmp.ne.s32.totalorder %s63_s3, %s9935_s2  ;;  %p9941_p5 = scmp.lt.s32.totalorder %s9935_s2, %s9935_s2 }
  0x25   :  { %p9942_p6 = por %p9941_p5, %p9940_p4 }
  0x27   :  { %p9943_p7 = pnand %p9942_p6, %p9936_p3 }
  0x29   :  { %9946 = shalt.err (!%p9943_p7)
}
  0x2a   :  { %s10250_s5 = smov 384   ;;  %s10251_s10 = smov 24  }
  0x2b   :  { %68 = dma.hbm_to_vmem [thread:$0]  %s11525_s8, 12288, %s63_s3, [#allocation6], %s10250_s5, %s10250_s5, %s10251_s10  }
  0x2c   :  { %s10252_s27 = smov [#allocation8]   ;;  %s10253_s28 = smov [#allocation11]  }
  0x2d   :  { %s86_s7 = sshll.u32 %s10252_s27, 4  ;;  %s110_s4 = sshll.u32 %s10253_s28, 4  ;;  %s87_s7 = int_to_ptr.vmem [resolvable:$true] %s86_s7  ;;  %s111_s4 = int_to_ptr.vmem [resolvable:$true] %s110_s4 }
  0x2e   :  { %s11526_s9 = sld [smem:[#allocation38_spill]] }
  0x34   :  { %s9947_s30 = scalar_lea.hbm %s11526_s9, 4096 }
  0x35   :  { %p9948_p8 = scmp.ne.s32.totalorder %s11526_s9, %s9947_s30  ;;  %p9951_p9 = scmp.lt.u32.totalorder %s9947_s30, %s11526_s9 }
  0x37   :  { %p9953_p10 = pnand %p9951_p9, %p9948_p8 }
  0x39   :  { %9956 = shalt.err (!%p9953_p10)
}
  0x3a   :  { %s9957_s3 = scalar_lea.vmem %s87_s7, 4096  ;;  %p9962_p12 = scmp.lt.s32.totalorder %s87_s7, %s87_s7 }
  0x3b   :  { %p9958_p11 = scmp.ne.s32.totalorder %s87_s7, %s9957_s3  ;;  %p9963_p13 = scmp.lt.s32.totalorder %s9957_s3, %s9957_s3 }
  0x3d   :  { %p9964_p0 = por %p9963_p13, %p9962_p12 }
  0x3f   :  { %p9965_p1 = pnand %p9964_p0, %p9958_p11 }
  0x41   :  { %9968 = shalt.err (!%p9965_p1)
}
  0x42   :  { %s11509_s8 = smov 128   ;;  %s11510_s5 = smov 8  }
  0x43   :  { %92 = dma.hbm_to_vmem [thread:$0]  %s11526_s9, 4096, %s87_s7, [#allocation9], %s11509_s8, %s11509_s8, %s11510_s5  }
  0x44   :  { %s11527_s6 = sld [smem:[#allocation40_spill]] }
  0x4a   :  { %s9969_s1 = scalar_lea.hbm %s11527_s6, 4096 }
  0x4b   :  { %p9970_p2 = scmp.ne.s32.totalorder %s11527_s6, %s9969_s1  ;;  %p9973_p3 = scmp.lt.u32.totalorder %s9969_s1, %s11527_s6 }
  0x4d   :  { %p9975_p4 = pnand %p9973_p3, %p9970_p2 }
  0x4f   :  { %9978 = shalt.err (!%p9975_p4)
}
  0x50   :  { %s9979_s30 = scalar_lea.vmem %s111_s4, 4096  ;;  %p9984_p6 = scmp.lt.s32.totalorder %s111_s4, %s111_s4 }
  0x51   :  { %p9980_p5 = scmp.ne.s32.totalorder %s111_s4, %s9979_s30  ;;  %p9985_p7 = scmp.lt.s32.totalorder %s9979_s30, %s9979_s30 }
  0x53   :  { %p9986_p8 = por %p9985_p7, %p9984_p6 }
  0x55   :  { %p9987_p9 = pnand %p9986_p8, %p9980_p5 }
  0x57   :  { %9990 = shalt.err (!%p9987_p9)
}
  0x58   :  { %116 = dma.hbm_to_vmem [thread:$0]  %s11527_s6, 4096, %s111_s4, [#allocation12], %s11509_s8, %s11509_s8, %s11510_s5  }
  0x59   :  { %s10256_s2 = smov [#allocation14]   ;;  %s10257_s26 = smov [#allocation17]  }
  0x5a   :  { %s134_s3 = sshll.u32 %s10256_s2, 4  ;;  %s158_s10 = sshll.u32 %s10257_s26, 4  ;;  %s135_s3 = int_to_ptr.vmem [resolvable:$true] %s134_s3  ;;  %s159_s10 = int_to_ptr.vmem [resolvable:$true] %s158_s10 }
  0x5b   :  { %s11528_s1 = sld [smem:[#allocation42_spill]] }
  0x61   :  { %s9991_s27 = scalar_lea.hbm %s11528_s1, 8192 }
  0x62   :  { %p9992_p10 = scmp.ne.s32.totalorder %s11528_s1, %s9991_s27  ;;  %p9995_p11 = scmp.lt.u32.totalorder %s9991_s27, %s11528_s1 }
  0x64   :  { %p9997_p12 = pnand %p9995_p11, %p9992_p10 }
  0x66   :  { %10000 = shalt.err (!%p9997_p12)
}
  0x67   :  { %s10001_s4 = scalar_lea.vmem %s135_s3, 8192  ;;  %p10006_p0 = scmp.lt.s32.totalorder %s135_s3, %s135_s3 }
  0x68   :  { %p10002_p13 = scmp.ne.s32.totalorder %s135_s3, %s10001_s4  ;;  %p10007_p1 = scmp.lt.s32.totalorder %s10001_s4, %s10001_s4 }
  0x6a   :  { %p10008_p2 = por %p10007_p1, %p10006_p0 }
  0x6c   :  { %p10009_p3 = pnand %p10008_p2, %p10002_p13 }
  0x6e   :  { %10012 = shalt.err (!%p10009_p3)
}
  0x6f   :  { %s10258_s6 = smov 256   ;;  %s10259_s7 = smov 16  }
  0x70   :  { %140 = dma.hbm_to_vmem [thread:$0]  %s11528_s1, 8192, %s135_s3, [#allocation15], %s10258_s6, %s10258_s6, %s10259_s7  }
  0x71   :  { %s10013_s25 = scalar_lea.hbm %s11482_s12, 4096 }
  0x72   :  { %p10014_p4 = scmp.ne.s32.totalorder %s11482_s12, %s10013_s25  ;;  %p10017_p5 = scmp.lt.u32.totalorder %s10013_s25, %s11482_s12 }
  0x74   :  { %p10019_p6 = pnand %p10017_p5, %p10014_p4 }
  0x76   :  { %10022 = shalt.err (!%p10019_p6)
}
  0x77   :  { %s10023_s30 = scalar_lea.vmem %s159_s10, 4096  ;;  %p10028_p8 = scmp.lt.s32.totalorder %s159_s10, %s159_s10 }
  0x78   :  { %p10024_p7 = scmp.ne.s32.totalorder %s159_s10, %s10023_s30  ;;  %p10029_p9 = scmp.lt.s32.totalorder %s10023_s30, %s10023_s30 }
  0x7a   :  { %p10030_p10 = por %p10029_p9, %p10028_p8 }
  0x7c   :  { %p10031_p11 = pnand %p10030_p10, %p10024_p7 }
  0x7e   :  { %10034 = shalt.err (!%p10031_p11)
}
  0x7f   :  { %164 = dma.hbm_to_vmem [thread:$0]  %s11482_s12, 4096, %s159_s10, [#allocation18], %s11509_s8, %s11509_s8, %s11510_s5  }
  0x80   :  { %s10260_s4 = smov [#allocation20]   ;;  %s10261_s2 = smov [#allocation2]  }
  0x81   :  { %s198_s9 = sshll.u32 %s10260_s4, 4  ;;  %s48_s26 = sshll.u32 %s10261_s2, 4  ;;  %s199_s9 = int_to_ptr.vmem [resolvable:$true] %s198_s9  ;;  %s49_s26 = int_to_ptr.vmem [resolvable:$true] %s48_s26 }
  0x82   :  { %s10035_s27 = scalar_lea.hbm %s11492_s22, 8192 }
  0x83   :  { %p10036_p12 = scmp.ne.s32.totalorder %s11492_s22, %s10035_s27  ;;  %p10039_p13 = scmp.lt.u32.totalorder %s10035_s27, %s11492_s22 }
  0x85   :  { %p10041_p0 = pnand %p10039_p13, %p10036_p12 }
  0x87   :  { %10044 = shalt.err (!%p10041_p0)
}
  0x88   :  { %s10045_s12 = scalar_lea.vmem %s199_s9, 8192  ;;  %p10050_p2 = scmp.lt.s32.totalorder %s199_s9, %s199_s9 }
  0x89   :  { %p10046_p1 = scmp.ne.s32.totalorder %s199_s9, %s10045_s12  ;;  %p10051_p3 = scmp.lt.s32.totalorder %s10045_s12, %s10045_s12 }
  0x8b   :  { %p10052_p4 = por %p10051_p3, %p10050_p2 }
  0x8d   :  { %p10053_p5 = pnand %p10052_p4, %p10046_p1 }
  0x8f   :  { %10056 = shalt.err (!%p10053_p5)
}
  0x90   :  { %204 = dma.hbm_to_vmem [thread:$0]  %s11492_s22, 8192, %s199_s9, [#allocation21], %s11509_s8, %s11509_s8, %s11510_s5  }
  0x91   :  { %s11529_s2 = sld [smem:[#allocation34_spill]] }
  0x97   :  { %s10057_s19 = scalar_lea.hbm %s11529_s2, 2048 }
  0x98   :  { %p10058_p6 = scmp.ne.s32.totalorder %s11529_s2, %s10057_s19  ;;  %p10061_p7 = scmp.lt.u32.totalorder %s10057_s19, %s11529_s2 }
  0x9a   :  { %p10063_p8 = pnand %p10061_p7, %p10058_p6 }
  0x9c   :  { %10066 = shalt.err (!%p10063_p8)
}
  0x9d   :  { %s10067_s0 = scalar_lea.vmem %s49_s26, 2048  ;;  %p10072_p10 = scmp.lt.s32.totalorder %s49_s26, %s49_s26 }
  0x9e   :  { %p10068_p9 = scmp.ne.s32.totalorder %s49_s26, %s10067_s0  ;;  %p10073_p11 = scmp.lt.s32.totalorder %s10067_s0, %s10067_s0 }
  0xa0   :  { %p10074_p12 = por %p10073_p11, %p10072_p10 }
  0xa2   :  { %p10075_p13 = pnand %p10074_p12, %p10068_p9 }
  0xa4   :  { %10078 = shalt.err (!%p10075_p13)
}
  0xa5   :  { %54 = dma.hbm_to_vmem [thread:$0]  %s11529_s2, 2048, %s49_s26, [#allocation3], %s11509_s8, %s11509_s8, %s11510_s5  }
  0xa6   :  { %s10262_s30 = smov [#allocation7]   ;;  %s11530_s1 = sld [smem:[#allocation37_spill]] }
  0xa7   :  { %s74_s12 = sshll.u32 %s10262_s30, 4  ;;  %s75_s12 = int_to_ptr.vmem [resolvable:$true] %s74_s12 }
  0xac   :  { %s10079_s4 = scalar_lea.hbm %s11530_s1, 96 }
  0xad   :  { %p10080_p0 = scmp.ne.s32.totalorder %s11530_s1, %s10079_s4  ;;  %p10083_p1 = scmp.lt.u32.totalorder %s10079_s4, %s11530_s1 }
  0xaf   :  { %p10085_p2 = pnand %p10083_p1, %p10080_p0 }
  0xb1   :  { %10088 = shalt.err (!%p10085_p2)
}
  0xb2   :  { %s10089_s29 = scalar_lea.vmem %s75_s12, 96  ;;  %p10094_p4 = scmp.lt.s32.totalorder %s75_s12, %s75_s12 }
  0xb3   :  { %p10090_p3 = scmp.ne.s32.totalorder %s75_s12, %s10089_s29  ;;  %p10095_p5 = scmp.lt.s32.totalorder %s10089_s29, %s10089_s29 }
  0xb5   :  { %p10096_p6 = por %p10095_p5, %p10094_p4 }
  0xb7   :  { %p10097_p7 = pnand %p10096_p6, %p10090_p3 }
  0xb9   :  { %10100 = shalt.err (!%p10097_p7)
}
  0xba   :  { %s10263_s26 = smov 48   ;;  %s10264_s2 = smov 3  }
  0xbb   :  { %80 = dma.hbm_to_vmem [thread:$0]  %s11530_s1, 96, %s75_s12, [#allocation6], %s10263_s26, %s10263_s26, %s10264_s2  }
  0xbc   :  { %s10265_s9 = smov [#allocation10]   ;;  %s10266_s10 = smov [#allocation13]  }
  0xbd   :  { %s98_s30 = sshll.u32 %s10265_s9, 4  ;;  %s122_s3 = sshll.u32 %s10266_s10, 4  ;;  %s99_s30 = int_to_ptr.vmem [resolvable:$true] %s98_s30  ;;  %s123_s3 = int_to_ptr.vmem [resolvable:$true] %s122_s3 }
  0xbe   :  { %s11531_s25 = sld [smem:[#allocation39_spill]] }
  0xc4   :  { %s10101_s27 = scalar_lea.hbm %s11531_s25, 32 }
  0xc5   :  { %p10102_p8 = scmp.ne.s32.totalorder %s11531_s25, %s10101_s27  ;;  %p10105_p9 = scmp.lt.u32.totalorder %s10101_s27, %s11531_s25 }
  0xc7   :  { %p10107_p10 = pnand %p10105_p9, %p10102_p8 }
  0xc9   :  { %10110 = shalt.err (!%p10107_p10)
}
  0xca   :  { %s10111_s12 = scalar_lea.vmem %s99_s30, 32  ;;  %p10116_p12 = scmp.lt.s32.totalorder %s99_s30, %s99_s30 }
  0xcb   :  { %p10112_p11 = scmp.ne.s32.totalorder %s99_s30, %s10111_s12  ;;  %p10117_p13 = scmp.lt.s32.totalorder %s10111_s12, %s10111_s12 }
  0xcd   :  { %p10118_p0 = por %p10117_p13, %p10116_p12 }
  0xcf   :  { %p10119_p1 = pnand %p10118_p0, %p10112_p11 }
  0xd1   :  { %10122 = shalt.err (!%p10119_p1)
}
  0xd2   :  { %s10267_s1 = smov 1   ;;  %s11532_s5 = sld [smem:[#allocation41_spill]] }
  0xd3   :  { %104 = dma.hbm_to_vmem [thread:$0]  %s11531_s25, 32, %s99_s30, [#allocation9], %s10259_s7, %s10259_s7, %s10267_s1  }
  0xd8   :  { %s10123_s22 = scalar_lea.hbm %s11532_s5, 32 }
  0xd9   :  { %p10124_p2 = scmp.ne.s32.totalorder %s11532_s5, %s10123_s22  ;;  %p10127_p3 = scmp.lt.u32.totalorder %s10123_s22, %s11532_s5 }
  0xdb   :  { %p10129_p4 = pnand %p10127_p3, %p10124_p2 }
  0xdd   :  { %10132 = shalt.err (!%p10129_p4)
}
  0xde   :  { %s10133_s27 = scalar_lea.vmem %s123_s3, 32  ;;  %p10138_p6 = scmp.lt.s32.totalorder %s123_s3, %s123_s3 }
  0xdf   :  { %p10134_p5 = scmp.ne.s32.totalorder %s123_s3, %s10133_s27  ;;  %p10139_p7 = scmp.lt.s32.totalorder %s10133_s27, %s10133_s27 }
  0xe1   :  { %p10140_p8 = por %p10139_p7, %p10138_p6 }
  0xe3   :  { %p10141_p9 = pnand %p10140_p8, %p10134_p5 }
  0xe5   :  { %10144 = shalt.err (!%p10141_p9)
}
  0xe6   :  { %128 = dma.hbm_to_vmem [thread:$0]  %s11532_s5, 32, %s123_s3, [#allocation12], %s10259_s7, %s10259_s7, %s10267_s1  }
  0xe7   :  { %s10268_s28 = smov [#allocation16]   ;;  %s10145_s2 = scalar_lea.hbm %s11481_s11, 64 }
  0xe8   :  { %s146_s29 = sshll.u32 %s10268_s28, 4  ;;  %p10146_p10 = scmp.ne.s32.totalorder %s11481_s11, %s10145_s2  ;;  %s147_s29 = int_to_ptr.vmem [resolvable:$true] %s146_s29 }
  0xe9   :  { %p10149_p11 = scmp.lt.u32.totalorder %s10145_s2, %s11481_s11 }
  0xeb   :  { %p10151_p12 = pnand %p10149_p11, %p10146_p10 }
  0xed   :  { %10154 = shalt.err (!%p10151_p12)
}
  0xee   :  { %s10155_s10 = scalar_lea.vmem %s147_s29, 64  ;;  %p10160_p0 = scmp.lt.s32.totalorder %s147_s29, %s147_s29 }
  0xef   :  { %p10156_p13 = scmp.ne.s32.totalorder %s147_s29, %s10155_s10  ;;  %p10161_p1 = scmp.lt.s32.totalorder %s10155_s10, %s10155_s10 }
  0xf1   :  { %p10162_p2 = por %p10161_p1, %p10160_p0 }
  0xf3   :  { %p10163_p3 = pnand %p10162_p2, %p10156_p13 }
  0xf5   :  { %10166 = shalt.err (!%p10163_p3)
}
  0xf6   :  { %s10269_s3 = smov 32   ;;  %s10270_s1 = smov 2  }
  0xf7   :  { %152 = dma.hbm_to_vmem [thread:$0]  %s11481_s11, 64, %s147_s29, [#allocation15], %s10269_s3, %s10269_s3, %s10270_s1  }
  0xf8   :  { %s10271_s19 = smov [#allocation19]   ;;  %s10272_s30 = smov [#allocation22]  }
  0xf9   :  { %s184_s27 = sshll.u32 %s10271_s19, 4  ;;  %s212_s25 = sshll.u32 %s10272_s30, 4  ;;  %s185_s27 = int_to_ptr.vmem [resolvable:$true] %s184_s27  ;;  %s10570_s25 = int_to_ptr.vmem [resolvable:$true] %s212_s25 }
  0xfa   :  { %s10167_s26 = scalar_lea.hbm %s11490_s20, 8192 }
  0xfb   :  { %p10168_p4 = scmp.ne.s32.totalorder %s11490_s20, %s10167_s26  ;;  %p10171_p5 = scmp.lt.u32.totalorder %s10167_s26, %s11490_s20 }
  0xfd   :  { %p10173_p6 = pnand %p10171_p5, %p10168_p4 }
  0xff   :  { %10176 = shalt.err (!%p10173_p6)
}
 0x100   :  { %s10177_s11 = scalar_lea.vmem %s185_s27, 8192  ;;  %p10182_p8 = scmp.lt.s32.totalorder %s185_s27, %s185_s27 }
 0x101   :  { %p10178_p7 = scmp.ne.s32.totalorder %s185_s27, %s10177_s11  ;;  %p10183_p9 = scmp.lt.s32.totalorder %s10177_s11, %s10177_s11 }
 0x103   :  { %p10184_p10 = por %p10183_p9, %p10182_p8 }
 0x105   :  { %p10185_p11 = pnand %p10184_p10, %p10178_p7 }
 0x107   :  { %10188 = shalt.err (!%p10185_p11)
}
 0x108   :  { %190 = dma.hbm_to_vmem [thread:$0]  %s11490_s20, 8192, %s185_s27, [#allocation18], %s10258_s6, %s10258_s6, %s10259_s7  }
 0x109   :  { %s10189_s5 = scalar_lea.hbm %s11494_s24, 2048 }
 0x10a   :  { %p10190_p12 = scmp.ne.s32.totalorder %s11494_s24, %s10189_s5  ;;  %p10193_p13 = scmp.lt.u32.totalorder %s10189_s5, %s11494_s24 }
 0x10c   :  { %p10195_p0 = pnand %p10193_p13, %p10190_p12 }
 0x10e   :  { %10198 = shalt.err (!%p10195_p0)
}
 0x10f   :  { %s10199_s12 = scalar_lea.vmem %s10570_s25, 2048  ;;  %p10204_p2 = scmp.lt.s32.totalorder %s10570_s25, %s10570_s25 }
 0x110   :  { %p10200_p1 = scmp.ne.s32.totalorder %s10570_s25, %s10199_s12  ;;  %p10205_p3 = scmp.lt.s32.totalorder %s10199_s12, %s10199_s12 }
 0x112   :  { %p10206_p4 = por %p10205_p3, %p10204_p2 }
 0x114   :  { %p10207_p5 = pnand %p10206_p4, %p10200_p1 }
 0x116   :  { %10210 = shalt.err (!%p10207_p5)
}
 0x117   :  { %s11533_s20 = smov 8   ;;  %s11534_s6 = smov 128  }
 0x118   :  { %218 = dma.hbm_to_vmem [thread:$0]  %s11494_s24, 2048, %s10570_s25, [#allocation21], %s11534_s6, %s11534_s6, %s11533_s20  }
 0x119   :  { %10233 = dma.done.wait [#allocation3], 2048  }
 0x11a   :  { %10234 = vsyncadd [#allocation3], 4294965248 }
 0x11b   :  { %10235 = dma.done.wait [#allocation6], 12384  }
 0x11c   :  { %10236 = vsyncadd [#allocation6], 4294954912 }
 0x11d   :  { %10237 = dma.done.wait [#allocation9], 4128  }
 0x11e   :  { %10238 = vsyncadd [#allocation9], 4294963168 }
 0x11f   :  { %10239 = dma.done.wait [#allocation12], 4128  }
 0x120   :  { %10240 = vsyncadd [#allocation12], 4294963168 }
 0x121   :  { %10241 = dma.done.wait [#allocation15], 8256  }
 0x122   :  { %10242 = vsyncadd [#allocation15], 4294959040 }
 0x123   :  { %10243 = dma.done.wait [#allocation18], 12288  }
 0x124   :  { %10244 = vsyncadd [#allocation18], 4294955008 }
 0x125   :  { %10245 = dma.done.wait [#allocation21], 10240  }
 0x126   :  { %10246 = vsyncadd [#allocation21], 4294957056  ;;  %v264_v0 = vld [vmem:[#allocation2] sm:$0xff]  ;;  %v265_v1 = vld [vmem:[#allocation2 + $0x8] sm:$0xff]  ;;  %s11535_s26 = sld [smem:[#allocation32_spill]]  ;;  %s11536_s11 = sld [smem:[#allocation35_spill]] }
 0x127   :  { %v266_v2 = vld [vmem:[#allocation2 + $0x10] sm:$0xff]  ;;  %v9109_v3 = vpack.c.bf16 %v265_v1, %v264_v0  ;;  %v267_v4 = vld [vmem:[#allocation2 + $0x18] sm:$0xff]  ;;  %v268_v6 = vld [vmem:[#allocation2 + $0x20] sm:$0xff]  ;;  %vm10274_vm0 = vmmov 0   ;;  %vm579_vm1 = vcmask 261120   ;;  %s10275_s29 = smov 96  }
 0x128   :  { %v9113_v5 = vpack.c.bf16 %v267_v4, %v266_v2  ;;  %v269_v7 = vld [vmem:[#allocation2 + $0x28] sm:$0xff]  ;;  %v270_v9 = vld [vmem:[#allocation2 + $0x30] sm:$0xff]  ;;  %v271_v10 = vld [vmem:[#allocation2 + $0x38] sm:$0xff]  ;;  %vm657_vm2 = vcmask 64512   ;;  %s10276_s9 = smov 64   ;;  %vm1254_vm3 = vcmask 523264  }
 0x129   :  { %9110 = vmatprep.subr.bf16.mxu0 %v9109_v3  ;;  %v9117_v8 = vpack.c.bf16 %v269_v7, %v268_v6  ;;  %v363_v12 = vld [vmem:[#allocation5 + $0x8] sm:$0xff]  ;;  %v366_v13 = vld [vmem:[#allocation5 + $0x20] sm:$0xff]  ;;  %v365_v16 = vld [vmem:[#allocation5 + $0x18] sm:$0xff]  ;;  %v9121_v21 = vpack.c.bf16 %v271_v10, %v270_v9  ;;  %vm1256_vm4 = vcmask 785408   ;;  %s11537_s5 = sld [smem:[#allocation33_spill]]  ;;  %s11538_s19 = sld [smem:[#allocation43_spill]] }
 0x12a   :  { %9112 = vmatpush3.bf16.msra.mxu0 %v9109_v3  ;;  %v362_v14 = vld [vmem:[#allocation5] sm:$0xff]  ;;  %v9141_v15 = vpack.c.bf16 %v366_v13, %v363_v12  ;;  %v369_v18 = vld [vmem:[#allocation5 + $0x38] sm:$0xff]  ;;  %v372_v19 = vld [vmem:[#allocation5 + $0x50] sm:$0xff]  ;;  %vm7796_vm5 = vcmask 1040384   ;;  %s11539_s8 = sld [smem:[#allocation44_spill]]  ;;  %vm7895_vm7 = vcmask 1041408  }
 0x12b   :  { %9114 = vmatprep.subr.bf16.mxu0 %v9113_v5  ;;  %v9143_v17 = vpack.c.bf16 %v365_v16, %v362_v14  ;;  %v368_v20 = vld [vmem:[#allocation5 + $0x30] sm:$0xff]  ;;  %v272_v22 = vld [vmem:[#allocation2 + $0x40] sm:$0xff]  ;;  %v9145_v23 = vpack.c.bf16 %v372_v19, %v369_v18  ;;  %v371_v24 = vld [vmem:[#allocation5 + $0x48] sm:$0xff]  ;;  %s10278_s22 = smov [#allocation23]  }
 0x12c   :  { %v260_v11 = vld [vmem:[%s11535_s26] sm:$0xff]  ;;  %9142 = vmatprep.subr.bf16.mxu1 %v9141_v15  ;;  %v273_v25 = vld [vmem:[#allocation2 + $0x48] sm:$0xff]  ;;  %v9147_v26 = vpack.c.bf16 %v371_v24, %v368_v20  ;;  %v377_v31 = vld [vmem:[#allocation5 + $0x78] sm:$0xff] }
 0x12d   :  { %8471 = vmatprep.mubr.f32.mxu0 %v260_v11  ;;  %9144 = vmatpush1.bf16.msra.mxu1 %v9143_v17  ;;  %v375_v27 = vld [vmem:[#allocation5 + $0x68] sm:$0xff]  ;;  %v378_v28 = vld [vmem:[#allocation5 + $0x80] sm:$0xff]  ;;  %v381_v32 = vld [vmem:[#allocation5 + $0x98] sm:$0xff]  ;;  %v9125_v34 = vpack.c.bf16 %v273_v25, %v272_v22 }
 0x12e   :  { %9116 = vmatpush3.bf16.msra.mxu0 %v9113_v5  ;;  %9146 = vmatprep.subr.bf16.mxu1 %v9145_v23  ;;  %v9149_v29 = vpack.c.bf16 %v378_v28, %v375_v27  ;;  %v374_v30 = vld [vmem:[#allocation5 + $0x60] sm:$0xff]  ;;  %v384_v33 = vld [vmem:[#allocation5 + $0xb0] sm:$0xff]  ;;  %v275_v36 = vld [vmem:[#allocation2 + $0x58] sm:$0xff] }
 0x12f   :  { %9118 = vmatprep.subr.bf16.mxu0 %v9117_v8  ;;  %v274_v35 = vld [vmem:[#allocation2 + $0x50] sm:$0xff]  ;;  %v9151_v37 = vpack.c.bf16 %v377_v31, %v374_v30  ;;  %v9153_v38 = vpack.c.bf16 %v384_v33, %v381_v32  ;;  %v383_v40 = vld [vmem:[#allocation5 + $0xa8] sm:$0xff]  ;;  %v390_v42 = vld [vmem:[#allocation5 + $0xe0] sm:$0xff] }
 0x130   :  { %v380_v39 = vld [vmem:[#allocation5 + $0x90] sm:$0xff]  ;;  %v387_v41 = vld [vmem:[#allocation5 + $0xc8] sm:$0xff]  ;;  %v9129_v43 = vpack.c.bf16 %v275_v36, %v274_v35  ;;  %v276_v44 = vld [vmem:[#allocation2 + $0x60] sm:$0xff] }
 0x131   :  { %9148 = vmatpush1.bf16.msra.mxu1 %v9147_v26  ;;  %v277_v45 = vld [vmem:[#allocation2 + $0x68] sm:$0xff]  ;;  %v9155_v46 = vpack.c.bf16 %v383_v40, %v380_v39  ;;  %v9157_v47 = vpack.c.bf16 %v390_v42, %v387_v41  ;;  %v386_v48 = vld [vmem:[#allocation5 + $0xc0] sm:$0xff]  ;;  %v389_v49 = vld [vmem:[#allocation5 + $0xd8] sm:$0xff]  ;;  %v412_v40 = vlaneseq }
 0x132   :  { %9120 = vmatpush3.bf16.msra.mxu0 %v9117_v8  ;;  %9150 = vmatprep.subr.bf16.mxu1 %v9149_v29  ;;  %v393_v50 = vld [vmem:[#allocation5 + $0xf8] sm:$0xff]  ;;  %v396_v51 = vld [vmem:[#allocation5 + $0x110] sm:$0xff]  ;;  %v9133_v52 = vpack.c.bf16 %v277_v45, %v276_v44  ;;  %v9159_v55 = vpack.c.bf16 %v389_v49, %v386_v48  ;;  %v395_v58 = vld [vmem:[#allocation5 + $0x108] sm:$0xff] }
 0x133   :  { %9122 = vmatprep.subr.bf16.mxu0 %v9121_v21  ;;  %v278_v53 = vld [vmem:[#allocation2 + $0x70] sm:$0xff]  ;;  %v279_v54 = vld [vmem:[#allocation2 + $0x78] sm:$0xff]  ;;  %v9161_v56 = vpack.c.bf16 %v396_v51, %v393_v50  ;;  %v399_v59 = vld [vmem:[#allocation5 + $0x128] sm:$0xff]  ;;  %v10633_v41 = vshrl.u32 %v412_v40, 7 }
 0x134   :  { %v392_v57 = vld [vmem:[#allocation5 + $0xf0] sm:$0xff]  ;;  %v402_v60 = vld [vmem:[#allocation5 + $0x140] sm:$0xff]  ;;  %v9137_v61 = vpack.c.bf16 %v279_v54, %v278_v53  ;;  %v367_v63 = vld [vmem:[#allocation5 + $0x28] sm:$0xff] }
 0x135   :  { %9152 = vmatpush1.bf16.msra.mxu1 %v9151_v37  ;;  %v364_v62 = vld [vmem:[#allocation5 + $0x10] sm:$0xff]  ;;  %v9163_v0 = vpack.c.bf16 %v395_v58, %v392_v57  ;;  %v9165_v1 = vpack.c.bf16 %v402_v60, %v399_v59  ;;  %v398_v2 = vld [vmem:[#allocation5 + $0x120] sm:$0xff]  ;;  %v401_v3 = vld [vmem:[#allocation5 + $0x138] sm:$0xff]  ;;  %v10636_v42 = vsub.s32 1, %v10633_v41  ;;  %v10640_v45 = vsub.s32 0, %v10633_v41 }
 0x136   :  { %9124 = vmatpush3.bf16.msra.mxu0 %v9121_v21  ;;  %9154 = vmatprep.subr.bf16.mxu1 %v9153_v38  ;;  %v9173_v4 = vpack.c.bf16 %v367_v63, %v364_v62  ;;  %v370_v5 = vld [vmem:[#allocation5 + $0x40] sm:$0xff]  ;;  %v373_v6 = vld [vmem:[#allocation5 + $0x58] sm:$0xff]  ;;  %v9167_v7 = vpack.c.bf16 %v401_v3, %v398_v2  ;;  %v261_v8 = vld [vmem:[%s11535_s26 + $0x8] sm:$0xff] }
 0x137   :  { %9126 = vmatprep.subr.bf16.mxu0 %v9125_v34  ;;  %v9177_v9 = vpack.c.bf16 %v373_v6, %v370_v5  ;;  %v376_v10 = vld [vmem:[#allocation5 + $0x70] sm:$0xff]  ;;  %v379_v11 = vld [vmem:[#allocation5 + $0x88] sm:$0xff]  ;;  %v382_v13 = vld [vmem:[#allocation5 + $0xa0] sm:$0xff] }
 0x138   :  { %v9181_v12 = vpack.c.bf16 %v379_v11, %v376_v10  ;;  %v385_v14 = vld [vmem:[#allocation5 + $0xb8] sm:$0xff]  ;;  %v388_v16 = vld [vmem:[#allocation5 + $0xd0] sm:$0xff]  ;;  %v391_v17 = vld [vmem:[#allocation5 + $0xe8] sm:$0xff] }
 0x139   :  { %9156 = vmatpush1.bf16.msra.mxu1 %v9155_v46  ;;  %v9185_v15 = vpack.c.bf16 %v385_v14, %v382_v13  ;;  %v9189_v18 = vpack.c.bf16 %v391_v17, %v388_v16  ;;  %v394_v19 = vld [vmem:[#allocation5 + $0x100] sm:$0xff]  ;;  %v397_v20 = vld [vmem:[#allocation5 + $0x118] sm:$0xff]  ;;  %v400_v22 = vld [vmem:[#allocation5 + $0x130] sm:$0xff] }
 0x13a   :  { %9128 = vmatpush3.bf16.msra.mxu0 %v9125_v34  ;;  %9158 = vmatprep.subr.bf16.mxu1 %v9157_v47  ;;  %v9193_v21 = vpack.c.bf16 %v397_v20, %v394_v19  ;;  %v403_v23 = vld [vmem:[#allocation5 + $0x148] sm:$0xff]  ;;  %v405_v25 = vld [vmem:[#allocation5 + $0x158] sm:$0xff]  ;;  %v408_v26 = vld [vmem:[#allocation5 + $0x170] sm:$0xff]  ;;  %v10273_v34 = vmov 0.0  }
 0x13b   :  { %9130 = vmatprep.subr.bf16.mxu0 %v9129_v43  ;;  %v9197_v24 = vpack.c.bf16 %v403_v23, %v400_v22  ;;  %v9169_v27 = vpack.c.bf16 %v408_v26, %v405_v25  ;;  %v404_v28 = vld [vmem:[#allocation5 + $0x150] sm:$0xff]  ;;  %v407_v29 = vld [vmem:[#allocation5 + $0x168] sm:$0xff]  ;;  %v406_v30 = vld [vmem:[#allocation5 + $0x160] sm:$0xff]  ;;  %491 = vmatprep.mubr.f32.mxu1 %v10273_v34 }
 0x13c   :  { %v9171_v31 = vpack.c.bf16 %v407_v29, %v404_v28  ;;  %v409_v32 = vld [vmem:[#allocation5 + $0x178] sm:$0xff]  ;;  %v7929_v35 = vld [vmem:[%s11536_s11] ss:$0 sm:$0xff]  ;;  %s7914_s11 = sshll.u32 %s10278_s22, 4  ;;  %s7915_s11 = int_to_ptr.vmem [resolvable:$true] %s7914_s11 }
 0x13d   :  { %9160 = vmatpush1.bf16.msra.mxu1 %v9159_v55  ;;  %v9201_v33 = vpack.c.bf16 %v409_v32, %v406_v30  ;;  %v410_v44 = vld [vmem:[#allocation7] sm:$0x7]  ;;  %s10211_s10 = scalar_lea.vmem %s7915_s11, 32  ;;  %p10216_p7 = scmp.lt.s32.totalorder %s7915_s11, %s7915_s11 }
 0x13e   :  { %9132 = vmatpush3.bf16.msra.mxu0 %v9129_v43  ;;  %9162 = vmatprep.subr.bf16.mxu1 %v9161_v56  ;;  %v422_v43 = vsub.s32 2, %v10633_v41  ;;  %v419_v46 = vrot.slane %v410_v44, %v10636_v42  ;;  %v415_v49 = vrot.slane %v410_v44, %v10640_v45  ;;  %p10212_p6 = scmp.ne.s32.totalorder %s7915_s11, %s10211_s10  ;;  %p10217_p8 = scmp.lt.s32.totalorder %s10211_s10, %s10211_s10 }
 0x13f   :  { %9134 = vmatprep.subr.bf16.mxu0 %v9133_v52 }
 0x140   :  { %v423_v47 = vrot.slane %v410_v44, %v422_v43  ;;  %p10218_p9 = por %p10217_p8, %p10216_p7 }
 0x141   :  { %9164 = vmatpush1.bf16.msra.mxu1 %v9163_v0 }
 0x142   :  { %9136 = vmatpush3.bf16.msra.mxu0 %v9133_v52  ;;  %9166 = vmatprep.subr.bf16.mxu1 %v9165_v1  ;;  %p10219_p10 = pnand %p10218_p9, %p10212_p6 }
 0x143   :  { %9138 = vmatprep.subr.bf16.mxu0 %v9137_v61 }
 0x145   :  { %9168 = vmatpush1.bf16.msra.mxu1 %v9167_v7 }
 0x146   :  { %9140 = vmatpush3.bf16.msra.mxu0 %v9137_v61  ;;  %9170 = vmatprep.subr.bf16.mxu1 %v9169_v27 }
 0x147   :  { %9174 = vmatprep.subr.bf16.mxu0 %v9173_v4 }
 0x149   :  { %8472 = vmatmul.mubr.f32.vlgmr.msra.gmra.mrb[0].mxu0 %v261_v8  ;;  %9172 = vmatpush1.bf16.msra.mxu1 %v9171_v31 }
 0x14a   :  { %9176 = vmatpush3.bf16.msra.mxu0 %v9173_v4  ;;  %8509 = vmatprep.subr.mxu1 %v10273_v34 }
 0x14b   :  { %9178 = vmatprep.subr.bf16.mxu0 %v9177_v9 }
 0x14e   :  { %9180 = vmatpush3.bf16.msra.mxu0 %v9177_v9 }
 0x14f   :  { %9182 = vmatprep.subr.bf16.mxu0 %v9181_v12 }
 0x152   :  { %9184 = vmatpush3.bf16.msra.mxu0 %v9181_v12 }
 0x153   :  { %9186 = vmatprep.subr.bf16.mxu0 %v9185_v15 }
 0x156   :  { %9188 = vmatpush3.bf16.msra.mxu0 %v9185_v15 }
 0x157   :  { %9190 = vmatprep.subr.bf16.mxu0 %v9189_v18 }
 0x15a   :  { %9192 = vmatpush3.bf16.msra.mxu0 %v9189_v18 }
 0x15b   :  { %9194 = vmatprep.subr.bf16.mxu0 %v9193_v21 }
 0x15e   :  { %9196 = vmatpush3.bf16.msra.mxu0 %v9193_v21 }
 0x15f   :  { %9198 = vmatprep.subr.bf16.mxu0 %v9197_v24 }
 0x162   :  { %9200 = vmatpush3.bf16.msra.mxu0 %v9197_v24 }
 0x163   :  { %9202 = vmatprep.subr.bf16.mxu0 %v9201_v33 }
 0x166   :  { %9204 = vmatpush3.bf16.msra.mxu0 %v9201_v33 }
 0x167   :  { %8544 = vmatprep.subr.mxu0 %v10273_v34 }
 0x21c   :  { %v8473_v36 = vpop.f32.mrb[0].mxu0 }
 0x21d   :  { %v353_v37 = vpop.f32.mrb[1].mxu0  ;;  %v10621_v39 = vadd.f32 %v8473_v36, %v7929_v35 }
 0x21e   :  { %v10619_v38 = vadd.f32 %v7929_v35, %v353_v37 }
 0x220   :  { %492 = vmatmul.mubr.f32.vlgmr.msra.gmra.mrb[0].mxu1 %v10619_v38  ;;  %8506 = vmatprep.mubr.f32.mxu0 %v10619_v38 }
 0x221   :  { %8507 = vmatmul.mubr.f32.vlgmr.msra.gmra.mrb[2].mxu0 %v10621_v39  ;;  %497 = vmatprep.mubr.f32.mxu1 %v10273_v34 }
 0x222   :  { %8546 = vmatprep.mubr.msk.f32.mxu0 %vm10274_vm0, %v10273_v34 }
 0x224   :  { %498 = vmatmul.mubr.f32.gmra.mrb[2].mxu1 %v10621_v39 }
 0x225   :  { %8511 = vmatprep.mubr.msk.f32.mxu1 %vm10274_vm0, %v10273_v34 }
 0x2f3   :  { %v493_v48 = vpop.f32.mrb[0].mxu1 }
 0x2f4   :  { %v495_v50 = vpop.f32.mrb[1].mxu1  ;;  %v8508_v51 = vpop.f32.mrb[2].mxu0  ;;  %v494_v56 = vadd.f32 %v493_v48, %v415_v49 }
 0x2f5   :  { %v10646_v52 = vadd.f32 %v495_v50, %v419_v46  ;;  %v10648_v53 = vadd.f32 %v8508_v51, %v423_v47  ;;  %v570_v54 = vpop.f32.mrb[3].mxu0 }
 0x2f6   :  { %v10657_v59 = vadd.f32 %v570_v54, %v423_v47 }
 0x2f7   :  { %v499_v55 = vpop.f32.mrb[2].mxu1  ;;  %744 = vrot.lane.b32.xlu1 %v10646_v52, %s10275_s29  ;;  %8510 = vmatpush3.xpose.msk.msra.mxu1 %vm579_vm1, %v10646_v52 }
 0x2f8   :  { %v10654_v57 = vadd.f32 %v499_v55, %v415_v49  ;;  %v501_v58 = vpop.f32.mrb[3].mxu1  ;;  %8514 = vmatprep.subr.mxu1 %v10273_v34 }
 0x2f9   :  { %v10659_v60 = vadd.f32 %v501_v58, %v419_v46 }
 0x2fa   :  { %8512 = vmatmul.mubr.msk.f32.vlgmr.msra.gmra.mrb[4].mxu1 %vm579_vm1, %v494_v56 }
 0x2fb   :  { %742 = vrot.lane.b32.xlu1 %v494_v56, %s10275_s29  ;;  %8515 = vmatpush3.msra.mxu1 %v10657_v59 }
 0x2fc   :  { %8516 = vmatprep.mubr.msk.f32.mxu1 %vm10274_vm0, %v10273_v34  ;;  %8519 = vmatprep.subr.mxu1 %v10273_v34 }
 0x369   :  { %v745_v8 = vpop.permute.xlu1 %744 }
 0x36d   :  { %v743_v10 = vpop.permute.xlu1 %742 }
 0x3cd   :  { %v652_v61 = vpop.f32.mrb[4].mxu1 }
 0x3ce   :  { %v656_v62 = vmul.f32 0.17677669, %v652_v61  ;;  %v8513_v63 = vpop.f32.mrb[5].mxu1 }
 0x3d0   :  { %v658_v0 = vsel %vm657_vm2, %v656_v62, -inf }
 0x3d1   :  { %659 = vmax.xlane.f32.xlu0 %v658_v0 }
 0x45e   :  { %v660_v1 = vpop.xlane.xlu0 %659 }
 0x45f   :  { %v661_v2 = vsub.f32 %v656_v62, %v660_v1 }
 0x461   :  { %v662_v3 = vmul.f32 1.442695, %v661_v2 }
 0x463   :  { %9767 = vpow2.f32 %v662_v3 }
 0x46d   :  { %v9768_v4 = vpop.eup %9767 }
 0x46e   :  { %v664_v5 = vsel %vm657_vm2, %v9768_v4, 0.0 }
 0x46f   :  { %665 = vadd.xlane.f32.xlu0 %v664_v5 }
 0x4fc   :  { %v666_v6 = vpop.xlane.xlu0 %665 }
 0x4fd   :  { %9769 = vrcp.f32 %v666_v6 }
 0x507   :  { %v9770_v7 = vpop.eup %9769 }
 0x508   :  { %v668_v9 = vmul.f32 %v9770_v7, %v9768_v4 }
 0x50a   :  { %8517 = vmatmul.mubr.msk.f32.vlgmr.msra.gmra.mrb[6].mxu1 %vm657_vm2, %v668_v9 }
 0x50b   :  { %8520 = vmatpush3.xpose.msk.msra.mxu1 %vm579_vm1, %v745_v8  ;;  %8521 = vmatprep.mubr.msk.f32.mxu1 %vm10274_vm0, %v10273_v34 }
 0x50c   :  { %8524 = vmatprep.subr.mxu1 %v10273_v34 }
 0x50e   :  { %8522 = vmatmul.mubr.msk.f32.vlgmr.msra.gmra.mrb[8].mxu1 %vm579_vm1, %v743_v10 }
 0x50f   :  { %8526 = vmatprep.mubr.msk.f32.mxu1 %vm10274_vm0, %v10273_v34 }
 0x5dd   :  { %v10677_v11 = vpop.f32.mrb[6].mxu1 }
 0x5de   :  { %v8518_v12 = vpop.f32.mrb[7].mxu1 }
 0x5e1   :  { %v816_v13 = vpop.f32.mrb[8].mxu1 }
 0x5e2   :  { %v820_v14 = vmul.f32 0.17677669, %v816_v13  ;;  %v8523_v15 = vpop.f32.mrb[9].mxu1 }
 0x5e4   :  { %v821_v16 = vsel %vm657_vm2, %v820_v14, -inf }
 0x5e5   :  { %822 = vmax.xlane.f32.xlu0 %v821_v16 }
 0x5fb   :  { %833 = vrot.lane.b32.xlu0 %v10657_v59, %s10275_s29 }
 0x5ff   :  { %911 = vrot.lane.b32.xlu0 %v10646_v52, %s10276_s9 }
 0x603   :  { %909 = vrot.lane.b32.xlu0 %v494_v56, %s10276_s9 }
 0x672   :  { %v823_v17 = vpop.xlane.xlu0 %822 }
 0x673   :  { %v824_v18 = vsub.f32 %v820_v14, %v823_v17 }
 0x675   :  { %v825_v19 = vmul.f32 1.442695, %v824_v18 }
 0x676   :  { %v834_v20 = vpop.permute.xlu0 %833 }
 0x677   :  { %9771 = vpow2.f32 %v825_v19  ;;  %8525 = vmatpush3.msra.mxu1 %v834_v20 }
 0x678   :  { %8529 = vmatprep.subr.mxu1 %v10273_v34 }
 0x67a   :  { %v912_v25 = vpop.permute.xlu0 %911 }
 0x67e   :  { %v910_v27 = vpop.permute.xlu0 %909 }
 0x681   :  { %v9772_v21 = vpop.eup %9771 }
 0x682   :  { %v827_v22 = vsel %vm657_vm2, %v9772_v21, 0.0 }
 0x683   :  { %828 = vadd.xlane.f32.xlu1 %v827_v22 }
 0x694   :  { %999 = vrot.lane.b32.xlu1 %v10657_v59, %s10276_s9 }
 0x698   :  { %1077 = vrot.lane.b32.xlu1 %v10646_v52, %s10269_s3 }
 0x69c   :  { %1075 = vrot.lane.b32.xlu1 %v494_v56, %s10269_s3 }
 0x6a0   :  { %1419 = vrot.lane.b32.xlu1 %v10654_v57, %s10275_s29 }
 0x710   :  { %v829_v23 = vpop.xlane.xlu1 %828 }
 0x711   :  { %9773 = vrcp.f32 %v829_v23 }
 0x714   :  { %v1000_v28 = vpop.permute.xlu1 %999 }
 0x718   :  { %v1078_v48 = vpop.permute.xlu1 %1077 }
 0x71b   :  { %v9774_v24 = vpop.eup %9773 }
 0x71c   :  { %v831_v26 = vmul.f32 %v9774_v24, %v9772_v21  ;;  %v1076_v49 = vpop.permute.xlu1 %1075 }
 0x71e   :  { %8527 = vmatmul.mubr.msk.f32.vlgmr.msra.gmra.mrb[10].mxu1 %vm657_vm2, %v831_v26 }
 0x71f   :  { %8530 = vmatpush3.xpose.msk.msra.mxu1 %vm579_vm1, %v912_v25  ;;  %8531 = vmatprep.mubr.msk.f32.mxu1 %vm10274_vm0, %v10273_v34 }
 0x720   :  { %8534 = vmatprep.subr.mxu1 %v10273_v34  ;;  %v1420_v50 = vpop.permute.xlu1 %1419 }
 0x722   :  { %8532 = vmatmul.mubr.msk.f32.vlgmr.msra.gmra.mrb[12].mxu1 %vm579_vm1, %v910_v27 }
 0x723   :  { %8535 = vmatpush3.msra.mxu1 %v1000_v28  ;;  %8536 = vmatprep.mubr.msk.f32.mxu1 %vm10274_vm0, %v10273_v34 }
 0x724   :  { %8539 = vmatprep.subr.mxu1 %v10273_v34 }
 0x7f1   :  { %v10703_v29 = vpop.f32.mrb[10].mxu1 }
 0x7f2   :  { %v8528_v30 = vpop.f32.mrb[11].mxu1 }
 0x7f5   :  { %v983_v31 = vpop.f32.mrb[12].mxu1 }
 0x7f6   :  { %v987_v32 = vmul.f32 0.17677669, %v983_v31  ;;  %v8533_v33 = vpop.f32.mrb[13].mxu1 }
 0x7f8   :  { %v988_v35 = vsel %vm657_vm2, %v987_v32, -inf }
 0x7f9   :  { %989 = vmax.xlane.f32.xlu0 %v988_v35 }
 0x80f   :  { %1421 = vrot.lane.b32.xlu0 %v10659_v60, %s10275_s29 }
 0x886   :  { %v990_v36 = vpop.xlane.xlu0 %989 }
 0x887   :  { %v991_v37 = vsub.f32 %v987_v32, %v990_v36 }
 0x889   :  { %v992_v44 = vmul.f32 1.442695, %v991_v37 }
 0x88a   :  { %v1422_v58 = vpop.permute.xlu0 %1421 }
 0x88b   :  { %9775 = vpow2.f32 %v992_v44 }
 0x895   :  { %v9776_v46 = vpop.eup %9775 }
 0x896   :  { %v994_v47 = vsel %vm657_vm2, %v9776_v46, 0.0 }
 0x897   :  { %995 = vadd.xlane.f32.xlu1 %v994_v47 }
 0x8a8   :  { %1588 = vrot.lane.b32.xlu1 %v10659_v60, %s10276_s9 }
 0x8ac   :  { %1586 = vrot.lane.b32.xlu1 %v10654_v57, %s10276_s9 }
 0x8b0   :  { %1754 = vrot.lane.b32.xlu1 %v10659_v60, %s10269_s3 }
 0x8b4   :  { %1752 = vrot.lane.b32.xlu1 %v10654_v57, %s10269_s3 }
 0x924   :  { %v996_v51 = vpop.xlane.xlu1 %995 }
 0x925   :  { %9777 = vrcp.f32 %v996_v51 }
 0x928   :  { %v1589_v55 = vpop.permute.xlu1 %1588 }
 0x92c   :  { %v1587_v56 = vpop.permute.xlu1 %1586 }
 0x92f   :  { %v9778_v52 = vpop.eup %9777 }
 0x930   :  { %v998_v54 = vmul.f32 %v9778_v52, %v9776_v46 }
 0x932   :  { %8537 = vmatmul.mubr.msk.f32.vlgmr.msra.gmra.mrb[14].mxu1 %vm657_vm2, %v998_v54 }
 0x933   :  { %8540 = vmatpush3.xpose.msk.msra.mxu1 %vm579_vm1, %v1078_v48  ;;  %8541 = vmatprep.mubr.msk.f32.mxu1 %vm10274_vm0, %v10273_v34 }
 0x934   :  { %8549 = vmatprep.subr.mxu1 %v10273_v34 }
 0x936   :  { %8542 = vmatmul.mubr.msk.f32.vlgmr.msra.gmra.mrb[16].mxu1 %vm579_vm1, %v1076_v49 }
 0x937   :  { %8550 = vmatpush3.xpose.msk.msra.mxu1 %vm579_vm1, %v10659_v60  ;;  %8551 = vmatprep.mubr.msk.f32.mxu1 %vm10274_vm0, %v10273_v34  ;;  %v1755_v60 = vpop.permute.xlu1 %1754 }
 0x938   :  { %8559 = vmatprep.subr.mxu1 %v10273_v34 }
 0x93a   :  { %8552 = vmatmul.mubr.msk.f32.vlgmr.msra.gmra.mrb[18].mxu1 %vm579_vm1, %v10654_v57 }
 0x93b   :  { %8560 = vmatpush3.xpose.msk.msra.mxu1 %vm579_vm1, %v1422_v58  ;;  %8561 = vmatprep.mubr.msk.f32.mxu1 %vm10274_vm0, %v10273_v34  ;;  %v1753_v57 = vpop.permute.xlu1 %1752 }
 0x93c   :  { %8569 = vmatprep.subr.mxu1 %v10273_v34 }
 0x93e   :  { %8562 = vmatmul.mubr.msk.f32.vlgmr.msra.gmra.mrb[20].mxu1 %vm579_vm1, %v1420_v50 }
 0x93f   :  { %8570 = vmatpush3.xpose.msk.msra.mxu1 %vm579_vm1, %v1589_v55  ;;  %8571 = vmatprep.mubr.msk.f32.mxu1 %vm10274_vm0, %v10273_v34 }
 0x940   :  { %8579 = vmatprep.subr.mxu1 %v10273_v34 }
 0x942   :  { %8572 = vmatmul.mubr.msk.f32.vlgmr.msra.gmra.mrb[22].mxu1 %vm579_vm1, %v1587_v56 }
 0x943   :  { %8580 = vmatpush3.xpose.msk.msra.mxu1 %vm579_vm1, %v1755_v60  ;;  %8581 = vmatprep.mubr.msk.f32.mxu1 %vm10274_vm0, %v10273_v34 }
 0x946   :  { %8582 = vmatmul.mubr.msk.f32.vlgmr.msra.gmra.mrb[24].mxu1 %vm579_vm1, %v1753_v57 }
 0xa05   :  { %v10744_v61 = vpop.f32.mrb[14].mxu1 }
 0xa06   :  { %v8538_v62 = vpop.f32.mrb[15].mxu1 }
 0xa09   :  { %v1149_v63 = vpop.f32.mrb[16].mxu1 }
 0xa0a   :  { %v1153_v0 = vmul.f32 0.17677669, %v1149_v63  ;;  %v8543_v1 = vpop.f32.mrb[17].mxu1 }
 0xa0c   :  { %v1154_v2 = vsel %vm657_vm2, %v1153_v0, -inf }
 0xa0d   :  { %1155 = vmax.xlane.f32.xlu1 %v1154_v2  ;;  %v1330_v3 = vpop.f32.mrb[18].mxu1 }
 0xa0e   :  { %v1334_v4 = vmul.f32 0.17677669, %v1330_v3  ;;  %v8553_v5 = vpop.f32.mrb[19].mxu1 }
 0xa10   :  { %v1335_v6 = vsel %vm657_vm2, %v1334_v4, -inf }
 0xa11   :  { %1336 = vmax.xlane.f32.xlu0 %v1335_v6  ;;  %v1493_v7 = vpop.f32.mrb[20].mxu1 }
 0xa12   :  { %v1497_v8 = vmul.f32 0.17677669, %v1493_v7  ;;  %v8563_v9 = vpop.f32.mrb[21].mxu1 }
 0xa14   :  { %v1498_v10 = vsel %vm657_vm2, %v1497_v8, -inf }
 0xa15   :  { %1499 = vmax.xlane.f32.xlu0 %v1498_v10  ;;  %v1660_v12 = vpop.f32.mrb[22].mxu1  ;;  %v1933_v10 = vld [vmem:[#allocation8] sm:$0xff] }
 0xa16   :  { %v1664_v13 = vmul.f32 0.17677669, %v1660_v12  ;;  %v8573_v14 = vpop.f32.mrb[23].mxu1  ;;  %v1934_v12 = vld [vmem:[#allocation8 + $0x8] sm:$0xff] }
 0xa17   :  { %v9205_v14 = vpack.c.bf16 %v1934_v12, %v1933_v10 }
 0xa18   :  { %v1665_v15 = vsel %vm657_vm2, %v1664_v13, -inf }
 0xa19   :  { %1666 = vmax.xlane.f32.xlu1 %v1665_v15  ;;  %v1826_v16 = vpop.f32.mrb[24].mxu1  ;;  %v1936_v15 = vld [vmem:[#allocation8 + $0x18] sm:$0xff]  ;;  %9206 = vmatprep.subr.bf16.mxu1 %v9205_v14 }
 0xa1a   :  { %v1830_v17 = vmul.f32 0.17677669, %v1826_v16  ;;  %v8583_v18 = vpop.f32.mrb[25].mxu1  ;;  %9208 = vmatpush3.bf16.msra.mxu1 %v9205_v14  ;;  %v2173_v14 = vld [vmem:[#allocation14 + $0x8] sm:$0xff] }
 0xa1b   :  { %v1938_v18 = vld [vmem:[#allocation8 + $0x28] sm:$0xff] }
 0xa1c   :  { %v1831_v19 = vsel %vm657_vm2, %v1830_v17, -inf }
 0xa1d   :  { %1832 = vmax.xlane.f32.xlu0 %v1831_v19 }
 0xa9a   :  { %v1156_v20 = vpop.xlane.xlu1 %1155 }
 0xa9b   :  { %v1157_v21 = vsub.f32 %v1153_v0, %v1156_v20  ;;  %v1939_v20 = vld [vmem:[#allocation8 + $0x30] sm:$0xff] }
 0xa9d   :  { %v1158_v22 = vmul.f32 1.442695, %v1157_v21  ;;  %v1940_v21 = vld [vmem:[#allocation8 + $0x38] sm:$0xff] }
 0xa9e   :  { %v1337_v23 = vpop.xlane.xlu0 %1336 }
 0xa9f   :  { %9779 = vpow2.f32 %v1158_v22  ;;  %v1338_v24 = vsub.f32 %v1334_v4, %v1337_v23  ;;  %v9217_v22 = vpack.c.bf16 %v1940_v21, %v1939_v20  ;;  %v1941_v23 = vld [vmem:[#allocation8 + $0x40] sm:$0xff]  ;;  %v2075_v20 = vld [vmem:[#allocation11 + $0x8] sm:$0xff] }
 0xaa1   :  { %v1339_v25 = vmul.f32 1.442695, %v1338_v24  ;;  %v1942_v24 = vld [vmem:[#allocation8 + $0x48] sm:$0xff] }
 0xaa2   :  { %v1500_v31 = vpop.xlane.xlu0 %1499 }
 0xaa3   :  { %9781 = vpow2.f32 %v1339_v25  ;;  %v1501_v32 = vsub.f32 %v1497_v8, %v1500_v31  ;;  %v9221_v25 = vpack.c.bf16 %v1942_v24, %v1941_v23  ;;  %v1943_v31 = vld [vmem:[#allocation8 + $0x50] sm:$0xff]  ;;  %v2179_v24 = vld [vmem:[#allocation14 + $0x38] sm:$0xff] }
 0xaa4   :  { %v2177_v23 = vld [vmem:[#allocation14 + $0x28] sm:$0xff] }
 0xaa5   :  { %v1502_v37 = vmul.f32 1.442695, %v1501_v32  ;;  %v1944_v32 = vld [vmem:[#allocation8 + $0x58] sm:$0xff] }
 0xaa6   :  { %v1667_v33 = vpop.xlane.xlu1 %1666 }
 0xaa7   :  { %v1668_v36 = vsub.f32 %v1664_v13, %v1667_v33  ;;  %9783 = vpow2.f32 %v1502_v37  ;;  %v1935_v13 = vld [vmem:[#allocation8 + $0x10] sm:$0xff]  ;;  %v9225_v33 = vpack.c.bf16 %v1944_v32, %v1943_v31  ;;  %v2183_v32 = vld [vmem:[#allocation14 + $0x58] sm:$0xff] }
 0xaa8   :  { %v9209_v16 = vpack.c.bf16 %v1936_v15, %v1935_v13  ;;  %v2175_v15 = vld [vmem:[#allocation14 + $0x18] sm:$0xff]  ;;  %v2181_v31 = vld [vmem:[#allocation14 + $0x48] sm:$0xff] }
 0xaa9   :  { %v9780_v26 = vpop.eup %9779  ;;  %v1669_v46 = vmul.f32 1.442695, %v1668_v36  ;;  %v1946_v36 = vld [vmem:[#allocation8 + $0x68] sm:$0xff] }
 0xaaa   :  { %v1160_v27 = vsel %vm657_vm2, %v9780_v26, 0.0  ;;  %v1833_v35 = vpop.xlane.xlu0 %1832  ;;  %9210 = vmatprep.subr.bf16.mxu1 %v9209_v16 }
 0xaab   :  { %1161 = vadd.xlane.f32.xlu1 %v1160_v27  ;;  %v1834_v44 = vsub.f32 %v1830_v17, %v1833_v35  ;;  %9785 = vpow2.f32 %v1669_v46  ;;  %v1937_v17 = vld [vmem:[#allocation8 + $0x20] sm:$0xff]  ;;  %9212 = vmatpush3.bf16.msra.mxu1 %v9209_v16  ;;  %v1948_v46 = vld [vmem:[#allocation8 + $0x78] sm:$0xff] }
 0xaac   :  { %v9213_v19 = vpack.c.bf16 %v1938_v18, %v1937_v17  ;;  %v1945_v35 = vld [vmem:[#allocation8 + $0x60] sm:$0xff]  ;;  %v9269_v17 = vpack.c.bf16 %v2175_v15, %v2173_v14  ;;  %v2174_v18 = vld [vmem:[#allocation14 + $0x10] sm:$0xff] }
 0xaad   :  { %v9782_v28 = vpop.eup %9781  ;;  %v1835_v47 = vmul.f32 1.442695, %v1834_v44  ;;  %v9229_v37 = vpack.c.bf16 %v1946_v36, %v1945_v35  ;;  %v1947_v44 = vld [vmem:[#allocation8 + $0x70] sm:$0xff]  ;;  %v2172_v16 = vld [vmem:[#allocation14] sm:$0xff]  ;;  %v2085_v15 = vld [vmem:[#allocation11 + $0x58] sm:$0xff] }
 0xaae   :  { %v1341_v30 = vsel %vm657_vm2, %v9782_v28, 0.0  ;;  %9214 = vmatprep.subr.bf16.mxu1 %v9213_v19  ;;  %v9271_v21 = vpack.c.bf16 %v2174_v18, %v2172_v16  ;;  %v2180_v35 = vld [vmem:[#allocation14 + $0x40] sm:$0xff]  ;;  %v2182_v36 = vld [vmem:[#allocation14 + $0x50] sm:$0xff]  ;;  %v2197_v18 = vld [vmem:[#allocation14 + $0xc8] sm:$0xff] }
 0xaaf   :  { %1342 = vadd.xlane.f32.xlu0 %v1341_v30  ;;  %9787 = vpow2.f32 %v1835_v47  ;;  %9216 = vmatpush3.bf16.msra.mxu1 %v9213_v19  ;;  %v9233_v47 = vpack.c.bf16 %v1948_v46, %v1947_v44  ;;  %v2074_v19 = vld [vmem:[#allocation11] sm:$0xff]  ;;  %v2084_v14 = vld [vmem:[#allocation11 + $0x50] sm:$0xff] }
 0xab0   :  { %9218 = vmatprep.subr.bf16.mxu1 %v9217_v22 }
 0xab1   :  { %v9784_v48 = vpop.eup %9783 }
 0xab2   :  { %v1504_v50 = vsel %vm657_vm2, %v9784_v48, 0.0 }
 0xab3   :  { %9220 = vmatpush3.bf16.msra.mxu1 %v9217_v22  ;;  %v9237_v22 = vpack.c.bf16 %v2075_v20, %v2074_v19  ;;  %v2199_v19 = vld [vmem:[#allocation14 + $0xd8] sm:$0xff]  ;;  %v2196_v20 = vld [vmem:[#allocation14 + $0xc0] sm:$0xff] }
 0xab4   :  { %9222 = vmatprep.subr.bf16.mxu1 %v9221_v25 }
 0xab5   :  { %v9786_v49 = vpop.eup %9785 }
 0xab7   :  { %9224 = vmatpush3.bf16.msra.mxu1 %v9221_v25  ;;  %v2176_v25 = vld [vmem:[#allocation14 + $0x20] sm:$0xff] }
 0xab8   :  { %9226 = vmatprep.subr.bf16.mxu1 %v9225_v33 }
 0xab9   :  { %v9788_v51 = vpop.eup %9787 }
 0xaba   :  { %v1837_v52 = vsel %vm657_vm2, %v9788_v51, 0.0 }
 0xabb   :  { %9228 = vmatpush3.bf16.msra.mxu1 %v9225_v33  ;;  %v9277_v33 = vpack.c.bf16 %v2183_v32, %v2181_v31  ;;  %v2088_v31 = vld [vmem:[#allocation11 + $0x70] sm:$0xff]  ;;  %v2089_v32 = vld [vmem:[#allocation11 + $0x78] sm:$0xff] }
 0xabc   :  { %1510 = vrot.lane.b32.xlu1 %v10648_v53, %s10275_s29  ;;  %9230 = vmatprep.subr.bf16.mxu1 %v9229_v37 }
 0xabf   :  { %9232 = vmatpush3.bf16.msra.mxu1 %v9229_v37  ;;  %v9279_v37 = vpack.c.bf16 %v2182_v36, %v2180_v35  ;;  %v9265_v35 = vpack.c.bf16 %v2089_v32, %v2088_v31  ;;  %v262_v36 = vld [vmem:[%s11537_s5] sm:$0xff] }
 0xac0   :  { %9234 = vmatprep.subr.bf16.mxu1 %v9233_v47 }
 0xac3   :  { %9236 = vmatpush3.bf16.msra.mxu1 %v9233_v47 }
 0xac4   :  { %9270 = vmatprep.subr.bf16.mxu1 %v9269_v17  ;;  %v9257_v17 = vpack.c.bf16 %v2085_v15, %v2084_v14 }
 0xac5   :  { %1165 = vrot.lane.b32.xlu0 %v10657_v59, %s10269_s3  ;;  %v1671_v59 = vsel %vm657_vm2, %v9786_v49, 0.0 }
 0xae0   :  { %1505 = vadd.xlane.f32.xlu1 %v1504_v50 }
 0xae4   :  { %1672 = vadd.xlane.f32.xlu0 %v1671_v59  ;;  %1838 = vadd.xlane.f32.xlu1 %v1837_v52 }
 0xaf5   :  { %1676 = vrot.lane.b32.xlu1 %v10648_v53, %s10276_s9 }
 0xafa   :  { %1842 = vrot.lane.b32.xlu0 %v10648_v53, %s10269_s3 }
 0xb38   :  { %v1162_v54 = vpop.xlane.xlu1 %1161 }
 0xb39   :  { %9789 = vrcp.f32 %v1162_v54 }
 0xb3c   :  { %v1343_v55 = vpop.xlane.xlu0 %1342  ;;  %v1511_v63 = vpop.permute.xlu1 %1510 }
 0xb3d   :  { %9791 = vrcp.f32 %v1343_v55 }
 0xb40   :  { %v1166_v56 = vpop.permute.xlu0 %1165 }
 0xb41   :  { %8545 = vmatpush3.msra.mxu0 %v1166_v56 }
 0xb42   :  { %8554 = vmatprep.subr.mxu0 %v10273_v34 }
 0xb43   :  { %v9790_v58 = vpop.eup %9789 }
 0xb44   :  { %v1164_v60 = vmul.f32 %v9790_v58, %v9780_v26 }
 0xb46   :  { %8547 = vmatmul.mubr.msk.f32.vlgmr.msra.gmra.mrb[4].mxu0 %vm657_vm2, %v1164_v60 }
 0xb47   :  { %v9792_v57 = vpop.eup %9791  ;;  %8555 = vmatpush3.msra.mxu0 %v10648_v53  ;;  %8556 = vmatprep.mubr.msk.f32.mxu0 %vm10274_vm0, %v10273_v34 }
 0xb48   :  { %8564 = vmatprep.subr.mxu0 %v10273_v34  ;;  %v1345_v62 = vmul.f32 %v9792_v57, %v9782_v28 }
 0xb4a   :  { %8557 = vmatmul.mubr.msk.f32.vlgmr.msra.gmra.mrb[6].mxu0 %vm657_vm2, %v1345_v62 }
 0xb4b   :  { %8565 = vmatpush3.msra.mxu0 %v1511_v63  ;;  %8566 = vmatprep.mubr.msk.f32.mxu0 %vm10274_vm0, %v10273_v34 }
 0xb4c   :  { %8574 = vmatprep.subr.mxu0 %v10273_v34 }
 0xb6d   :  { %v1506_v0 = vpop.xlane.xlu1 %1505 }
 0xb6e   :  { %9793 = vrcp.f32 %v1506_v0 }
 0xb71   :  { %v1673_v1 = vpop.xlane.xlu0 %1672  ;;  %v1839_v2 = vpop.xlane.xlu1 %1838 }
 0xb72   :  { %9795 = vrcp.f32 %v1673_v1 }
 0xb73   :  { %9797 = vrcp.f32 %v1839_v2 }
 0xb75   :  { %v1677_v4 = vpop.permute.xlu1 %1676  ;;  %v1843_v8 = vpop.permute.xlu0 %1842 }
 0xb78   :  { %v9794_v53 = vpop.eup %9793 }
 0xb79   :  { %v1508_v3 = vmul.f32 %v9794_v53, %v9784_v48 }
 0xb7b   :  { %8567 = vmatmul.mubr.msk.f32.vlgmr.msra.gmra.mrb[8].mxu0 %vm657_vm2, %v1508_v3 }
 0xb7c   :  { %8575 = vmatpush3.msra.mxu0 %v1677_v4  ;;  %8576 = vmatprep.mubr.msk.f32.mxu0 %vm10274_vm0, %v10273_v34  ;;  %v9796_v5 = vpop.eup %9795 }
 0xb7d   :  { %8584 = vmatprep.subr.mxu0 %v10273_v34  ;;  %v1675_v6 = vmul.f32 %v9796_v5, %v9786_v49  ;;  %v9798_v7 = vpop.eup %9797 }
 0xb7e   :  { %v1841_v9 = vmul.f32 %v9798_v7, %v9788_v51  ;;  %v7954_v7 = vld [vmem:[#allocation10] ss:$0 sm:$0xff] }
 0xb7f   :  { %8577 = vmatmul.mubr.msk.f32.vlgmr.msra.gmra.mrb[10].mxu0 %vm657_vm2, %v1675_v6 }
 0xb80   :  { %8585 = vmatpush3.msra.mxu0 %v1843_v8  ;;  %8586 = vmatprep.mubr.msk.f32.mxu0 %vm10274_vm0, %v10273_v34 }
 0xb81   :  { %9238 = vmatprep.subr.bf16.mxu0 %v9237_v22 }
 0xb83   :  { %8587 = vmatmul.mubr.msk.f32.vlgmr.msra.gmra.mrb[12].mxu0 %vm657_vm2, %v1841_v9 }
 0xb84   :  { %9240 = vmatpush3.bf16.msra.mxu0 %v9237_v22  ;;  %v2198_v22 = vld [vmem:[#allocation14 + $0xd0] sm:$0xff] }
 0xc19   :  { %v1237_v26 = vpop.f32.mrb[4].mxu0 }
 0xc1a   :  { %v8548_v27 = vpop.f32.mrb[5].mxu0 }
 0xc1b   :  { %v2178_v27 = vld [vmem:[#allocation14 + $0x30] sm:$0xff] }
 0xc1d   :  { %v1415_v28 = vpop.f32.mrb[6].mxu0 }
 0xc1e   :  { %v8558_v30 = vpop.f32.mrb[7].mxu0 }
 0xc4e   :  { %v1582_v48 = vpop.f32.mrb[8].mxu0 }
 0xc4f   :  { %v9707_v49 = vpack.i.bf16 %v1582_v48, %v10703_v29  ;;  %v8568_v50 = vpop.f32.mrb[9].mxu0 }
 0xc51   :  { %9708 = vrot.lane.b32.xlu1 %v9707_v49, %s10269_s3 }
 0xc52   :  { %v1748_v51 = vpop.f32.mrb[10].mxu0 }
 0xc53   :  { %v9712_v59 = vpack.i.bf16 %v1748_v51, %v10744_v61  ;;  %v8578_v52 = vpop.f32.mrb[11].mxu0 }
 0xc54   :  { %v2078_v52 = vld [vmem:[#allocation11 + $0x20] sm:$0xff] }
 0xc55   :  { %9713 = vrot.lane.b32.xlu0 %v9712_v59, %s10276_s9 }
 0xc56   :  { %v1914_v54 = vpop.f32.mrb[12].mxu0 }
 0xc57   :  { %v9717_v55 = vpack.i.bf16 %v1914_v54, %v1237_v26  ;;  %v8588_v56 = vpop.f32.mrb[13].mxu0  ;;  %v9273_v26 = vpack.c.bf16 %v2179_v24, %v2177_v23  ;;  %v2079_v54 = vld [vmem:[#allocation11 + $0x28] sm:$0xff]  ;;  %v2086_v23 = vld [vmem:[#allocation11 + $0x60] sm:$0xff] }
 0xc58   :  { %v2185_v56 = vld [vmem:[#allocation14 + $0x68] sm:$0xff] }
 0xc59   :  { %9718 = vrot.lane.b32.xlu1 %v9717_v55, %s10275_s29  ;;  %v9245_v55 = vpack.c.bf16 %v2079_v54, %v2078_v52  ;;  %v2087_v24 = vld [vmem:[#allocation11 + $0x68] sm:$0xff]  ;;  %v7955_v52 = vld [vmem:[%s11484_s14] ss:$0 sm:$0xff] }
 0xcc3   :  { %v9709_v58 = vpop.permute.xlu1 %9708 }
 0xcc4   :  { %v9711_v57 = vunpack.i.h.bf16 %v9709_v58  ;;  %v9710_v62 = vunpack.i.l.bf16 %v9709_v58  ;;  %v2187_v58 = vld [vmem:[#allocation14 + $0x78] sm:$0xff] }
 0xcc6   :  { %v1253_v61 = vsel %vm579_vm1, %v10677_v11, %v9710_v62  ;;  %v1930_v53 = vsel %vm579_vm1, %v1415_v28, %v9711_v57  ;;  %v2077_v28 = vld [vmem:[#allocation11 + $0x18] sm:$0xff]  ;;  %v2184_v57 = vld [vmem:[#allocation14 + $0x60] sm:$0xff] }
 0xcc7   :  { %v9714_v60 = vpop.permute.xlu0 %9713  ;;  %v2186_v62 = vld [vmem:[#allocation14 + $0x70] sm:$0xff] }
 0xcc8   :  { %v9716_v29 = vunpack.i.h.bf16 %v9714_v60  ;;  %v9715_v63 = vunpack.i.l.bf16 %v9714_v60  ;;  %v9281_v60 = vpack.c.bf16 %v2187_v58, %v2185_v56 }
 0xcca   :  { %v1255_v3 = vsel %vm1254_vm3, %v1253_v61, %v9715_v63  ;;  %v1931_v4 = vsel %vm1254_vm3, %v1930_v53, %v9716_v29  ;;  %v9283_v29 = vpack.c.bf16 %v2186_v62, %v2184_v57  ;;  %v2080_v63 = vld [vmem:[#allocation11 + $0x30] sm:$0xff]  ;;  %v2191_v61 = vld [vmem:[#allocation14 + $0x98] sm:$0xff] }
 0xccb   :  { %v9719_v0 = vpop.permute.xlu1 %9718 }
 0xccc   :  { %v9721_v1 = vunpack.i.h.bf16 %v9719_v0  ;;  %v9720_v2 = vunpack.i.l.bf16 %v9719_v0  ;;  %v2081_v0 = vld [vmem:[#allocation11 + $0x38] sm:$0xff] }
 0xcce   :  { %v1257_v5 = vsel %vm1256_vm4, %v1255_v3, %v9720_v2  ;;  %v1932_v6 = vsel %vm1256_vm4, %v1931_v4, %v9721_v1  ;;  %v9249_v1 = vpack.c.bf16 %v2081_v0, %v2080_v63  ;;  %v2189_v2 = vld [vmem:[#allocation14 + $0x88] sm:$0xff]  ;;  %v2188_v3 = vld [vmem:[#allocation14 + $0x80] sm:$0xff]  ;;  %v2190_v4 = vld [vmem:[#allocation14 + $0x90] sm:$0xff] }
 0xccf   :  { %8621 = vmatprep.mubr.f32.mxu1 %v1257_v5  ;;  %v9285_v53 = vpack.c.bf16 %v2191_v61, %v2189_v2  ;;  %v9287_v5 = vpack.c.bf16 %v2190_v4, %v2188_v3  ;;  %v7957_v2 = vld [vmem:[#allocation13] ss:$0 sm:$0xff] }
 0xcd0   :  { %8622 = vmatmul.mubr.f32.vlgmr.msra.gmra.mrb[26].mxu1 %v1932_v6  ;;  %v2082_v6 = vld [vmem:[#allocation11 + $0x40] sm:$0xff] }
 0xcd1   :  { %2280 = vmatprep.mubr.f32.mxu1 %v10273_v34  ;;  %9272 = vmatpush1.bf16.msra.mxu1 %v9271_v21  ;;  %v9293_v21 = vpack.c.bf16 %v2199_v19, %v2197_v18 }
 0xcd2   :  { %9274 = vmatprep.subr.bf16.mxu1 %v9273_v26  ;;  %v9261_v26 = vpack.c.bf16 %v2087_v24, %v2086_v23 }
 0xda3   :  { %v8623_v8 = vpop.f32.mrb[26].mxu1 }
 0xda4   :  { %v2028_v9 = vadd.f32 %v8623_v8, %v7954_v7  ;;  %v2022_v10 = vpop.f32.mrb[27].mxu1 }
 0xda5   :  { %v2023_v12 = vadd.f32 %v7954_v7, %v2022_v10  ;;  %v2083_v7 = vld [vmem:[#allocation11 + $0x48] sm:$0xff]  ;;  %v2195_v10 = vld [vmem:[#allocation14 + $0xb8] sm:$0xff] }
 0xda6   :  { %v2034_v11 = vadd.f32 %v2028_v9, %v10621_v39  ;;  %v2076_v39 = vld [vmem:[#allocation11 + $0x10] sm:$0xff]  ;;  %v9253_v8 = vpack.c.bf16 %v2083_v7, %v2082_v6 }
 0xda7   :  { %v2033_v13 = vadd.f32 %v2023_v12, %v10619_v38  ;;  %v9275_v38 = vpack.c.bf16 %v2178_v27, %v2176_v25  ;;  %v9241_v30 = vpack.c.bf16 %v2077_v28, %v2076_v39  ;;  %v2193_v9 = vld [vmem:[#allocation14 + $0xa8] sm:$0xff]  ;;  %v2192_v12 = vld [vmem:[#allocation14 + $0xa0] sm:$0xff]  ;;  %v9295_v25 = vpack.c.bf16 %v2198_v22, %v2196_v20  ;;  %v2203_v39 = vld [vmem:[#allocation14 + $0xf8] sm:$0xff] }
 0xda8   :  { %2037 = vadd.xlane.f32.xlu1 %v2034_v11  ;;  %v2201_v27 = vld [vmem:[#allocation14 + $0xe8] sm:$0xff]  ;;  %v2200_v28 = vld [vmem:[#allocation14 + $0xe0] sm:$0xff] }
 0xda9   :  { %2035 = vadd.xlane.f32.xlu0 %v2033_v13  ;;  %9242 = vmatprep.subr.bf16.mxu0 %v9241_v30 }
 0xdaa   :  { %9276 = vmatpush1.bf16.msra.mxu1 %v9275_v38  ;;  %9244 = vmatpush3.bf16.msra.mxu0 %v9241_v30  ;;  %v9297_v38 = vpack.c.bf16 %v2203_v39, %v2201_v27  ;;  %v2202_v30 = vld [vmem:[#allocation14 + $0xf0] sm:$0xff] }
 0xdab   :  { %9278 = vmatprep.subr.bf16.mxu1 %v9277_v33  ;;  %9246 = vmatprep.subr.bf16.mxu0 %v9245_v55  ;;  %v9299_v33 = vpack.c.bf16 %v2202_v30, %v2200_v28 }
 0xdae   :  { %9280 = vmatpush1.bf16.msra.mxu1 %v9279_v37  ;;  %9248 = vmatpush3.bf16.msra.mxu0 %v9245_v55  ;;  %v7956_v55 = vld [vmem:[%s11485_s15] ss:$0 sm:$0xff] }
 0xdaf   :  { %9282 = vmatprep.subr.bf16.mxu1 %v9281_v60  ;;  %9250 = vmatprep.subr.bf16.mxu0 %v9249_v1 }
 0xdb2   :  { %9284 = vmatpush1.bf16.msra.mxu1 %v9283_v29  ;;  %9252 = vmatpush3.bf16.msra.mxu0 %v9249_v1 }
 0xdb3   :  { %9286 = vmatprep.subr.bf16.mxu1 %v9285_v53  ;;  %9254 = vmatprep.subr.bf16.mxu0 %v9253_v8 }
 0xdb6   :  { %9288 = vmatpush1.bf16.msra.mxu1 %v9287_v5  ;;  %9256 = vmatpush3.bf16.msra.mxu0 %v9253_v8 }
 0xdb7   :  { %9258 = vmatprep.subr.bf16.mxu0 %v9257_v17 }
 0xdba   :  { %9260 = vmatpush3.bf16.msra.mxu0 %v9257_v17 }
 0xdbb   :  { %9262 = vmatprep.subr.bf16.mxu0 %v9261_v26 }
 0xdbe   :  { %9264 = vmatpush3.bf16.msra.mxu0 %v9261_v26 }
 0xdbf   :  { %9266 = vmatprep.subr.bf16.mxu0 %v9265_v35 }
 0xdc2   :  { %9268 = vmatpush3.bf16.msra.mxu0 %v9265_v35 }
 0xdc3   :  { %8659 = vmatprep.subr.mxu0 %v10273_v34 }
 0xe35   :  { %v2038_v44 = vpop.xlane.xlu1 %2037 }
 0xe36   :  { %v2036_v46 = vpop.xlane.xlu0 %2035  ;;  %v2041_v47 = vmul.f32 0.0078125, %v2038_v44 }
 0xe37   :  { %v2040_v48 = vmul.f32 0.0078125, %v2036_v46 }
 0xe38   :  { %v10801_v51 = vsub.f32 %v2034_v11, %v2041_v47  ;;  %v9289_v11 = vpack.c.bf16 %v2195_v10, %v2193_v9 }
 0xe39   :  { %v10797_v49 = vsub.f32 %v2033_v13, %v2040_v48  ;;  %v2194_v13 = vld [vmem:[#allocation14 + $0xb0] sm:$0xff] }
 0xe3a   :  { %v2045_v59 = vmul.f32 %v10801_v51, %v10801_v51  ;;  %v9291_v16 = vpack.c.bf16 %v2194_v13, %v2192_v12  ;;  %9290 = vmatprep.subr.bf16.mxu1 %v9289_v11 }
 0xe3b   :  { %v2044_v50 = vmul.f32 %v10797_v49, %v10797_v49 }
 0xe3c   :  { %9292 = vmatpush1.bf16.msra.mxu1 %v9291_v16 }
 0xe3d   :  { %2046 = vadd.xlane.f32.xlu0 %v2044_v50  ;;  %9294 = vmatprep.subr.bf16.mxu1 %v9293_v21 }
 0xe40   :  { %9296 = vmatpush1.bf16.msra.mxu1 %v9295_v25 }
 0xe41   :  { %2048 = vadd.xlane.f32.xlu0 %v2045_v59  ;;  %9298 = vmatprep.subr.bf16.mxu1 %v9297_v38 }
 0xe44   :  { %9300 = vmatpush1.bf16.msra.mxu1 %v9299_v33 }
 0xe45   :  { %8704 = vmatprep.subr.mxu1 %v10273_v34 }
 0xe47   :  { %2281 = vmatmul.mubr.f32.vlgmr.msra.gmra.mrb[28].mxu1 %v262_v36 }
 0xe48   :  { %2286 = vmatprep.mubr.f32.mxu1 %v10273_v34 }
 0xeca   :  { %v2047_v37 = vpop.xlane.xlu0 %2046 }
 0xecb   :  { %v2050_v44 = vmul.f32 0.0078125, %v2047_v37 }
 0xecd   :  { %v2052_v46 = vadd.f32 1e-05, %v2050_v44 }
 0xece   :  { %v2049_v47 = vpop.xlane.xlu0 %2048 }
 0xecf   :  { %9799 = vrsqrt.f32 %v2052_v46  ;;  %v2051_v48 = vmul.f32 0.0078125, %v2049_v47 }
 0xed1   :  { %v2053_v50 = vadd.f32 1e-05, %v2051_v48 }
 0xed3   :  { %9801 = vrsqrt.f32 %v2053_v50 }
 0xed9   :  { %v9800_v59 = vpop.eup %9799 }
 0xeda   :  { %v2056_v54 = vmul.f32 %v9800_v59, %v10797_v49  ;;  %v2204_v49 = vld [vmem:[#allocation16] sm:$0x3] }
 0xedb   :  { %v10828_v63 = vrot.slane %v2204_v49, %v10640_v45  ;;  %v10837_v61 = vrot.slane %v2204_v49, %v10636_v42 }
 0xedc   :  { %v2064_v56 = vmul.f32 %v7955_v52, %v2056_v54 }
 0xedd   :  { %v9802_v58 = vpop.eup %9801 }
 0xede   :  { %v2057_v60 = vmul.f32 %v9802_v58, %v10801_v51  ;;  %v10819_v57 = vadd.f32 %v7956_v55, %v2064_v56 }
 0xee0   :  { %v2065_v62 = vmul.f32 %v7955_v52, %v2057_v60  ;;  %8656 = vmatprep.mubr.f32.mxu0 %v10819_v57  ;;  %v263_v60 = vld [vmem:[%s11537_s5 + $0x8] sm:$0xff] }
 0xee1   :  { %2287 = vmatmul.mubr.f32.gmra.mrb[30].mxu1 %v263_v60 }
 0xee2   :  { %v10822_v29 = vadd.f32 %v7956_v55, %v2065_v62  ;;  %8706 = vmatprep.mubr.msk.f32.mxu1 %vm10274_vm0, %v10273_v34 }
 0xee4   :  { %8657 = vmatmul.mubr.f32.vlgmr.msra.gmra.mrb[14].mxu0 %v10822_v29 }
 0xee5   :  { %8661 = vmatprep.mubr.msk.f32.mxu0 %vm10274_vm0, %v10273_v34 }
 0xf1a   :  { %v2282_v0 = vpop.f32.mrb[28].mxu1 }
 0xf1b   :  { %v10831_v1 = vadd.f32 %v2282_v0, %v10828_v63  ;;  %v2284_v51 = vpop.f32.mrb[29].mxu1 }
 0xf1c   :  { %v10844_v6 = vadd.f32 %v2284_v51, %v10837_v61 }
 0xf1d   :  { %8660 = vmatpush3.xpose.msk.msra.mxu0 %vm579_vm1, %v10831_v1 }
 0xf1e   :  { %8664 = vmatprep.subr.mxu0 %v10273_v34 }
 0xfb7   :  { %v8658_v53 = vpop.f32.mrb[14].mxu0 }
 0xfb8   :  { %v10839_v3 = vadd.f32 %v8658_v53, %v7957_v2  ;;  %v2163_v4 = vpop.f32.mrb[15].mxu0  ;;  %v2288_v53 = vpop.f32.mrb[30].mxu1 }
 0xfb9   :  { %v10841_v5 = vadd.f32 %v7957_v2, %v2163_v4  ;;  %v2289_v4 = vadd.f32 %v2288_v53, %v10828_v63 }
 0xfbb   :  { %8662 = vmatmul.mubr.msk.f32.vlgmr.msra.gmra.mrb[16].mxu0 %vm579_vm1, %v10841_v5 }
 0xfbc   :  { %8665 = vmatpush3.msra.mxu0 %v10844_v6  ;;  %8666 = vmatprep.mubr.msk.f32.mxu0 %vm10274_vm0, %v10273_v34 }
 0xfbd   :  { %8669 = vmatprep.subr.mxu0 %v10273_v34 }
0x108e   :  { %v2365_v7 = vpop.f32.mrb[16].mxu0 }
0x108f   :  { %v2369_v8 = vmul.f32 0.17677669, %v2365_v7  ;;  %v8663_v9 = vpop.f32.mrb[17].mxu0 }
0x1091   :  { %v2370_v10 = vsel %vm657_vm2, %v2369_v8, -inf }
0x1092   :  { %2371 = vmax.xlane.f32.xlu1 %v2370_v10 }
0x10a3   :  { %2456 = vrot.lane.b32.xlu1 %v10831_v1, %s10275_s29 }
0x111f   :  { %v2372_v12 = vpop.xlane.xlu1 %2371 }
0x1120   :  { %v2373_v11 = vsub.f32 %v2369_v8, %v2372_v12 }
0x1122   :  { %v2374_v13 = vmul.f32 1.442695, %v2373_v11 }
0x1123   :  { %v2457_v19 = vpop.permute.xlu1 %2456 }
0x1124   :  { %9803 = vpow2.f32 %v2374_v13 }
0x112e   :  { %v9804_v14 = vpop.eup %9803 }
0x112f   :  { %v2376_v15 = vsel %vm657_vm2, %v9804_v14, 0.0 }
0x1130   :  { %2377 = vadd.xlane.f32.xlu0 %v2376_v15 }
0x1146   :  { %2454 = vrot.lane.b32.xlu0 %v10841_v5, %s10275_s29 }
0x11bd   :  { %v2378_v16 = vpop.xlane.xlu0 %2377 }
0x11be   :  { %9805 = vrcp.f32 %v2378_v16 }
0x11c1   :  { %v2455_v20 = vpop.permute.xlu0 %2454 }
0x11c8   :  { %v9806_v17 = vpop.eup %9805 }
0x11c9   :  { %v2380_v18 = vmul.f32 %v9806_v17, %v9804_v14 }
0x11cb   :  { %8667 = vmatmul.mubr.msk.f32.vlgmr.msra.gmra.mrb[18].mxu0 %vm657_vm2, %v2380_v18 }
0x11cc   :  { %8670 = vmatpush3.xpose.msk.msra.mxu0 %vm579_vm1, %v2457_v19  ;;  %8671 = vmatprep.mubr.msk.f32.mxu0 %vm10274_vm0, %v10273_v34 }
0x11cd   :  { %8674 = vmatprep.subr.mxu0 %v10273_v34 }
0x11cf   :  { %8672 = vmatmul.mubr.msk.f32.vlgmr.msra.gmra.mrb[20].mxu0 %vm579_vm1, %v2455_v20 }
0x11d0   :  { %8676 = vmatprep.mubr.msk.f32.mxu0 %vm10274_vm0, %v10273_v34 }
0x129e   :  { %v10866_v21 = vpop.f32.mrb[18].mxu0 }
0x129f   :  { %v8668_v22 = vpop.f32.mrb[19].mxu0 }
0x12a2   :  { %v2528_v23 = vpop.f32.mrb[20].mxu0 }
0x12a3   :  { %v2532_v24 = vmul.f32 0.17677669, %v2528_v23  ;;  %v8673_v25 = vpop.f32.mrb[21].mxu0 }
0x12a5   :  { %v2533_v26 = vsel %vm657_vm2, %v2532_v24, -inf }
0x12a6   :  { %2534 = vmax.xlane.f32.xlu1 %v2533_v26 }
0x12b7   :  { %2545 = vrot.lane.b32.xlu1 %v10844_v6, %s10275_s29 }
0x12bb   :  { %2621 = vrot.lane.b32.xlu1 %v10841_v5, %s10276_s9 }
0x1333   :  { %v2535_v27 = vpop.xlane.xlu1 %2534 }
0x1334   :  { %v2536_v39 = vsub.f32 %v2532_v24, %v2535_v27 }
0x1336   :  { %v2537_v28 = vmul.f32 1.442695, %v2536_v39 }
0x1337   :  { %v2546_v38 = vpop.permute.xlu1 %2545 }
0x1338   :  { %9807 = vpow2.f32 %v2537_v28  ;;  %8675 = vmatpush3.msra.mxu0 %v2546_v38 }
0x1339   :  { %8679 = vmatprep.subr.mxu0 %v10273_v34 }
0x133b   :  { %v2622_v37 = vpop.permute.xlu1 %2621 }
0x1342   :  { %v9808_v30 = vpop.eup %9807 }
0x1343   :  { %v2539_v31 = vsel %vm657_vm2, %v9808_v30, 0.0 }
0x1344   :  { %2540 = vadd.xlane.f32.xlu0 %v2539_v31 }
0x135a   :  { %2623 = vrot.lane.b32.xlu0 %v10831_v1, %s10276_s9 }
0x13d1   :  { %v2541_v32 = vpop.xlane.xlu0 %2540 }
0x13d2   :  { %9809 = vrcp.f32 %v2541_v32 }
0x13d5   :  { %v2624_v36 = vpop.permute.xlu0 %2623 }
0x13dc   :  { %v9810_v33 = vpop.eup %9809 }
0x13dd   :  { %v2543_v35 = vmul.f32 %v9810_v33, %v9808_v30 }
0x13df   :  { %8677 = vmatmul.mubr.msk.f32.vlgmr.msra.gmra.mrb[22].mxu0 %vm657_vm2, %v2543_v35 }
0x13e0   :  { %8680 = vmatpush3.xpose.msk.msra.mxu0 %vm579_vm1, %v2624_v36  ;;  %8681 = vmatprep.mubr.msk.f32.mxu0 %vm10274_vm0, %v10273_v34 }
0x13e1   :  { %8684 = vmatprep.subr.mxu0 %v10273_v34 }
0x13e3   :  { %8682 = vmatmul.mubr.msk.f32.vlgmr.msra.gmra.mrb[24].mxu0 %vm579_vm1, %v2622_v37 }
0x13e4   :  { %8686 = vmatprep.mubr.msk.f32.mxu0 %vm10274_vm0, %v10273_v34 }
0x14b2   :  { %v10885_v44 = vpop.f32.mrb[22].mxu0 }
0x14b3   :  { %v8678_v46 = vpop.f32.mrb[23].mxu0 }
0x14b6   :  { %v2695_v47 = vpop.f32.mrb[24].mxu0 }
0x14b7   :  { %v2699_v48 = vmul.f32 0.17677669, %v2695_v47  ;;  %v8683_v50 = vpop.f32.mrb[25].mxu0 }
0x14b9   :  { %v2700_v59 = vsel %vm657_vm2, %v2699_v48, -inf }
0x14ba   :  { %2701 = vmax.xlane.f32.xlu1 %v2700_v59 }
0x14cb   :  { %2789 = vrot.lane.b32.xlu1 %v10831_v1, %s10269_s3 }
0x14cf   :  { %2787 = vrot.lane.b32.xlu1 %v10841_v5, %s10269_s3  ;;  %v2290_v5 = vpop.f32.mrb[31].mxu1 }
0x14d0   :  { %v10911_v7 = vadd.f32 %v2290_v5, %v10837_v61 }
0x14d2   :  { %8705 = vmatpush3.msra.mxu1 %v10911_v7 }
0x14d3   :  { %3131 = vrot.lane.b32.xlu1 %v2289_v4, %s10275_s29  ;;  %8714 = vmatprep.subr.mxu1 %v10273_v34 }
0x1547   :  { %v2702_v52 = vpop.xlane.xlu1 %2701 }
0x1548   :  { %v2703_v54 = vsub.f32 %v2699_v48, %v2702_v52 }
0x154a   :  { %v2704_v55 = vmul.f32 1.442695, %v2703_v54 }
0x154b   :  { %v2790_v1 = vpop.permute.xlu1 %2789 }
0x154c   :  { %9811 = vpow2.f32 %v2704_v55 }
0x154f   :  { %v2788_v2 = vpop.permute.xlu1 %2787 }
0x1553   :  { %v3132_v17 = vpop.permute.xlu1 %3131 }
0x1556   :  { %v9812_v56 = vpop.eup %9811 }
0x1557   :  { %v2706_v58 = vsel %vm657_vm2, %v9812_v56, 0.0 }
0x1558   :  { %2707 = vadd.xlane.f32.xlu0 %v2706_v58 }
0x156e   :  { %2711 = vrot.lane.b32.xlu0 %v10844_v6, %s10276_s9 }
0x15e5   :  { %v2708_v62 = vpop.xlane.xlu0 %2707 }
0x15e6   :  { %9813 = vrcp.f32 %v2708_v62 }
0x15e9   :  { %v2712_v49 = vpop.permute.xlu0 %2711 }
0x15ea   :  { %8685 = vmatpush3.msra.mxu0 %v2712_v49 }
0x15eb   :  { %8689 = vmatprep.subr.mxu0 %v10273_v34 }
0x15f0   :  { %v9814_v0 = vpop.eup %9813 }
0x15f1   :  { %v2710_v51 = vmul.f32 %v9814_v0, %v9812_v56 }
0x15f3   :  { %8687 = vmatmul.mubr.msk.f32.vlgmr.msra.gmra.mrb[26].mxu0 %vm657_vm2, %v2710_v51 }
0x15f4   :  { %8690 = vmatpush3.xpose.msk.msra.mxu0 %vm579_vm1, %v2790_v1  ;;  %8691 = vmatprep.mubr.msk.f32.mxu0 %vm10274_vm0, %v10273_v34 }
0x15f5   :  { %8694 = vmatprep.subr.mxu0 %v10273_v34 }
0x15f7   :  { %8692 = vmatmul.mubr.msk.f32.vlgmr.msra.gmra.mrb[28].mxu0 %vm579_vm1, %v2788_v2 }
0x15f8   :  { %8696 = vmatprep.mubr.msk.f32.mxu0 %vm10274_vm0, %v10273_v34 }
0x16c6   :  { %v10916_v8 = vpop.f32.mrb[26].mxu0 }
0x16c7   :  { %v8688_v9 = vpop.f32.mrb[27].mxu0 }
0x16ca   :  { %v2861_v10 = vpop.f32.mrb[28].mxu0 }
0x16cb   :  { %v2865_v12 = vmul.f32 0.17677669, %v2861_v10  ;;  %v8693_v11 = vpop.f32.mrb[29].mxu0 }
0x16cd   :  { %v2866_v13 = vsel %vm657_vm2, %v2865_v12, -inf }
0x16ce   :  { %2867 = vmax.xlane.f32.xlu0 %v2866_v13 }
0x16e4   :  { %2877 = vrot.lane.b32.xlu0 %v10844_v6, %s10269_s3 }
0x16e8   :  { %3129 = vrot.lane.b32.xlu0 %v10839_v3, %s10275_s29 }
0x16ec   :  { %3296 = vrot.lane.b32.xlu0 %v10839_v3, %s10276_s9 }
0x16f0   :  { %3462 = vrot.lane.b32.xlu0 %v10839_v3, %s10269_s3 }
0x175b   :  { %v2868_v63 = vpop.xlane.xlu0 %2867 }
0x175c   :  { %v2869_v61 = vsub.f32 %v2865_v12, %v2868_v63 }
0x175e   :  { %v2870_v14 = vmul.f32 1.442695, %v2869_v61 }
0x175f   :  { %v2878_v15 = vpop.permute.xlu0 %2877 }
0x1760   :  { %9815 = vpow2.f32 %v2870_v14  ;;  %8695 = vmatpush3.msra.mxu0 %v2878_v15 }
0x1761   :  { %8699 = vmatprep.subr.mxu0 %v10273_v34 }
0x1763   :  { %v3130_v22 = vpop.permute.xlu0 %3129 }
0x1767   :  { %v3297_v24 = vpop.permute.xlu0 %3296 }
0x176a   :  { %v9816_v16 = vpop.eup %9815 }
0x176b   :  { %v2872_v6 = vsel %vm657_vm2, %v9816_v16, 0.0 }
0x176c   :  { %2873 = vadd.xlane.f32.xlu1 %v2872_v6 }
0x177d   :  { %3298 = vrot.lane.b32.xlu1 %v2289_v4, %s10276_s9 }
0x1781   :  { %3464 = vrot.lane.b32.xlu1 %v2289_v4, %s10269_s3 }
0x17f9   :  { %v2874_v18 = vpop.xlane.xlu1 %2873 }
0x17fa   :  { %9817 = vrcp.f32 %v2874_v18 }
0x17fd   :  { %v3299_v23 = vpop.permute.xlu1 %3298 }
0x1801   :  { %v3465_v25 = vpop.permute.xlu1 %3464 }
0x1804   :  { %v9818_v19 = vpop.eup %9817 }
0x1805   :  { %v2876_v20 = vmul.f32 %v9818_v19, %v9816_v16 }
0x1807   :  { %8697 = vmatmul.mubr.msk.f32.vlgmr.msra.gmra.mrb[30].mxu0 %vm657_vm2, %v2876_v20 }
0x1808   :  { %8700 = vmatpush3.xpose.msk.msra.mxu0 %vm579_vm1, %v2289_v4  ;;  %8701 = vmatprep.mubr.msk.f32.mxu0 %vm10274_vm0, %v10273_v34 }
0x1809   :  { %8709 = vmatprep.subr.mxu0 %v10273_v34 }
0x180b   :  { %8702 = vmatmul.mubr.msk.f32.vlgmr.msra.gmra.mrb[32].mxu0 %vm579_vm1, %v10839_v3  ;;  %v3463_v3 = vpop.permute.xlu0 %3462 }
0x180c   :  { %8710 = vmatpush3.xpose.msk.msra.mxu0 %vm579_vm1, %v3132_v17  ;;  %8711 = vmatprep.mubr.msk.f32.mxu0 %vm10274_vm0, %v10273_v34 }
0x180d   :  { %8719 = vmatprep.subr.mxu0 %v10273_v34 }
0x180f   :  { %8712 = vmatmul.mubr.msk.f32.vlgmr.msra.gmra.mrb[34].mxu0 %vm579_vm1, %v3130_v22 }
0x1810   :  { %8720 = vmatpush3.xpose.msk.msra.mxu0 %vm579_vm1, %v3299_v23  ;;  %8721 = vmatprep.mubr.msk.f32.mxu0 %vm10274_vm0, %v10273_v34 }
0x1811   :  { %8729 = vmatprep.subr.mxu0 %v10273_v34 }
0x1813   :  { %8722 = vmatmul.mubr.msk.f32.vlgmr.msra.gmra.mrb[36].mxu0 %vm579_vm1, %v3297_v24 }
0x1814   :  { %8730 = vmatpush3.xpose.msk.msra.mxu0 %vm579_vm1, %v3465_v25  ;;  %8731 = vmatprep.mubr.msk.f32.mxu0 %vm10274_vm0, %v10273_v34 }
0x1817   :  { %8732 = vmatmul.mubr.msk.f32.vlgmr.msra.gmra.mrb[38].mxu0 %vm579_vm1, %v3463_v3 }
0x18da   :  { %v10952_v26 = vpop.f32.mrb[30].mxu0 }
0x18db   :  { %v8698_v27 = vpop.f32.mrb[31].mxu0 }
0x18dc   :  { %v3643_v27 = vld [vmem:[#allocation17] sm:$0xff] }
0x18de   :  { %v3040_v39 = vpop.f32.mrb[32].mxu0 }
0x18df   :  { %v3044_v28 = vmul.f32 0.17677669, %v3040_v39  ;;  %v8703_v38 = vpop.f32.mrb[33].mxu0  ;;  %v3644_v39 = vld [vmem:[#allocation17 + $0x8] sm:$0xff] }
0x18e0   :  { %v9301_v38 = vpack.c.bf16 %v3644_v39, %v3643_v27  ;;  %v3784_v27 = vld [vmem:[#allocation19 + $0x8] sm:$0xff]  ;;  %v3786_v39 = vld [vmem:[#allocation19 + $0x18] sm:$0xff] }
0x18e1   :  { %v3045_v30 = vsel %vm657_vm2, %v3044_v28, -inf }
0x18e2   :  { %3046 = vmax.xlane.f32.xlu1 %v3045_v30  ;;  %v3203_v31 = vpop.f32.mrb[34].mxu0  ;;  %v3646_v30 = vld [vmem:[#allocation17 + $0x18] sm:$0xff]  ;;  %9302 = vmatprep.subr.bf16.mxu0 %v9301_v38 }
0x18e3   :  { %v3207_v32 = vmul.f32 0.17677669, %v3203_v31  ;;  %v8713_v33 = vpop.f32.mrb[35].mxu0  ;;  %9304 = vmatpush3.bf16.msra.mxu0 %v9301_v38  ;;  %v9333_v38 = vpack.c.bf16 %v3786_v39, %v3784_v27 }
0x18e4   :  { %v3647_v33 = vld [vmem:[#allocation17 + $0x20] sm:$0xff] }
0x18e5   :  { %v3208_v35 = vsel %vm657_vm2, %v3207_v32, -inf }
0x18e6   :  { %3209 = vmax.xlane.f32.xlu0 %v3208_v35  ;;  %v3370_v36 = vpop.f32.mrb[36].mxu0  ;;  %v3648_v35 = vld [vmem:[#allocation17 + $0x28] sm:$0xff] }
0x18e7   :  { %v3374_v37 = vmul.f32 0.17677669, %v3370_v36  ;;  %v8723_v46 = vpop.f32.mrb[37].mxu0 }
0x18e9   :  { %v3375_v47 = vsel %vm657_vm2, %v3374_v37, -inf }
0x18ea   :  { %3376 = vmax.xlane.f32.xlu0 %v3375_v47  ;;  %v3536_v48 = vpop.f32.mrb[38].mxu0  ;;  %v3649_v47 = vld [vmem:[#allocation17 + $0x30] sm:$0xff] }
0x18eb   :  { %v3540_v50 = vmul.f32 0.17677669, %v3536_v48  ;;  %v8733_v59 = vpop.f32.mrb[39].mxu0  ;;  %v3650_v48 = vld [vmem:[#allocation17 + $0x38] sm:$0xff] }
0x18ed   :  { %v3541_v52 = vsel %vm657_vm2, %v3540_v50, -inf }
0x18ee   :  { %3542 = vmax.xlane.f32.xlu1 %v3541_v52  ;;  %v9313_v52 = vpack.c.bf16 %v3650_v48, %v3649_v47  ;;  %v3794_v47 = vld [vmem:[#allocation19 + $0x58] sm:$0xff] }
0x196f   :  { %v3047_v54 = vpop.xlane.xlu1 %3046 }
0x1970   :  { %v3048_v55 = vsub.f32 %v3044_v28, %v3047_v54  ;;  %v3645_v28 = vld [vmem:[#allocation17 + $0x10] sm:$0xff] }
0x1972   :  { %v3049_v56 = vmul.f32 1.442695, %v3048_v55  ;;  %v3651_v55 = vld [vmem:[#allocation17 + $0x40] sm:$0xff] }
0x1973   :  { %v3210_v58 = vpop.xlane.xlu0 %3209 }
0x1974   :  { %9819 = vpow2.f32 %v3049_v56  ;;  %v3211_v60 = vsub.f32 %v3207_v32, %v3210_v58  ;;  %v9305_v32 = vpack.c.bf16 %v3646_v30, %v3645_v28  ;;  %v3652_v56 = vld [vmem:[#allocation17 + $0x48] sm:$0xff]  ;;  %v3783_v28 = vld [vmem:[#allocation19] sm:$0xff]  ;;  %v3785_v30 = vld [vmem:[#allocation19 + $0x10] sm:$0xff] }
0x1976   :  { %v3212_v62 = vmul.f32 1.442695, %v3211_v60  ;;  %9306 = vmatprep.subr.bf16.mxu0 %v9305_v32 }
0x1977   :  { %v3377_v49 = vpop.xlane.xlu0 %3376  ;;  %9308 = vmatpush3.bf16.msra.mxu0 %v9305_v32  ;;  %v3790_v32 = vld [vmem:[#allocation19 + $0x38] sm:$0xff] }
0x1978   :  { %9821 = vpow2.f32 %v3212_v62  ;;  %v3378_v0 = vsub.f32 %v3374_v37, %v3377_v49  ;;  %v9309_v37 = vpack.c.bf16 %v3648_v35, %v3647_v33  ;;  %v9317_v62 = vpack.c.bf16 %v3652_v56, %v3651_v55  ;;  %v3653_v49 = vld [vmem:[#allocation17 + $0x50] sm:$0xff] }
0x1979   :  { %v9335_v33 = vpack.c.bf16 %v3785_v30, %v3783_v28 }
0x197a   :  { %v3379_v1 = vmul.f32 1.442695, %v3378_v0  ;;  %9310 = vmatprep.subr.bf16.mxu0 %v9309_v37  ;;  %v3654_v0 = vld [vmem:[#allocation17 + $0x58] sm:$0xff] }
0x197b   :  { %v3543_v10 = vpop.xlane.xlu1 %3542  ;;  %9312 = vmatpush3.bf16.msra.mxu0 %v9309_v37  ;;  %v3789_v37 = vld [vmem:[#allocation19 + $0x30] sm:$0xff] }
0x197c   :  { %9823 = vpow2.f32 %v3379_v1  ;;  %v3544_v12 = vsub.f32 %v3540_v50, %v3543_v10  ;;  %9314 = vmatprep.subr.bf16.mxu0 %v9313_v52  ;;  %v3655_v1 = vld [vmem:[#allocation17 + $0x60] sm:$0xff] }
0x197e   :  { %v9820_v51 = vpop.eup %9819  ;;  %v3545_v11 = vmul.f32 1.442695, %v3544_v12 }
0x197f   :  { %v3051_v2 = vsel %vm657_vm2, %v9820_v51, 0.0  ;;  %9316 = vmatpush3.bf16.msra.mxu0 %v9313_v52 }
0x1980   :  { %3052 = vadd.xlane.f32.xlu0 %v3051_v2  ;;  %9825 = vpow2.f32 %v3545_v11  ;;  %9318 = vmatprep.subr.bf16.mxu0 %v9317_v62 }
0x1982   :  { %v9822_v53 = vpop.eup %9821 }
0x1983   :  { %v3214_v4 = vsel %vm657_vm2, %v9822_v53, 0.0  ;;  %9320 = vmatpush3.bf16.msra.mxu0 %v9317_v62  ;;  %v3796_v62 = vld [vmem:[#allocation19 + $0x68] sm:$0xff] }
0x1984   :  { %3215 = vadd.xlane.f32.xlu1 %v3214_v4 }
0x1986   :  { %v9824_v5 = vpop.eup %9823 }
0x1987   :  { %v3381_v9 = vsel %vm657_vm2, %v9824_v5, 0.0 }
0x1988   :  { %3382 = vadd.xlane.f32.xlu0 %v3381_v9 }
0x198a   :  { %v9826_v13 = vpop.eup %9825 }
0x198b   :  { %v3547_v63 = vsel %vm657_vm2, %v9826_v13, 0.0 }
0x1995   :  { %3386 = vrot.lane.b32.xlu1 %v10911_v7, %s10276_s9 }
0x199e   :  { %3220 = vrot.lane.b32.xlu0 %v10911_v7, %s10275_s29 }
0x19b9   :  { %3548 = vadd.xlane.f32.xlu1 %v3547_v63 }
0x19ca   :  { %3552 = vrot.lane.b32.xlu1 %v10911_v7, %s10269_s3 }
0x1a0d   :  { %v3053_v61 = vpop.xlane.xlu0 %3052 }
0x1a0e   :  { %9827 = vrcp.f32 %v3053_v61 }
0x1a11   :  { %v3216_v14 = vpop.xlane.xlu1 %3215 }
0x1a12   :  { %9829 = vrcp.f32 %v3216_v14 }
0x1a15   :  { %v3383_v15 = vpop.xlane.xlu0 %3382  ;;  %v3387_v7 = vpop.permute.xlu1 %3386 }
0x1a16   :  { %9831 = vrcp.f32 %v3383_v15 }
0x1a18   :  { %v9828_v16 = vpop.eup %9827 }
0x1a19   :  { %v3055_v6 = vmul.f32 %v9828_v16, %v9820_v51  ;;  %v3221_v17 = vpop.permute.xlu0 %3220  ;;  %v3656_v51 = vld [vmem:[#allocation17 + $0x68] sm:$0xff] }
0x1a1a   :  { %v9325_v2 = vpack.c.bf16 %v3656_v51, %v3655_v1  ;;  %v3797_v1 = vld [vmem:[#allocation19 + $0x70] sm:$0xff] }
0x1a1b   :  { %8707 = vmatmul.mubr.msk.f32.vlgmr.msra.gmra.mrb[32].mxu1 %vm657_vm2, %v3055_v6 }
0x1a1c   :  { %v9830_v18 = vpop.eup %9829  ;;  %8715 = vmatpush3.msra.mxu1 %v3221_v17  ;;  %8716 = vmatprep.mubr.msk.f32.mxu1 %vm10274_vm0, %v10273_v34 }
0x1a1d   :  { %8724 = vmatprep.subr.mxu1 %v10273_v34  ;;  %v3218_v19 = vmul.f32 %v9830_v18, %v9822_v53  ;;  %v3658_v53 = vld [vmem:[#allocation17 + $0x78] sm:$0xff] }
0x1a1f   :  { %8717 = vmatmul.mubr.msk.f32.vlgmr.msra.gmra.mrb[34].mxu1 %vm657_vm2, %v3218_v19 }
0x1a20   :  { %v9832_v20 = vpop.eup %9831  ;;  %8725 = vmatpush3.msra.mxu1 %v3387_v7  ;;  %8726 = vmatprep.mubr.msk.f32.mxu1 %vm10274_vm0, %v10273_v34 }
0x1a21   :  { %v3385_v22 = vmul.f32 %v9832_v20, %v9824_v5  ;;  %8734 = vmatprep.subr.mxu1 %v10273_v34 }
0x1a23   :  { %8727 = vmatmul.mubr.msk.f32.vlgmr.msra.gmra.mrb[36].mxu1 %vm657_vm2, %v3385_v22  ;;  %v7982_v22 = vld [vmem:[%s11483_s13] ss:$0 sm:$0xff] }
0x1a24   :  { %8736 = vmatprep.mubr.msk.f32.mxu1 %vm10274_vm0, %v10273_v34 }
0x1a46   :  { %v3549_v23 = vpop.xlane.xlu1 %3548 }
0x1a47   :  { %9833 = vrcp.f32 %v3549_v23 }
0x1a4a   :  { %v3553_v24 = vpop.permute.xlu1 %3552 }
0x1a4b   :  { %8735 = vmatpush3.msra.mxu1 %v3553_v24 }
0x1a4c   :  { %9334 = vmatprep.subr.bf16.mxu1 %v9333_v38  ;;  %v11006_v38 = vld [vmem:[%s11486_s16] ss:$0 sm:$0xff] }
0x1a51   :  { %v9834_v25 = vpop.eup %9833 }
0x1a52   :  { %v3551_v3 = vmul.f32 %v9834_v25, %v9826_v13 }
0x1a54   :  { %8737 = vmatmul.mubr.msk.f32.vlgmr.msra.gmra.mrb[38].mxu1 %vm657_vm2, %v3551_v3 }
0x1a55   :  { %3891 = vmatprep.mubr.f32.mxu1 %v10273_v34  ;;  %9336 = vmatpush1.bf16.msra.mxu1 %v9335_v33 }
0x1aee   :  { %v3125_v31 = vpop.f32.mrb[32].mxu1 }
0x1aef   :  { %v8708_v36 = vpop.f32.mrb[33].mxu1 }
0x1af0   :  { %v3787_v36 = vld [vmem:[#allocation19 + $0x20] sm:$0xff] }
0x1af1   :  { %v9339_v48 = vpack.c.bf16 %v3789_v37, %v3787_v36  ;;  %v3925_v36 = vld [vmem:[#allocation20 + $0x88] sm:$0xff]  ;;  %v3908_v37 = vld [vmem:[#allocation20] sm:$0xff] }
0x1af2   :  { %v3292_v46 = vpop.f32.mrb[34].mxu1 }
0x1af3   :  { %v9722_v50 = vpack.i.bf16 %v3292_v46, %v10885_v44  ;;  %v8718_v59 = vpop.f32.mrb[35].mxu1  ;;  %v9321_v44 = vpack.c.bf16 %v3654_v0, %v3653_v49  ;;  %v3792_v46 = vld [vmem:[#allocation19 + $0x48] sm:$0xff]  ;;  %v3798_v49 = vld [vmem:[#allocation19 + $0x78] sm:$0xff] }
0x1af4   :  { %v3793_v59 = vld [vmem:[#allocation19 + $0x50] sm:$0xff]  ;;  %v9345_v0 = vpack.c.bf16 %v3798_v49, %v3796_v62  ;;  %v3912_v62 = vld [vmem:[#allocation20 + $0x20] sm:$0xff]  ;;  %v3913_v49 = vld [vmem:[#allocation20 + $0x28] sm:$0xff] }
0x1af5   :  { %9723 = vrot.lane.b32.xlu0 %v9722_v50, %s10269_s3  ;;  %9322 = vmatprep.subr.bf16.mxu0 %v9321_v44  ;;  %v9341_v50 = vpack.c.bf16 %v3794_v47, %v3792_v46  ;;  %v3909_v47 = vld [vmem:[#allocation20 + $0x8] sm:$0xff] }
0x1af6   :  { %v3458_v54 = vpop.f32.mrb[36].mxu1  ;;  %9324 = vmatpush3.bf16.msra.mxu0 %v9321_v44  ;;  %v3795_v44 = vld [vmem:[#allocation19 + $0x60] sm:$0xff] }
0x1af7   :  { %v9727_v58 = vpack.i.bf16 %v3458_v54, %v10916_v8  ;;  %v8728_v60 = vpop.f32.mrb[37].mxu1  ;;  %9326 = vmatprep.subr.bf16.mxu0 %v9325_v2  ;;  %v3657_v8 = vld [vmem:[#allocation17 + $0x70] sm:$0xff]  ;;  %v9347_v51 = vpack.c.bf16 %v3797_v1, %v3795_v44  ;;  %v3931_v44 = vld [vmem:[#allocation20 + $0xb8] sm:$0xff]  ;;  %v9375_v1 = vpack.c.bf16 %v3913_v49, %v3912_v62 }
0x1af8   :  { %v9329_v4 = vpack.c.bf16 %v3658_v53, %v3657_v8  ;;  %v3802_v8 = vld [vmem:[#allocation19 + $0x98] sm:$0xff] }
0x1af9   :  { %9728 = vrot.lane.b32.xlu1 %v9727_v58, %s10276_s9 }
0x1afa   :  { %9328 = vmatpush3.bf16.msra.mxu0 %v9325_v2  ;;  %v3800_v2 = vld [vmem:[#allocation19 + $0x88] sm:$0xff] }
0x1afb   :  { %9330 = vmatprep.subr.bf16.mxu0 %v9329_v4  ;;  %v9349_v53 = vpack.c.bf16 %v3802_v8, %v3800_v2  ;;  %v3914_v2 = vld [vmem:[#allocation20 + $0x30] sm:$0xff]  ;;  %v3915_v8 = vld [vmem:[#allocation20 + $0x38] sm:$0xff] }
0x1afe   :  { %9332 = vmatpush3.bf16.msra.mxu0 %v9329_v4  ;;  %v3799_v4 = vld [vmem:[#allocation19 + $0x80] sm:$0xff] }
0x1b27   :  { %v3624_v5 = vpop.f32.mrb[38].mxu1 }
0x1b28   :  { %v9732_v9 = vpack.i.bf16 %v3624_v5, %v10952_v26  ;;  %v8738_v10 = vpop.f32.mrb[39].mxu1  ;;  %v3801_v5 = vld [vmem:[#allocation19 + $0x90] sm:$0xff] }
0x1b29   :  { %v3804_v10 = vld [vmem:[#allocation19 + $0xa8] sm:$0xff] }
0x1b2a   :  { %9733 = vrot.lane.b32.xlu0 %v9732_v9, %s10275_s29  ;;  %v9351_v9 = vpack.c.bf16 %v3801_v5, %v3799_v4  ;;  %v3933_v4 = vld [vmem:[#allocation20 + $0xc8] sm:$0xff]  ;;  %v9379_v5 = vpack.c.bf16 %v3915_v8, %v3914_v2  ;;  %v4065_v2 = vld [vmem:[#allocation5 + $0x180] sm:$0xff] }
0x1b67   :  { %v9724_v12 = vpop.permute.xlu0 %9723 }
0x1b68   :  { %v9726_v13 = vunpack.i.h.bf16 %v9724_v12  ;;  %v9725_v63 = vunpack.i.l.bf16 %v9724_v12  ;;  %v3806_v12 = vld [vmem:[#allocation19 + $0xb8] sm:$0xff] }
0x1b6a   :  { %v2965_v17 = vsel %vm579_vm1, %v10866_v21, %v9725_v63  ;;  %v3640_v18 = vsel %vm579_vm1, %v3125_v31, %v9726_v13  ;;  %v3788_v31 = vld [vmem:[#allocation19 + $0x28] sm:$0xff]  ;;  %v3805_v13 = vld [vmem:[#allocation19 + $0xb0] sm:$0xff] }
0x1b6b   :  { %v9729_v11 = vpop.permute.xlu1 %9728  ;;  %v9337_v35 = vpack.c.bf16 %v3790_v32, %v3788_v31  ;;  %v11011_v31 = vld [vmem:[%s11487_s17] ss:$0 sm:$0xff] }
0x1b6c   :  { %v9731_v61 = vunpack.i.h.bf16 %v9729_v11  ;;  %v9730_v14 = vunpack.i.l.bf16 %v9729_v11  ;;  %v3803_v11 = vld [vmem:[#allocation19 + $0xa0] sm:$0xff] }
0x1b6d   :  { %9338 = vmatprep.subr.bf16.mxu1 %v9337_v35  ;;  %v9355_v63 = vpack.c.bf16 %v3805_v13, %v3803_v11  ;;  %v3924_v35 = vld [vmem:[#allocation20 + $0x80] sm:$0xff]  ;;  %v3934_v11 = vld [vmem:[#allocation20 + $0xd0] sm:$0xff] }
0x1b6e   :  { %v2966_v19 = vsel %vm1254_vm3, %v2965_v17, %v9730_v14  ;;  %v3641_v26 = vsel %vm1254_vm3, %v3640_v18, %v9731_v61  ;;  %9340 = vmatpush1.bf16.msra.mxu1 %v9339_v48  ;;  %v3808_v61 = vld [vmem:[#allocation19 + $0xc8] sm:$0xff]  ;;  %v3810_v14 = vld [vmem:[#allocation19 + $0xd8] sm:$0xff]  ;;  %v9365_v46 = vpack.c.bf16 %v3925_v36, %v3924_v35  ;;  %v3926_v48 = vld [vmem:[#allocation20 + $0x90] sm:$0xff] }
0x1b6f   :  { %9342 = vmatprep.subr.bf16.mxu1 %v9341_v50  ;;  %v3812_v17 = vld [vmem:[#allocation19 + $0xe8] sm:$0xff]  ;;  %v3814_v18 = vld [vmem:[#allocation19 + $0xf8] sm:$0xff]  ;;  %v3815_v36 = vld [vmem:[%s11491_s21] sm:$0x3] }
0x1b70   :  { %v3927_v50 = vld [vmem:[#allocation20 + $0x98] sm:$0xff]  ;;  %9366 = vmatprep.subr.bf16.mxu0 %v9365_v46  ;;  %v3824_v46 = vrot.slane %v3815_v36, %v10636_v42 }
0x1b9c   :  { %v9734_v15 = vpop.permute.xlu0 %9733 }
0x1b9d   :  { %v9736_v16 = vunpack.i.h.bf16 %v9734_v15  ;;  %v9735_v6 = vunpack.i.l.bf16 %v9734_v15  ;;  %v3807_v15 = vld [vmem:[#allocation19 + $0xc0] sm:$0xff] }
0x1b9f   :  { %v2967_v7 = vsel %vm1256_vm4, %v2966_v19, %v9735_v6  ;;  %v3642_v20 = vsel %vm1256_vm4, %v3641_v26, %v9736_v16  ;;  %v9357_v16 = vpack.c.bf16 %v3810_v14, %v3808_v61  ;;  %v3809_v6 = vld [vmem:[#allocation19 + $0xd0] sm:$0xff]  ;;  %v9361_v26 = vpack.c.bf16 %v3814_v18, %v3812_v17  ;;  %v3919_v14 = vld [vmem:[#allocation20 + $0x58] sm:$0xff]  ;;  %v3920_v18 = vld [vmem:[#allocation20 + $0x60] sm:$0xff] }
0x1ba0   :  { %8771 = vmatprep.mubr.f32.mxu0 %v2967_v7  ;;  %v9359_v19 = vpack.c.bf16 %v3809_v6, %v3807_v15  ;;  %v3811_v7 = vld [vmem:[#allocation19 + $0xe0] sm:$0xff]  ;;  %v3918_v61 = vld [vmem:[#allocation20 + $0x50] sm:$0xff] }
0x1ba1   :  { %8772 = vmatmul.mubr.f32.vlgmr.msra.gmra.mrb[40].mxu0 %v3642_v20  ;;  %v3813_v20 = vld [vmem:[#allocation19 + $0xf0] sm:$0xff]  ;;  %v3936_v15 = vld [vmem:[#allocation20 + $0xe0] sm:$0xff]  ;;  %v9387_v6 = vpack.c.bf16 %v3919_v14, %v3918_v61 }
0x1ba2   :  { %v4080_v14 = vld [vmem:[#allocation5 + $0x1f8] sm:$0xff] }
0x1c74   :  { %v8773_v23 = vpop.f32.mrb[40].mxu0 }
0x1c75   :  { %v3738_v24 = vadd.f32 %v8773_v23, %v7982_v22  ;;  %v3732_v25 = vpop.f32.mrb[41].mxu0 }
0x1c76   :  { %v3733_v21 = vadd.f32 %v7982_v22, %v3732_v25  ;;  %v9363_v22 = vpack.c.bf16 %v3813_v20, %v3811_v7  ;;  %v3938_v7 = vld [vmem:[#allocation20 + $0xf0] sm:$0xff]  ;;  %v3939_v20 = vld [vmem:[#allocation20 + $0xf8] sm:$0xff] }
0x1c77   :  { %v3744_v60 = vadd.f32 %v3738_v24, %v10822_v29  ;;  %v9353_v29 = vpack.c.bf16 %v3806_v12, %v3804_v10  ;;  %v3916_v10 = vld [vmem:[#allocation20 + $0x40] sm:$0xff]  ;;  %v3917_v12 = vld [vmem:[#allocation20 + $0x48] sm:$0xff] }
0x1c78   :  { %v3743_v3 = vadd.f32 %v3733_v21, %v10819_v57  ;;  %v3791_v57 = vld [vmem:[#allocation19 + $0x40] sm:$0xff]  ;;  %v9383_v13 = vpack.c.bf16 %v3917_v12, %v3916_v10 }
0x1c79   :  { %v9343_v52 = vpack.c.bf16 %v3793_v59, %v3791_v57  ;;  %v9367_v57 = vpack.c.bf16 %v3909_v47, %v3908_v37  ;;  %v9369_v59 = vpack.c.bf16 %v3927_v50, %v3926_v48  ;;  %v3820_v37 = vrot.slane %v3815_v36, %v10640_v45  ;;  %v4071_v12 = vld [vmem:[#allocation5 + $0x1b0] sm:$0xff]  ;;  %v4089_v36 = vld [vmem:[#allocation5 + $0x240] sm:$0xff] }
0x1c7a   :  { %3745 = vadd.xlane.f32.xlu1 %v3743_v3 }
0x1c7b   :  { %9344 = vmatpush1.bf16.msra.mxu1 %v9343_v52  ;;  %v3910_v52 = vld [vmem:[#allocation20 + $0x10] sm:$0xff]  ;;  %9368 = vmatpush3.bf16.msra.mxu0 %v9367_v57 }
0x1c7c   :  { %9346 = vmatprep.subr.bf16.mxu1 %v9345_v0  ;;  %9370 = vmatprep.subr.bf16.mxu0 %v9369_v59  ;;  %v3930_v0 = vld [vmem:[#allocation20 + $0xb0] sm:$0xff] }
0x1c7f   :  { %9348 = vmatpush1.bf16.msra.mxu1 %v9347_v51  ;;  %v9377_v51 = vpack.c.bf16 %v3931_v44, %v3930_v0 }
0x1c80   :  { %9350 = vmatprep.subr.bf16.mxu1 %v9349_v53  ;;  %v3932_v53 = vld [vmem:[#allocation20 + $0xc0] sm:$0xff] }
0x1c83   :  { %9352 = vmatpush1.bf16.msra.mxu1 %v9351_v9  ;;  %v9381_v9 = vpack.c.bf16 %v3933_v4, %v3932_v53  ;;  %v4068_v53 = vld [vmem:[#allocation5 + $0x198] sm:$0xff] }
0x1c84   :  { %9354 = vmatprep.subr.bf16.mxu1 %v9353_v29  ;;  %v3935_v29 = vld [vmem:[#allocation20 + $0xd8] sm:$0xff]  ;;  %v4072_v4 = vld [vmem:[#allocation5 + $0x1b8] sm:$0xff] }
0x1c87   :  { %9356 = vmatpush1.bf16.msra.mxu1 %v9355_v63  ;;  %v9385_v63 = vpack.c.bf16 %v3935_v29, %v3934_v11  ;;  %v4074_v11 = vld [vmem:[#allocation5 + $0x1c8] sm:$0xff] }
0x1c88   :  { %9358 = vmatprep.subr.bf16.mxu1 %v9357_v16  ;;  %v3937_v16 = vld [vmem:[#allocation20 + $0xe8] sm:$0xff]  ;;  %v4078_v29 = vld [vmem:[#allocation5 + $0x1e8] sm:$0xff] }
0x1c89   :  { %v9389_v17 = vpack.c.bf16 %v3937_v16, %v3936_v15 }
0x1c8b   :  { %9360 = vmatpush1.bf16.msra.mxu1 %v9359_v19  ;;  %v3921_v19 = vld [vmem:[#allocation20 + $0x68] sm:$0xff] }
0x1c8c   :  { %9362 = vmatprep.subr.bf16.mxu1 %v9361_v26  ;;  %v9391_v26 = vpack.c.bf16 %v3921_v19, %v3920_v18 }
0x1c8f   :  { %9364 = vmatpush1.bf16.msra.mxu1 %v9363_v22  ;;  %v9393_v22 = vpack.c.bf16 %v3939_v20, %v3938_v7 }
0x1d07   :  { %v3746_v54 = vpop.xlane.xlu1 %3745 }
0x1d08   :  { %v3749_v55 = vmul.f32 0.0078125, %v3746_v54  ;;  %v3911_v54 = vld [vmem:[#allocation20 + $0x18] sm:$0xff] }
0x1d0a   :  { %v3751_v56 = vsub.f32 %v3743_v3, %v3749_v55  ;;  %v3928_v55 = vld [vmem:[#allocation20 + $0xa0] sm:$0xff] }
0x1d0c   :  { %v3753_v58 = vmul.f32 %v3751_v56, %v3751_v56 }
0x1d0e   :  { %3755 = vadd.xlane.f32.xlu0 %v3753_v58  ;;  %v9371_v58 = vpack.c.bf16 %v3911_v54, %v3910_v52 }
0x1d10   :  { %9372 = vmatpush3.bf16.msra.mxu0 %v9371_v58 }
0x1d12   :  { %3747 = vadd.xlane.f32.xlu0 %v3744_v60 }
0x1d9b   :  { %v3756_v23 = vpop.xlane.xlu0 %3755 }
0x1d9c   :  { %v3759_v24 = vmul.f32 0.0078125, %v3756_v23  ;;  %v3922_v23 = vld [vmem:[#allocation20 + $0x70] sm:$0xff] }
0x1d9e   :  { %v3761_v25 = vadd.f32 1e-05, %v3759_v24  ;;  %v3923_v24 = vld [vmem:[#allocation20 + $0x78] sm:$0xff] }
0x1d9f   :  { %v3748_v21 = vpop.xlane.xlu0 %3747 }
0x1da0   :  { %9835 = vrsqrt.f32 %v3761_v25  ;;  %v3750_v3 = vmul.f32 0.0078125, %v3748_v21  ;;  %v9395_v25 = vpack.c.bf16 %v3923_v24, %v3922_v23  ;;  %v4084_v23 = vld [vmem:[#allocation5 + $0x218] sm:$0xff]  ;;  %v4087_v24 = vld [vmem:[#allocation5 + $0x230] sm:$0xff] }
0x1da2   :  { %v10999_v27 = vsub.f32 %v3744_v60, %v3750_v3 }
0x1da4   :  { %v3754_v39 = vmul.f32 %v10999_v27, %v10999_v27 }
0x1da6   :  { %3757 = vadd.xlane.f32.xlu1 %v3754_v39 }
0x1daa   :  { %v9836_v28 = vpop.eup %9835 }
0x1dab   :  { %v3765_v30 = vmul.f32 %v9836_v28, %v3751_v56  ;;  %v3929_v56 = vld [vmem:[#allocation20 + $0xa8] sm:$0xff] }
0x1dac   :  { %v9373_v60 = vpack.c.bf16 %v3929_v56, %v3928_v55 }
0x1dad   :  { %v3773_v32 = vmul.f32 %v11006_v38, %v3765_v30 }
0x1dae   :  { %9374 = vmatprep.subr.bf16.mxu0 %v9373_v60  ;;  %v7985_v60 = vld [vmem:[%s11493_s23] ss:$0 sm:$0xff] }
0x1daf   :  { %v11015_v33 = vadd.f32 %v11011_v31, %v3773_v32  ;;  %9376 = vmatpush3.bf16.msra.mxu0 %v9375_v1  ;;  %v4066_v1 = vld [vmem:[#allocation5 + $0x188] sm:$0xff] }
0x1db0   :  { %9378 = vmatprep.subr.bf16.mxu0 %v9377_v51  ;;  %v4069_v51 = vld [vmem:[#allocation5 + $0x1a0] sm:$0xff] }
0x1db1   :  { %3892 = vmatmul.mubr.f32.vlgmr.msra.gmra.mrb[40].mxu1 %v11015_v33  ;;  %v9397_v8 = vpack.c.bf16 %v4069_v51, %v4066_v1  ;;  %v4070_v1 = vld [vmem:[#allocation5 + $0x1a8] sm:$0xff]  ;;  %v4073_v51 = vld [vmem:[#allocation5 + $0x1c0] sm:$0xff] }
0x1db2   :  { %3897 = vmatprep.mubr.f32.mxu1 %v10273_v34 }
0x1db3   :  { %9380 = vmatpush3.bf16.msra.mxu0 %v9379_v5  ;;  %v4075_v5 = vld [vmem:[#allocation5 + $0x1d0] sm:$0xff]  ;;  %9398 = vmatprep.subr.bf16.mxu1 %v9397_v8  ;;  %v4076_v8 = vld [vmem:[#allocation5 + $0x1d8] sm:$0xff] }
0x1db4   :  { %9382 = vmatprep.subr.bf16.mxu0 %v9381_v9  ;;  %v9399_v9 = vpack.c.bf16 %v4068_v53, %v4065_v2  ;;  %v9401_v10 = vpack.c.bf16 %v4075_v5, %v4072_v4  ;;  %v9433_v53 = vpack.c.bf16 %v4076_v8, %v4073_v51  ;;  %v4079_v4 = vld [vmem:[#allocation5 + $0x1f0] sm:$0xff]  ;;  %v4082_v5 = vld [vmem:[#allocation5 + $0x208] sm:$0xff] }
0x1db6   :  { %9400 = vmatpush1.bf16.msra.mxu1 %v9399_v9  ;;  %v9437_v9 = vpack.c.bf16 %v4082_v5, %v4079_v4 }
0x1db7   :  { %9384 = vmatpush3.bf16.msra.mxu0 %v9383_v13  ;;  %v4081_v13 = vld [vmem:[#allocation5 + $0x200] sm:$0xff]  ;;  %9402 = vmatprep.subr.bf16.mxu1 %v9401_v10 }
0x1db8   :  { %9386 = vmatprep.subr.bf16.mxu0 %v9385_v63  ;;  %v9403_v63 = vpack.c.bf16 %v4074_v11, %v4071_v12  ;;  %v9405_v61 = vpack.c.bf16 %v4081_v13, %v4078_v29 }
0x1dba   :  { %9404 = vmatpush1.bf16.msra.mxu1 %v9403_v63 }
0x1dbb   :  { %9388 = vmatpush3.bf16.msra.mxu0 %v9387_v6  ;;  %9406 = vmatprep.subr.bf16.mxu1 %v9405_v61 }
0x1dbc   :  { %9390 = vmatprep.subr.bf16.mxu0 %v9389_v17 }
0x1dbf   :  { %9392 = vmatpush3.bf16.msra.mxu0 %v9391_v26 }
0x1dc0   :  { %9394 = vmatprep.subr.bf16.mxu0 %v9393_v22 }
0x1dc3   :  { %9396 = vmatpush3.bf16.msra.mxu0 %v9395_v25  ;;  %v9409_v25 = vpack.c.bf16 %v4087_v24, %v4084_v23  ;;  %v4097_v23 = vld [vmem:[#allocation5 + $0x280] sm:$0xff]  ;;  %v4100_v24 = vld [vmem:[#allocation5 + $0x298] sm:$0xff] }
0x1e33   :  { %v3758_v21 = vpop.xlane.xlu1 %3757 }
0x1e34   :  { %v3760_v3 = vmul.f32 0.0078125, %v3758_v21  ;;  %v4083_v21 = vld [vmem:[#allocation5 + $0x210] sm:$0xff] }
0x1e36   :  { %v3762_v39 = vadd.f32 1e-05, %v3760_v3  ;;  %v4086_v3 = vld [vmem:[#allocation5 + $0x228] sm:$0xff] }
0x1e38   :  { %9837 = vrsqrt.f32 %v3762_v39  ;;  %v9411_v39 = vpack.c.bf16 %v4086_v3, %v4083_v21  ;;  %v4103_v21 = vld [vmem:[#allocation5 + $0x2b0] sm:$0xff]  ;;  %v4106_v3 = vld [vmem:[#allocation5 + $0x2c8] sm:$0xff] }
0x1e42   :  { %v9838_v28 = vpop.eup %9837 }
0x1e43   :  { %v3766_v30 = vmul.f32 %v9838_v28, %v10999_v27  ;;  %v4090_v28 = vld [vmem:[#allocation5 + $0x248] sm:$0xff] }
0x1e45   :  { %v3774_v32 = vmul.f32 %v11006_v38, %v3766_v30  ;;  %v4093_v30 = vld [vmem:[#allocation5 + $0x260] sm:$0xff] }
0x1e47   :  { %v3782_v35 = vadd.f32 %v11011_v31, %v3774_v32  ;;  %v9413_v32 = vpack.c.bf16 %v4093_v30, %v4090_v28  ;;  %v4109_v28 = vld [vmem:[#allocation5 + $0x2e0] sm:$0xff]  ;;  %v4112_v30 = vld [vmem:[#allocation5 + $0x2f8] sm:$0xff] }
0x1e49   :  { %3898 = vmatmul.mubr.f32.gmra.mrb[42].mxu1 %v3782_v35 }
0x1e4a   :  { %4195 = vmatprep.mubr.f32.mxu1 %v10273_v34 }
0x1e84   :  { %v3893_v47 = vpop.f32.mrb[40].mxu1 }
0x1e85   :  { %v3894_v48 = vadd.f32 %v3893_v47, %v3820_v37  ;;  %v3895_v50 = vpop.f32.mrb[41].mxu1  ;;  %v4099_v47 = vld [vmem:[#allocation5 + $0x290] sm:$0xff] }
0x1e86   :  { %v3896_v57 = vadd.f32 %v3895_v50, %v3824_v46  ;;  %v4095_v50 = vld [vmem:[#allocation5 + $0x270] sm:$0xff] }
0x1e87   :  { %v3904_v59 = vmax.f32 %v3894_v48, 0.0 }
0x1e88   :  { %v3905_v27 = vmax.f32 %v3896_v57, 0.0  ;;  %v4098_v57 = vld [vmem:[#allocation5 + $0x288] sm:$0xff] }
0x1e8a   :  { %4011 = vmatprep.mubr.f32.mxu0 %v3905_v27  ;;  %v9419_v27 = vpack.c.bf16 %v4098_v57, %v4095_v50  ;;  %v4114_v57 = vld [vmem:[#allocation7 + $0x3] sm:$0x7] }
0x1e8b   :  { %4012 = vmatmul.mubr.f32.vlgmr.msra.gmra.mrb[42].mxu0 %v3904_v59  ;;  %v4102_v59 = vld [vmem:[#allocation5 + $0x2a8] sm:$0xff] }
0x1f1c   :  { %v3899_v38 = vpop.f32.mrb[42].mxu1 }
0x1f1d   :  { %v3900_v31 = vadd.f32 %v3899_v38, %v3820_v37  ;;  %v3901_v52 = vpop.f32.mrb[43].mxu1  ;;  %v4092_v37 = vld [vmem:[#allocation5 + $0x258] sm:$0xff]  ;;  %v4105_v38 = vld [vmem:[#allocation5 + $0x2c0] sm:$0xff] }
0x1f1e   :  { %v3902_v54 = vadd.f32 %v3901_v52, %v3824_v46  ;;  %v9415_v46 = vpack.c.bf16 %v4092_v37, %v4089_v36  ;;  %v4101_v52 = vld [vmem:[#allocation5 + $0x2a0] sm:$0xff] }
0x1f1f   :  { %v3906_v56 = vmax.f32 %v3900_v31, 0.0  ;;  %v9421_v31 = vpack.c.bf16 %v4105_v38, %v4102_v59  ;;  %v11066_v38 = vrot.slane %v4114_v57, %v10640_v45 }
0x1f20   :  { %v3907_v55 = vmax.f32 %v3902_v54, 0.0  ;;  %v4104_v54 = vld [vmem:[#allocation5 + $0x2b8] sm:$0xff] }
0x1f22   :  { %4016 = vmatprep.mubr.f32.mxu0 %v3907_v55  ;;  %v9423_v55 = vpack.c.bf16 %v4104_v54, %v4101_v52 }
0x1f23   :  { %4017 = vmatmul.mubr.f32.gmra.mrb[44].mxu0 %v3906_v56  ;;  %v4108_v56 = vld [vmem:[#allocation5 + $0x2d8] sm:$0xff] }
0x1f5e   :  { %v8242_v58 = vpop.f32.mrb[42].mxu0 }
0x1f5f   :  { %v8243_v62 = vpop.f32.mrb[43].mxu0 }
0x1f60   :  { %v8244_v49 = vadd.f32 %v8243_v62, %v8242_v58  ;;  %v4111_v58 = vld [vmem:[#allocation5 + $0x2f0] sm:$0xff] }
0x1f61   :  { %v9425_v62 = vpack.c.bf16 %v4111_v58, %v4108_v56 }
0x1f62   :  { %v4014_v0 = vadd.f32 %v8244_v49, %v7985_v60  ;;  %v4110_v49 = vld [vmem:[#allocation5 + $0x2e8] sm:$0xff] }
0x1f64   :  { %v4024_v44 = vadd.f32 %v4014_v0, %v11015_v33  ;;  %v4077_v33 = vld [vmem:[#allocation5 + $0x1e0] sm:$0xff] }
0x1f65   :  { %v9407_v15 = vpack.c.bf16 %v4080_v14, %v4077_v33  ;;  %v7986_v14 = vld [vmem:[%s11488_s18] ss:$0 sm:$0xff] }
0x1f66   :  { %4026 = vadd.xlane.f32.xlu0 %v4024_v44 }
0x1f67   :  { %9408 = vmatpush1.bf16.msra.mxu1 %v9407_v15 }
0x1f68   :  { %9410 = vmatprep.subr.bf16.mxu1 %v9409_v25  ;;  %v9449_v25 = vpack.c.bf16 %v4100_v24, %v4097_v23 }
0x1f6b   :  { %9412 = vmatpush1.bf16.msra.mxu1 %v9411_v39  ;;  %v9453_v39 = vpack.c.bf16 %v4106_v3, %v4103_v21 }
0x1f6c   :  { %9414 = vmatprep.subr.bf16.mxu1 %v9413_v32  ;;  %v9457_v32 = vpack.c.bf16 %v4112_v30, %v4109_v28 }
0x1f6f   :  { %9416 = vmatpush1.bf16.msra.mxu1 %v9415_v46 }
0x1ff3   :  { %v4027_v16 = vpop.xlane.xlu0 %4026 }
0x1ff4   :  { %v4030_v6 = vmul.f32 0.0078125, %v4027_v16  ;;  %v7987_v16 = vld [vmem:[%s11538_s19] ss:$0 sm:$0xff] }
0x1ff6   :  { %v11032_v17 = vsub.f32 %v4024_v44, %v4030_v6  ;;  %v8245_v18 = vpop.f32.mrb[44].mxu0  ;;  %v4067_v44 = vld [vmem:[#allocation5 + $0x190] sm:$0xff] }
0x1ff7   :  { %v8246_v19 = vpop.f32.mrb[45].mxu0  ;;  %v9429_v2 = vpack.c.bf16 %v4070_v1, %v4067_v44 }
0x1ff8   :  { %v8247_v26 = vadd.f32 %v8246_v19, %v8245_v18  ;;  %v4034_v7 = vmul.f32 %v11032_v17, %v11032_v17  ;;  %v4085_v19 = vld [vmem:[#allocation5 + $0x220] sm:$0xff] }
0x1ff9   :  { %9430 = vmatprep.subr.bf16.mxu0 %v9429_v2 }
0x1ffa   :  { %v4019_v20 = vadd.f32 %v8247_v26, %v7985_v60  ;;  %4036 = vadd.xlane.f32.xlu1 %v4034_v7  ;;  %v4107_v60 = vld [vmem:[#allocation5 + $0x2d0] sm:$0xff]  ;;  %9432 = vmatpush3.bf16.msra.mxu0 %v9429_v2  ;;  %v4088_v26 = vld [vmem:[#allocation5 + $0x238] sm:$0xff] }
0x1ffb   :  { %v9427_v0 = vpack.c.bf16 %v4110_v49, %v4107_v60  ;;  %9434 = vmatprep.subr.bf16.mxu0 %v9433_v53  ;;  %v9441_v7 = vpack.c.bf16 %v4088_v26, %v4085_v19 }
0x1ffc   :  { %v11036_v22 = vadd.f32 %v4019_v20, %v3782_v35  ;;  %v4096_v35 = vld [vmem:[#allocation5 + $0x278] sm:$0xff]  ;;  %v4091_v20 = vld [vmem:[#allocation5 + $0x250] sm:$0xff] }
0x1ffd   :  { %v9417_v48 = vpack.c.bf16 %v4099_v47, %v4096_v35 }
0x1ffe   :  { %4028 = vadd.xlane.f32.xlu0 %v11036_v22  ;;  %9436 = vmatpush3.bf16.msra.mxu0 %v9433_v53 }
0x1fff   :  { %9418 = vmatprep.subr.bf16.mxu1 %v9417_v48  ;;  %9438 = vmatprep.subr.bf16.mxu0 %v9437_v9 }
0x2000   :  { %9420 = vmatpush1.bf16.msra.mxu1 %v9419_v27  ;;  %v11063_v27 = vrot.slane %v4114_v57, %v10636_v42 }
0x2001   :  { %9422 = vmatprep.subr.bf16.mxu1 %v9421_v31 }
0x2002   :  { %9440 = vmatpush3.bf16.msra.mxu0 %v9437_v9 }
0x2003   :  { %9442 = vmatprep.subr.bf16.mxu0 %v9441_v7 }
0x2004   :  { %9424 = vmatpush1.bf16.msra.mxu1 %v9423_v55  ;;  %v4127_v55 = vrot.slane %v4114_v57, %v422_v43 }
0x2005   :  { %9426 = vmatprep.subr.bf16.mxu1 %v9425_v62 }
0x2006   :  { %9444 = vmatpush3.bf16.msra.mxu0 %v9441_v7 }
0x2008   :  { %9428 = vmatpush1.bf16.msra.mxu1 %v9427_v0 }
0x2009   :  { %8809 = vmatprep.subr.mxu1 %v10273_v34 }
0x2087   :  { %v4037_v10 = vpop.xlane.xlu1 %4036 }
0x2088   :  { %v4040_v12 = vmul.f32 0.0078125, %v4037_v10 }
0x208a   :  { %v4042_v11 = vadd.f32 1e-05, %v4040_v12 }
0x208b   :  { %v4029_v29 = vpop.xlane.xlu0 %4028 }
0x208c   :  { %9839 = vrsqrt.f32 %v4042_v11  ;;  %v4031_v13 = vmul.f32 0.0078125, %v4029_v29 }
0x208e   :  { %v4033_v63 = vsub.f32 %v11036_v22, %v4031_v13 }
0x2090   :  { %v4035_v61 = vmul.f32 %v4033_v63, %v4033_v63 }
0x2092   :  { %4038 = vadd.xlane.f32.xlu1 %v4035_v61 }
0x2096   :  { %v9840_v33 = vpop.eup %9839 }
0x2097   :  { %v4046_v15 = vmul.f32 %v9840_v33, %v11032_v17  ;;  %v4094_v17 = vld [vmem:[#allocation5 + $0x268] sm:$0xff] }
0x2098   :  { %v9445_v22 = vpack.c.bf16 %v4094_v17, %v4091_v20 }
0x2099   :  { %v4054_v6 = vmul.f32 %v7986_v14, %v4046_v15 }
0x209a   :  { %9446 = vmatprep.subr.bf16.mxu0 %v9445_v22 }
0x209b   :  { %v11048_v18 = vadd.f32 %v7987_v16, %v4054_v6  ;;  %9448 = vmatpush3.bf16.msra.mxu0 %v9445_v22 }
0x209c   :  { %9450 = vmatprep.subr.bf16.mxu0 %v9449_v25 }
0x209d   :  { %4196 = vmatmul.mubr.f32.vlgmr.msra.gmra.mrb[44].mxu1 %v11048_v18  ;;  %8806 = vmatprep.mubr.f32.mxu0 %v11048_v18 }
0x209e   :  { %4201 = vmatprep.mubr.f32.mxu1 %v10273_v34 }
0x209f   :  { %9452 = vmatpush3.bf16.msra.mxu0 %v9449_v25 }
0x20a0   :  { %9454 = vmatprep.subr.bf16.mxu0 %v9453_v39 }
0x20a3   :  { %9456 = vmatpush3.bf16.msra.mxu0 %v9453_v39 }
0x20a4   :  { %9458 = vmatprep.subr.bf16.mxu0 %v9457_v32 }
0x20a7   :  { %9460 = vmatpush3.bf16.msra.mxu0 %v9457_v32 }
0x20a8   :  { %8844 = vmatprep.subr.mxu0 %v10273_v34 }
0x211f   :  { %v4039_v36 = vpop.xlane.xlu1 %4038 }
0x2120   :  { %v4041_v37 = vmul.f32 0.0078125, %v4039_v36 }
0x2122   :  { %v4043_v46 = vadd.f32 1e-05, %v4041_v37 }
0x2124   :  { %9841 = vrsqrt.f32 %v4043_v46 }
0x212e   :  { %v9842_v35 = vpop.eup %9841 }
0x212f   :  { %v4047_v47 = vmul.f32 %v9842_v35, %v4033_v63 }
0x2131   :  { %v4055_v48 = vmul.f32 %v7986_v14, %v4047_v47 }
0x2133   :  { %v11054_v50 = vadd.f32 %v7987_v16, %v4055_v48 }
0x2135   :  { %4202 = vmatmul.mubr.f32.gmra.mrb[46].mxu1 %v11054_v50  ;;  %8807 = vmatmul.mubr.f32.vlgmr.msra.gmra.mrb[46].mxu0 %v11054_v50 }
0x2136   :  { %8811 = vmatprep.mubr.msk.f32.mxu1 %vm10274_vm0, %v10273_v34  ;;  %8846 = vmatprep.mubr.msk.f32.mxu0 %vm10274_vm0, %v10273_v34 }
0x2170   :  { %v4197_v59 = vpop.f32.mrb[44].mxu1 }
0x2171   :  { %v4199_v31 = vpop.f32.mrb[45].mxu1  ;;  %v11071_v54 = vadd.f32 %v4197_v59, %v11066_v38 }
0x2172   :  { %v4200_v52 = vadd.f32 %v4199_v31, %v11063_v27 }
0x2174   :  { %8810 = vmatpush3.xpose.msk.msra.mxu1 %vm579_vm1, %v4200_v52 }
0x2175   :  { %8814 = vmatprep.subr.mxu1 %v10273_v34 }
0x2177   :  { %8812 = vmatmul.mubr.msk.f32.vlgmr.msra.gmra.mrb[48].mxu1 %vm579_vm1, %v11071_v54 }
0x2178   :  { %8816 = vmatprep.mubr.msk.f32.mxu1 %vm10274_vm0, %v10273_v34 }
0x2208   :  { %v11080_v56 = vpop.f32.mrb[46].mxu1  ;;  %v8808_v58 = vpop.f32.mrb[46].mxu0 }
0x2209   :  { %v11082_v60 = vadd.f32 %v8808_v58, %v4127_v55  ;;  %v11084_v62 = vpop.f32.mrb[47].mxu1  ;;  %v4274_v49 = vpop.f32.mrb[47].mxu0  ;;  %v4204_v32 = vadd.f32 %v11080_v56, %v11066_v38 }
0x220a   :  { %v11086_v0 = vadd.f32 %v4274_v49, %v4127_v55  ;;  %v4206_v57 = vadd.f32 %v11084_v62, %v11063_v27 }
0x220c   :  { %8815 = vmatpush3.msra.mxu1 %v11086_v0 }
0x220d   :  { %8819 = vmatprep.subr.mxu1 %v10273_v34 }
0x224a   :  { %v4355_v44 = vpop.f32.mrb[48].mxu1 }
0x224b   :  { %v4359_v1 = vmul.f32 0.17677669, %v4355_v44  ;;  %v8813_v51 = vpop.f32.mrb[49].mxu1 }
0x224d   :  { %v4360_v41 = vsel %vm657_vm2, %v4359_v1, -inf }
0x224e   :  { %4361 = vmax.xlane.f32.xlu0 %v4360_v41 }
0x2264   :  { %4446 = vrot.lane.b32.xlu0 %v4200_v52, %s10275_s29 }
0x22db   :  { %v4362_v43 = vpop.xlane.xlu0 %4361 }
0x22dc   :  { %v4363_v2 = vsub.f32 %v4359_v1, %v4362_v43 }
0x22de   :  { %v4364_v8 = vmul.f32 1.442695, %v4363_v2 }
0x22df   :  { %v4447_v12 = vpop.permute.xlu0 %4446 }
0x22e0   :  { %9843 = vpow2.f32 %v4364_v8 }
0x22ea   :  { %v9844_v53 = vpop.eup %9843 }
0x22eb   :  { %v4366_v4 = vsel %vm657_vm2, %v9844_v53, 0.0 }
0x22ec   :  { %4367 = vadd.xlane.f32.xlu1 %v4366_v4 }
0x22fd   :  { %4444 = vrot.lane.b32.xlu1 %v11071_v54, %s10275_s29 }
0x2379   :  { %v4368_v5 = vpop.xlane.xlu1 %4367 }
0x237a   :  { %9845 = vrcp.f32 %v4368_v5 }
0x237d   :  { %v4445_v11 = vpop.permute.xlu1 %4444 }
0x2384   :  { %v9846_v9 = vpop.eup %9845 }
0x2385   :  { %v4370_v10 = vmul.f32 %v9846_v9, %v9844_v53 }
0x2387   :  { %8817 = vmatmul.mubr.msk.f32.vlgmr.msra.gmra.mrb[50].mxu1 %vm657_vm2, %v4370_v10 }
0x2388   :  { %8820 = vmatpush3.xpose.msk.msra.mxu1 %vm579_vm1, %v4447_v12  ;;  %8821 = vmatprep.mubr.msk.f32.mxu1 %vm10274_vm0, %v10273_v34 }
0x2389   :  { %8824 = vmatprep.subr.mxu1 %v10273_v34 }
0x238b   :  { %8822 = vmatmul.mubr.msk.f32.vlgmr.msra.gmra.mrb[52].mxu1 %vm579_vm1, %v4445_v11 }
0x238c   :  { %8826 = vmatprep.mubr.msk.f32.mxu1 %vm10274_vm0, %v10273_v34 }
0x245a   :  { %v11103_v29 = vpop.f32.mrb[50].mxu1 }
0x245b   :  { %v8818_v13 = vpop.f32.mrb[51].mxu1 }
0x245e   :  { %v4518_v63 = vpop.f32.mrb[52].mxu1 }
0x245f   :  { %v4522_v61 = vmul.f32 0.17677669, %v4518_v63  ;;  %v8823_v33 = vpop.f32.mrb[53].mxu1 }
0x2461   :  { %v4523_v14 = vsel %vm657_vm2, %v4522_v61, -inf }
0x2462   :  { %4524 = vmax.xlane.f32.xlu1 %v4523_v14 }
0x2473   :  { %4613 = vrot.lane.b32.xlu1 %v4200_v52, %s10276_s9 }
0x2477   :  { %4611 = vrot.lane.b32.xlu1 %v11071_v54, %s10276_s9 }
0x247b   :  { %4779 = vrot.lane.b32.xlu1 %v4200_v52, %s10269_s3 }
0x24ef   :  { %v4525_v15 = vpop.xlane.xlu1 %4524 }
0x24f0   :  { %v4526_v16 = vsub.f32 %v4522_v61, %v4525_v15 }
0x24f2   :  { %v4527_v6 = vmul.f32 1.442695, %v4526_v16 }
0x24f3   :  { %v4614_v22 = vpop.permute.xlu1 %4613 }
0x24f4   :  { %9847 = vpow2.f32 %v4527_v6 }
0x24f7   :  { %v4612_v24 = vpop.permute.xlu1 %4611 }
0x24fb   :  { %v4780_v59 = vpop.permute.xlu1 %4779 }
0x24fe   :  { %v9848_v19 = vpop.eup %9847 }
0x24ff   :  { %v4529_v26 = vsel %vm657_vm2, %v9848_v19, 0.0 }
0x2500   :  { %4530 = vadd.xlane.f32.xlu0 %v4529_v26 }
0x2516   :  { %4535 = vrot.lane.b32.xlu0 %v11086_v0, %s10275_s29 }
0x258d   :  { %v4531_v7 = vpop.xlane.xlu0 %4530 }
0x258e   :  { %9849 = vrcp.f32 %v4531_v7 }
0x2591   :  { %v4536_v20 = vpop.permute.xlu0 %4535 }
0x2592   :  { %8825 = vmatpush3.msra.mxu1 %v4536_v20 }
0x2593   :  { %8829 = vmatprep.subr.mxu1 %v10273_v34 }
0x2598   :  { %v9850_v17 = vpop.eup %9849 }
0x2599   :  { %v4533_v23 = vmul.f32 %v9850_v17, %v9848_v19 }
0x259b   :  { %8827 = vmatmul.mubr.msk.f32.vlgmr.msra.gmra.mrb[54].mxu1 %vm657_vm2, %v4533_v23 }
0x259c   :  { %8830 = vmatpush3.xpose.msk.msra.mxu1 %vm579_vm1, %v4614_v22  ;;  %8831 = vmatprep.mubr.msk.f32.mxu1 %vm10274_vm0, %v10273_v34 }
0x259d   :  { %8834 = vmatprep.subr.mxu1 %v10273_v34 }
0x259f   :  { %8832 = vmatmul.mubr.msk.f32.vlgmr.msra.gmra.mrb[56].mxu1 %vm579_vm1, %v4612_v24 }
0x25a0   :  { %8836 = vmatprep.mubr.msk.f32.mxu1 %vm10274_vm0, %v10273_v34 }
0x266e   :  { %v11122_v25 = vpop.f32.mrb[54].mxu1 }
0x266f   :  { %v8828_v21 = vpop.f32.mrb[55].mxu1 }
0x2672   :  { %v4685_v3 = vpop.f32.mrb[56].mxu1 }
0x2673   :  { %v4689_v39 = vmul.f32 0.17677669, %v4685_v3  ;;  %v8833_v28 = vpop.f32.mrb[57].mxu1 }
0x2675   :  { %v4690_v30 = vsel %vm657_vm2, %v4689_v39, -inf }
0x2676   :  { %4691 = vmax.xlane.f32.xlu0 %v4690_v30 }
0x268c   :  { %4701 = vrot.lane.b32.xlu0 %v11086_v0, %s10276_s9 }
0x2690   :  { %4777 = vrot.lane.b32.xlu0 %v11071_v54, %s10269_s3 }
0x2694   :  { %5119 = vrot.lane.b32.xlu0 %v4204_v32, %s10275_s29 }
0x2698   :  { %5286 = vrot.lane.b32.xlu0 %v4204_v32, %s10276_s9 }
0x269c   :  { %5452 = vrot.lane.b32.xlu0 %v4204_v32, %s10269_s3 }
0x2703   :  { %v4692_v36 = vpop.xlane.xlu0 %4691 }
0x2704   :  { %v4693_v37 = vsub.f32 %v4689_v39, %v4692_v36 }
0x2706   :  { %v4694_v46 = vmul.f32 1.442695, %v4693_v37 }
0x2707   :  { %v4702_v35 = vpop.permute.xlu0 %4701 }
0x2708   :  { %9851 = vpow2.f32 %v4694_v46  ;;  %8835 = vmatpush3.msra.mxu1 %v4702_v35 }
0x2709   :  { %8839 = vmatprep.subr.mxu1 %v10273_v34 }
0x270b   :  { %v4778_v54 = vpop.permute.xlu0 %4777 }
0x270f   :  { %v5120_v55 = vpop.permute.xlu0 %5119 }
0x2712   :  { %v9852_v47 = vpop.eup %9851 }
0x2713   :  { %v4696_v48 = vsel %vm657_vm2, %v9852_v47, 0.0  ;;  %v5287_v58 = vpop.permute.xlu0 %5286 }
0x2714   :  { %4697 = vadd.xlane.f32.xlu1 %v4696_v48 }
0x2717   :  { %v5453_v49 = vpop.permute.xlu0 %5452 }
0x2725   :  { %5121 = vrot.lane.b32.xlu1 %v4206_v57, %s10275_s29 }
0x2729   :  { %5288 = vrot.lane.b32.xlu1 %v4206_v57, %s10276_s9 }
0x272d   :  { %5454 = vrot.lane.b32.xlu1 %v4206_v57, %s10269_s3 }
0x27a1   :  { %v4698_v38 = vpop.xlane.xlu1 %4697 }
0x27a2   :  { %9853 = vrcp.f32 %v4698_v38 }
0x27a5   :  { %v5122_v27 = vpop.permute.xlu1 %5121 }
0x27a9   :  { %v5289_v56 = vpop.permute.xlu1 %5288 }
0x27ac   :  { %v9854_v31 = vpop.eup %9853 }
0x27ad   :  { %v4700_v52 = vmul.f32 %v9854_v31, %v9852_v47  ;;  %v5455_v62 = vpop.permute.xlu1 %5454 }
0x27af   :  { %8837 = vmatmul.mubr.msk.f32.vlgmr.msra.gmra.mrb[58].mxu1 %vm657_vm2, %v4700_v52 }
0x27b0   :  { %8840 = vmatpush3.xpose.msk.msra.mxu1 %vm579_vm1, %v4780_v59  ;;  %8841 = vmatprep.mubr.msk.f32.mxu1 %vm10274_vm0, %v10273_v34 }
0x27b1   :  { %8849 = vmatprep.subr.mxu1 %v10273_v34 }
0x27b3   :  { %8842 = vmatmul.mubr.msk.f32.vlgmr.msra.gmra.mrb[60].mxu1 %vm579_vm1, %v4778_v54 }
0x27b4   :  { %8850 = vmatpush3.xpose.msk.msra.mxu1 %vm579_vm1, %v4206_v57  ;;  %8851 = vmatprep.mubr.msk.f32.mxu1 %vm10274_vm0, %v10273_v34 }
0x27b5   :  { %8859 = vmatprep.subr.mxu1 %v10273_v34 }
0x27b7   :  { %8852 = vmatmul.mubr.msk.f32.vlgmr.msra.gmra.mrb[62].mxu1 %vm579_vm1, %v4204_v32 }
0x27b8   :  { %8860 = vmatpush3.xpose.msk.msra.mxu1 %vm579_vm1, %v5122_v27  ;;  %8861 = vmatprep.mubr.msk.f32.mxu1 %vm10274_vm0, %v10273_v34 }
0x27b9   :  { %8869 = vmatprep.subr.mxu1 %v10273_v34 }
0x27bb   :  { %8862 = vmatmul.mubr.msk.f32.vlgmr.msra.gmra.mrb[64].mxu1 %vm579_vm1, %v5120_v55 }
0x27bc   :  { %8870 = vmatpush3.xpose.msk.msra.mxu1 %vm579_vm1, %v5289_v56  ;;  %8871 = vmatprep.mubr.msk.f32.mxu1 %vm10274_vm0, %v10273_v34 }
0x27bd   :  { %8879 = vmatprep.subr.mxu1 %v10273_v34 }
0x27bf   :  { %8872 = vmatmul.mubr.msk.f32.vlgmr.msra.gmra.mrb[66].mxu1 %vm579_vm1, %v5287_v58 }
0x27c0   :  { %8880 = vmatpush3.xpose.msk.msra.mxu1 %vm579_vm1, %v5455_v62  ;;  %8881 = vmatprep.mubr.msk.f32.mxu1 %vm10274_vm0, %v10273_v34 }
0x27c3   :  { %8882 = vmatmul.mubr.msk.f32.vlgmr.msra.gmra.mrb[68].mxu1 %vm579_vm1, %v5453_v49 }
0x2882   :  { %v11166_v44 = vpop.f32.mrb[58].mxu1 }
0x2883   :  { %v8838_v1 = vpop.f32.mrb[59].mxu1 }
0x2886   :  { %v4851_v51 = vpop.f32.mrb[60].mxu1 }
0x2887   :  { %v4855_v41 = vmul.f32 0.17677669, %v4851_v51  ;;  %v8843_v43 = vpop.f32.mrb[61].mxu1 }
0x2889   :  { %v4856_v2 = vsel %vm657_vm2, %v4855_v41, -inf }
0x288a   :  { %4857 = vmax.xlane.f32.xlu1 %v4856_v2  ;;  %v5030_v8 = vpop.f32.mrb[62].mxu1 }
0x288b   :  { %v5034_v53 = vmul.f32 0.17677669, %v5030_v8  ;;  %v8853_v4 = vpop.f32.mrb[63].mxu1 }
0x288d   :  { %v5035_v5 = vsel %vm657_vm2, %v5034_v53, -inf }
0x288e   :  { %5036 = vmax.xlane.f32.xlu0 %v5035_v5  ;;  %v5193_v9 = vpop.f32.mrb[64].mxu1 }
0x288f   :  { %v5197_v10 = vmul.f32 0.17677669, %v5193_v9  ;;  %v8863_v12 = vpop.f32.mrb[65].mxu1 }
0x2890   :  { %v5635_v12 = vld [vmem:[#allocation8 + $0x88] sm:$0xff] }
0x2891   :  { %v5198_v11 = vsel %vm657_vm2, %v5197_v10, -inf }
0x2892   :  { %5199 = vmax.xlane.f32.xlu0 %v5198_v11  ;;  %v5360_v13 = vpop.f32.mrb[66].mxu1  ;;  %v5636_v11 = vld [vmem:[#allocation8 + $0x90] sm:$0xff] }
0x2893   :  { %v5364_v63 = vmul.f32 0.17677669, %v5360_v13  ;;  %v8873_v61 = vpop.f32.mrb[67].mxu1 }
0x2895   :  { %v5365_v33 = vsel %vm657_vm2, %v5364_v63, -inf }
0x2896   :  { %5366 = vmax.xlane.f32.xlu1 %v5365_v33  ;;  %v5526_v14 = vpop.f32.mrb[68].mxu1  ;;  %v5638_v33 = vld [vmem:[#allocation8 + $0xa0] sm:$0xff] }
0x2897   :  { %v5530_v15 = vmul.f32 0.17677669, %v5526_v14  ;;  %v8883_v16 = vpop.f32.mrb[69].mxu1  ;;  %v5639_v14 = vld [vmem:[#allocation8 + $0xa8] sm:$0xff] }
0x2898   :  { %v5640_v16 = vld [vmem:[#allocation8 + $0xb0] sm:$0xff] }
0x2899   :  { %v5531_v6 = vsel %vm657_vm2, %v5530_v15, -inf }
0x289a   :  { %5532 = vmax.xlane.f32.xlu0 %v5531_v6  ;;  %v5641_v6 = vld [vmem:[#allocation8 + $0xb8] sm:$0xff] }
0x2917   :  { %v4858_v19 = vpop.xlane.xlu1 %4857 }
0x2918   :  { %v4859_v26 = vsub.f32 %v4855_v41, %v4858_v19  ;;  %v9473_v19 = vpack.c.bf16 %v5641_v6, %v5640_v16  ;;  %v5883_v6 = vld [vmem:[#allocation14 + $0x128] sm:$0xff] }
0x291a   :  { %v4860_v7 = vmul.f32 1.442695, %v4859_v26  ;;  %v5642_v26 = vld [vmem:[#allocation8 + $0xc0] sm:$0xff] }
0x291b   :  { %v5037_v20 = vpop.xlane.xlu0 %5036 }
0x291c   :  { %9855 = vpow2.f32 %v4860_v7  ;;  %v5038_v17 = vsub.f32 %v5034_v53, %v5037_v20  ;;  %v5643_v7 = vld [vmem:[#allocation8 + $0xc8] sm:$0xff] }
0x291d   :  { %v9477_v20 = vpack.c.bf16 %v5643_v7, %v5642_v26  ;;  %v5882_v26 = vld [vmem:[#allocation14 + $0x120] sm:$0xff] }
0x291e   :  { %v5039_v22 = vmul.f32 1.442695, %v5038_v17 }
0x291f   :  { %v5200_v39 = vpop.xlane.xlu0 %5199 }
0x2920   :  { %9857 = vpow2.f32 %v5039_v22  ;;  %v5201_v28 = vsub.f32 %v5197_v10, %v5200_v39  ;;  %v5634_v10 = vld [vmem:[#allocation8 + $0x80] sm:$0xff] }
0x2921   :  { %v9461_v13 = vpack.c.bf16 %v5635_v12, %v5634_v10  ;;  %v5879_v12 = vld [vmem:[#allocation14 + $0x108] sm:$0xff] }
0x2922   :  { %v5202_v37 = vmul.f32 1.442695, %v5201_v28  ;;  %v5646_v28 = vld [vmem:[#allocation8 + $0xe0] sm:$0xff] }
0x2923   :  { %v5367_v30 = vpop.xlane.xlu1 %5366  ;;  %9462 = vmatprep.subr.bf16.mxu1 %v9461_v13 }
0x2924   :  { %v5368_v36 = vsub.f32 %v5364_v63, %v5367_v30  ;;  %9859 = vpow2.f32 %v5202_v37  ;;  %v5637_v63 = vld [vmem:[#allocation8 + $0x98] sm:$0xff]  ;;  %9464 = vmatpush3.bf16.msra.mxu1 %v9461_v13  ;;  %v5647_v30 = vld [vmem:[#allocation8 + $0xe8] sm:$0xff] }
0x2925   :  { %v9465_v61 = vpack.c.bf16 %v5637_v63, %v5636_v11  ;;  %v5649_v37 = vld [vmem:[#allocation8 + $0xf8] sm:$0xff]  ;;  %v5878_v13 = vld [vmem:[#allocation14 + $0x100] sm:$0xff] }
0x2926   :  { %v9856_v23 = vpop.eup %9855  ;;  %v5369_v35 = vmul.f32 1.442695, %v5368_v36  ;;  %v5648_v36 = vld [vmem:[#allocation8 + $0xf0] sm:$0xff]  ;;  %v5881_v11 = vld [vmem:[#allocation14 + $0x118] sm:$0xff] }
0x2927   :  { %v4862_v24 = vsel %vm657_vm2, %v9856_v23, 0.0  ;;  %v5533_v32 = vpop.xlane.xlu0 %5532  ;;  %9466 = vmatprep.subr.bf16.mxu1 %v9465_v61  ;;  %v9525_v63 = vpack.c.bf16 %v5881_v11, %v5879_v12 }
0x2928   :  { %4863 = vadd.xlane.f32.xlu1 %v4862_v24  ;;  %v5534_v46 = vsub.f32 %v5530_v15, %v5533_v32  ;;  %9861 = vpow2.f32 %v5369_v35  ;;  %v9469_v15 = vpack.c.bf16 %v5639_v14, %v5638_v33  ;;  %9468 = vmatpush3.bf16.msra.mxu1 %v9465_v61  ;;  %v9485_v32 = vpack.c.bf16 %v5647_v30, %v5646_v28  ;;  %v5880_v61 = vld [vmem:[#allocation14 + $0x110] sm:$0xff]  ;;  %v5778_v33 = vld [vmem:[#allocation11 + $0x80] sm:$0xff]  ;;  %v5779_v14 = vld [vmem:[#allocation11 + $0x88] sm:$0xff] }
0x2929   :  { %v9493_v16 = vpack.c.bf16 %v5779_v14, %v5778_v33  ;;  %v5904_v14 = vld [vmem:[#allocation14 + $0x1d0] sm:$0xff] }
0x292a   :  { %v9858_v21 = vpop.eup %9857  ;;  %v5535_v47 = vmul.f32 1.442695, %v5534_v46  ;;  %9470 = vmatprep.subr.bf16.mxu1 %v9469_v15  ;;  %v9489_v46 = vpack.c.bf16 %v5649_v37, %v5648_v36 }
0x292b   :  { %v5041_v3 = vsel %vm657_vm2, %v9858_v21, 0.0 }
0x292c   :  { %5042 = vadd.xlane.f32.xlu0 %v5041_v3  ;;  %9863 = vpow2.f32 %v5535_v47  ;;  %9472 = vmatpush3.bf16.msra.mxu1 %v9469_v15  ;;  %v5645_v3 = vld [vmem:[#allocation8 + $0xd8] sm:$0xff]  ;;  %v9527_v15 = vpack.c.bf16 %v5880_v61, %v5878_v13  ;;  %v5903_v13 = vld [vmem:[#allocation14 + $0x1c8] sm:$0xff]  ;;  %v5902_v61 = vld [vmem:[#allocation14 + $0x1c0] sm:$0xff] }
0x292d   :  { %9474 = vmatprep.subr.bf16.mxu1 %v9473_v19 }
0x292e   :  { %v9860_v48 = vpop.eup %9859 }
0x292f   :  { %v5204_v59 = vsel %vm657_vm2, %v9860_v48, 0.0 }
0x2930   :  { %9476 = vmatpush3.bf16.msra.mxu1 %v9473_v19  ;;  %v5885_v19 = vld [vmem:[#allocation14 + $0x138] sm:$0xff] }
0x2931   :  { %9478 = vmatprep.subr.bf16.mxu1 %v9477_v20  ;;  %v9529_v7 = vpack.c.bf16 %v5885_v19, %v5883_v6  ;;  %v9551_v6 = vpack.c.bf16 %v5904_v14, %v5902_v61 }
0x2932   :  { %v9862_v57 = vpop.eup %9861 }
0x2934   :  { %9480 = vmatpush3.bf16.msra.mxu1 %v9477_v20  ;;  %v5884_v20 = vld [vmem:[#allocation14 + $0x130] sm:$0xff] }
0x2936   :  { %v9864_v38 = vpop.eup %9863 }
0x2937   :  { %v5537_v31 = vsel %vm657_vm2, %v9864_v38, 0.0 }
0x2939   :  { %5210 = vrot.lane.b32.xlu1 %v11082_v60, %s10275_s29 }
0x2942   :  { %4867 = vrot.lane.b32.xlu0 %v11086_v0, %s10269_s3  ;;  %v5371_v0 = vsel %vm657_vm2, %v9862_v57, 0.0 }
0x295d   :  { %5205 = vadd.xlane.f32.xlu1 %v5204_v59 }
0x2961   :  { %5372 = vadd.xlane.f32.xlu0 %v5371_v0  ;;  %5538 = vadd.xlane.f32.xlu1 %v5537_v31 }
0x2972   :  { %5376 = vrot.lane.b32.xlu1 %v11082_v60, %s10276_s9 }
0x2977   :  { %5542 = vrot.lane.b32.xlu0 %v11082_v60, %s10269_s3 }
0x29b5   :  { %v4864_v52 = vpop.xlane.xlu1 %4863 }
0x29b6   :  { %9865 = vrcp.f32 %v4864_v52 }
0x29b9   :  { %v5043_v54 = vpop.xlane.xlu0 %5042  ;;  %v5211_v49 = vpop.permute.xlu1 %5210 }
0x29ba   :  { %9867 = vrcp.f32 %v5043_v54 }
0x29bd   :  { %v4868_v27 = vpop.permute.xlu0 %4867 }
0x29be   :  { %8845 = vmatpush3.msra.mxu0 %v4868_v27 }
0x29bf   :  { %8854 = vmatprep.subr.mxu0 %v10273_v34 }
0x29c0   :  { %v9866_v55 = vpop.eup %9865 }
0x29c1   :  { %v4866_v56 = vmul.f32 %v9866_v55, %v9856_v23 }
0x29c3   :  { %8847 = vmatmul.mubr.msk.f32.vlgmr.msra.gmra.mrb[48].mxu0 %vm657_vm2, %v4866_v56 }
0x29c4   :  { %v9868_v58 = vpop.eup %9867  ;;  %8855 = vmatpush3.msra.mxu0 %v11082_v60  ;;  %8856 = vmatprep.mubr.msk.f32.mxu0 %vm10274_vm0, %v10273_v34 }
0x29c5   :  { %v5045_v62 = vmul.f32 %v9868_v58, %v9858_v21  ;;  %8864 = vmatprep.subr.mxu0 %v10273_v34  ;;  %v5644_v21 = vld [vmem:[#allocation8 + $0xd0] sm:$0xff] }
0x29c6   :  { %v9481_v39 = vpack.c.bf16 %v5645_v3, %v5644_v21 }
0x29c7   :  { %8857 = vmatmul.mubr.msk.f32.vlgmr.msra.gmra.mrb[50].mxu0 %vm657_vm2, %v5045_v62 }
0x29c8   :  { %8865 = vmatpush3.msra.mxu0 %v5211_v49  ;;  %8866 = vmatprep.mubr.msk.f32.mxu0 %vm10274_vm0, %v10273_v34 }
0x29c9   :  { %8874 = vmatprep.subr.mxu0 %v10273_v34  ;;  %9482 = vmatprep.subr.bf16.mxu1 %v9481_v39 }
0x29ca   :  { %9484 = vmatpush3.bf16.msra.mxu1 %v9481_v39 }
0x29cb   :  { %9486 = vmatprep.subr.bf16.mxu1 %v9485_v32 }
0x29ce   :  { %9488 = vmatpush3.bf16.msra.mxu1 %v9485_v32 }
0x29cf   :  { %9490 = vmatprep.subr.bf16.mxu1 %v9489_v46 }
0x29d2   :  { %9492 = vmatpush3.bf16.msra.mxu1 %v9489_v46 }
0x29d3   :  { %9526 = vmatprep.subr.bf16.mxu1 %v9525_v63  ;;  %v5905_v63 = vld [vmem:[#allocation14 + $0x1d8] sm:$0xff] }
0x29d4   :  { %v9549_v33 = vpack.c.bf16 %v5905_v63, %v5903_v13 }
0x29ea   :  { %v5206_v1 = vpop.xlane.xlu1 %5205 }
0x29eb   :  { %9869 = vrcp.f32 %v5206_v1 }
0x29ee   :  { %v5373_v51 = vpop.xlane.xlu0 %5372  ;;  %v5539_v41 = vpop.xlane.xlu1 %5538 }
0x29ef   :  { %9871 = vrcp.f32 %v5373_v51 }
0x29f0   :  { %9873 = vrcp.f32 %v5539_v41 }
0x29f2   :  { %v5377_v2 = vpop.permute.xlu1 %5376  ;;  %v5543_v5 = vpop.permute.xlu0 %5542 }
0x29f5   :  { %v9870_v60 = vpop.eup %9869 }
0x29f6   :  { %v5208_v43 = vmul.f32 %v9870_v60, %v9860_v48 }
0x29f8   :  { %8867 = vmatmul.mubr.msk.f32.vlgmr.msra.gmra.mrb[52].mxu0 %vm657_vm2, %v5208_v43 }
0x29f9   :  { %8875 = vmatpush3.msra.mxu0 %v5377_v2  ;;  %8876 = vmatprep.mubr.msk.f32.mxu0 %vm10274_vm0, %v10273_v34  ;;  %v9872_v8 = vpop.eup %9871 }
0x29fa   :  { %8884 = vmatprep.subr.mxu0 %v10273_v34  ;;  %v5375_v53 = vmul.f32 %v9872_v8, %v9862_v57  ;;  %v9874_v4 = vpop.eup %9873  ;;  %v8012_v8 = vld [vmem:[#allocation10 + $0x1] ss:$0 sm:$0xff] }
0x29fb   :  { %v5541_v9 = vmul.f32 %v9874_v4, %v9864_v38 }
0x29fc   :  { %8877 = vmatmul.mubr.msk.f32.vlgmr.msra.gmra.mrb[54].mxu0 %vm657_vm2, %v5375_v53 }
0x29fd   :  { %8885 = vmatpush3.msra.mxu0 %v5543_v5  ;;  %8886 = vmatprep.mubr.msk.f32.mxu0 %vm10274_vm0, %v10273_v34 }
0x29fe   :  { %9494 = vmatprep.subr.bf16.mxu0 %v9493_v16 }
0x2a00   :  { %8887 = vmatmul.mubr.msk.f32.vlgmr.msra.gmra.mrb[56].mxu0 %vm657_vm2, %v5541_v9 }
0x2a01   :  { %9496 = vmatpush3.bf16.msra.mxu0 %v9493_v16  ;;  %v5791_v16 = vld [vmem:[#allocation11 + $0xe8] sm:$0xff] }
0x2a96   :  { %v4939_v17 = vpop.f32.mrb[48].mxu0 }
0x2a97   :  { %v8848_v22 = vpop.f32.mrb[49].mxu0 }
0x2a9a   :  { %v5115_v23 = vpop.f32.mrb[50].mxu0 }
0x2a9b   :  { %v8858_v24 = vpop.f32.mrb[51].mxu0 }
0x2a9c   :  { %v5889_v24 = vld [vmem:[#allocation14 + $0x158] sm:$0xff] }
0x2acb   :  { %v5282_v35 = vpop.f32.mrb[52].mxu0 }
0x2acc   :  { %v9737_v47 = vpack.i.bf16 %v5282_v35, %v11122_v25  ;;  %v8868_v48 = vpop.f32.mrb[53].mxu0  ;;  %v5886_v35 = vld [vmem:[#allocation14 + $0x140] sm:$0xff] }
0x2ace   :  { %9738 = vrot.lane.b32.xlu1 %v9737_v47, %s10269_s3  ;;  %v5888_v47 = vld [vmem:[#allocation14 + $0x150] sm:$0xff] }
0x2acf   :  { %v5448_v57 = vpop.f32.mrb[54].mxu0  ;;  %v9535_v48 = vpack.c.bf16 %v5888_v47, %v5886_v35 }
0x2ad0   :  { %v9742_v59 = vpack.i.bf16 %v5448_v57, %v11166_v44  ;;  %v8878_v38 = vpop.f32.mrb[55].mxu0  ;;  %v5782_v57 = vld [vmem:[#allocation11 + $0xa0] sm:$0xff] }
0x2ad2   :  { %9743 = vrot.lane.b32.xlu0 %v9742_v59, %s10276_s9  ;;  %v5783_v59 = vld [vmem:[#allocation11 + $0xa8] sm:$0xff] }
0x2ad3   :  { %v5614_v0 = vpop.f32.mrb[56].mxu0  ;;  %v9501_v38 = vpack.c.bf16 %v5783_v59, %v5782_v57  ;;  %v8016_v59 = vld [vmem:[%s11485_s15 + $0x1] ss:$0 sm:$0xff] }
0x2ad4   :  { %v9747_v31 = vpack.i.bf16 %v5614_v0, %v4939_v17  ;;  %v8888_v52 = vpop.f32.mrb[57].mxu0  ;;  %v5781_v17 = vld [vmem:[#allocation11 + $0x98] sm:$0xff]  ;;  %v5891_v0 = vld [vmem:[#allocation14 + $0x168] sm:$0xff] }
0x2ad6   :  { %9748 = vrot.lane.b32.xlu1 %v9747_v31, %s10275_s29  ;;  %v5893_v31 = vld [vmem:[#allocation14 + $0x178] sm:$0xff] }
0x2ad7   :  { %v9537_v52 = vpack.c.bf16 %v5893_v31, %v5891_v0 }
0x2b40   :  { %v9739_v54 = vpop.permute.xlu1 %9738 }
0x2b41   :  { %v9741_v55 = vunpack.i.h.bf16 %v9739_v54  ;;  %v9740_v56 = vunpack.i.l.bf16 %v9739_v54  ;;  %v5890_v54 = vld [vmem:[#allocation14 + $0x160] sm:$0xff] }
0x2b43   :  { %v5630_v49 = vsel %vm579_vm1, %v5115_v23, %v9741_v55  ;;  %v4955_v44 = vsel %vm579_vm1, %v11103_v29, %v9740_v56  ;;  %v5887_v23 = vld [vmem:[#allocation14 + $0x148] sm:$0xff] }
0x2b44   :  { %v9744_v27 = vpop.permute.xlu0 %9743  ;;  %v9533_v21 = vpack.c.bf16 %v5889_v24, %v5887_v23  ;;  %v5784_v56 = vld [vmem:[#allocation11 + $0xb0] sm:$0xff] }
0x2b45   :  { %v9746_v25 = vunpack.i.h.bf16 %v9744_v27  ;;  %v9745_v58 = vunpack.i.l.bf16 %v9744_v27  ;;  %v5892_v27 = vld [vmem:[#allocation14 + $0x170] sm:$0xff] }
0x2b46   :  { %v9539_v55 = vpack.c.bf16 %v5892_v27, %v5890_v54 }
0x2b47   :  { %v4956_v41 = vsel %vm1254_vm3, %v4955_v44, %v9745_v58  ;;  %v5631_v60 = vsel %vm1254_vm3, %v5630_v49, %v9746_v25  ;;  %v5785_v25 = vld [vmem:[#allocation11 + $0xb8] sm:$0xff] }
0x2b48   :  { %v9749_v62 = vpop.permute.xlu1 %9748  ;;  %v9505_v58 = vpack.c.bf16 %v5785_v25, %v5784_v56  ;;  %v5897_v49 = vld [vmem:[#allocation14 + $0x198] sm:$0xff]  ;;  %v5896_v44 = vld [vmem:[#allocation14 + $0x190] sm:$0xff] }
0x2b49   :  { %v9751_v1 = vunpack.i.h.bf16 %v9749_v62  ;;  %v9750_v51 = vunpack.i.l.bf16 %v9749_v62  ;;  %v5895_v62 = vld [vmem:[#allocation14 + $0x188] sm:$0xff] }
0x2b4b   :  { %v4957_v43 = vsel %vm1256_vm4, %v4956_v41, %v9750_v51  ;;  %v5632_v2 = vsel %vm1256_vm4, %v5631_v60, %v9751_v1  ;;  %v9541_v1 = vpack.c.bf16 %v5897_v49, %v5895_v62  ;;  %v5894_v51 = vld [vmem:[#allocation14 + $0x180] sm:$0xff] }
0x2b4c   :  { %8921 = vmatprep.mubr.f32.mxu1 %v4957_v43  ;;  %v9543_v41 = vpack.c.bf16 %v5896_v44, %v5894_v51  ;;  %v5786_v60 = vld [vmem:[#allocation11 + $0xc0] sm:$0xff]  ;;  %v5787_v43 = vld [vmem:[#allocation11 + $0xc8] sm:$0xff] }
0x2b4d   :  { %8922 = vmatmul.mubr.f32.vlgmr.msra.gmra.mrb[70].mxu1 %v5632_v2  ;;  %v9509_v2 = vpack.c.bf16 %v5787_v43, %v5786_v60 }
0x2b4e   :  { %5987 = vmatprep.mubr.f32.mxu1 %v10273_v34  ;;  %9528 = vmatpush1.bf16.msra.mxu1 %v9527_v15  ;;  %v5790_v15 = vld [vmem:[#allocation11 + $0xe0] sm:$0xff] }
0x2b4f   :  { %9530 = vmatprep.subr.bf16.mxu1 %v9529_v7  ;;  %v9517_v19 = vpack.c.bf16 %v5791_v16, %v5790_v15  ;;  %v5909_v7 = vld [vmem:[#allocation14 + $0x1f8] sm:$0xff] }
0x2c20   :  { %v8923_v53 = vpop.f32.mrb[70].mxu1 }
0x2c21   :  { %v5730_v4 = vadd.f32 %v8923_v53, %v8012_v8  ;;  %v5724_v5 = vpop.f32.mrb[71].mxu1  ;;  %v5901_v53 = vld [vmem:[#allocation14 + $0x1b8] sm:$0xff] }
0x2c22   :  { %v5725_v9 = vadd.f32 %v8012_v8, %v5724_v5  ;;  %v5899_v8 = vld [vmem:[#allocation14 + $0x1a8] sm:$0xff] }
0x2c23   :  { %v5738_v10 = vadd.f32 %v5730_v4, %v11054_v50  ;;  %v5780_v50 = vld [vmem:[#allocation11 + $0x90] sm:$0xff]  ;;  %v5898_v4 = vld [vmem:[#allocation14 + $0x1a0] sm:$0xff]  ;;  %v9545_v5 = vpack.c.bf16 %v5901_v53, %v5899_v8 }
0x2c24   :  { %v5737_v29 = vadd.f32 %v5725_v9, %v11048_v18  ;;  %v9531_v18 = vpack.c.bf16 %v5884_v20, %v5882_v26  ;;  %v9497_v22 = vpack.c.bf16 %v5781_v17, %v5780_v50  ;;  %v5900_v9 = vld [vmem:[#allocation14 + $0x1b0] sm:$0xff]  ;;  %v5907_v26 = vld [vmem:[#allocation14 + $0x1e8] sm:$0xff]  ;;  %v5906_v20 = vld [vmem:[#allocation14 + $0x1e0] sm:$0xff] }
0x2c25   :  { %5741 = vadd.xlane.f32.xlu1 %v5738_v10  ;;  %v9547_v12 = vpack.c.bf16 %v5900_v9, %v5898_v4  ;;  %v9553_v50 = vpack.c.bf16 %v5909_v7, %v5907_v26  ;;  %v5908_v17 = vld [vmem:[#allocation14 + $0x1f0] sm:$0xff] }
0x2c26   :  { %5739 = vadd.xlane.f32.xlu0 %v5737_v29  ;;  %9498 = vmatprep.subr.bf16.mxu0 %v9497_v22  ;;  %v9555_v23 = vpack.c.bf16 %v5908_v17, %v5906_v20 }
0x2c27   :  { %9532 = vmatpush1.bf16.msra.mxu1 %v9531_v18  ;;  %9500 = vmatpush3.bf16.msra.mxu0 %v9497_v22  ;;  %v5792_v18 = vld [vmem:[#allocation11 + $0xf0] sm:$0xff]  ;;  %v5793_v22 = vld [vmem:[#allocation11 + $0xf8] sm:$0xff] }
0x2c28   :  { %9534 = vmatprep.subr.bf16.mxu1 %v9533_v21  ;;  %9502 = vmatprep.subr.bf16.mxu0 %v9501_v38  ;;  %v9521_v24 = vpack.c.bf16 %v5793_v22, %v5792_v18  ;;  %v9923_v21 = vld [vmem:[%s11537_s5] sm:$0xff] }
0x2c2b   :  { %9536 = vmatpush1.bf16.msra.mxu1 %v9535_v48  ;;  %9504 = vmatpush3.bf16.msra.mxu0 %v9501_v38  ;;  %v8015_v48 = vld [vmem:[%s11484_s14 + $0x1] ss:$0 sm:$0xff] }
0x2c2c   :  { %9538 = vmatprep.subr.bf16.mxu1 %v9537_v52  ;;  %9506 = vmatprep.subr.bf16.mxu0 %v9505_v58 }
0x2c2f   :  { %9540 = vmatpush1.bf16.msra.mxu1 %v9539_v55  ;;  %9508 = vmatpush3.bf16.msra.mxu0 %v9505_v58  ;;  %v8017_v58 = vld [vmem:[#allocation13 + $0x1] ss:$0 sm:$0xff] }
0x2c30   :  { %9542 = vmatprep.subr.bf16.mxu1 %v9541_v1  ;;  %9510 = vmatprep.subr.bf16.mxu0 %v9509_v2 }
0x2c33   :  { %9544 = vmatpush1.bf16.msra.mxu1 %v9543_v41  ;;  %9512 = vmatpush3.bf16.msra.mxu0 %v9509_v2 }
0x2c34   :  { %9546 = vmatprep.subr.bf16.mxu1 %v9545_v5 }
0x2c37   :  { %9548 = vmatpush1.bf16.msra.mxu1 %v9547_v12 }
0x2c38   :  { %9550 = vmatprep.subr.bf16.mxu1 %v9549_v33 }
0x2c3b   :  { %9552 = vmatpush1.bf16.msra.mxu1 %v9551_v6 }
0x2c3c   :  { %9554 = vmatprep.subr.bf16.mxu1 %v9553_v50 }
0x2c3f   :  { %9556 = vmatpush1.bf16.msra.mxu1 %v9555_v23 }
0x2c40   :  { %9004 = vmatprep.subr.mxu1 %v10273_v34 }
0x2c42   :  { %5988 = vmatmul.mubr.f32.vlgmr.msra.gmra.mrb[72].mxu1 %v9923_v21 }
0x2c43   :  { %5993 = vmatprep.mubr.f32.mxu1 %v10273_v34 }
0x2cb2   :  { %v5742_v3 = vpop.xlane.xlu1 %5741 }
0x2cb3   :  { %v5740_v39 = vpop.xlane.xlu0 %5739  ;;  %v5744_v28 = vmul.f32 0.0078125, %v5742_v3  ;;  %v9924_v3 = vld [vmem:[%s11537_s5 + $0x8] sm:$0xff] }
0x2cb4   :  { %v5743_v30 = vmul.f32 0.0078125, %v5740_v39  ;;  %5994 = vmatmul.mubr.f32.gmra.mrb[74].mxu1 %v9924_v3 }
0x2cb5   :  { %v11221_v36 = vsub.f32 %v5738_v10, %v5744_v28  ;;  %v5788_v10 = vld [vmem:[#allocation11 + $0xd0] sm:$0xff]  ;;  %9006 = vmatprep.mubr.msk.f32.mxu1 %vm10274_vm0, %v10273_v34 }
0x2cb6   :  { %v11219_v32 = vsub.f32 %v5737_v29, %v5743_v30  ;;  %v5789_v29 = vld [vmem:[#allocation11 + $0xd8] sm:$0xff] }
0x2cb7   :  { %v5748_v46 = vmul.f32 %v11221_v36, %v11221_v36  ;;  %v9513_v11 = vpack.c.bf16 %v5789_v29, %v5788_v10 }
0x2cb8   :  { %v5747_v37 = vmul.f32 %v11219_v32, %v11219_v32 }
0x2cb9   :  { %9514 = vmatprep.subr.bf16.mxu0 %v9513_v11 }
0x2cba   :  { %5749 = vadd.xlane.f32.xlu0 %v5747_v37  ;;  %9516 = vmatpush3.bf16.msra.mxu0 %v9513_v11 }
0x2cbb   :  { %9518 = vmatprep.subr.bf16.mxu0 %v9517_v19 }
0x2cbe   :  { %5751 = vadd.xlane.f32.xlu0 %v5748_v46  ;;  %9520 = vmatpush3.bf16.msra.mxu0 %v9517_v19 }
0x2cbf   :  { %9522 = vmatprep.subr.bf16.mxu0 %v9521_v24 }
0x2cc2   :  { %9524 = vmatpush3.bf16.msra.mxu0 %v9521_v24 }
0x2cc3   :  { %8959 = vmatprep.subr.mxu0 %v10273_v34 }
0x2d15   :  { %v5989_v56 = vpop.f32.mrb[72].mxu1 }
0x2d47   :  { %v5750_v39 = vpop.xlane.xlu0 %5749 }
0x2d48   :  { %v5753_v28 = vmul.f32 0.0078125, %v5750_v39 }
0x2d4a   :  { %v5755_v30 = vadd.f32 1e-05, %v5753_v28 }
0x2d4b   :  { %v5752_v37 = vpop.xlane.xlu0 %5751 }
0x2d4c   :  { %9875 = vrsqrt.f32 %v5755_v30  ;;  %v5754_v46 = vmul.f32 0.0078125, %v5752_v37 }
0x2d4e   :  { %v5756_v35 = vadd.f32 1e-05, %v5754_v46 }
0x2d50   :  { %9877 = vrsqrt.f32 %v5756_v35 }
0x2d56   :  { %v9876_v47 = vpop.eup %9875 }
0x2d57   :  { %v5759_v57 = vmul.f32 %v9876_v47, %v11219_v32  ;;  %v5911_v32 = vld [vmem:[#allocation16 + $0x2] sm:$0x3] }
0x2d58   :  { %v11255_v55 = vrot.slane %v5911_v32, %v10640_v45  ;;  %v11264_v62 = vrot.slane %v5911_v32, %v10636_v42 }
0x2d59   :  { %v5767_v38 = vmul.f32 %v8015_v48, %v5759_v57 }
0x2d5a   :  { %v9878_v0 = vpop.eup %9877  ;;  %v11258_v25 = vadd.f32 %v5989_v56, %v11255_v55 }
0x2d5b   :  { %v5760_v31 = vmul.f32 %v9878_v0, %v11221_v36  ;;  %v11246_v52 = vadd.f32 %v8016_v59, %v5767_v38  ;;  %v5991_v36 = vpop.f32.mrb[73].mxu1 }
0x2d5c   :  { %v11271_v41 = vadd.f32 %v5991_v36, %v11264_v62 }
0x2d5d   :  { %v5768_v54 = vmul.f32 %v8015_v48, %v5760_v31  ;;  %8956 = vmatprep.mubr.f32.mxu0 %v11246_v52 }
0x2d5f   :  { %v11249_v27 = vadd.f32 %v8016_v59, %v5768_v54 }
0x2d61   :  { %8957 = vmatmul.mubr.f32.vlgmr.msra.gmra.mrb[58].mxu0 %v11249_v27 }
0x2d62   :  { %8961 = vmatprep.mubr.msk.f32.mxu0 %vm10274_vm0, %v10273_v34  ;;  %8960 = vmatpush3.xpose.msk.msra.mxu0 %vm579_vm1, %v11258_v25 }
0x2d63   :  { %8964 = vmatprep.subr.mxu0 %v10273_v34 }
0x2e34   :  { %v8958_v49 = vpop.f32.mrb[58].mxu0 }
0x2e35   :  { %v11266_v1 = vadd.f32 %v8958_v49, %v8017_v58  ;;  %v5868_v51 = vpop.f32.mrb[59].mxu0 }
0x2e36   :  { %v11268_v44 = vadd.f32 %v8017_v58, %v5868_v51 }
0x2e38   :  { %8962 = vmatmul.mubr.msk.f32.vlgmr.msra.gmra.mrb[60].mxu0 %vm579_vm1, %v11268_v44 }
0x2e39   :  { %8965 = vmatpush3.msra.mxu0 %v11271_v41  ;;  %8966 = vmatprep.mubr.msk.f32.mxu0 %vm10274_vm0, %v10273_v34 }
0x2e3a   :  { %8969 = vmatprep.subr.mxu0 %v10273_v34 }
0x2f0b   :  { %v6072_v60 = vpop.f32.mrb[60].mxu0 }
0x2f0c   :  { %v6076_v43 = vmul.f32 0.17677669, %v6072_v60  ;;  %v8963_v2 = vpop.f32.mrb[61].mxu0 }
0x2f0e   :  { %v6077_v8 = vsel %vm657_vm2, %v6076_v43, -inf }
0x2f0f   :  { %6078 = vmax.xlane.f32.xlu1 %v6077_v8 }
0x2f20   :  { %6163 = vrot.lane.b32.xlu1 %v11258_v25, %s10275_s29 }
0x2f9c   :  { %v6079_v53 = vpop.xlane.xlu1 %6078 }
0x2f9d   :  { %v6080_v4 = vsub.f32 %v6076_v43, %v6079_v53 }
0x2f9f   :  { %v6081_v5 = vmul.f32 1.442695, %v6080_v4 }
0x2fa0   :  { %v6164_v13 = vpop.permute.xlu1 %6163 }
0x2fa1   :  { %9879 = vpow2.f32 %v6081_v5 }
0x2fab   :  { %v9880_v9 = vpop.eup %9879 }
0x2fac   :  { %v6083_v10 = vsel %vm657_vm2, %v9880_v9, 0.0 }
0x2fad   :  { %6084 = vadd.xlane.f32.xlu0 %v6083_v10 }
0x2fc3   :  { %6161 = vrot.lane.b32.xlu0 %v11268_v44, %s10275_s29 }
0x303a   :  { %v6085_v29 = vpop.xlane.xlu0 %6084 }
0x303b   :  { %9881 = vrcp.f32 %v6085_v29 }
0x303e   :  { %v6162_v63 = vpop.permute.xlu0 %6161 }
0x3045   :  { %v9882_v12 = vpop.eup %9881 }
0x3046   :  { %v6087_v11 = vmul.f32 %v9882_v12, %v9880_v9 }
0x3048   :  { %8967 = vmatmul.mubr.msk.f32.vlgmr.msra.gmra.mrb[62].mxu0 %vm657_vm2, %v6087_v11 }
0x3049   :  { %8970 = vmatpush3.xpose.msk.msra.mxu0 %vm579_vm1, %v6164_v13  ;;  %8971 = vmatprep.mubr.msk.f32.mxu0 %vm10274_vm0, %v10273_v34 }
0x304a   :  { %8974 = vmatprep.subr.mxu0 %v10273_v34 }
0x304c   :  { %8972 = vmatmul.mubr.msk.f32.vlgmr.msra.gmra.mrb[64].mxu0 %vm579_vm1, %v6162_v63 }
0x304d   :  { %8976 = vmatprep.mubr.msk.f32.mxu0 %vm10274_vm0, %v10273_v34 }
0x311b   :  { %v11293_v61 = vpop.f32.mrb[62].mxu0 }
0x311c   :  { %v8968_v33 = vpop.f32.mrb[63].mxu0 }
0x311f   :  { %v6235_v14 = vpop.f32.mrb[64].mxu0 }
0x3120   :  { %v6239_v15 = vmul.f32 0.17677669, %v6235_v14  ;;  %v8973_v16 = vpop.f32.mrb[65].mxu0 }
0x3122   :  { %v6240_v6 = vsel %vm657_vm2, %v6239_v15, -inf }
0x3123   :  { %6241 = vmax.xlane.f32.xlu1 %v6240_v6 }
0x3134   :  { %6252 = vrot.lane.b32.xlu1 %v11271_v41, %s10275_s29 }
0x3138   :  { %6328 = vrot.lane.b32.xlu1 %v11268_v44, %s10276_s9 }
0x31b0   :  { %v6242_v19 = vpop.xlane.xlu1 %6241 }
0x31b1   :  { %v6243_v26 = vsub.f32 %v6239_v15, %v6242_v19 }
0x31b3   :  { %v6244_v7 = vmul.f32 1.442695, %v6243_v26 }
0x31b4   :  { %v6253_v20 = vpop.permute.xlu1 %6252 }
0x31b5   :  { %9883 = vpow2.f32 %v6244_v7  ;;  %8975 = vmatpush3.msra.mxu0 %v6253_v20 }
0x31b6   :  { %8979 = vmatprep.subr.mxu0 %v10273_v34 }
0x31b8   :  { %v6329_v21 = vpop.permute.xlu1 %6328 }
0x31bf   :  { %v9884_v50 = vpop.eup %9883 }
0x31c0   :  { %v6246_v17 = vsel %vm657_vm2, %v9884_v50, 0.0 }
0x31c1   :  { %6247 = vadd.xlane.f32.xlu0 %v6246_v17 }
0x31d7   :  { %6330 = vrot.lane.b32.xlu0 %v11258_v25, %s10276_s9 }
0x324e   :  { %v6248_v18 = vpop.xlane.xlu0 %6247 }
0x324f   :  { %9885 = vrcp.f32 %v6248_v18 }
0x3252   :  { %v6331_v24 = vpop.permute.xlu0 %6330 }
0x3259   :  { %v9886_v22 = vpop.eup %9885 }
0x325a   :  { %v6250_v23 = vmul.f32 %v9886_v22, %v9884_v50 }
0x325c   :  { %8977 = vmatmul.mubr.msk.f32.vlgmr.msra.gmra.mrb[66].mxu0 %vm657_vm2, %v6250_v23 }
0x325d   :  { %8980 = vmatpush3.xpose.msk.msra.mxu0 %vm579_vm1, %v6331_v24  ;;  %8981 = vmatprep.mubr.msk.f32.mxu0 %vm10274_vm0, %v10273_v34 }
0x325e   :  { %8984 = vmatprep.subr.mxu0 %v10273_v34 }
0x3260   :  { %8982 = vmatmul.mubr.msk.f32.vlgmr.msra.gmra.mrb[68].mxu0 %vm579_vm1, %v6329_v21 }
0x3261   :  { %8986 = vmatprep.mubr.msk.f32.mxu0 %vm10274_vm0, %v10273_v34 }
0x332f   :  { %v11312_v3 = vpop.f32.mrb[66].mxu0 }
0x3330   :  { %v8978_v39 = vpop.f32.mrb[67].mxu0 }
0x3333   :  { %v6402_v28 = vpop.f32.mrb[68].mxu0 }
0x3334   :  { %v6406_v30 = vmul.f32 0.17677669, %v6402_v28  ;;  %v8983_v37 = vpop.f32.mrb[69].mxu0 }
0x3336   :  { %v6407_v46 = vsel %vm657_vm2, %v6406_v30, -inf }
0x3337   :  { %6408 = vmax.xlane.f32.xlu1 %v6407_v46 }
0x3348   :  { %6496 = vrot.lane.b32.xlu1 %v11258_v25, %s10269_s3  ;;  %v5995_v25 = vpop.f32.mrb[74].mxu1 }
0x3349   :  { %v5996_v36 = vadd.f32 %v5995_v25, %v11255_v55  ;;  %v5997_v58 = vpop.f32.mrb[75].mxu1 }
0x334a   :  { %v11333_v49 = vadd.f32 %v5997_v58, %v11264_v62 }
0x334c   :  { %6494 = vrot.lane.b32.xlu1 %v11268_v44, %s10269_s3  ;;  %9005 = vmatpush3.msra.mxu1 %v11333_v49 }
0x334d   :  { %9014 = vmatprep.subr.mxu1 %v10273_v34 }
0x3350   :  { %6838 = vrot.lane.b32.xlu1 %v5996_v36, %s10275_s29 }
0x33c4   :  { %v6409_v35 = vpop.xlane.xlu1 %6408 }
0x33c5   :  { %v6410_v47 = vsub.f32 %v6406_v30, %v6409_v35 }
0x33c7   :  { %v6411_v48 = vmul.f32 1.442695, %v6410_v47 }
0x33c8   :  { %v6497_v54 = vpop.permute.xlu1 %6496 }
0x33c9   :  { %9887 = vpow2.f32 %v6411_v48 }
0x33cc   :  { %v6495_v56 = vpop.permute.xlu1 %6494 }
0x33d0   :  { %v6839_v9 = vpop.permute.xlu1 %6838 }
0x33d3   :  { %v9888_v57 = vpop.eup %9887 }
0x33d4   :  { %v6413_v59 = vsel %vm657_vm2, %v9888_v57, 0.0 }
0x33d5   :  { %6414 = vadd.xlane.f32.xlu0 %v6413_v59 }
0x33eb   :  { %6418 = vrot.lane.b32.xlu0 %v11271_v41, %s10276_s9 }
0x3462   :  { %v6415_v38 = vpop.xlane.xlu0 %6414 }
0x3463   :  { %9889 = vrcp.f32 %v6415_v38 }
0x3466   :  { %v6419_v0 = vpop.permute.xlu0 %6418 }
0x3467   :  { %8985 = vmatpush3.msra.mxu0 %v6419_v0 }
0x3468   :  { %8989 = vmatprep.subr.mxu0 %v10273_v34 }
0x346d   :  { %v9890_v31 = vpop.eup %9889 }
0x346e   :  { %v6417_v32 = vmul.f32 %v9890_v31, %v9888_v57 }
0x3470   :  { %8987 = vmatmul.mubr.msk.f32.vlgmr.msra.gmra.mrb[70].mxu0 %vm657_vm2, %v6417_v32 }
0x3471   :  { %8990 = vmatpush3.xpose.msk.msra.mxu0 %vm579_vm1, %v6497_v54  ;;  %8991 = vmatprep.mubr.msk.f32.mxu0 %vm10274_vm0, %v10273_v34 }
0x3472   :  { %8994 = vmatprep.subr.mxu0 %v10273_v34 }
0x3474   :  { %8992 = vmatmul.mubr.msk.f32.vlgmr.msra.gmra.mrb[72].mxu0 %vm579_vm1, %v6495_v56 }
0x3475   :  { %8996 = vmatprep.mubr.msk.f32.mxu0 %vm10274_vm0, %v10273_v34 }
0x3543   :  { %v11338_v51 = vpop.f32.mrb[70].mxu0 }
0x3544   :  { %v8988_v44 = vpop.f32.mrb[71].mxu0 }
0x3547   :  { %v6568_v60 = vpop.f32.mrb[72].mxu0 }
0x3548   :  { %v6572_v43 = vmul.f32 0.17677669, %v6568_v60  ;;  %v8993_v2 = vpop.f32.mrb[73].mxu0 }
0x354a   :  { %v6573_v8 = vsel %vm657_vm2, %v6572_v43, -inf }
0x354b   :  { %6574 = vmax.xlane.f32.xlu0 %v6573_v8 }
0x3561   :  { %6584 = vrot.lane.b32.xlu0 %v11271_v41, %s10269_s3 }
0x3565   :  { %6836 = vrot.lane.b32.xlu0 %v11266_v1, %s10275_s29 }
0x3569   :  { %7003 = vrot.lane.b32.xlu0 %v11266_v1, %s10276_s9 }
0x356d   :  { %7169 = vrot.lane.b32.xlu0 %v11266_v1, %s10269_s3 }
0x35d8   :  { %v6575_v55 = vpop.xlane.xlu0 %6574 }
0x35d9   :  { %v6576_v62 = vsub.f32 %v6572_v43, %v6575_v55 }
0x35db   :  { %v6577_v53 = vmul.f32 1.442695, %v6576_v62 }
0x35dc   :  { %v6585_v4 = vpop.permute.xlu0 %6584 }
0x35dd   :  { %9891 = vpow2.f32 %v6577_v53  ;;  %8995 = vmatpush3.msra.mxu0 %v6585_v4 }
0x35de   :  { %8999 = vmatprep.subr.mxu0 %v10273_v34 }
0x35e0   :  { %v6837_v11 = vpop.permute.xlu0 %6836 }
0x35e4   :  { %v7004_v63 = vpop.permute.xlu0 %7003 }
0x35e7   :  { %v9892_v5 = vpop.eup %9891 }
0x35e8   :  { %v6579_v41 = vsel %vm657_vm2, %v9892_v5, 0.0 }
0x35e9   :  { %6580 = vadd.xlane.f32.xlu1 %v6579_v41 }
0x35fa   :  { %7005 = vrot.lane.b32.xlu1 %v5996_v36, %s10276_s9 }
0x35fe   :  { %7171 = vrot.lane.b32.xlu1 %v5996_v36, %s10269_s3 }
0x3676   :  { %v6581_v10 = vpop.xlane.xlu1 %6580 }
0x3677   :  { %9893 = vrcp.f32 %v6581_v10 }
0x367a   :  { %v7006_v13 = vpop.permute.xlu1 %7005 }
0x367e   :  { %v7172_v33 = vpop.permute.xlu1 %7171 }
0x3681   :  { %v9894_v29 = vpop.eup %9893 }
0x3682   :  { %v6583_v12 = vmul.f32 %v9894_v29, %v9892_v5 }
0x3684   :  { %8997 = vmatmul.mubr.msk.f32.vlgmr.msra.gmra.mrb[74].mxu0 %vm657_vm2, %v6583_v12 }
0x3685   :  { %9000 = vmatpush3.xpose.msk.msra.mxu0 %vm579_vm1, %v5996_v36  ;;  %9001 = vmatprep.mubr.msk.f32.mxu0 %vm10274_vm0, %v10273_v34 }
0x3686   :  { %9009 = vmatprep.subr.mxu0 %v10273_v34 }
0x3688   :  { %9002 = vmatmul.mubr.msk.f32.vlgmr.msra.gmra.mrb[76].mxu0 %vm579_vm1, %v11266_v1  ;;  %v7170_v1 = vpop.permute.xlu0 %7169 }
0x3689   :  { %9010 = vmatpush3.xpose.msk.msra.mxu0 %vm579_vm1, %v6839_v9  ;;  %9011 = vmatprep.mubr.msk.f32.mxu0 %vm10274_vm0, %v10273_v34 }
0x368a   :  { %9019 = vmatprep.subr.mxu0 %v10273_v34 }
0x368c   :  { %9012 = vmatmul.mubr.msk.f32.vlgmr.msra.gmra.mrb[78].mxu0 %vm579_vm1, %v6837_v11 }
0x368d   :  { %9020 = vmatpush3.xpose.msk.msra.mxu0 %vm579_vm1, %v7006_v13  ;;  %9021 = vmatprep.mubr.msk.f32.mxu0 %vm10274_vm0, %v10273_v34 }
0x368e   :  { %9029 = vmatprep.subr.mxu0 %v10273_v34 }
0x3690   :  { %9022 = vmatmul.mubr.msk.f32.vlgmr.msra.gmra.mrb[80].mxu0 %vm579_vm1, %v7004_v63 }
0x3691   :  { %9030 = vmatpush3.xpose.msk.msra.mxu0 %vm579_vm1, %v7172_v33  ;;  %9031 = vmatprep.mubr.msk.f32.mxu0 %vm10274_vm0, %v10273_v34  ;;  %v7351_v33 = vld [vmem:[#allocation17 + $0x80] sm:$0xff] }
0x3694   :  { %9032 = vmatmul.mubr.msk.f32.vlgmr.msra.gmra.mrb[82].mxu0 %vm579_vm1, %v7170_v1  ;;  %v7352_v1 = vld [vmem:[#allocation17 + $0x88] sm:$0xff] }
0x3757   :  { %v11374_v14 = vpop.f32.mrb[74].mxu0 }
0x3758   :  { %v8998_v15 = vpop.f32.mrb[75].mxu0 }
0x3759   :  { %v7353_v15 = vld [vmem:[#allocation17 + $0x90] sm:$0xff] }
0x375b   :  { %v6747_v16 = vpop.f32.mrb[76].mxu0 }
0x375c   :  { %v6751_v6 = vmul.f32 0.17677669, %v6747_v16  ;;  %v9003_v19 = vpop.f32.mrb[77].mxu0  ;;  %v9557_v16 = vpack.c.bf16 %v7352_v1, %v7351_v33  ;;  %v7498_v33 = vld [vmem:[#allocation19 + $0x118] sm:$0xff]  ;;  %v7495_v1 = vld [vmem:[#allocation19 + $0x100] sm:$0xff] }
0x375e   :  { %v6752_v26 = vsel %vm657_vm2, %v6751_v6, -inf  ;;  %9558 = vmatprep.subr.bf16.mxu0 %v9557_v16 }
0x375f   :  { %6753 = vmax.xlane.f32.xlu1 %v6752_v26  ;;  %v6910_v7 = vpop.f32.mrb[78].mxu0  ;;  %9560 = vmatpush3.bf16.msra.mxu0 %v9557_v16  ;;  %v7497_v16 = vld [vmem:[#allocation19 + $0x110] sm:$0xff] }
0x3760   :  { %v6914_v20 = vmul.f32 0.17677669, %v6910_v7  ;;  %v9013_v50 = vpop.f32.mrb[79].mxu0  ;;  %v7355_v7 = vld [vmem:[#allocation17 + $0xa0] sm:$0xff] }
0x3762   :  { %v6915_v17 = vsel %vm657_vm2, %v6914_v20, -inf }
0x3763   :  { %6916 = vmax.xlane.f32.xlu0 %v6915_v17  ;;  %v7077_v18 = vpop.f32.mrb[80].mxu0 }
0x3764   :  { %v7081_v22 = vmul.f32 0.17677669, %v7077_v18  ;;  %v9023_v23 = vpop.f32.mrb[81].mxu0 }
0x3765   :  { %v7358_v23 = vld [vmem:[#allocation17 + $0xb8] sm:$0xff] }
0x3766   :  { %v7082_v24 = vsel %vm657_vm2, %v7081_v22, -inf }
0x3767   :  { %7083 = vmax.xlane.f32.xlu0 %v7082_v24  ;;  %v7243_v21 = vpop.f32.mrb[82].mxu0 }
0x3768   :  { %v7247_v39 = vmul.f32 0.17677669, %v7243_v21  ;;  %v9033_v28 = vpop.f32.mrb[83].mxu0 }
0x376a   :  { %v7248_v30 = vsel %vm657_vm2, %v7247_v39, -inf }
0x376b   :  { %7249 = vmax.xlane.f32.xlu1 %v7248_v30  ;;  %v7359_v30 = vld [vmem:[#allocation17 + $0xc0] sm:$0xff] }
0x37ec   :  { %v6754_v37 = vpop.xlane.xlu1 %6753 }
0x37ed   :  { %v6755_v46 = vsub.f32 %v6751_v6, %v6754_v37  ;;  %v7354_v6 = vld [vmem:[#allocation17 + $0x98] sm:$0xff]  ;;  %v7360_v37 = vld [vmem:[#allocation17 + $0xc8] sm:$0xff] }
0x37ee   :  { %v9561_v26 = vpack.c.bf16 %v7354_v6, %v7353_v15  ;;  %v7500_v6 = vld [vmem:[#allocation19 + $0x128] sm:$0xff] }
0x37ef   :  { %v6756_v35 = vmul.f32 1.442695, %v6755_v46 }
0x37f0   :  { %v6917_v47 = vpop.xlane.xlu0 %6916  ;;  %9562 = vmatprep.subr.bf16.mxu0 %v9561_v26 }
0x37f1   :  { %9895 = vpow2.f32 %v6756_v35  ;;  %v6918_v48 = vsub.f32 %v6914_v20, %v6917_v47  ;;  %v7356_v20 = vld [vmem:[#allocation17 + $0xa8] sm:$0xff]  ;;  %9564 = vmatpush3.bf16.msra.mxu0 %v9561_v26  ;;  %v9573_v47 = vpack.c.bf16 %v7360_v37, %v7359_v30  ;;  %v9591_v26 = vpack.c.bf16 %v7497_v16, %v7495_v1  ;;  %v7641_v1 = vld [vmem:[#allocation20 + $0x198] sm:$0xff] }
0x37f2   :  { %v9565_v17 = vpack.c.bf16 %v7356_v20, %v7355_v7  ;;  %v7499_v20 = vld [vmem:[#allocation19 + $0x120] sm:$0xff] }
0x37f3   :  { %v6919_v57 = vmul.f32 1.442695, %v6918_v48  ;;  %v7361_v48 = vld [vmem:[#allocation17 + $0xd0] sm:$0xff] }
0x37f4   :  { %v7084_v59 = vpop.xlane.xlu0 %7083  ;;  %9566 = vmatprep.subr.bf16.mxu0 %v9565_v17 }
0x37f5   :  { %9897 = vpow2.f32 %v6919_v57  ;;  %v7085_v38 = vsub.f32 %v7081_v22, %v7084_v59  ;;  %v7357_v22 = vld [vmem:[#allocation17 + $0xb0] sm:$0xff]  ;;  %9568 = vmatpush3.bf16.msra.mxu0 %v9565_v17  ;;  %v7362_v57 = vld [vmem:[#allocation17 + $0xd8] sm:$0xff]  ;;  %v7363_v59 = vld [vmem:[#allocation17 + $0xe0] sm:$0xff] }
0x37f6   :  { %v7504_v17 = vld [vmem:[#allocation19 + $0x148] sm:$0xff] }
0x37f7   :  { %v7086_v0 = vmul.f32 1.442695, %v7085_v38  ;;  %v7364_v38 = vld [vmem:[#allocation17 + $0xe8] sm:$0xff] }
0x37f8   :  { %v7250_v58 = vpop.xlane.xlu1 %7249 }
0x37f9   :  { %9899 = vpow2.f32 %v7086_v0  ;;  %v7251_v44 = vsub.f32 %v7247_v39, %v7250_v58  ;;  %v9569_v39 = vpack.c.bf16 %v7358_v23, %v7357_v22  ;;  %v9581_v0 = vpack.c.bf16 %v7364_v38, %v7363_v59  ;;  %v7503_v22 = vld [vmem:[#allocation19 + $0x140] sm:$0xff]  ;;  %v7505_v23 = vld [vmem:[#allocation19 + $0x150] sm:$0xff] }
0x37fa   :  { %v7507_v59 = vld [vmem:[#allocation19 + $0x160] sm:$0xff]  ;;  %v7509_v38 = vld [vmem:[#allocation19 + $0x170] sm:$0xff] }
0x37fb   :  { %v9896_v31 = vpop.eup %9895  ;;  %v7252_v60 = vmul.f32 1.442695, %v7251_v44  ;;  %9570 = vmatprep.subr.bf16.mxu0 %v9569_v39 }
0x37fc   :  { %v6758_v54 = vsel %vm657_vm2, %v9896_v31, 0.0  ;;  %9572 = vmatpush3.bf16.msra.mxu0 %v9569_v39 }
0x37fd   :  { %6759 = vadd.xlane.f32.xlu0 %v6758_v54  ;;  %9901 = vpow2.f32 %v7252_v60  ;;  %9574 = vmatprep.subr.bf16.mxu0 %v9573_v47 }
0x37ff   :  { %v9898_v32 = vpop.eup %9897 }
0x3800   :  { %v6921_v56 = vsel %vm657_vm2, %v9898_v32, 0.0  ;;  %9576 = vmatpush3.bf16.msra.mxu0 %v9573_v47 }
0x3801   :  { %6922 = vadd.xlane.f32.xlu1 %v6921_v56 }
0x3803   :  { %v9900_v25 = vpop.eup %9899 }
0x3804   :  { %v7088_v36 = vsel %vm657_vm2, %v9900_v25, 0.0 }
0x3805   :  { %7089 = vadd.xlane.f32.xlu0 %v7088_v36 }
0x3807   :  { %v9902_v43 = vpop.eup %9901 }
0x3808   :  { %v7254_v2 = vsel %vm657_vm2, %v9902_v43, 0.0 }
0x3812   :  { %7093 = vrot.lane.b32.xlu1 %v11333_v49, %s10276_s9 }
0x381b   :  { %6927 = vrot.lane.b32.xlu0 %v11333_v49, %s10275_s29 }
0x3836   :  { %7255 = vadd.xlane.f32.xlu1 %v7254_v2 }
0x3847   :  { %7259 = vrot.lane.b32.xlu1 %v11333_v49, %s10269_s3 }
0x388a   :  { %v6760_v8 = vpop.xlane.xlu0 %6759 }
0x388b   :  { %9903 = vrcp.f32 %v6760_v8 }
0x388e   :  { %v6923_v55 = vpop.xlane.xlu1 %6922 }
0x388f   :  { %9905 = vrcp.f32 %v6923_v55 }
0x3892   :  { %v7090_v62 = vpop.xlane.xlu0 %7089  ;;  %v7094_v49 = vpop.permute.xlu1 %7093 }
0x3893   :  { %9907 = vrcp.f32 %v7090_v62 }
0x3895   :  { %v9904_v53 = vpop.eup %9903 }
0x3896   :  { %v6762_v4 = vmul.f32 %v9904_v53, %v9896_v31  ;;  %v6928_v5 = vpop.permute.xlu0 %6927  ;;  %v7366_v31 = vld [vmem:[#allocation17 + $0xf8] sm:$0xff] }
0x3898   :  { %9007 = vmatmul.mubr.msk.f32.vlgmr.msra.gmra.mrb[76].mxu1 %vm657_vm2, %v6762_v4 }
0x3899   :  { %v9906_v41 = vpop.eup %9905  ;;  %9015 = vmatpush3.msra.mxu1 %v6928_v5  ;;  %9016 = vmatprep.mubr.msk.f32.mxu1 %vm10274_vm0, %v10273_v34 }
0x389a   :  { %v6925_v9 = vmul.f32 %v9906_v41, %v9898_v32  ;;  %9024 = vmatprep.subr.mxu1 %v10273_v34 }
0x389c   :  { %9017 = vmatmul.mubr.msk.f32.vlgmr.msra.gmra.mrb[78].mxu1 %vm657_vm2, %v6925_v9 }
0x389d   :  { %v9908_v10 = vpop.eup %9907  ;;  %9025 = vmatpush3.msra.mxu1 %v7094_v49  ;;  %9026 = vmatprep.mubr.msk.f32.mxu1 %vm10274_vm0, %v10273_v34  ;;  %v8043_v49 = vld [vmem:[%s11483_s13 + $0x1] ss:$0 sm:$0xff] }
0x389e   :  { %v7092_v29 = vmul.f32 %v9908_v10, %v9900_v25  ;;  %9034 = vmatprep.subr.mxu1 %v10273_v34 }
0x38a0   :  { %9027 = vmatmul.mubr.msk.f32.vlgmr.msra.gmra.mrb[80].mxu1 %vm657_vm2, %v7092_v29 }
0x38a1   :  { %9036 = vmatprep.mubr.msk.f32.mxu1 %vm10274_vm0, %v10273_v34 }
0x38c3   :  { %v7256_v12 = vpop.xlane.xlu1 %7255 }
0x38c4   :  { %9909 = vrcp.f32 %v7256_v12 }
0x38c7   :  { %v7260_v11 = vpop.permute.xlu1 %7259 }
0x38c8   :  { %9035 = vmatpush3.msra.mxu1 %v7260_v11 }
0x38ce   :  { %v9910_v13 = vpop.eup %9909 }
0x38cf   :  { %v7258_v63 = vmul.f32 %v9910_v13, %v9902_v43 }
0x38d1   :  { %9037 = vmatmul.mubr.msk.f32.vlgmr.msra.gmra.mrb[82].mxu1 %vm657_vm2, %v7258_v63  ;;  %v7496_v63 = vld [vmem:[#allocation19 + $0x108] sm:$0xff] }
0x38d2   :  { %7604 = vmatprep.mubr.f32.mxu1 %v10273_v34  ;;  %v9589_v15 = vpack.c.bf16 %v7498_v33, %v7496_v63  ;;  %v7623_v63 = vld [vmem:[#allocation20 + $0x108] sm:$0xff]  ;;  %v7640_v33 = vld [vmem:[#allocation20 + $0x190] sm:$0xff] }
0x38d3   :  { %v9625_v16 = vpack.c.bf16 %v7641_v1, %v7640_v33 }
0x38d4   :  { %9590 = vmatprep.subr.bf16.mxu1 %v9589_v15 }
0x38d5   :  { %9592 = vmatpush1.bf16.msra.mxu1 %v9591_v26  ;;  %v7642_v26 = vld [vmem:[#allocation20 + $0x1a0] sm:$0xff] }
0x396b   :  { %v6832_v19 = vpop.f32.mrb[76].mxu1 }
0x396c   :  { %v9008_v50 = vpop.f32.mrb[77].mxu1 }
0x396d   :  { %v7501_v50 = vld [vmem:[#allocation19 + $0x130] sm:$0xff] }
0x396f   :  { %v6999_v18 = vpop.f32.mrb[78].mxu1 }
0x3970   :  { %v9752_v24 = vpack.i.bf16 %v6999_v18, %v11312_v3  ;;  %v9018_v21 = vpop.f32.mrb[79].mxu1  ;;  %v9577_v3 = vpack.c.bf16 %v7362_v57, %v7361_v48  ;;  %v7506_v18 = vld [vmem:[#allocation19 + $0x158] sm:$0xff]  ;;  %v7508_v48 = vld [vmem:[#allocation19 + $0x168] sm:$0xff] }
0x3971   :  { %v7510_v57 = vld [vmem:[#allocation19 + $0x178] sm:$0xff] }
0x3972   :  { %9753 = vrot.lane.b32.xlu0 %v9752_v24, %s10269_s3  ;;  %9578 = vmatprep.subr.bf16.mxu0 %v9577_v3  ;;  %v9599_v24 = vpack.c.bf16 %v7505_v23, %v7503_v22 }
0x3973   :  { %v7165_v28 = vpop.f32.mrb[80].mxu1  ;;  %9580 = vmatpush3.bf16.msra.mxu0 %v9577_v3  ;;  %v9601_v3 = vpack.c.bf16 %v7510_v57, %v7508_v48  ;;  %v7631_v48 = vld [vmem:[#allocation20 + $0x148] sm:$0xff]  ;;  %v7648_v57 = vld [vmem:[#allocation20 + $0x1d0] sm:$0xff] }
0x3974   :  { %v9757_v46 = vpack.i.bf16 %v7165_v28, %v11338_v51  ;;  %v9028_v35 = vpop.f32.mrb[81].mxu1  ;;  %9582 = vmatprep.subr.bf16.mxu0 %v9581_v0  ;;  %v7365_v51 = vld [vmem:[#allocation17 + $0xf0] sm:$0xff] }
0x3975   :  { %v9585_v54 = vpack.c.bf16 %v7366_v31, %v7365_v51  ;;  %v7512_v51 = vld [vmem:[#allocation19 + $0x188] sm:$0xff]  ;;  %v7514_v31 = vld [vmem:[#allocation19 + $0x198] sm:$0xff] }
0x3976   :  { %9758 = vrot.lane.b32.xlu1 %v9757_v46, %s10276_s9 }
0x3977   :  { %9584 = vmatpush3.bf16.msra.mxu0 %v9581_v0  ;;  %v9603_v0 = vpack.c.bf16 %v7509_v38, %v7507_v59 }
0x3978   :  { %9586 = vmatprep.subr.bf16.mxu0 %v9585_v54 }
0x397b   :  { %9588 = vmatpush3.bf16.msra.mxu0 %v9585_v54  ;;  %v9605_v54 = vpack.c.bf16 %v7514_v31, %v7512_v51  ;;  %v7633_v51 = vld [vmem:[#allocation20 + $0x158] sm:$0xff]  ;;  %v7650_v31 = vld [vmem:[#allocation20 + $0x1e0] sm:$0xff] }
0x39a4   :  { %v7331_v32 = vpop.f32.mrb[82].mxu1 }
0x39a5   :  { %v9762_v56 = vpack.i.bf16 %v7331_v32, %v11374_v14  ;;  %v9038_v25 = vpop.f32.mrb[83].mxu1  ;;  %v7511_v32 = vld [vmem:[#allocation19 + $0x180] sm:$0xff] }
0x39a6   :  { %v7516_v25 = vld [vmem:[#allocation19 + $0x1a8] sm:$0xff] }
0x39a7   :  { %9763 = vrot.lane.b32.xlu0 %v9762_v56, %s10275_s29  ;;  %v7513_v56 = vld [vmem:[#allocation19 + $0x190] sm:$0xff] }
0x39e4   :  { %v9754_v36 = vpop.permute.xlu0 %9753 }
0x39e5   :  { %v9756_v44 = vunpack.i.h.bf16 %v9754_v36  ;;  %v9755_v60 = vunpack.i.l.bf16 %v9754_v36  ;;  %v9607_v36 = vpack.c.bf16 %v7513_v56, %v7511_v32 }
0x39e7   :  { %v7347_v55 = vsel %vm579_vm1, %v6832_v19, %v9756_v44  ;;  %v6672_v4 = vsel %vm579_vm1, %v11293_v61, %v9755_v60  ;;  %v7502_v19 = vld [vmem:[#allocation19 + $0x138] sm:$0xff]  ;;  %v7515_v44 = vld [vmem:[#allocation19 + $0x1a0] sm:$0xff]  ;;  %v7517_v60 = vld [vmem:[#allocation19 + $0x1b0] sm:$0xff] }
0x39e8   :  { %v9759_v58 = vpop.permute.xlu1 %9758  ;;  %v9593_v7 = vpack.c.bf16 %v7502_v19, %v7500_v6  ;;  %v7624_v6 = vld [vmem:[#allocation20 + $0x110] sm:$0xff]  ;;  %v7625_v19 = vld [vmem:[#allocation20 + $0x118] sm:$0xff] }
0x39e9   :  { %v9761_v43 = vunpack.i.h.bf16 %v9759_v58  ;;  %v9760_v2 = vunpack.i.l.bf16 %v9759_v58  ;;  %v7518_v58 = vld [vmem:[#allocation19 + $0x1b8] sm:$0xff] }
0x39ea   :  { %9594 = vmatprep.subr.bf16.mxu1 %v9593_v7  ;;  %v7643_v7 = vld [vmem:[#allocation20 + $0x1a8] sm:$0xff] }
0x39eb   :  { %v6673_v5 = vsel %vm1254_vm3, %v6672_v4, %v9760_v2  ;;  %v7348_v14 = vsel %vm1254_vm3, %v7347_v55, %v9761_v43  ;;  %v9609_v43 = vpack.c.bf16 %v7518_v58, %v7516_v25  ;;  %v7520_v2 = vld [vmem:[#allocation19 + $0x1c8] sm:$0xff]  ;;  %v9611_v55 = vpack.c.bf16 %v7517_v60, %v7515_v44  ;;  %v7521_v4 = vld [vmem:[#allocation19 + $0x1d0] sm:$0xff] }
0x3a19   :  { %v9764_v8 = vpop.permute.xlu0 %9763 }
0x3a1a   :  { %v9766_v62 = vunpack.i.h.bf16 %v9764_v8  ;;  %v9765_v53 = vunpack.i.l.bf16 %v9764_v8  ;;  %v7522_v8 = vld [vmem:[#allocation19 + $0x1d8] sm:$0xff] }
0x3a1c   :  { %v6674_v41 = vsel %vm1256_vm4, %v6673_v5, %v9765_v53  ;;  %v7349_v9 = vsel %vm1256_vm4, %v7348_v14, %v9766_v62  ;;  %v9613_v62 = vpack.c.bf16 %v7522_v8, %v7520_v2  ;;  %v7519_v53 = vld [vmem:[#allocation19 + $0x1c0] sm:$0xff]  ;;  %v7524_v5 = vld [vmem:[#allocation19 + $0x1e8] sm:$0xff]  ;;  %v7526_v14 = vld [vmem:[#allocation19 + $0x1f8] sm:$0xff] }
0x3a1d   :  { %9071 = vmatprep.mubr.f32.mxu0 %v6674_v41  ;;  %v9615_v41 = vpack.c.bf16 %v7521_v4, %v7519_v53  ;;  %v8047_v4 = vld [vmem:[%s11487_s17 + $0x1] ss:$0 sm:$0xff] }
0x3a1e   :  { %9072 = vmatmul.mubr.f32.vlgmr.msra.gmra.mrb[84].mxu0 %v7349_v9  ;;  %v9617_v9 = vpack.c.bf16 %v7526_v14, %v7524_v5 }
0x3af1   :  { %v9073_v10 = vpop.f32.mrb[84].mxu0 }
0x3af2   :  { %v7447_v29 = vadd.f32 %v9073_v10, %v8043_v49  ;;  %v7441_v12 = vpop.f32.mrb[85].mxu0  ;;  %v7525_v10 = vld [vmem:[#allocation19 + $0x1f0] sm:$0xff] }
0x3af3   :  { %v7442_v11 = vadd.f32 %v8043_v49, %v7441_v12  ;;  %v7523_v49 = vld [vmem:[#allocation19 + $0x1e0] sm:$0xff] }
0x3af4   :  { %v7455_v61 = vadd.f32 %v7447_v29, %v11249_v27  ;;  %v9595_v27 = vpack.c.bf16 %v7501_v50, %v7499_v20  ;;  %v9619_v29 = vpack.c.bf16 %v7525_v10, %v7523_v49  ;;  %v7638_v12 = vld [vmem:[#allocation20 + $0x180] sm:$0xff]  ;;  %v9627_v20 = vpack.c.bf16 %v7625_v19, %v7624_v6  ;;  %v7635_v10 = vld [vmem:[#allocation20 + $0x168] sm:$0xff] }
0x3af5   :  { %v7454_v13 = vadd.f32 %v7442_v11, %v11246_v52  ;;  %v9597_v52 = vpack.c.bf16 %v7506_v18, %v7504_v17  ;;  %v7639_v11 = vld [vmem:[#allocation20 + $0x188] sm:$0xff]  ;;  %v9629_v50 = vpack.c.bf16 %v7643_v7, %v7642_v26  ;;  %v7626_v17 = vld [vmem:[#allocation20 + $0x120] sm:$0xff] }
0x3af6   :  { %7458 = vadd.xlane.f32.xlu0 %v7455_v61  ;;  %9596 = vmatpush1.bf16.msra.mxu1 %v9595_v27  ;;  %v7627_v18 = vld [vmem:[#allocation20 + $0x128] sm:$0xff]  ;;  %v7644_v27 = vld [vmem:[#allocation20 + $0x1b0] sm:$0xff]  ;;  %v7634_v49 = vld [vmem:[#allocation20 + $0x160] sm:$0xff] }
0x3af7   :  { %7456 = vadd.xlane.f32.xlu1 %v7454_v13  ;;  %9598 = vmatprep.subr.bf16.mxu1 %v9597_v52  ;;  %v7645_v52 = vld [vmem:[#allocation20 + $0x1b8] sm:$0xff]  ;;  %v9631_v22 = vpack.c.bf16 %v7627_v18, %v7626_v17 }
0x3af8   :  { %v9633_v23 = vpack.c.bf16 %v7645_v52, %v7644_v27 }
0x3afa   :  { %9600 = vmatpush1.bf16.msra.mxu1 %v9599_v24  ;;  %v7628_v24 = vld [vmem:[#allocation20 + $0x130] sm:$0xff] }
0x3afb   :  { %9602 = vmatprep.subr.bf16.mxu1 %v9601_v3  ;;  %v7649_v3 = vld [vmem:[#allocation20 + $0x1d8] sm:$0xff] }
0x3afc   :  { %v9641_v38 = vpack.c.bf16 %v7649_v3, %v7648_v57 }
0x3afe   :  { %9604 = vmatpush1.bf16.msra.mxu1 %v9603_v0  ;;  %v7632_v0 = vld [vmem:[#allocation20 + $0x150] sm:$0xff] }
0x3aff   :  { %9606 = vmatprep.subr.bf16.mxu1 %v9605_v54  ;;  %v7651_v54 = vld [vmem:[#allocation20 + $0x1e8] sm:$0xff]  ;;  %v9643_v32 = vpack.c.bf16 %v7633_v51, %v7632_v0 }
0x3b00   :  { %v9645_v56 = vpack.c.bf16 %v7651_v54, %v7650_v31  ;;  %v7798_v31 = vld [vmem:[#allocation22] sm:$0xff]  ;;  %v7799_v54 = vld [vmem:[#allocation22 + $0x8] sm:$0xff] }
0x3b02   :  { %9608 = vmatpush1.bf16.msra.mxu1 %v9607_v36 }
0x3b03   :  { %9610 = vmatprep.subr.bf16.mxu1 %v9609_v43 }
0x3b06   :  { %9612 = vmatpush1.bf16.msra.mxu1 %v9611_v55  ;;  %v8046_v55 = vld [vmem:[%s11486_s16 + $0x1] ss:$0 sm:$0xff] }
0x3b07   :  { %9614 = vmatprep.subr.bf16.mxu1 %v9613_v62 }
0x3b0a   :  { %9616 = vmatpush1.bf16.msra.mxu1 %v9615_v41 }
0x3b0b   :  { %9618 = vmatprep.subr.bf16.mxu1 %v9617_v9 }
0x3b0e   :  { %9620 = vmatpush1.bf16.msra.mxu1 %v9619_v29  ;;  %v7653_v29 = vld [vmem:[#allocation20 + $0x1f8] sm:$0xff] }
0x3b83   :  { %v7459_v21 = vpop.xlane.xlu0 %7458 }
0x3b84   :  { %v7461_v39 = vmul.f32 0.0078125, %v7459_v21  ;;  %v7457_v28 = vpop.xlane.xlu1 %7456  ;;  %v7629_v21 = vld [vmem:[#allocation20 + $0x138] sm:$0xff] }
0x3b85   :  { %v7460_v30 = vmul.f32 0.0078125, %v7457_v28  ;;  %v7647_v28 = vld [vmem:[#allocation20 + $0x1c8] sm:$0xff] }
0x3b86   :  { %v11421_v37 = vsub.f32 %v7455_v61, %v7461_v39  ;;  %v7622_v61 = vld [vmem:[#allocation20 + $0x100] sm:$0xff] }
0x3b87   :  { %v11423_v46 = vsub.f32 %v7454_v13, %v7460_v30  ;;  %v9621_v13 = vpack.c.bf16 %v7639_v11, %v7638_v12  ;;  %v9623_v15 = vpack.c.bf16 %v7623_v63, %v7622_v61  ;;  %v7646_v39 = vld [vmem:[#allocation20 + $0x1c0] sm:$0xff]  ;;  %v9635_v30 = vpack.c.bf16 %v7629_v21, %v7628_v24  ;;  %v7636_v11 = vld [vmem:[#allocation20 + $0x170] sm:$0xff]  ;;  %v7637_v61 = vld [vmem:[#allocation20 + $0x178] sm:$0xff] }
0x3b88   :  { %v7465_v35 = vmul.f32 %v11421_v37, %v11421_v37  ;;  %v8048_v63 = vld [vmem:[%s11491_s21 + $0x2] sm:$0x3] }
0x3b89   :  { %v7464_v47 = vmul.f32 %v11423_v46, %v11423_v46  ;;  %9622 = vmatprep.subr.bf16.mxu0 %v9621_v13  ;;  %v9651_v13 = vpack.c.bf16 %v7637_v61, %v7636_v11  ;;  %v7533_v33 = vrot.slane %v8048_v63, %v10640_v45 }
0x3b8a   :  { %7468 = vadd.xlane.f32.xlu1 %v7465_v35  ;;  %9624 = vmatpush3.bf16.msra.mxu0 %v9623_v15  ;;  %v9637_v35 = vpack.c.bf16 %v7647_v28, %v7646_v39 }
0x3b8b   :  { %7466 = vadd.xlane.f32.xlu0 %v7464_v47  ;;  %9626 = vmatprep.subr.bf16.mxu0 %v9625_v16  ;;  %v7630_v47 = vld [vmem:[#allocation20 + $0x140] sm:$0xff] }
0x3b8c   :  { %v9639_v59 = vpack.c.bf16 %v7631_v48, %v7630_v47 }
0x3b8e   :  { %9628 = vmatpush3.bf16.msra.mxu0 %v9627_v20 }
0x3b8f   :  { %9630 = vmatprep.subr.bf16.mxu0 %v9629_v50 }
0x3b92   :  { %9632 = vmatpush3.bf16.msra.mxu0 %v9631_v22 }
0x3b93   :  { %9634 = vmatprep.subr.bf16.mxu0 %v9633_v23 }
0x3b96   :  { %9636 = vmatpush3.bf16.msra.mxu0 %v9635_v30 }
0x3b97   :  { %9638 = vmatprep.subr.bf16.mxu0 %v9637_v35 }
0x3b9a   :  { %9640 = vmatpush3.bf16.msra.mxu0 %v9639_v59 }
0x3b9b   :  { %9642 = vmatprep.subr.bf16.mxu0 %v9641_v38 }
0x3b9e   :  { %9644 = vmatpush3.bf16.msra.mxu0 %v9643_v32  ;;  %v9654_v32 = vpack.c.bf16 %v7799_v54, %v7798_v31 }
0x3b9f   :  { %9646 = vmatprep.subr.bf16.mxu0 %v9645_v56  ;;  %v10277_v56 = vmov 0.0|0.0  }
0x3ba0   :  { %9653 = vmatprep.subr.bf16.mxu1 %v10277_v56 }
0x3c17   :  { %v7469_v25 = vpop.xlane.xlu1 %7468 }
0x3c18   :  { %v7471_v36 = vmul.f32 0.0078125, %v7469_v25  ;;  %v7467_v58 = vpop.xlane.xlu0 %7466  ;;  %v7800_v25 = vld [vmem:[#allocation22 + $0x10] sm:$0xff] }
0x3c19   :  { %v7470_v44 = vmul.f32 0.0078125, %v7467_v58 }
0x3c1a   :  { %v7473_v60 = vadd.f32 1e-05, %v7471_v36  ;;  %v7801_v36 = vld [vmem:[#allocation22 + $0x18] sm:$0xff] }
0x3c1b   :  { %v7472_v43 = vadd.f32 1e-05, %v7470_v44  ;;  %v9657_v58 = vpack.c.bf16 %v7801_v36, %v7800_v25  ;;  %v7802_v44 = vld [vmem:[#allocation22 + $0x20] sm:$0xff] }
0x3c1c   :  { %9911 = vrsqrt.f32 %v7473_v60  ;;  %v7803_v60 = vld [vmem:[#allocation22 + $0x28] sm:$0xff] }
0x3c1d   :  { %9913 = vrsqrt.f32 %v7472_v43  ;;  %v9660_v43 = vpack.c.bf16 %v7803_v60, %v7802_v44 }
0x3c26   :  { %v9912_v2 = vpop.eup %9911 }
0x3c27   :  { %v9914_v8 = vpop.eup %9913  ;;  %v7477_v53 = vmul.f32 %v9912_v2, %v11421_v37  ;;  %v7652_v37 = vld [vmem:[#allocation20 + $0x1f0] sm:$0xff] }
0x3c28   :  { %v7476_v62 = vmul.f32 %v9914_v8, %v11423_v46  ;;  %v9647_v46 = vpack.c.bf16 %v7635_v10, %v7634_v49  ;;  %v9649_v12 = vpack.c.bf16 %v7653_v29, %v7652_v37  ;;  %v7804_v2 = vld [vmem:[#allocation22 + $0x30] sm:$0xff]  ;;  %v7805_v8 = vld [vmem:[#allocation22 + $0x38] sm:$0xff]  ;;  %v7811_v49 = vld [vmem:[#allocation22 + $0x68] sm:$0xff] }
0x3c29   :  { %v7485_v41 = vmul.f32 %v8046_v55, %v7477_v53  ;;  %v7807_v53 = vld [vmem:[#allocation22 + $0x48] sm:$0xff]  ;;  %v7813_v37 = vld [vmem:[#allocation22 + $0x78] sm:$0xff] }
0x3c2a   :  { %v7484_v5 = vmul.f32 %v8046_v55, %v7476_v62  ;;  %9648 = vmatpush3.bf16.msra.mxu0 %v9647_v46  ;;  %v9663_v55 = vpack.c.bf16 %v7805_v8, %v7804_v2  ;;  %v7806_v62 = vld [vmem:[#allocation22 + $0x40] sm:$0xff]  ;;  %v7812_v46 = vld [vmem:[#allocation22 + $0x70] sm:$0xff] }
0x3c2b   :  { %v7493_v9 = vadd.f32 %v8047_v4, %v7485_v41  ;;  %9650 = vmatprep.subr.bf16.mxu0 %v9649_v12  ;;  %v9675_v29 = vpack.c.bf16 %v7813_v37, %v7812_v46 }
0x3c2c   :  { %v7492_v14 = vadd.f32 %v8047_v4, %v7484_v5  ;;  %v7808_v4 = vld [vmem:[#allocation22 + $0x50] sm:$0xff]  ;;  %v9666_v5 = vpack.c.bf16 %v7807_v53, %v7806_v62 }
0x3c2e   :  { %7605 = vmatmul.mubr.f32.vlgmr.msra.gmra.mrb[84].mxu1 %v7492_v14  ;;  %9652 = vmatpush3.bf16.msra.mxu0 %v9651_v13 }
0x3c2f   :  { %7610 = vmatprep.mubr.f32.mxu1 %v10273_v34  ;;  %9655 = vmatpush3.bf16.msra.mxu1 %v9654_v32 }
0x3c30   :  { %9656 = vmatprep.subr.bf16.mxu1 %v10277_v56 }
0x3c32   :  { %7611 = vmatmul.mubr.f32.gmra.mrb[86].mxu1 %v7493_v9 }
0x3c33   :  { %9106 = vmatprep.mubr.msk.f32.mxu1 %vm10274_vm0, %v10273_v34  ;;  %v7537_v34 = vrot.slane %v8048_v63, %v10636_v42  ;;  %v8050_v42 = vld [vmem:[%s11493_s23 + $0x1] ss:$0 sm:$0xff]  ;;  %9658 = vmatpush3.bf16.msra.mxu1 %v9657_v58 }
0x3c34   :  { %9659 = vmatprep.subr.bf16.mxu1 %v10277_v56 }
0x3c37   :  { %9661 = vmatpush3.bf16.msra.mxu1 %v9660_v43 }
0x3c38   :  { %9662 = vmatprep.subr.bf16.mxu1 %v10277_v56 }
0x3c3b   :  { %9664 = vmatpush3.bf16.msra.mxu1 %v9663_v55 }
0x3c3c   :  { %9665 = vmatprep.subr.bf16.mxu1 %v10277_v56 }
0x3c3f   :  { %9667 = vmatpush3.bf16.msra.mxu1 %v9666_v5 }
0x3c40   :  { %9668 = vmatprep.subr.bf16.mxu1 %v10277_v56 }
0x3d01   :  { %v7606_v1 = vpop.f32.mrb[84].mxu1 }
0x3d02   :  { %v7607_v15 = vadd.f32 %v7606_v1, %v7533_v33  ;;  %v7608_v16 = vpop.f32.mrb[85].mxu1  ;;  %v8053_v1 = vld [vmem:[%s11488_s18 + $0x1] ss:$0 sm:$0xff] }
0x3d03   :  { %v7609_v6 = vadd.f32 %v7608_v16, %v7537_v34  ;;  %v8054_v16 = vld [vmem:[%s11538_s19 + $0x1] ss:$0 sm:$0xff] }
0x3d04   :  { %v7617_v7 = vmax.f32 %v7607_v15, 0.0 }
0x3d05   :  { %v7618_v19 = vmax.f32 %v7609_v6, 0.0  ;;  %v7612_v26 = vpop.f32.mrb[86].mxu1 }
0x3d06   :  { %v7613_v20 = vadd.f32 %v7612_v26, %v7533_v33  ;;  %v7614_v50 = vpop.f32.mrb[87].mxu1 }
0x3d07   :  { %v7615_v17 = vadd.f32 %v7614_v50, %v7537_v34  ;;  %7726 = vmatprep.mubr.f32.mxu0 %v7618_v19 }
0x3d08   :  { %7727 = vmatmul.mubr.f32.vlgmr.msra.gmra.mrb[86].mxu0 %v7617_v7  ;;  %v7619_v27 = vmax.f32 %v7613_v20, 0.0 }
0x3d09   :  { %v7620_v18 = vmax.f32 %v7615_v17, 0.0 }
0x3d0b   :  { %7731 = vmatprep.mubr.f32.mxu0 %v7620_v18 }
0x3d0c   :  { %7732 = vmatmul.mubr.f32.gmra.mrb[88].mxu0 %v7619_v27 }
0x3ddb   :  { %v8416_v52 = vpop.f32.mrb[86].mxu0 }
0x3ddc   :  { %v8417_v45 = vpop.f32.mrb[87].mxu0 }
0x3ddd   :  { %v8418_v22 = vadd.f32 %v8417_v45, %v8416_v52 }
0x3ddf   :  { %v7729_v23 = vadd.f32 %v8418_v22, %v8050_v42  ;;  %v8419_v24 = vpop.f32.mrb[88].mxu0 }
0x3de0   :  { %v8420_v21 = vpop.f32.mrb[89].mxu0 }
0x3de1   :  { %v8421_v39 = vadd.f32 %v8420_v21, %v8419_v24  ;;  %v7741_v28 = vadd.f32 %v7729_v23, %v7492_v14  ;;  %v7809_v14 = vld [vmem:[#allocation22 + $0x58] sm:$0xff] }
0x3de2   :  { %v9669_v41 = vpack.c.bf16 %v7809_v14, %v7808_v4 }
0x3de3   :  { %v7734_v30 = vadd.f32 %v8421_v39, %v8050_v42  ;;  %7743 = vadd.xlane.f32.xlu0 %v7741_v28 }
0x3de4   :  { %9670 = vmatpush3.bf16.msra.mxu1 %v9669_v41 }
0x3de5   :  { %v7742_v35 = vadd.f32 %v7734_v30, %v7493_v9  ;;  %v7810_v9 = vld [vmem:[#allocation22 + $0x60] sm:$0xff]  ;;  %9671 = vmatprep.subr.bf16.mxu1 %v10277_v56 }
0x3de6   :  { %v9672_v10 = vpack.c.bf16 %v7811_v49, %v7810_v9 }
0x3de7   :  { %7745 = vadd.xlane.f32.xlu1 %v7742_v35 }
0x3de8   :  { %9673 = vmatpush3.bf16.msra.mxu1 %v9672_v10 }
0x3de9   :  { %9674 = vmatprep.subr.bf16.mxu1 %v10277_v56 }
0x3dec   :  { %9676 = vmatpush3.bf16.msra.mxu1 %v9675_v29 }
0x3e70   :  { %v7744_v47 = vpop.xlane.xlu0 %7743 }
0x3e71   :  { %v7747_v48 = vmul.f32 0.0078125, %v7744_v47 }
0x3e73   :  { %v7749_v57 = vsub.f32 %v7741_v28, %v7747_v48  ;;  %v7892_v48 = vand.u32 127, %v412_v40 }
0x3e74   :  { %v7746_v3 = vpop.xlane.xlu1 %7745 }
0x3e75   :  { %v7748_v59 = vmul.f32 0.0078125, %v7746_v3  ;;  %v7751_v38 = vmul.f32 %v7749_v57, %v7749_v57  ;;  %vm7893_vm6 = vcmp.lt.s32.totalorder %v7892_v48, 3 }
0x3e77   :  { %v7750_v0 = vsub.f32 %v7742_v35, %v7748_v59  ;;  %7753 = vadd.xlane.f32.xlu0 %v7751_v38 }
0x3e79   :  { %v7752_v51 = vmul.f32 %v7750_v0, %v7750_v0 }
0x3e7b   :  { %7755 = vadd.xlane.f32.xlu1 %v7752_v51 }
0x3f04   :  { %v7754_v12 = vpop.xlane.xlu0 %7753 }
0x3f05   :  { %v7757_v11 = vmul.f32 0.0078125, %v7754_v12 }
0x3f07   :  { %v7759_v61 = vadd.f32 1e-05, %v7757_v11 }
0x3f08   :  { %v7756_v13 = vpop.xlane.xlu1 %7755 }
0x3f09   :  { %9915 = vrsqrt.f32 %v7759_v61  ;;  %v7758_v63 = vmul.f32 0.0078125, %v7756_v13 }
0x3f0b   :  { %v7760_v33 = vadd.f32 1e-05, %v7758_v63 }
0x3f0d   :  { %9917 = vrsqrt.f32 %v7760_v33 }
0x3f13   :  { %v9916_v34 = vpop.eup %9915 }
0x3f14   :  { %v7763_v15 = vmul.f32 %v9916_v34, %v7749_v57  ;;  %v8055_v57 = vld [vmem:[%s11539_s8] ss:$0 sm:$0xff] }
0x3f16   :  { %v7771_v6 = vmul.f32 %v8053_v1, %v7763_v15 }
0x3f17   :  { %v9918_v19 = vpop.eup %9917 }
0x3f18   :  { %v7779_v26 = vadd.f32 %v8054_v16, %v7771_v6  ;;  %v7764_v7 = vmul.f32 %v9918_v19, %v7750_v0 }
0x3f1a   :  { %v7772_v20 = vmul.f32 %v8053_v1, %v7764_v7  ;;  %v7781_v50 = vrot.slane %v7779_v26, 4 }
0x3f1c   :  { %v7780_v17 = vadd.f32 %v8054_v16, %v7772_v20  ;;  %v7782_v18 = vadd.f32 %v7781_v50, %v7779_v26 }
0x3f1e   :  { %v7783_v27 = vrot.slane %v7782_v18, 2  ;;  %v7789_v52 = vrot.slane %v7780_v17, 4 }
0x3f20   :  { %v7784_v42 = vadd.f32 %v7783_v27, %v7782_v18  ;;  %v7790_v45 = vadd.f32 %v7789_v52, %v7780_v17 }
0x3f22   :  { %v7785_v22 = vrot.slane %v7784_v42, 1  ;;  %v7791_v23 = vrot.slane %v7790_v45, 2 }
0x3f24   :  { %v7792_v24 = vadd.f32 %v7791_v23, %v7790_v45  ;;  %v7786_v21 = vadd.f32 %v7785_v22, %v7784_v42 }
0x3f26   :  { %v7793_v39 = vrot.slane %v7792_v24, 1  ;;  %v7788_v30 = vmul.f32 0.125, %v7786_v21 }
0x3f28   :  { %v7794_v28 = vadd.f32 %v7793_v39, %v7792_v24 }
0x3f2a   :  { %v7795_v35 = vmul.f32 0.125, %v7794_v28 }
0x3f2c   :  { %v7797_v47 = vsel %vm7796_vm5, %v7788_v30, %v7795_v35 }
0x3f2d   :  { %9107 = vmatmul.mubr.f32.vlgmr.msra.gmra.mrb[88].mxu1 %v7797_v47 }
0x4000   :  { %v7887_v3 = vpop.f32.mrb[88].mxu1 }
0x4001   :  { %v7888_v59 = vadd.f32 %v8055_v57, %v7887_v3  ;;  %v9108_v38 = vpop.f32.mrb[89].mxu1 }
0x4003   :  { %v7894_v0 = vsel %vm7893_vm6, %v7888_v59, -inf }
0x4004   :  { %v7896_v51 = vsel %vm7895_vm7, %v7894_v0, -inf }
0x4005   :  { %7897 = vmax.xlane.f32.xlu0 %v7896_v51 }
0x4092   :  { %v7898_v31 = vpop.xlane.xlu0 %7897 }
0x4093   :  { %v7899_v54 = vsub.f32 %v7894_v0, %v7898_v31 }
0x4095   :  { %v7900_v32 = vmul.f32 1.442695, %v7899_v54 }
0x4097   :  { %9919 = vpow2.f32 %v7900_v32 }
0x40a1   :  { %v9920_v56 = vpop.eup %9919 }
0x40a2   :  { %v7902_v25 = vsel %vm7895_vm7, %v9920_v56, 0.0 }
0x40a3   :  { %7903 = vadd.xlane.f32.xlu1 %v7902_v25 }
0x4130   :  { %v7904_v40 = vpop.xlane.xlu1 %7903 }
0x4131   :  { %9921 = vrcp.f32 %v7904_v40 }
0x413b   :  { %v9922_v36 = vpop.eup %9921 }
0x413c   :  { %v7906_v58 = vmul.f32 %v9922_v36, %v9920_v56 }
0x413e   :  { %7907 = vst [vmem:[#allocation23] sm:$0x3] %v7906_v58 }
0x413f   :  { %10222 = shalt.err (!%p10219_p10)
}
0x4140   :  { %s11540_s19 = sld [smem:[#allocation45_spill]] }
0x4146   :  { %s10223_s30 = scalar_lea.hbm %s11540_s19, 32 }
0x4147   :  { %p10224_p11 = scmp.ne.s32.totalorder %s11540_s19, %s10223_s30  ;;  %p10227_p12 = scmp.lt.u32.totalorder %s10223_s30, %s11540_s19 }
0x4149   :  { %p10229_p13 = pnand %p10227_p12, %p10224_p11 }
0x414b   :  { %10232 = shalt.err (!%p10229_p13)
}
0x414c   :  { %7917 = dma.vmem_to_hbm [thread:$0]  %s7915_s11, 32, %s11540_s19, [#allocation4]  }
0x414d   :  { %10247 = dma.done.wait [#allocation4], 32  }
0x414e   :  { %10248 = vsyncadd [#allocation4], 4294967264 }
0x414f   :  { %7921 = vsyncpa [#allocation3], 1 }
0x4150   :  { %7922 = vsyncpa [#allocation6], 1 }
0x4151   :  { %7923 = vsyncpa [#allocation9], 1 }
0x4152   :  { %7924 = vsyncpa [#allocation12], 1 }
0x4153   :  { %7925 = vsyncpa [#allocation15], 1 }
0x4154   :  { %7926 = vsyncpa [#allocation18], 1 }
0x4155   :  { %7927 = vsyncpa [#allocation21], 1 }
0x4156   :  { %7928 = vsyncpa [#allocation4], 1 }

</bundles_post_ra>
